<compile_context>
chip_gen: v7x
topology: tpu7x:2x2x1
jax: 0.10.0
libtpu: 0.0.40
codegen_flags: <defaults>
</compile_context>

<pallas_src>
import functools

import jax
import jax.numpy as jnp
from jax.experimental import pallas as pl
from jax.experimental.pallas import tpu as pltpu

_VMEM_LIMIT = 48 * 1024 * 1024  # below v7x's 64 MiB physical VMEM; safe on v5e/v6e (128 MiB)


# ---------------------------------------------------------------------------
# Kernel 1: fused stem conv + conv_head (1x1 -> 1280) + global average pool
# ---------------------------------------------------------------------------
def _backbone_kernel(cols_ref, ws_ref, bs_ref, wh_ref, bh_ref, o_ref, acc_ref, *, inv_hw):
    s = pl.program_id(1)

    @pl.when(s == 0)
    def _():
        acc_ref[...] = jnp.zeros_like(acc_ref)

    # stem conv (im2col matmul, bf16 MXU, f32 accumulate) + folded-BN bias + SiLU (f32 epilogue)
    stem = jnp.dot(cols_ref[...], ws_ref[...], preferred_element_type=jnp.float32)
    stem = stem + bs_ref[...]
    stem = stem * jax.nn.sigmoid(stem)                       # SiLU (exp goes to EUP)

    # conv_head: 1x1 conv -> 1280 + folded-BN bias + SiLU; stem never leaves VMEM/vregs
    feats = jnp.dot(stem.astype(wh_ref.dtype), wh_ref[...],
                    preferred_element_type=jnp.float32)
    feats = feats + bh_ref[...]
    feats = feats * jax.nn.sigmoid(feats)

    # global average pool: accumulate this spatial tile's sum in f32
    acc_ref[...] += jnp.sum(feats, axis=0, keepdims=True)

    @pl.when(s == pl.num_programs(1) - 1)
    def _():
        pooled = (acc_ref[...] * inv_hw).astype(o_ref.dtype)
        o_ref[...] = pooled.reshape(o_ref.shape)


def _pick_spatial_tile(hw, cap=512):
    for t in (512, 256, 128, 64, 32, 16, 8):
        if t <= cap and hw % t == 0:
            return t
    return hw


def backbone_gap(cols, ws, bs, wh, bh, *, n_batch, hw):
    m, k_pad = cols.shape
    assert m == n_batch * hw
    c_stem = ws.shape[1]
    c_feat = wh.shape[1]
    tile_s = _pick_spatial_tile(hw)
    s_tiles = hw // tile_s

    kernel = functools.partial(_backbone_kernel, inv_hw=1.0 / float(hw))
    pooled = pl.pallas_call(
        kernel,
        out_shape=jax.ShapeDtypeStruct((n_batch, 1, c_feat), jnp.float32),
        grid=(n_batch, s_tiles),
        in_specs=[
            pl.BlockSpec((tile_s, k_pad), lambda n, s: (n * s_tiles + s, 0)),
            pl.BlockSpec((k_pad, c_stem), lambda n, s: (0, 0)),
            pl.BlockSpec((1, c_stem), lambda n, s: (0, 0)),
            pl.BlockSpec((c_stem, c_feat), lambda n, s: (0, 0)),
            pl.BlockSpec((1, c_feat), lambda n, s: (0, 0)),
        ],
        out_specs=pl.BlockSpec((1, 1, c_feat), lambda n, s: (n, 0, 0)),
        scratch_shapes=[pltpu.VMEM((1, c_feat), jnp.float32)],
        compiler_params=pltpu.CompilerParams(
            dimension_semantics=("parallel", "arbitrary"),
            vmem_limit_bytes=_VMEM_LIMIT,
        ),
    )(cols, ws, bs, wh, bh)
    return pooled.reshape(n_batch, c_feat)


# ---------------------------------------------------------------------------
# Kernel 2: MLP head, column-tiled over the 1024-wide hidden dimension
# ---------------------------------------------------------------------------
def _head_kernel(p_ref, w1_ref, b1_ref, w2_ref, b2_ref, w3_ref, b3_ref, o_ref, acc_ref):
    j = pl.program_id(0)

    @pl.when(j == 0)
    def _():
        acc_ref[...] = jnp.zeros_like(acc_ref)

    # Linear(1280,1024) column tile + bias + ReLU   (first Dropout == identity, eval semantics)
    pooled = p_ref[...].astype(w1_ref.dtype)
    h1 = jnp.dot(pooled, w1_ref[...], preferred_element_type=jnp.float32) + b1_ref[...]
    h1 = jnp.maximum(h1, 0.0)
    # partial Linear(1024,512): relu(h1) column-tile @ w2 row-tile, accumulated in f32
    acc_ref[...] += jnp.dot(h1.astype(w2_ref.dtype), w2_ref[...],
                            preferred_element_type=jnp.float32)

    @pl.when(j == pl.num_programs(0) - 1)
    def _():
        h2 = acc_ref[...] + b2_ref[...]                 # second Dropout == identity (eval)
        o_ref[...] = (jnp.dot(h2, w3_ref[...], preferred_element_type=jnp.float32)
                      + b3_ref[...]).astype(o_ref.dtype)


def mlp_head(pooled, w1, b1, w2, b2, w3, b3, *, tile_h1=256):
    n, c = pooled.shape
    h1 = w1.shape[1]
    h2 = w2.shape[1]
    nc = w3.shape[1]
    assert h1 % tile_h1 == 0
    j_tiles = h1 // tile_h1
    return pl.pallas_call(
        _head_kernel,
        out_shape=jax.ShapeDtypeStruct((n, nc), jnp.float32),
        grid=(j_tiles,),
        in_specs=[
            pl.BlockSpec((n, c), lambda j: (0, 0)),
            pl.BlockSpec((c, tile_h1), lambda j: (0, j)),
            pl.BlockSpec((1, tile_h1), lambda j: (0, j)),
            pl.BlockSpec((tile_h1, h2), lambda j: (j, 0)),
            pl.BlockSpec((1, h2), lambda j: (0, 0)),
            pl.BlockSpec((h2, nc), lambda j: (0, 0)),
            pl.BlockSpec((1, nc), lambda j: (0, 0)),
        ],
        out_specs=pl.BlockSpec((n, nc), lambda j: (0, 0)),
        scratch_shapes=[pltpu.VMEM((n, h2), jnp.float32)],
        compiler_params=pltpu.CompilerParams(
            dimension_semantics=("arbitrary",),
            vmem_limit_bytes=_VMEM_LIMIT,
        ),
    )(pooled, w1, b1, w2, b2, w3, b3)


# ---------------------------------------------------------------------------
# JAX glue (layout conversion, im2col, parameter setup)
# ---------------------------------------------------------------------------
def tf_same_pad(x_nhwc, k, s):
    """TensorFlow-style SAME padding (as in timm tf_efficientnet_* models)."""
    H, W = x_nhwc.shape[1], x_nhwc.shape[2]
    out_h = -(-H // s)
    out_w = -(-W // s)
    pad_h = max((out_h - 1) * s + k - H, 0)
    pad_w = max((out_w - 1) * s + k - W, 0)
    xp = jnp.pad(x_nhwc, ((0, 0),
                          (pad_h // 2, pad_h - pad_h // 2),
                          (pad_w // 2, pad_w - pad_w // 2),
                          (0, 0)))
    return xp, out_h, out_w


def im2col(xp, k, s, out_h, out_w):
    cols = []
    for ky in range(k):
        for kx in range(k):
            cols.append(xp[:, ky:ky + s * (out_h - 1) + 1:s,
                           kx:kx + s * (out_w - 1) + 1:s, :])
    return jnp.concatenate(cols, axis=-1)   # (N, out_h, out_w, k*k*Cin), (ky, kx, c) order


def init_params(key):
    ks = jax.random.split(key, 8)
    p = {}
    # conv_stem: 3x3 stride 2, 3 -> 32 (HWIO flattened to (27, 32), (ky, kx, cin) order)
    p["stem_w"] = (jax.random.normal(ks[0], (3, 3, 3, 32), jnp.float32) * 0.1).reshape(27, 32)
    # folded BatchNorm (gamma=1, beta=0, mean=0, var=1) -> affine identity, kept explicit
    p["stem_scale"] = jnp.ones((1, 32), jnp.float32)
    p["stem_bias"] = jnp.zeros((1, 32), jnp.float32)
    # conv_head: 1x1, 32 -> 1280 (backbone.num_features = 1280)
    p["convhead_w"] = jax.random.normal(ks[1], (32, 1280), jnp.float32) * 0.05
    p["convhead_scale"] = jnp.ones((1, 1280), jnp.float32)
    p["convhead_bias"] = jnp.zeros((1, 1280), jnp.float32)
    # head MLP
    p["w1"] = jax.random.normal(ks[2], (1280, 1024), jnp.float32) * 0.02
    p["b1"] = jnp.zeros((1, 1024), jnp.float32)
    p["w2"] = jax.random.normal(ks[3], (1024, 512), jnp.float32) * 0.02
    p["b2"] = jnp.zeros((1, 512), jnp.float32)
    p["w3"] = jax.random.normal(ks[4], (512, 5), jnp.float32) * 0.02
    p["b3"] = jnp.zeros((1, 5), jnp.float32)
    return p


def prepare_params(p):
    """Fold BN scale into conv weights, pad stem K to a multiple of 8, cast big weights to bf16."""
    k_raw = p["stem_w"].shape[0]                 # 27
    k_pad = -(-k_raw // 8) * 8                   # 32 -> clean sublane tiling for the A tile
    stem_w = p["stem_w"] * p["stem_scale"]       # y = (x@w)*scale + b  ==  x@(w*scale) + b
    stem_w = jnp.pad(stem_w, ((0, k_pad - k_raw), (0, 0)))
    head_w = p["convhead_w"] * p["convhead_scale"]
    return {
        "stem_w": stem_w.astype(jnp.bfloat16),
        "stem_b": p["stem_bias"].astype(jnp.float32),
        "convhead_w": head_w.astype(jnp.bfloat16),
        "convhead_b": p["convhead_bias"].astype(jnp.float32),
        "w1": p["w1"].astype(jnp.bfloat16),
        "b1": p["b1"].astype(jnp.float32),
        "w2": p["w2"].astype(jnp.bfloat16),
        "b2": p["b2"].astype(jnp.float32),
        "w3": p["w3"].astype(jnp.float32),
        "b3": p["b3"].astype(jnp.float32),
    }


def custom_model_forward(x_nchw, params):
    # NCHW (PyTorch) -> NHWC
    x = jnp.transpose(x_nchw, (0, 2, 3, 1)).astype(jnp.float32)
    n, _, _, cin = x.shape

    # --- backbone stem im2col (3x3 stride 2, TF-SAME padding, (ky, kx, c) patch order) ---
    xp, oh, ow = tf_same_pad(x, 3, 2)
    cols = im2col(xp, 3, 2, oh, ow).reshape(n * oh * ow, 3 * 3 * cin)
    k_pad = params["stem_w"].shape[0]
    cols = jnp.pad(cols, ((0, 0), (0, k_pad - cols.shape[1])))  # K 27 -> 32
    cols = cols.astype(jnp.bfloat16)
    # TODO(synk): im2col is still materialized by XLA in HBM (9x amplification of the input);
    #             an in-kernel overlapping-window gather would remove that traffic entirely.

    # --- fused: stem conv+BN+SiLU -> conv_head 1x1 -> 1280 +BN+SiLU -> global avg pool ---
    pooled = backbone_gap(cols, params["stem_w"], params["stem_b"],
                          params["convhead_w"], params["convhead_b"],
                          n_batch=n, hw=oh * ow)

    # TODO(synk): EfficientNet-B0 MBConv blocks omitted (synthetic backbone).

    # --- MLP head (Dropout layers are identity in eval/inference semantics) ---
    return mlp_head(pooled, params["w1"], params["b1"],
                    params["w2"], params["b2"],
                    params["w3"], params["b3"])


if __name__ == "__main__":
    key = jax.random.PRNGKey(0)
    k_x, k_p = jax.random.split(key)
    # small shapes: batch=2, 3 input channels, 32x32 spatial
    x = jax.random.normal(k_x, (2, 3, 32, 32), jnp.float32)
    params = prepare_params(init_params(k_p))

    fwd = jax.jit(custom_model_forward)
    out = fwd(x, params)
    jax.block_until_ready(out)

    assert out.shape == (2, 5) and out.dtype == jnp.float32
    print("KERNEL_OK")
</pallas_src>

<mosaic_0001>
module attributes {stable_mosaic.version = 11 : i64} {
  func.func @_backbone_kernel(%arg0: i32, %arg1: i32, %arg2: memref<256x32xbf16, #tpu.memory_space<vmem>>, %arg3: memref<32x32xbf16, #tpu.memory_space<vmem>>, %arg4: memref<1x32xf32, #tpu.memory_space<vmem>>, %arg5: memref<32x1280xbf16, #tpu.memory_space<vmem>>, %arg6: memref<1x1280xf32, #tpu.memory_space<vmem>>, %arg7: memref<1x1x1280xf32, #tpu.memory_space<vmem>>, %arg8: memref<1x1280xf32, #tpu.memory_space<vmem>>) attributes {dimension_semantics = [#tpu.dimension_semantics<parallel>, #tpu.dimension_semantics<arbitrary>], iteration_bounds = array<i64: 2, 1>, scalar_prefetch = 0 : i64, scratch_operands = 1 : i64, tpu.core_type = #tpu.core_type<tc>, window_params = [{transform_indices = @transform_0, window_bounds = array<i64: 256, 32>}, {pipeline_mode = #tpu.pipeline_mode<synchronous>, transform_indices = @transform_1, window_bounds = array<i64: 32, 32>}, {pipeline_mode = #tpu.pipeline_mode<synchronous>, transform_indices = @transform_2, window_bounds = array<i64: 1, 32>}, {pipeline_mode = #tpu.pipeline_mode<synchronous>, transform_indices = @transform_3, window_bounds = array<i64: 32, 1280>}, {pipeline_mode = #tpu.pipeline_mode<synchronous>, transform_indices = @transform_4, window_bounds = array<i64: 1, 1280>}, {transform_indices = @transform_5, window_bounds = array<i64: 1, 1, 1280>}]} {
    %c0_i32 = arith.constant 0 : i32
    %0 = arith.cmpi eq, %arg1, %c0_i32 : i32
    %1 = arith.extui %0 : i1 to i32
    %c0_i32_0 = arith.constant 0 : i32
    %2 = arith.cmpi ne, %1, %c0_i32_0 : i32
    scf.if %2 {
      %cst_20 = arith.constant 0.000000e+00 : f32
      %35 = vector.broadcast %cst_20 : f32 to vector<1x1280xf32>
      %c0_21 = arith.constant 0 : index
      %c0_22 = arith.constant 0 : index
      %36 = vector.load %arg8[%c0_21, %c0_22] : memref<1x1280xf32, #tpu.memory_space<vmem>>, vector<1x1280xf32>
      tpu.vector_store %arg8[%c0_21, %c0_22], %35 {strides = array<i32>} : memref<1x1280xf32, #tpu.memory_space<vmem>>, vector<1x1280xf32>,
    } else {
    }
    %c0 = arith.constant 0 : index
    %c0_1 = arith.constant 0 : index
    %3 = vector.load %arg2[%c0, %c0_1] : memref<256x32xbf16, #tpu.memory_space<vmem>>, vector<256x32xbf16>
    %c0_2 = arith.constant 0 : index
    %c0_3 = arith.constant 0 : index
    %4 = vector.load %arg3[%c0_2, %c0_3] : memref<32x32xbf16, #tpu.memory_space<vmem>>, vector<32x32xbf16>
    %cst = arith.constant dense<0.000000e+00> : vector<256x32xf32>
    %5 = tpu.matmul %3, %4, %cst {dimension_numbers = #tpu.dot_dimension_numbers<[1], [0], [0], [1], [0, 0, 1, 1], [], []>} : vector<256x32xbf16>, vector<32x32xbf16>, vector<256x32xf32> -> vector<256x32xf32>
    %c0_4 = arith.constant 0 : index
    %c0_5 = arith.constant 0 : index
    %6 = vector.load %arg4[%c0_4, %c0_5] : memref<1x32xf32, #tpu.memory_space<vmem>>, vector<1x32xf32>
    %7 = vector.broadcast %6 : vector<1x32xf32> to vector<256x32xf32>
    %8 = arith.addf %5, %7 : vector<256x32xf32>
    %9 = arith.negf %8 : vector<256x32xf32>
    %10 = math.exp %9 : vector<256x32xf32>
    %cst_6 = arith.constant 1.000000e+00 : f32
    %11 = vector.broadcast %cst_6 : f32 to vector<256x32xf32>
    %12 = arith.addf %11, %10 : vector<256x32xf32>
    %13 = arith.divf %11, %12 : vector<256x32xf32>
    %14 = arith.mulf %8, %13 : vector<256x32xf32>
    %15 = arith.truncf %14 : vector<256x32xf32> to vector<256x32xbf16>
    %c0_7 = arith.constant 0 : index
    %c0_8 = arith.constant 0 : index
    %16 = vector.load %arg5[%c0_7, %c0_8] : memref<32x1280xbf16, #tpu.memory_space<vmem>>, vector<32x1280xbf16>
    %cst_9 = arith.constant dense<0.000000e+00> : vector<256x1280xf32>
    %17 = tpu.matmul %15, %16, %cst_9 {dimension_numbers = #tpu.dot_dimension_numbers<[1], [0], [0], [1], [0, 0, 1, 1], [], []>} : vector<256x32xbf16>, vector<32x1280xbf16>, vector<256x1280xf32> -> vector<256x1280xf32>
    %c0_10 = arith.constant 0 : index
    %c0_11 = arith.constant 0 : index
    %18 = vector.load %arg6[%c0_10, %c0_11] : memref<1x1280xf32, #tpu.memory_space<vmem>>, vector<1x1280xf32>
    %19 = vector.broadcast %18 : vector<1x1280xf32> to vector<256x1280xf32>
    %20 = arith.addf %17, %19 : vector<256x1280xf32>
    %21 = arith.negf %20 : vector<256x1280xf32>
    %22 = math.exp %21 : vector<256x1280xf32>
    %cst_12 = arith.constant 1.000000e+00 : f32
    %23 = vector.broadcast %cst_12 : f32 to vector<256x1280xf32>
    %24 = arith.addf %23, %22 : vector<256x1280xf32>
    %25 = arith.divf %23, %24 : vector<256x1280xf32>
    %26 = arith.mulf %20, %25 : vector<256x1280xf32>
    %c0_13 = arith.constant 0 : index
    %c0_14 = arith.constant 0 : index
    %27 = vector.load %arg8[%c0_13, %c0_14] : memref<1x1280xf32, #tpu.memory_space<vmem>>, vector<1x1280xf32>
    %cst_15 = arith.constant dense<0.000000e+00> : vector<1280xf32>
    %28 = vector.multi_reduction <add>, %26, %cst_15 [0] : vector<256x1280xf32> to vector<1280xf32>
    %29 = vector.shape_cast %28 : vector<1280xf32> to vector<1x1280xf32>
    %30 = arith.addf %27, %29 : vector<1x1280xf32>
    %c0_16 = arith.constant 0 : index
    %c0_17 = arith.constant 0 : index
    %31 = vector.load %arg8[%c0_16, %c0_17] : memref<1x1280xf32, #tpu.memory_space<vmem>>, vector<1x1280xf32>
    tpu.vector_store %arg8[%c0_16, %c0_17], %30 {strides = array<i32>} : memref<1x1280xf32, #tpu.memory_space<vmem>>, vector<1x1280xf32>,
    %c0_i32_18 = arith.constant 0 : i32
    %32 = arith.cmpi eq, %arg1, %c0_i32_18 : i32
    %33 = arith.extui %32 : i1 to i32
    %c0_i32_19 = arith.constant 0 : i32
    %34 = arith.cmpi ne, %33, %c0_i32_19 : i32
    scf.if %34 {
      %c0_20 = arith.constant 0 : index
      %c0_21 = arith.constant 0 : index
      %35 = vector.load %arg8[%c0_20, %c0_21] : memref<1x1280xf32, #tpu.memory_space<vmem>>, vector<1x1280xf32>
      %cst_22 = arith.constant 3.906250e-03 : f32
      %36 = vector.broadcast %cst_22 : f32 to vector<1x1280xf32>
      %37 = arith.mulf %35, %36 : vector<1x1280xf32>
      %38 = vector.shape_cast %37 : vector<1x1280xf32> to vector<1x1x1280xf32>
      %c0_23 = arith.constant 0 : index
      %c0_24 = arith.constant 0 : index
      %c0_25 = arith.constant 0 : index
      %39 = vector.load %arg7[%c0_23, %c0_24, %c0_25] : memref<1x1x1280xf32, #tpu.memory_space<vmem>>, vector<1x1x1280xf32>
      tpu.vector_store %arg7[%c0_23, %c0_24, %c0_25], %38 {strides = array<i32>} : memref<1x1x1280xf32, #tpu.memory_space<vmem>>, vector<1x1x1280xf32>,
    } else {
    }
    return
  }
  func.func @transform_0(%arg0: i32, %arg1: i32) -> (i32, i32) {
    %c1_i32 = arith.constant 1 : i32
    %0 = arith.muli %arg0, %c1_i32 : i32
    %1 = arith.addi %0, %arg1 : i32
    %c0_i32 = arith.constant 0 : i32
    %c0_i32_0 = arith.constant 0 : i32
    return %1, %c0_i32 : i32, i32
  }
  func.func @transform_1(%arg0: i32, %arg1: i32) -> (i32, i32) {
    %c0_i32 = arith.constant 0 : i32
    %c0_i32_0 = arith.constant 0 : i32
    %c0_i32_1 = arith.constant 0 : i32
    return %c0_i32, %c0_i32_0 : i32, i32
  }
  func.func @transform_2(%arg0: i32, %arg1: i32) -> (i32, i32) {
    %c0_i32 = arith.constant 0 : i32
    %c0_i32_0 = arith.constant 0 : i32
    %c0_i32_1 = arith.constant 0 : i32
    return %c0_i32, %c0_i32_0 : i32, i32
  }
  func.func @transform_3(%arg0: i32, %arg1: i32) -> (i32, i32) {
    %c0_i32 = arith.constant 0 : i32
    %c0_i32_0 = arith.constant 0 : i32
    %c0_i32_1 = arith.constant 0 : i32
    return %c0_i32, %c0_i32_0 : i32, i32
  }
  func.func @transform_4(%arg0: i32, %arg1: i32) -> (i32, i32) {
    %c0_i32 = arith.constant 0 : i32
    %c0_i32_0 = arith.constant 0 : i32
    %c0_i32_1 = arith.constant 0 : i32
    return %c0_i32, %c0_i32_0 : i32, i32
  }
  func.func @transform_5(%arg0: i32, %arg1: i32) -> (i32, i32, i32) {
    %c0_i32 = arith.constant 0 : i32
    %c0_i32_0 = arith.constant 0 : i32
    %c0_i32_1 = arith.constant 0 : i32
    return %arg0, %c0_i32, %c0_i32_0 : i32, i32, i32
  }
}

module attributes {stable_mosaic.version = 11 : i64} {
  func.func @_head_kernel(%arg0: i32, %arg1: memref<2x1280xf32, #tpu.memory_space<vmem>>, %arg2: memref<1280x256xbf16, #tpu.memory_space<vmem>>, %arg3: memref<1x256xf32, #tpu.memory_space<vmem>>, %arg4: memref<256x512xbf16, #tpu.memory_space<vmem>>, %arg5: memref<1x512xf32, #tpu.memory_space<vmem>>, %arg6: memref<512x5xf32, #tpu.memory_space<vmem>>, %arg7: memref<1x5xf32, #tpu.memory_space<vmem>>, %arg8: memref<2x5xf32, #tpu.memory_space<vmem>>, %arg9: memref<2x512xf32, #tpu.memory_space<vmem>>) attributes {dimension_semantics = [#tpu.dimension_semantics<arbitrary>], iteration_bounds = array<i64: 4>, scalar_prefetch = 0 : i64, scratch_operands = 1 : i64, tpu.core_type = #tpu.core_type<tc>, window_params = [{pipeline_mode = #tpu.pipeline_mode<synchronous>, transform_indices = @transform_0, window_bounds = array<i64: 2, 1280>}, {transform_indices = @transform_1, window_bounds = array<i64: 1280, 256>}, {transform_indices = @transform_2, window_bounds = array<i64: 1, 256>}, {transform_indices = @transform_3, window_bounds = array<i64: 256, 512>}, {pipeline_mode = #tpu.pipeline_mode<synchronous>, transform_indices = @transform_4, window_bounds = array<i64: 1, 512>}, {pipeline_mode = #tpu.pipeline_mode<synchronous>, transform_indices = @transform_5, window_bounds = array<i64: 512, 5>}, {pipeline_mode = #tpu.pipeline_mode<synchronous>, transform_indices = @transform_6, window_bounds = array<i64: 1, 5>}, {pipeline_mode = #tpu.pipeline_mode<synchronous>, transform_indices = @transform_7, window_bounds = array<i64: 2, 5>}]} {
    %c0_i32 = arith.constant 0 : i32
    %0 = arith.cmpi eq, %arg0, %c0_i32 : i32
    %1 = arith.extui %0 : i1 to i32
    %c0_i32_0 = arith.constant 0 : i32
    %2 = arith.cmpi ne, %1, %c0_i32_0 : i32
    scf.if %2 {
      %cst_15 = arith.constant 0.000000e+00 : f32
      %21 = vector.broadcast %cst_15 : f32 to vector<2x512xf32>
      %c0_16 = arith.constant 0 : index
      %c0_17 = arith.constant 0 : index
      %22 = vector.load %arg9[%c0_16, %c0_17] : memref<2x512xf32, #tpu.memory_space<vmem>>, vector<2x512xf32>
      tpu.vector_store %arg9[%c0_16, %c0_17], %21 {strides = array<i32>} : memref<2x512xf32, #tpu.memory_space<vmem>>, vector<2x512xf32>,
    } else {
    }
    %c0 = arith.constant 0 : index
    %c0_1 = arith.constant 0 : index
    %3 = vector.load %arg1[%c0, %c0_1] : memref<2x1280xf32, #tpu.memory_space<vmem>>, vector<2x1280xf32>
    %4 = arith.truncf %3 : vector<2x1280xf32> to vector<2x1280xbf16>
    %c0_2 = arith.constant 0 : index
    %c0_3 = arith.constant 0 : index
    %5 = vector.load %arg2[%c0_2, %c0_3] : memref<1280x256xbf16, #tpu.memory_space<vmem>>, vector<1280x256xbf16>
    %cst = arith.constant dense<0.000000e+00> : vector<2x256xf32>
    %6 = tpu.matmul %4, %5, %cst {dimension_numbers = #tpu.dot_dimension_numbers<[1], [0], [0], [1], [0, 0, 1, 1], [], []>} : vector<2x1280xbf16>, vector<1280x256xbf16>, vector<2x256xf32> -> vector<2x256xf32>
    %c0_4 = arith.constant 0 : index
    %c0_5 = arith.constant 0 : index
    %7 = vector.load %arg3[%c0_4, %c0_5] : memref<1x256xf32, #tpu.memory_space<vmem>>, vector<1x256xf32>
    %8 = vector.broadcast %7 : vector<1x256xf32> to vector<2x256xf32>
    %9 = arith.addf %6, %8 : vector<2x256xf32>
    %cst_6 = arith.constant 0.000000e+00 : f32
    %10 = vector.broadcast %cst_6 : f32 to vector<2x256xf32>
    %11 = arith.maximumf %9, %10 : vector<2x256xf32>
    %c0_7 = arith.constant 0 : index
    %c0_8 = arith.constant 0 : index
    %12 = vector.load %arg9[%c0_7, %c0_8] : memref<2x512xf32, #tpu.memory_space<vmem>>, vector<2x512xf32>
    %13 = arith.truncf %11 : vector<2x256xf32> to vector<2x256xbf16>
    %c0_9 = arith.constant 0 : index
    %c0_10 = arith.constant 0 : index
    %14 = vector.load %arg4[%c0_9, %c0_10] : memref<256x512xbf16, #tpu.memory_space<vmem>>, vector<256x512xbf16>
    %cst_11 = arith.constant dense<0.000000e+00> : vector<2x512xf32>
    %15 = tpu.matmul %13, %14, %cst_11 {dimension_numbers = #tpu.dot_dimension_numbers<[1], [0], [0], [1], [0, 0, 1, 1], [], []>} : vector<2x256xbf16>, vector<256x512xbf16>, vector<2x512xf32> -> vector<2x512xf32>
    %16 = arith.addf %12, %15 : vector<2x512xf32>
    %c0_12 = arith.constant 0 : index
    %c0_13 = arith.constant 0 : index
    %17 = vector.load %arg9[%c0_12, %c0_13] : memref<2x512xf32, #tpu.memory_space<vmem>>, vector<2x512xf32>
    tpu.vector_store %arg9[%c0_12, %c0_13], %16 {strides = array<i32>} : memref<2x512xf32, #tpu.memory_space<vmem>>, vector<2x512xf32>,
    %c3_i32 = arith.constant 3 : i32
    %18 = arith.cmpi eq, %arg0, %c3_i32 : i32
    %19 = arith.extui %18 : i1 to i32
    %c0_i32_14 = arith.constant 0 : i32
    %20 = arith.cmpi ne, %19, %c0_i32_14 : i32
    scf.if %20 {
      %c0_15 = arith.constant 0 : index
      %c0_16 = arith.constant 0 : index
      %21 = vector.load %arg9[%c0_15, %c0_16] : memref<2x512xf32, #tpu.memory_space<vmem>>, vector<2x512xf32>
      %c0_17 = arith.constant 0 : index
      %c0_18 = arith.constant 0 : index
      %22 = vector.load %arg5[%c0_17, %c0_18] : memref<1x512xf32, #tpu.memory_space<vmem>>, vector<1x512xf32>
      %23 = vector.broadcast %22 : vector<1x512xf32> to vector<2x512xf32>
      %24 = arith.addf %21, %23 : vector<2x512xf32>
      %c0_19 = arith.constant 0 : index
      %c0_20 = arith.constant 0 : index
      %25 = vector.load %arg6[%c0_19, %c0_20] : memref<512x5xf32, #tpu.memory_space<vmem>>, vector<512x5xf32>
      %cst_21 = arith.constant dense<0.000000e+00> : vector<2x5xf32>
      %26 = tpu.matmul %24, %25, %cst_21 {dimension_numbers = #tpu.dot_dimension_numbers<[1], [0], [0], [1], [0, 0, 1, 1], [], []>} : vector<2x512xf32>, vector<512x5xf32>, vector<2x5xf32> -> vector<2x5xf32>
      %c0_22 = arith.constant 0 : index
      %c0_23 = arith.constant 0 : index
      %27 = vector.load %arg7[%c0_22, %c0_23] : memref<1x5xf32, #tpu.memory_space<vmem>>, vector<1x5xf32>
      %28 = vector.broadcast %27 : vector<1x5xf32> to vector<2x5xf32>
      %29 = arith.addf %26, %28 : vector<2x5xf32>
      %c0_24 = arith.constant 0 : index
      %c0_25 = arith.constant 0 : index
      %30 = vector.load %arg8[%c0_24, %c0_25] : memref<2x5xf32, #tpu.memory_space<vmem>>, vector<2x5xf32>
      tpu.vector_store %arg8[%c0_24, %c0_25], %29 {strides = array<i32>} : memref<2x5xf32, #tpu.memory_space<vmem>>, vector<2x5xf32>,
    } else {
    }
    return
  }
  func.func @transform_0(%arg0: i32) -> (i32, i32) {
    %c0_i32 = arith.constant 0 : i32
    %c0_i32_0 = arith.constant 0 : i32
    %c0_i32_1 = arith.constant 0 : i32
    return %c0_i32, %c0_i32_0 : i32, i32
  }
  func.func @transform_1(%arg0: i32) -> (i32, i32) {
    %c0_i32 = arith.constant 0 : i32
    %c0_i32_0 = arith.constant 0 : i32
    return %c0_i32, %arg0 : i32, i32
  }
  func.func @transform_2(%arg0: i32) -> (i32, i32) {
    %c0_i32 = arith.constant 0 : i32
    %c0_i32_0 = arith.constant 0 : i32
    return %c0_i32, %arg0 : i32, i32
  }
  func.func @transform_3(%arg0: i32) -> (i32, i32) {
    %c0_i32 = arith.constant 0 : i32
    %c0_i32_0 = arith.constant 0 : i32
    return %arg0, %c0_i32 : i32, i32
  }
  func.func @transform_4(%arg0: i32) -> (i32, i32) {
    %c0_i32 = arith.constant 0 : i32
    %c0_i32_0 = arith.constant 0 : i32
    %c0_i32_1 = arith.constant 0 : i32
    return %c0_i32, %c0_i32_0 : i32, i32
  }
  func.func @transform_5(%arg0: i32) -> (i32, i32) {
    %c0_i32 = arith.constant 0 : i32
    %c0_i32_0 = arith.constant 0 : i32
    %c0_i32_1 = arith.constant 0 : i32
    return %c0_i32, %c0_i32_0 : i32, i32
  }
  func.func @transform_6(%arg0: i32) -> (i32, i32) {
    %c0_i32 = arith.constant 0 : i32
    %c0_i32_0 = arith.constant 0 : i32
    %c0_i32_1 = arith.constant 0 : i32
    return %c0_i32, %c0_i32_0 : i32, i32
  }
  func.func @transform_7(%arg0: i32) -> (i32, i32) {
    %c0_i32 = arith.constant 0 : i32
    %c0_i32_0 = arith.constant 0 : i32
    %c0_i32_1 = arith.constant 0 : i32
    return %c0_i32, %c0_i32_0 : i32, i32
  }
}

</mosaic_0001>

<bundles_post_ra>
// kernel: custom_model_forward.3
= control target key start
LH: loop header
LB: loop body
LE: loop exit
PB: predicated region body
PF: predicated region fallthrough
CT: control target
= control target key end

     0   :  { %s4311_s0 = inlined_call_operand.vmem [shape: f32[2,1280], index: 0, kind: input, shape index: {}]   ;;  %s4312_s1 = inlined_call_operand.hbm [shape: bf16[1280,1024], index: 1, kind: input, shape index: {}]   ;;  %s4313_s2 = inlined_call_operand.hbm [shape: f32[1,1024], index: 2, kind: input, shape index: {}]   ;;  %s4314_s3 = inlined_call_operand.vmem [shape: bf16[1024,512], index: 3, kind: input, shape index: {}]   ;;  %s4315_s4 = inlined_call_operand.hbm [shape: f32[1,512], index: 4, kind: input, shape index: {}]   ;;  %s4316_s5 = inlined_call_operand.vmem [shape: f32[512,5], index: 5, kind: input, shape index: {}]   ;;  %s4317_s6 = inlined_call_operand.hbm [shape: f32[1,5], index: 6, kind: input, shape index: {}]   ;;  %s4318_s7 = inlined_call_operand.hbm [shape: f32[2,5], index: 7, kind: output, shape index: {}]  }
   0x1   :  { %4323 = sst [smem:[#allocation17_spill]] %s4312_s1 }
   0x2   :  { %4324 = sst [smem:[#allocation18_spill]] %s4315_s4 }
   0x3   :  { %4325 = sst [smem:[#allocation19_spill]] %s4317_s6 }
   0x4   :  { %12 = vsyncpa [#allocation4], 0 }
   0x5   :  { %14 = vsyncpa [#allocation4 + $0x1], 0 }
   0x6   :  { %15 = vsyncpa [#allocation7], 0 }
   0x7   :  { %17 = vsyncpa [#allocation7 + $0x1], 0 }
   0x8   :  { %18 = vsyncpa [#allocation10], 0 }
   0x9   :  { %19 = vsyncpa [#allocation5], 0  ;;  %s3571_s24 = smov 0   ;;  %s3573_s25 = smov 0  }
   0xa   :  { %s3575_s26 = smov 0   ;;  %s3577_s27 = smov 0  }
   0xb LB: > { %s3590_s28 = sadd.s32 4294967295, %s3519_s27   ;;  %s3593_s29 = sadd.s32 1, %s3519_s27   ;;  %s3519_s27 = sphi %s3577_s27, %s4346_s27   ;;  %s3515_s26 = sphi %s3575_s26, %s4345_s26   ;;  %s3511_s25 = sphi %s3573_s25, %s4344_s25   ;;  %s3507_s24 = sphi %s3571_s24, %s4343_s24  }
   0xc   : > { %s50_s30 = ssub.s32 %s3519_s27, %s3593_s29  ;;  %s53_s8 = sadd.s32 1, %s3515_s26 }
   0xd   : > { %p51_p0 = scmp.eq.s32.totalorder %s50_s30, 0  ;;  %p60_p1 = scmp.ne.s32.totalorder %s3515_s26, %s3511_s25 }
   0xe   : > { %p61_p2 = scmp.eq.s32.totalorder %s3519_s27, 0  ;;  %p66_p3 = scmp.ne.s32.totalorder %s3511_s25, %s3507_s24 }
   0xf   : > { %s3603_s9 = scalar_select %p51_p0, %s3515_s26, %s53_s8  }
  0x10   : > { %p3605_p4 = por %p61_p2, %p60_p1  ;;  %p4319_p5 = scmp.eq.s32.totalorder %s3590_s28, 0 }
  0x11   : > { %p2509_p6 = scmp.ge.s32.totalorder %s3519_s27, 1  ;;  %p213_p7 = scmp.lt.s32.totalorder %s3519_s27, 5 }
  0x12   : > { %p3614_p8 = por %p4319_p5, %p66_p3  ;;  %s3521_s13 = smov [#allocation8]  }
  0x13   : > { %p3619_p10 = pnand %p2509_p6, %p213_p7  ;;  %s229_s14 = sshll.u32 %s3521_s13, 4  ;;  %s230_s14 = int_to_ptr.vmem [resolvable:$true] %s229_s14 }
  0x14   : > { %s4327_s11 = scalar_select %p3614_p8, 1, 0 }
  0x15   : > { %s4328_s12 = scalar_select %p3619_p10, 1, 0 }
  0x16   : > { %p2928_p11 = pneg %p3619_p10  ;;  %p2944_p12 = scmp.lt.s32.totalorder %s3519_s27, 4 }
  0x17   : > { %s3522_s16 = smov [#allocation9]   ;;  %s3641_s19 = sand.u32 1, %s3515_s26  }
  0x18   : > { %p3628_p13 = pnand %p2928_p11, %p4319_p5  ;;  %s243_s17 = sshll.u32 %s3522_s16, 4  ;;  %s3638_s17 = int_to_ptr.vmem [resolvable:$true] %s243_s17 }
  0x19   : > { %p3634_p0 = pnand %p2944_p12, %p3605_p4  ;;  %s4331_s4 = sld [smem:[#allocation18_spill]] }
  0x1a   : > { %p3329_p2 = pneg %p3628_p13 }
  0x1b   : > { %s4330_s18 = scalar_select %p3634_p0, 1, 0 }
  0x1f   : > { %s3327_s22 = scalar_lea.hbm %s4331_s4, 64 }
  0x20   : > { %p3328_p1 = scmp.ne.s32.totalorder %s4331_s4, %s3327_s22  ;;  %p3334_p6 = scmp.lt.u32.totalorder %s3327_s22, %s4331_s4 }
  0x22   : > { %p3330_p3 = pnand %p3329_p2, %p3328_p1 }
  0x24   : > { %p3331_p4 = pneg %p3330_p3 }
  0x26   : > { %p3336_p7 = pnand %p3334_p6, %p3331_p4 }
  0x28   : > { %3339 = shalt.err (!%p3336_p7)
}
  0x29   : > { %s3340_s10 = scalar_lea.vmem %s230_s14, 64  ;;  %p3348_p5 = scmp.lt.s32.totalorder %s230_s14, %s230_s14 }
  0x2a   : > { %p3341_p11 = scmp.ne.s32.totalorder %s230_s14, %s3340_s10  ;;  %p3349_p8 = scmp.lt.s32.totalorder %s3340_s10, %s3340_s10 }
  0x2c   : > { %p3343_p12 = pnand %p3341_p11, %p3329_p2  ;;  %p3350_p10 = por %p3349_p8, %p3348_p5 }
  0x2e   : > { %p3344_p9 = pneg %p3343_p12 }
  0x30   : > { %p3351_p0 = pnand %p3350_p10, %p3344_p9 }
  0x32   : > { %3354 = shalt.err (!%p3351_p0)
}
  0x33   : > { %2931 = dma.hbm_to_vmem [thread:$0]  (!%p3628_p13), %s4331_s4, 64, %s230_s14, [#allocation7]  }
  0x34   : > { %s4332_s6 = sld [smem:[#allocation19_spill]] }
  0x3a   : > { %s3355_s22 = scalar_lea.hbm %s4332_s6, 16 }
  0x3b   : > { %p3356_p1 = scmp.ne.s32.totalorder %s4332_s6, %s3355_s22  ;;  %p3362_p9 = scmp.lt.u32.totalorder %s3355_s22, %s4332_s6 }
  0x3d   : > { %p3358_p5 = pnand %p3356_p1, %p3329_p2 }
  0x3f   : > { %p3359_p8 = pneg %p3358_p5 }
  0x41   : > { %p3364_p10 = pnand %p3362_p9, %p3359_p8 }
  0x43   : > { %3367 = shalt.err (!%p3364_p10)
}
  0x44   : > { %s3368_s14 = scalar_lea.vmem %s3638_s17, 16  ;;  %s3375_s10 = scalar_lea.vmem %s3638_s17, 32 }
  0x45   : > { %p3369_p0 = scmp.ne.s32.totalorder %s3638_s17, %s3368_s14  ;;  %p3376_p6 = scmp.lt.s32.totalorder %s3638_s17, %s3638_s17 }
  0x46   : > { %p3377_p7 = scmp.lt.s32.totalorder %s3375_s10, %s3368_s14 }
  0x47   : > { %p3371_p3 = pnand %p3369_p0, %p3329_p2 }
  0x48   : > { %p3378_p11 = por %p3377_p7, %p3376_p6 }
  0x49   : > { %p3372_p4 = pneg %p3371_p3 }
  0x4b   : > { %p3379_p12 = pnand %p3378_p11, %p3372_p4 }
  0x4d   : > { %3382 = shalt.err (!%p3379_p12)
}
  0x4e   : > { %2934 = dma.hbm_to_vmem [thread:$0]  (!%p3628_p13), %s4332_s6, 16, %s3638_s17, [#allocation10]  }
  0x4f   : > { %s2910_s20 = smul.u32 1280, %s3641_s19  ;;  %s2757_s21 = sshll.u32 %s3519_s27, 7 }
  0x50   : > { %s4333_s1 = sld [smem:[#allocation17_spill]]  ;;  %s255_s14 = scalar_lea.sflag [#allocation4], %s3641_s19 }
  0x51   : > { %s258_s15 = scalar_lea.vmem [#allocation3], %s2910_s20  ;;  %p4334_p13 = scmp.ne.s32.totalorder %s4330_s18, 0 }
  0x52   : > { %s265_s30 = sshll.u32 %s258_s15, 4  ;;  %s3698_s30 = int_to_ptr.vmem [resolvable:$true] %s265_s30 }
  0x53   : > { %p3385_p1 = pneg %p4334_p13 }
  0x56   : > { %s3696_s24 = scalar_lea.hbm %s4333_s1, %s2757_s21  ;;  %s3388_s16 = scalar_lea.hbm %s4333_s1, 81920 }
  0x57   : > { %s3383_s10 = scalar_lea.hbm %s3696_s24, 20480  ;;  %p3389_p9 = scmp.lt.u32.totalorder %s3696_s24, %s4333_s1 }
  0x58   : > { %p3384_p2 = scmp.ne.s32.totalorder %s3696_s24, %s3383_s10  ;;  %p3390_p10 = scmp.lt.u32.totalorder %s3388_s16, %s3383_s10 }
  0x59   : > { %p3392_p3 = scmp.lt.u32.totalorder %s3383_s10, %s3696_s24 }
  0x5a   : > { %p3386_p5 = pnand %p3385_p1, %p3384_p2  ;;  %p3391_p0 = por %p3390_p10, %p3389_p9 }
  0x5c   : > { %p3387_p8 = pneg %p3386_p5  ;;  %p3393_p4 = por %p3392_p3, %p3391_p0 }
  0x5e   : > { %p3394_p6 = pnand %p3393_p4, %p3387_p8 }
  0x60   : > { %3397 = shalt.err (!%p3394_p6)
}
  0x61   : > { %s3398_s20 = scalar_lea.vmem %s3698_s30, 20480  ;;  %s3523_s23 = smov [#allocation3]  }
  0x62   : > { %p3399_p7 = scmp.ne.s32.totalorder %s3698_s30, %s3398_s20  ;;  %s3403_s15 = sshll.u32 %s3523_s23, 4  ;;  %s3404_s15 = int_to_ptr.vmem [resolvable:$false] %s3403_s15 }
  0x63   : > { %s3405_s17 = scalar_lea.vmem %s3404_s15, 40960  ;;  %p3406_p2 = scmp.lt.s32.totalorder %s3698_s30, %s3404_s15 }
  0x64   : > { %p3401_p11 = pnand %p3399_p7, %p3385_p1  ;;  %p3407_p5 = scmp.lt.s32.totalorder %s3405_s17, %s3398_s20 }
  0x66   : > { %p3402_p12 = pneg %p3401_p11  ;;  %p3408_p9 = por %p3407_p5, %p3406_p2 }
  0x68   : > { %p3409_p10 = pnand %p3408_p9, %p3402_p12 }
  0x6a   : > { %3412 = shalt.err (!%p3409_p10)
}
  0x6b   : > { %s3524_s10 = smov 512   ;;  %s3525_s13 = smov 128  }
  0x6c   : > { %s3526_s16 = smov 8   ;;  %s2515_s21 = sshll.u32 %s3641_s19, 1 }
  0x6d   : > { %2938 = dma.hbm_to_vmem [thread:$0]  (!%p4334_p13), %s3696_s24, 20480, %s3698_s30, %s255_s14, %s3524_s10, %s3525_s13, %s3526_s16  }
  0x6e   : > { %s2758_s22 = sshll.u32 %s3519_s27, 5  ;;  %s279_s17 = scalar_lea.vmem [#allocation6], %s2515_s21 }
  0x6f   : > { %s3734_s15 = scalar_lea.hbm %s4313_s2, %s2758_s22  ;;  %s287_s8 = sshll.u32 %s279_s17, 4  ;;  %s288_s8 = int_to_ptr.vmem [resolvable:$true] %s287_s8 }
  0x70   : > { %s4335_s1 = sand.u32 1, %s3519_s27   ;;  %s3413_s6 = scalar_lea.hbm %s3734_s15, 32 }
  0x71   : > { %s276_s4 = scalar_lea.sflag [#allocation7], %s4335_s1  ;;  %p3414_p8 = scmp.ne.s32.totalorder %s3734_s15, %s3413_s6 }
  0x72   : > { %s3418_s30 = scalar_lea.hbm %s4313_s2, 128  ;;  %p3419_p4 = scmp.lt.u32.totalorder %s3734_s15, %s4313_s2 }
  0x73   : > { %p3416_p0 = pnand %p3414_p8, %p3385_p1  ;;  %p3420_p6 = scmp.lt.u32.totalorder %s3418_s30, %s3413_s6 }
  0x74   : > { %p3422_p11 = scmp.lt.u32.totalorder %s3413_s6, %s3734_s15 }
  0x75   : > { %p3417_p3 = pneg %p3416_p0  ;;  %p3421_p7 = por %p3420_p6, %p3419_p4 }
  0x77   : > { %p3423_p12 = por %p3422_p11, %p3421_p7 }
  0x79   : > { %p3424_p2 = pnand %p3423_p12, %p3417_p3 }
  0x7b   : > { %3427 = shalt.err (!%p3424_p2)
}
  0x7c   : > { %s3428_s1 = scalar_lea.vmem %s288_s8, 32  ;;  %s3527_s27 = smov [#allocation6]  }
  0x7d   : > { %p3429_p5 = scmp.ne.s32.totalorder %s288_s8, %s3428_s1  ;;  %s3433_s13 = sshll.u32 %s3527_s27, 4  ;;  %s3434_s13 = int_to_ptr.vmem [resolvable:$false] %s3433_s13 }
  0x7e   : > { %s3435_s16 = scalar_lea.vmem %s3434_s13, 64  ;;  %p3436_p8 = scmp.lt.s32.totalorder %s288_s8, %s3434_s13 }
  0x7f   : > { %p3431_p9 = pnand %p3429_p5, %p3385_p1  ;;  %p3437_p0 = scmp.lt.s32.totalorder %s3435_s16, %s3428_s1 }
  0x81   : > { %p3432_p10 = pneg %p3431_p9  ;;  %p3438_p4 = por %p3437_p0, %p3436_p8 }
  0x83   : > { %p3439_p6 = pnand %p3438_p4, %p3432_p10 }
  0x85   : > { %3442 = shalt.err (!%p3439_p6)
}
  0x86   : > { %2941 = dma.hbm_to_vmem [thread:$0]  (!%p4334_p13), %s3734_s15, 32, %s288_s8, %s276_s4  }
  0x87   : > { %p4336_p3 = scmp.ne.s32.totalorder %s4328_s12, 0 }
  0x88   : > { %s308_s6 = sand.u32 (!%p4336_p3), 1, %s3511_s25   ;;  %p4337_p1 = scmp.ne.s32.totalorder (!%p4336_p3), %s4327_s11, 0 }
  0x89   : > { %306 = sbr.rel (%p4336_p3) target bundleno = 1186 (0x4a2), region = 48  ;;  %s309_s22 = scalar_lea.sflag (!%p4336_p3), [#allocation4], %s308_s6 }
  0x8a   : > { %s2911_s21 = smul.u32 (!%p4336_p3), 1280, %s308_s6 }
  0x8c   : > { %s3760_s20 = scalar_lea.vmem (!%p4336_p3), [#allocation3], %s2911_s21 }
  0x90   : > { %3486 = dma.done.wait (%p4337_p1), %s309_s22, 20480  }
  0x91   : > { %3488 = vsyncadd (%p4337_p1), %s309_s22, 4294946816  ;;  %s317_s18 = sand.u32 1, %s3590_s28   ;;  %s2519_s23 = sshll.u32 %s308_s6, 1 }
  0x92   : > { %s318_s4 = scalar_lea.sflag [#allocation7], %s317_s18  ;;  %s3767_s8 = scalar_lea.vmem [#allocation6], %s2519_s23 }
  0x93   : > { %3490 = dma.done.wait (%p4337_p1), %s318_s4, 32  }
  0x94   : > { %3492 = vsyncadd (%p4337_p1), %s318_s4, 4294967264  ;;  %p4338_p13 = scmp.eq.s32.totalorder %s3590_s28, 0 }
  0x96   : > { %3494 = dma.done.wait (%p4338_p13), [#allocation7], 64   ;;  %p4339_p7 = pmov %p4338_p13 }
  0x98   : > { %3496 = vsyncadd (%p4339_p7), [#allocation7], 4294967232  ;;  %p4340_p11 = pmov %p4339_p7 }
  0x99   : > { %p4341_p12 = pmov %p4339_p7 }
  0x9a   : > { %3498 = dma.done.wait (%p4340_p11), [#allocation10], 16  }
  0x9b   : > { %3500 = vsyncadd (%p4341_p12), [#allocation10], 4294967280  ;;  %s2522_s12 = sshll.u32 %s3590_s28, 5  ;;  %p4342_p5 = scmp.ne.s32.totalorder %s3590_s28, 0 }
  0x9c   : > { %p369_p2 = scmp.lt.s32.totalorder %s2522_s12, 127  ;;  %v3528_v0 = vmov (!%p4342_p5), 0.0  }
  0x9d   : > { %378 = sbr.rel (%p4342_p5) target bundleno = 164 (0xa4), region = 68  ;;  %379 = vst [vmem:[#allocation2] sm:$0xff] (!%p4342_p5), %v3528_v0 }
  0x9e   : > { %s4348_s12 = smov (!%p369_p2, %s2522_s12), 127 }
  0x9f   : > { %s2759_s15 = sshll.u32 %s4348_s12, 4 }
  0xa0   : > { %s3785_s19 = scalar_lea.vmem %s4314_s3, %s2759_s15 }
  0xa4 PF: > { %v2989_v1 = vld [vmem:[%s3760_s20 + $0x104] ss:$8 sps:$4 sm:$0xff]   ;;  %v2991_v2 = vld [vmem:[%s3760_s20 + $0x100] ss:$8 sps:$4 sm:$0xff]   ;;  %v2992_v3 = vld [vmem:[%s3760_s20 + $0x114] ss:$8 sps:$4 sm:$0xff]   ;;  %v390_v12 = vlaneseq }
  0xa5   : > { %1461 = vmatprep.subr.bf16.mxu0 %v2989_v1  ;;  %v2994_v4 = vld [vmem:[%s3760_s20 + $0x110] ss:$8 sps:$4 sm:$0xff]   ;;  %v2995_v5 = vld [vmem:[%s3760_s20 + $0x124] ss:$8 sps:$4 sm:$0xff]   ;;  %v2997_v6 = vld [vmem:[%s3760_s20 + $0x120] ss:$8 sps:$4 sm:$0xff]  }
  0xa6   : > { %1462 = vmatpush1.bf16.msra.mxu0 %v2991_v2  ;;  %v2998_v7 = vld [vmem:[%s3760_s20 + $0x134] ss:$8 sps:$4 sm:$0xff]   ;;  %v3000_v8 = vld [vmem:[%s3760_s20 + $0x130] ss:$8 sps:$4 sm:$0xff]   ;;  %v3001_v9 = vld [vmem:[%s3760_s20 + $0x144] ss:$8 sps:$4 sm:$0xff]  }
  0xa7   : > { %1463 = vmatprep.subr.bf16.mxu0 %v2992_v3  ;;  %v3529_v10 = vmov 1983009808   ;;  %v3003_v13 = vld [vmem:[%s3760_s20 + $0x140] ss:$8 sps:$4 sm:$0xff]   ;;  %v3004_v14 = vld [vmem:[%s3760_s20 + $0x154] ss:$8 sps:$4 sm:$0xff]  }
  0xa8   : > { %v388_v11 = vunpack.c.l.s4 %v3529_v10  ;;  %v3800_v16 = vshrl.u32 %v390_v12, 7  ;;  %v3006_v17 = vld [vmem:[%s3760_s20 + $0x150] ss:$8 sps:$4 sm:$0xff]   ;;  %v3007_v18 = vld [vmem:[%s3760_s20 + $0x164] ss:$8 sps:$4 sm:$0xff]   ;;  %p2751_p9 = scmp.ne.s32.totalorder %s3590_s28, 3 }
  0xa9   : > { %v3810_v20 = vld [vmem:[%s4311_s0] sm:$0xff]  ;;  %v3009_v22 = vld [vmem:[%s3760_s20 + $0x160] ss:$8 sps:$4 sm:$0xff]   ;;  %v3013_v27 = vld [vmem:[%s3760_s20 + $0x184] ss:$8 sps:$4 sm:$0xff]   ;;  %vm2395_vm0 = vcmask (!%p2751_p9), 33792  }
  0xaa   : > { %1464 = vmatpush1.bf16.msra.mxu0 %v2994_v4  ;;  %v389_v15 = vunpack.c.0.s8 %v388_v11  ;;  %v386_v21 = vcombine.high %v3810_v20, %v3810_v20  ;;  %v3010_v23 = vld [vmem:[%s3760_s20 + $0x174] ss:$8 sps:$4 sm:$0xff]   ;;  %v3012_v26 = vld [vmem:[%s3760_s20 + $0x170] ss:$8 sps:$4 sm:$0xff]   ;;  %v3015_v29 = vld [vmem:[%s3760_s20 + $0x180] ss:$8 sps:$4 sm:$0xff]  }
  0xab   : > { %1465 = vmatprep.subr.bf16.mxu0 %v2995_v5  ;;  %v3016_v30 = vld [vmem:[%s3760_s20 + $0x194] ss:$8 sps:$4 sm:$0xff]   ;;  %v3018_v31 = vld [vmem:[%s3760_s20 + $0x190] ss:$8 sps:$4 sm:$0xff]   ;;  %v3019_v32 = vld [vmem:[%s3760_s20 + $0x1a4] ss:$8 sps:$4 sm:$0xff]  }
  0xac   : > { %v3805_v19 = vsub.s32 %v389_v15, %v3800_v16  ;;  %v3021_v33 = vld [vmem:[%s3760_s20 + $0x1a0] ss:$8 sps:$4 sm:$0xff]   ;;  %v3022_v34 = vld [vmem:[%s3760_s20 + $0x1b4] ss:$8 sps:$4 sm:$0xff]   ;;  %v3024_v35 = vld [vmem:[%s3760_s20 + $0x1b0] ss:$8 sps:$4 sm:$0xff]  }
  0xad   : > { %v3025_v36 = vld [vmem:[%s3760_s20 + $0x1c4] ss:$8 sps:$4 sm:$0xff]   ;;  %v3027_v37 = vld [vmem:[%s3760_s20 + $0x1c0] ss:$8 sps:$4 sm:$0xff]   ;;  %v3028_v38 = vld [vmem:[%s3760_s20 + $0x1d4] ss:$8 sps:$4 sm:$0xff]  }
  0xae   : > { %1466 = vmatpush1.bf16.msra.mxu0 %v2997_v6  ;;  %v400_v24 = vrot.slane %v386_v21, %v3805_v19  ;;  %v3030_v39 = vld [vmem:[%s3760_s20 + $0x1d0] ss:$8 sps:$4 sm:$0xff]   ;;  %v3031_v40 = vld [vmem:[%s3760_s20 + $0x1e4] ss:$8 sps:$4 sm:$0xff]   ;;  %v3033_v42 = vld [vmem:[%s3760_s20 + $0x1e0] ss:$8 sps:$4 sm:$0xff]  }
  0xaf   : > { %1467 = vmatprep.subr.bf16.mxu0 %v2998_v7  ;;  %v3834_v41 = vld [vmem:[%s4311_s0 + $0x8] sm:$0xff]  ;;  %v3034_v44 = vld [vmem:[%s3760_s20 + $0x1f4] ss:$8 sps:$4 sm:$0xff]   ;;  %v3036_v45 = vld [vmem:[%s3760_s20 + $0x1f0] ss:$8 sps:$4 sm:$0xff]  }
  0xb0   : > { %v402_v25 = vcombine.high %v400_v24, %v400_v24  ;;  %v3839_v43 = vrot.slane %v3834_v41, %v3805_v19  ;;  %v3040_v47 = vld [vmem:[%s3760_s20 + $0x204] ss:$8 sps:$4 sm:$0xff]   ;;  %v3038_v48 = vld [vmem:[%s3760_s20 + $0x200] ss:$8 sps:$4 sm:$0xff]   ;;  %v440_v49 = vpack.c.bf16 %v400_v24, %v400_v24  ;;  %v3043_v50 = vld [vmem:[%s3760_s20 + $0x214] ss:$8 sps:$4 sm:$0xff]  }
  0xb1   : > { %v3131_v52 = vld [vmem:[%s3760_s20 + $0x4] ss:$8 sps:$4 sm:$0xff]   ;;  %v3133_v53 = vld [vmem:[%s3760_s20] ss:$8 sps:$4 sm:$0xff]   ;;  %v3137_v54 = vld [vmem:[%s3760_s20 + $0x14] ss:$8 sps:$4 sm:$0xff]  }
  0xb2   : > { %1468 = vmatpush1.bf16.msra.mxu0 %v3000_v8  ;;  %v441_v28 = vpack.c.bf16 %v402_v25, %v402_v25  ;;  %v418_v46 = vcombine.high %v3839_v43, %v3839_v43  ;;  %1420 = vmatprep.subr.bf16.mxu1 %v3131_v52  ;;  %v3041_v55 = vld [vmem:[%s3760_s20 + $0x210] ss:$8 sps:$4 sm:$0xff]   ;;  %v3046_v56 = vld [vmem:[%s3760_s20 + $0x224] ss:$8 sps:$4 sm:$0xff]   ;;  %v3044_v59 = vld [vmem:[%s3760_s20 + $0x220] ss:$8 sps:$4 sm:$0xff]  }
  0xb3   : > { %1469 = vmatprep.subr.bf16.mxu0 %v3001_v9  ;;  %1421 = vmatpush1.bf16.msra.mxu1 %v3133_v53  ;;  %v3139_v57 = vld [vmem:[%s3760_s20 + $0x10] ss:$8 sps:$4 sm:$0xff]   ;;  %v3144_v58 = vld [vmem:[%s3760_s20 + $0x24] ss:$8 sps:$4 sm:$0xff]   ;;  %v3049_v60 = vld [vmem:[%s3760_s20 + $0x234] ss:$8 sps:$4 sm:$0xff]  }
  0xb4   : > { %1493 = vmatprep.mubr.bf16.mxu0 %v441_v28  ;;  %v443_v51 = vpack.c.bf16 %v418_v46, %v418_v46  ;;  %1422 = vmatprep.subr.bf16.mxu1 %v3137_v54  ;;  %v3146_v61 = vld [vmem:[%s3760_s20 + $0x20] ss:$8 sps:$4 sm:$0xff]   ;;  %v3150_v62 = vld [vmem:[%s3760_s20 + $0x34] ss:$8 sps:$4 sm:$0xff]   ;;  %v3047_v63 = vld [vmem:[%s3760_s20 + $0x230] ss:$8 sps:$4 sm:$0xff]   ;;  %v403_v46 = vcombine.high %v3834_v41, %v3834_v41 }
  0xb5   : > { %v3052_v0 = vld [vmem:[%s3760_s20 + $0x244] ss:$8 sps:$4 sm:$0xff]   ;;  %v3152_v1 = vld [vmem:[%s3760_s20 + $0x30] ss:$8 sps:$4 sm:$0xff]   ;;  %v3050_v3 = vld [vmem:[%s3760_s20 + $0x240] ss:$8 sps:$4 sm:$0xff]  }
  0xb6   : > { %1470 = vmatpush1.bf16.msra.mxu0 %v3003_v13  ;;  %v3156_v2 = vld [vmem:[%s3760_s20 + $0x44] ss:$8 sps:$4 sm:$0xff]   ;;  %v3055_v4 = vld [vmem:[%s3760_s20 + $0x254] ss:$8 sps:$4 sm:$0xff]   ;;  %v3158_v5 = vld [vmem:[%s3760_s20 + $0x40] ss:$8 sps:$4 sm:$0xff]   ;;  %v3910_v52 = vrot.slane %v403_v46, %v3805_v19 }
  0xb7   : > { %1471 = vmatprep.subr.bf16.mxu0 %v3004_v14  ;;  %1423 = vmatpush1.bf16.msra.mxu1 %v3139_v57  ;;  %v3162_v6 = vld [vmem:[%s3760_s20 + $0x54] ss:$8 sps:$4 sm:$0xff]   ;;  %v3053_v7 = vld [vmem:[%s3760_s20 + $0x250] ss:$8 sps:$4 sm:$0xff]   ;;  %v3058_v8 = vld [vmem:[%s3760_s20 + $0x264] ss:$8 sps:$4 sm:$0xff]  }
  0xb8   : > { %1424 = vmatprep.subr.bf16.mxu1 %v3144_v58  ;;  %v3164_v9 = vld [vmem:[%s3760_s20 + $0x50] ss:$8 sps:$4 sm:$0xff]   ;;  %v3168_v10 = vld [vmem:[%s3760_s20 + $0x64] ss:$8 sps:$4 sm:$0xff]   ;;  %v3056_v11 = vld [vmem:[%s3760_s20 + $0x260] ss:$8 sps:$4 sm:$0xff]  }
  0xb9   : > { %v3061_v12 = vld [vmem:[%s3760_s20 + $0x274] ss:$8 sps:$4 sm:$0xff]   ;;  %v3170_v13 = vld [vmem:[%s3760_s20 + $0x60] ss:$8 sps:$4 sm:$0xff]   ;;  %v3059_v15 = vld [vmem:[%s3760_s20 + $0x270] ss:$8 sps:$4 sm:$0xff]  }
  0xba   : > { %1472 = vmatpush1.bf16.msra.mxu0 %v3006_v17  ;;  %v3174_v14 = vld [vmem:[%s3760_s20 + $0x74] ss:$8 sps:$4 sm:$0xff]   ;;  %v3064_v17 = vld [vmem:[%s3760_s20 + $0x284] ss:$8 sps:$4 sm:$0xff]   ;;  %v3182_v24 = vld [vmem:[%s3760_s20 + $0x80] ss:$8 sps:$4 sm:$0xff]  }
  0xbb   : > { %1473 = vmatprep.subr.bf16.mxu0 %v3007_v18  ;;  %1425 = vmatpush1.bf16.msra.mxu1 %v3146_v61  ;;  %v3176_v18 = vld [vmem:[%s3760_s20 + $0x70] ss:$8 sps:$4 sm:$0xff]   ;;  %v3180_v21 = vld [vmem:[%s3760_s20 + $0x84] ss:$8 sps:$4 sm:$0xff]   ;;  %v3186_v25 = vld [vmem:[%s3760_s20 + $0x94] ss:$8 sps:$4 sm:$0xff]  }
  0xbc   : > { %1426 = vmatprep.subr.bf16.mxu1 %v3150_v62  ;;  %v3188_v28 = vld [vmem:[%s3760_s20 + $0x90] ss:$8 sps:$4 sm:$0xff]   ;;  %v3218_v53 = vld [vmem:[%s3760_s20 + $0xe0] ss:$8 sps:$4 sm:$0xff]   ;;  %v3222_v41 = vld [vmem:[%s3760_s20 + $0xf4] ss:$8 sps:$4 sm:$0xff]  }
  0xbd   : > { %v3088_v57 = vld [vmem:[%s3760_s20 + $0x304] ss:$8 sps:$4 sm:$0xff]   ;;  %v3224_v58 = vld [vmem:[%s3760_s20 + $0xf0] ss:$8 sps:$4 sm:$0xff]   ;;  %v3091_v61 = vld [vmem:[%s3760_s20 + $0x314] ss:$8 sps:$4 sm:$0xff]  }
  0xbe   : > { %1474 = vmatpush1.bf16.msra.mxu0 %v3009_v22  ;;  %v3062_v22 = vld [vmem:[%s3760_s20 + $0x280] ss:$8 sps:$4 sm:$0xff]   ;;  %v3119_v46 = vld [vmem:[%s3760_s20 + $0x3b0] ss:$8 sps:$4 sm:$0xff]  }
  0xbf   : > { %1475 = vmatprep.subr.bf16.mxu0 %v3010_v23  ;;  %1427 = vmatpush1.bf16.msra.mxu1 %v3152_v1  ;;  %v3067_v23 = vld [vmem:[%s3760_s20 + $0x294] ss:$8 sps:$4 sm:$0xff]  }
  0xc0   : > { %1428 = vmatprep.subr.bf16.mxu1 %v3156_v2  ;;  %v3233_v1 = vld [vmem:[%s3785_s19 + $0x4] ss:$16 sps:$4 sm:$0xff]   ;;  %v3089_v2 = vld [vmem:[%s3760_s20 + $0x310] ss:$8 sps:$4 sm:$0xff]  }
  0xc2   : > { %1476 = vmatpush1.bf16.msra.mxu0 %v3012_v26  ;;  %v3065_v26 = vld [vmem:[%s3760_s20 + $0x290] ss:$8 sps:$4 sm:$0xff]  }
  0xc3   : > { %1477 = vmatprep.subr.bf16.mxu0 %v3013_v27  ;;  %1429 = vmatpush1.bf16.msra.mxu1 %v3158_v5  ;;  %v3070_v27 = vld [vmem:[%s3760_s20 + $0x2a4] ss:$8 sps:$4 sm:$0xff]   ;;  %v3092_v5 = vld [vmem:[%s3760_s20 + $0x320] ss:$8 sps:$4 sm:$0xff]  }
  0xc4   : > { %1430 = vmatprep.subr.bf16.mxu1 %v3162_v6  ;;  %v3239_v6 = vld [vmem:[%s3785_s19 + $0x44] ss:$16 sps:$4 sm:$0xff]  }
  0xc6   : > { %1478 = vmatpush1.bf16.msra.mxu0 %v3015_v29  ;;  %v3192_v29 = vld [vmem:[%s3760_s20 + $0xa4] ss:$8 sps:$4 sm:$0xff]  }
  0xc7   : > { %1479 = vmatprep.subr.bf16.mxu0 %v3016_v30  ;;  %1431 = vmatpush1.bf16.msra.mxu1 %v3164_v9  ;;  %v3068_v30 = vld [vmem:[%s3760_s20 + $0x2a0] ss:$8 sps:$4 sm:$0xff]   ;;  %v3095_v9 = vld [vmem:[%s3760_s20 + $0x330] ss:$8 sps:$4 sm:$0xff]  }
  0xc8   : > { %1432 = vmatprep.subr.bf16.mxu1 %v3168_v10  ;;  %v3242_v10 = vld [vmem:[%s3785_s19 + $0x64] ss:$16 sps:$4 sm:$0xff]  }
  0xca   : > { %1480 = vmatpush1.bf16.msra.mxu0 %v3018_v31  ;;  %v3073_v31 = vld [vmem:[%s3760_s20 + $0x2b4] ss:$8 sps:$4 sm:$0xff]  }
  0xcb   : > { %1481 = vmatprep.subr.bf16.mxu0 %v3019_v32  ;;  %1433 = vmatpush1.bf16.msra.mxu1 %v3170_v13  ;;  %v3194_v32 = vld [vmem:[%s3760_s20 + $0xa0] ss:$8 sps:$4 sm:$0xff]  }
  0xcc   : > { %1434 = vmatprep.subr.bf16.mxu1 %v3174_v14  ;;  %v3098_v13 = vld [vmem:[%s3760_s20 + $0x340] ss:$8 sps:$4 sm:$0xff]   ;;  %v3245_v14 = vld [vmem:[%s3785_s19 + $0x84] ss:$16 sps:$4 sm:$0xff]  }
  0xce   : > { %1482 = vmatpush1.bf16.msra.mxu0 %v3021_v33  ;;  %v3198_v33 = vld [vmem:[%s3760_s20 + $0xb4] ss:$8 sps:$4 sm:$0xff]  }
  0xcf   : > { %1483 = vmatprep.subr.bf16.mxu0 %v3022_v34  ;;  %1435 = vmatpush1.bf16.msra.mxu1 %v3176_v18  ;;  %v3071_v34 = vld [vmem:[%s3760_s20 + $0x2b0] ss:$8 sps:$4 sm:$0xff]  }
  0xd0   : > { %1436 = vmatprep.subr.bf16.mxu1 %v3180_v21  ;;  %v3101_v18 = vld [vmem:[%s3760_s20 + $0x350] ss:$8 sps:$4 sm:$0xff]   ;;  %v3248_v21 = vld [vmem:[%s3785_s19 + $0xa4] ss:$16 sps:$4 sm:$0xff]  }
  0xd2   : > { %1484 = vmatpush1.bf16.msra.mxu0 %v3024_v35  ;;  %v3076_v35 = vld [vmem:[%s3760_s20 + $0x2c4] ss:$8 sps:$4 sm:$0xff]  }
  0xd3   : > { %1485 = vmatprep.subr.bf16.mxu0 %v3025_v36  ;;  %1437 = vmatpush1.bf16.msra.mxu1 %v3182_v24  ;;  %v3200_v36 = vld [vmem:[%s3760_s20 + $0xb0] ss:$8 sps:$4 sm:$0xff]   ;;  %v3104_v24 = vld [vmem:[%s3760_s20 + $0x360] ss:$8 sps:$4 sm:$0xff]  }
  0xd4   : > { %1438 = vmatprep.subr.bf16.mxu1 %v3186_v25  ;;  %v3251_v25 = vld [vmem:[%s3785_s19 + $0xc4] ss:$16 sps:$4 sm:$0xff]  }
  0xd6   : > { %1486 = vmatpush1.bf16.msra.mxu0 %v3027_v37  ;;  %v3204_v37 = vld [vmem:[%s3760_s20 + $0xc4] ss:$8 sps:$4 sm:$0xff]  }
  0xd7   : > { %1487 = vmatprep.subr.bf16.mxu0 %v3028_v38  ;;  %1439 = vmatpush1.bf16.msra.mxu1 %v3188_v28  ;;  %v3074_v38 = vld [vmem:[%s3760_s20 + $0x2c0] ss:$8 sps:$4 sm:$0xff]   ;;  %v3107_v28 = vld [vmem:[%s3760_s20 + $0x370] ss:$8 sps:$4 sm:$0xff]  }
  0xd8   : > { %1440 = vmatprep.subr.bf16.mxu1 %v3192_v29  ;;  %v3254_v29 = vld [vmem:[%s3785_s19 + $0xe4] ss:$16 sps:$4 sm:$0xff]  }
  0xda   : > { %1488 = vmatpush1.bf16.msra.mxu0 %v3030_v39  ;;  %v3079_v39 = vld [vmem:[%s3760_s20 + $0x2d4] ss:$8 sps:$4 sm:$0xff]  }
  0xdb   : > { %1489 = vmatprep.subr.bf16.mxu0 %v3031_v40  ;;  %1441 = vmatpush1.bf16.msra.mxu1 %v3194_v32  ;;  %v3206_v40 = vld [vmem:[%s3760_s20 + $0xc0] ss:$8 sps:$4 sm:$0xff]  }
  0xdc   : > { %1442 = vmatprep.subr.bf16.mxu1 %v3198_v33  ;;  %v3110_v32 = vld [vmem:[%s3760_s20 + $0x380] ss:$8 sps:$4 sm:$0xff]   ;;  %v3257_v33 = vld [vmem:[%s3785_s19 + $0x104] ss:$16 sps:$4 sm:$0xff]  }
  0xde   : > { %1490 = vmatpush1.bf16.msra.mxu0 %v3033_v42  ;;  %v3210_v42 = vld [vmem:[%s3760_s20 + $0xd4] ss:$8 sps:$4 sm:$0xff]  }
  0xdf   : > { %1491 = vmatprep.subr.bf16.mxu0 %v3034_v44  ;;  %1443 = vmatpush1.bf16.msra.mxu1 %v3200_v36  ;;  %v3077_v44 = vld [vmem:[%s3760_s20 + $0x2d0] ss:$8 sps:$4 sm:$0xff]  }
  0xe0   : > { %1444 = vmatprep.subr.bf16.mxu1 %v3204_v37  ;;  %v3113_v36 = vld [vmem:[%s3760_s20 + $0x390] ss:$8 sps:$4 sm:$0xff]   ;;  %v3260_v37 = vld [vmem:[%s3785_s19 + $0x124] ss:$16 sps:$4 sm:$0xff]  }
  0xe2   : > { %1492 = vmatpush1.bf16.msra.mxu0 %v3036_v45  ;;  %v3082_v45 = vld [vmem:[%s3760_s20 + $0x2e4] ss:$8 sps:$4 sm:$0xff]  }
  0xe3   : > { %1502 = vmatprep.subr.bf16.mxu0 %v3040_v47  ;;  %v3212_v47 = vld [vmem:[%s3760_s20 + $0xd0] ss:$8 sps:$4 sm:$0xff]   ;;  %1445 = vmatpush1.bf16.msra.mxu1 %v3206_v40  ;;  %v3116_v40 = vld [vmem:[%s3760_s20 + $0x3a0] ss:$8 sps:$4 sm:$0xff]  }
  0xe4   : > { %1446 = vmatprep.subr.bf16.mxu1 %v3210_v42  ;;  %v3263_v42 = vld [vmem:[%s3785_s19 + $0x144] ss:$16 sps:$4 sm:$0xff]  }
  0xe5   : > { %1494 = vmatmul.mubr.bf16.vlgmr.msra.gmra.mrb[0].mxu0 %v440_v49  ;;  %v393_v49 = vrot.slane %v3810_v20, %v3805_v19  ;;  %v419_v20 = vcombine.high %v3910_v52, %v3910_v52 }
  0xe6   : > { %1503 = vmatpush1.bf16.msra.mxu0 %v3038_v48  ;;  %1534 = vmatprep.mubr.bf16.mxu0 %v443_v51  ;;  %v3216_v48 = vld [vmem:[%s3760_s20 + $0xe4] ss:$8 sps:$4 sm:$0xff]   ;;  %v3085_v51 = vld [vmem:[%s3760_s20 + $0x2f4] ss:$8 sps:$4 sm:$0xff]  }
  0xe7   : > { %1504 = vmatprep.subr.bf16.mxu0 %v3043_v50  ;;  %v3080_v50 = vld [vmem:[%s3760_s20 + $0x2e0] ss:$8 sps:$4 sm:$0xff]   ;;  %1447 = vmatpush1.bf16.msra.mxu1 %v3212_v47  ;;  %v401_v54 = vcombine.high %v393_v49, %v393_v49  ;;  %v445_v62 = vpack.c.bf16 %v419_v20, %v419_v20  ;;  %v3266_v47 = vld [vmem:[%s3785_s19 + $0x164] ss:$16 sps:$4 sm:$0xff]  }
  0xe8   : > { %1448 = vmatprep.subr.bf16.mxu1 %v3216_v48  ;;  %v3124_v48 = vld [vmem:[%s3760_s20 + $0x3c4] ss:$8 sps:$4 sm:$0xff]   ;;  %v3980_v20 = vld.sshfl [vmem:[%s4311_s0 + $0x10] sm:$0x33 pattern:$0x76325410] }
  0xea   : > { %1505 = vmatpush1.bf16.msra.mxu0 %v3041_v55  ;;  %v439_v55 = vpack.c.bf16 %v401_v54, %v401_v54  ;;  %v3125_v54 = vld [vmem:[%s3760_s20 + $0x3d0] ss:$8 sps:$4 sm:$0xff]  }
  0xeb   : > { %1506 = vmatprep.subr.bf16.mxu0 %v3046_v56  ;;  %v3083_v56 = vld [vmem:[%s3760_s20 + $0x2f0] ss:$8 sps:$4 sm:$0xff]   ;;  %1449 = vmatpush1.bf16.msra.mxu1 %v3218_v53  ;;  %v3127_v53 = vld [vmem:[%s3760_s20 + $0x3d4] ss:$8 sps:$4 sm:$0xff]  }
  0xec   : > { %1450 = vmatprep.subr.bf16.mxu1 %v3222_v41  ;;  %1452 = vmatprep.mubr.bf16.mxu1 %v439_v55  ;;  %v3267_v41 = vld [vmem:[%s3785_s19 + $0x180] ss:$16 sps:$4 sm:$0xff]   ;;  %v3130_v55 = vld [vmem:[%s3760_s20 + $0x3e4] ss:$8 sps:$4 sm:$0xff]  }
  0xee   : > { %1507 = vmatpush1.bf16.msra.mxu0 %v3044_v59  ;;  %v3086_v59 = vld [vmem:[%s3760_s20 + $0x300] ss:$8 sps:$4 sm:$0xff]  }
  0xef   : > { %1508 = vmatprep.subr.bf16.mxu0 %v3049_v60  ;;  %v442_v60 = vpack.c.bf16 %v3839_v43, %v3839_v43  ;;  %1451 = vmatpush1.bf16.msra.mxu1 %v3224_v58  ;;  %v3094_v43 = vld [vmem:[%s3760_s20 + $0x324] ss:$8 sps:$4 sm:$0xff]   ;;  %v3134_v58 = vld [vmem:[%s3760_s20 + $0x3f0] ss:$8 sps:$4 sm:$0xff]  }
  0xf0   : > { %2014 = vmatprep.subr.bf16.mxu1 %v3233_v1  ;;  %v3147_v1 = vld [vmem:[%s3760_s20 + $0x410] ss:$8 sps:$4 sm:$0xff]  }
  0xf2   : > { %1509 = vmatpush1.bf16.msra.mxu0 %v3047_v63  ;;  %v438_v63 = vpack.c.bf16 %v393_v49, %v393_v49  ;;  %v3264_v49 = vld [vmem:[%s3785_s19 + $0x160] ss:$16 sps:$4 sm:$0xff]  }
  0xf3   : > { %1510 = vmatprep.subr.bf16.mxu0 %v3052_v0  ;;  %v3231_v0 = vld [vmem:[%s3785_s19] ss:$16 sps:$4 sm:$0xff]  }
  0xf4   : > { %1453 = vmatmul.mubr.bf16.vlgmr.msra.gmra.mrb[0].mxu1 %v438_v63 }
  0xf5   : > { %2015 = vmatpush1.bf16.msra.mxu1 %v3231_v0  ;;  %v3149_v0 = vld [vmem:[%s3760_s20 + $0x414] ss:$8 sps:$4 sm:$0xff]  }
  0xf6   : > { %1511 = vmatpush1.bf16.msra.mxu0 %v3050_v3  ;;  %v3236_v3 = vld [vmem:[%s3785_s19 + $0x24] ss:$16 sps:$4 sm:$0xff]  }
  0xf7   : > { %1512 = vmatprep.subr.bf16.mxu0 %v3055_v4  ;;  %v3234_v4 = vld [vmem:[%s3785_s19 + $0x20] ss:$16 sps:$4 sm:$0xff]   ;;  %2016 = vmatprep.subr.bf16.mxu1 %v3236_v3 }
  0xf8   : > { %v3153_v3 = vld [vmem:[%s3760_s20 + $0x420] ss:$8 sps:$4 sm:$0xff]  }
  0xf9   : > { %2017 = vmatpush1.bf16.msra.mxu1 %v3234_v4  ;;  %v3167_v4 = vld [vmem:[%s3760_s20 + $0x444] ss:$8 sps:$4 sm:$0xff]  }
  0xfa   : > { %1513 = vmatpush1.bf16.msra.mxu0 %v3053_v7  ;;  %v3097_v7 = vld [vmem:[%s3760_s20 + $0x334] ss:$8 sps:$4 sm:$0xff]   ;;  %2018 = vmatprep.subr.bf16.mxu1 %v3239_v6 }
  0xfb   : > { %1514 = vmatprep.subr.bf16.mxu0 %v3058_v8  ;;  %v3237_v8 = vld [vmem:[%s3785_s19 + $0x40] ss:$16 sps:$4 sm:$0xff]   ;;  %v3173_v6 = vld [vmem:[%s3760_s20 + $0x454] ss:$8 sps:$4 sm:$0xff]  }
  0xfd   : > { %2019 = vmatpush1.bf16.msra.mxu1 %v3237_v8  ;;  %v3179_v8 = vld [vmem:[%s3760_s20 + $0x464] ss:$8 sps:$4 sm:$0xff]  }
  0xfe   : > { %1515 = vmatpush1.bf16.msra.mxu0 %v3056_v11  ;;  %v3100_v11 = vld [vmem:[%s3760_s20 + $0x344] ss:$8 sps:$4 sm:$0xff]   ;;  %2020 = vmatprep.subr.bf16.mxu1 %v3242_v10  ;;  %v3185_v10 = vld [vmem:[%s3760_s20 + $0x474] ss:$8 sps:$4 sm:$0xff]  }
  0xff   : > { %1516 = vmatprep.subr.bf16.mxu0 %v3061_v12  ;;  %v3240_v12 = vld [vmem:[%s3785_s19 + $0x60] ss:$16 sps:$4 sm:$0xff]  }
 0x101   : > { %2021 = vmatpush1.bf16.msra.mxu1 %v3240_v12  ;;  %v3272_v12 = vld [vmem:[%s3785_s19 + $0x1a4] ss:$16 sps:$4 sm:$0xff]  }
 0x102   : > { %1517 = vmatpush1.bf16.msra.mxu0 %v3059_v15  ;;  %v3103_v15 = vld [vmem:[%s3760_s20 + $0x354] ss:$8 sps:$4 sm:$0xff]   ;;  %2022 = vmatprep.subr.bf16.mxu1 %v3245_v14  ;;  %v3191_v14 = vld [vmem:[%s3760_s20 + $0x484] ss:$8 sps:$4 sm:$0xff]  }
 0x103   : > { %1518 = vmatprep.subr.bf16.mxu0 %v3064_v17  ;;  %v3243_v17 = vld [vmem:[%s3785_s19 + $0x80] ss:$16 sps:$4 sm:$0xff]  }
 0x105   : > { %2023 = vmatpush1.bf16.msra.mxu1 %v3243_v17  ;;  %v3197_v17 = vld [vmem:[%s3760_s20 + $0x494] ss:$8 sps:$4 sm:$0xff]  }
 0x106   : > { %1519 = vmatpush1.bf16.msra.mxu0 %v3062_v22  ;;  %v3106_v22 = vld [vmem:[%s3760_s20 + $0x364] ss:$8 sps:$4 sm:$0xff]   ;;  %2024 = vmatprep.subr.bf16.mxu1 %v3248_v21 }
 0x107   : > { %1520 = vmatprep.subr.bf16.mxu0 %v3067_v23  ;;  %v3246_v23 = vld [vmem:[%s3785_s19 + $0xa0] ss:$16 sps:$4 sm:$0xff]   ;;  %v3203_v21 = vld [vmem:[%s3760_s20 + $0x4a4] ss:$8 sps:$4 sm:$0xff]  }
 0x109   : > { %2025 = vmatpush1.bf16.msra.mxu1 %v3246_v23  ;;  %v3209_v23 = vld [vmem:[%s3760_s20 + $0x4b4] ss:$8 sps:$4 sm:$0xff]  }
 0x10a   : > { %1521 = vmatpush1.bf16.msra.mxu0 %v3065_v26  ;;  %v3109_v26 = vld [vmem:[%s3760_s20 + $0x374] ss:$8 sps:$4 sm:$0xff]   ;;  %2026 = vmatprep.subr.bf16.mxu1 %v3251_v25  ;;  %v3215_v25 = vld [vmem:[%s3760_s20 + $0x4c4] ss:$8 sps:$4 sm:$0xff]  }
 0x10b   : > { %1522 = vmatprep.subr.bf16.mxu0 %v3070_v27  ;;  %v3249_v27 = vld [vmem:[%s3785_s19 + $0xc0] ss:$16 sps:$4 sm:$0xff]  }
 0x10d   : > { %2027 = vmatpush1.bf16.msra.mxu1 %v3249_v27  ;;  %v3221_v27 = vld [vmem:[%s3760_s20 + $0x4d4] ss:$8 sps:$4 sm:$0xff]  }
 0x10e   : > { %1523 = vmatpush1.bf16.msra.mxu0 %v3068_v30  ;;  %v3112_v30 = vld [vmem:[%s3760_s20 + $0x384] ss:$8 sps:$4 sm:$0xff]   ;;  %2028 = vmatprep.subr.bf16.mxu1 %v3254_v29 }
 0x10f   : > { %1524 = vmatprep.subr.bf16.mxu0 %v3073_v31  ;;  %v3252_v31 = vld [vmem:[%s3785_s19 + $0xe0] ss:$16 sps:$4 sm:$0xff]   ;;  %v3227_v29 = vld [vmem:[%s3760_s20 + $0x4e4] ss:$8 sps:$4 sm:$0xff]  }
 0x111   : > { %2029 = vmatpush1.bf16.msra.mxu1 %v3252_v31  ;;  %v3230_v31 = vld [vmem:[%s3760_s20 + $0x4f4] ss:$8 sps:$4 sm:$0xff]  }
 0x112   : > { %1525 = vmatpush1.bf16.msra.mxu0 %v3071_v34  ;;  %v3115_v34 = vld [vmem:[%s3760_s20 + $0x394] ss:$8 sps:$4 sm:$0xff]   ;;  %2030 = vmatprep.subr.bf16.mxu1 %v3257_v33  ;;  %v446_v33 = vpack.c.bf16 %v3980_v20, %v3980_v20 }
 0x113   : > { %1526 = vmatprep.subr.bf16.mxu0 %v3076_v35  ;;  %v3255_v35 = vld [vmem:[%s3785_s19 + $0x100] ss:$16 sps:$4 sm:$0xff]  }
 0x115   : > { %2031 = vmatpush1.bf16.msra.mxu1 %v3255_v35  ;;  %v3273_v35 = vld [vmem:[%s3785_s19 + $0x1c0] ss:$16 sps:$4 sm:$0xff]  }
 0x116   : > { %1527 = vmatpush1.bf16.msra.mxu0 %v3074_v38  ;;  %v3118_v38 = vld [vmem:[%s3760_s20 + $0x3a4] ss:$8 sps:$4 sm:$0xff]   ;;  %2032 = vmatprep.subr.bf16.mxu1 %v3260_v37 }
 0x117   : > { %1528 = vmatprep.subr.bf16.mxu0 %v3079_v39  ;;  %v3258_v39 = vld [vmem:[%s3785_s19 + $0x120] ss:$16 sps:$4 sm:$0xff]   ;;  %v3278_v37 = vld [vmem:[%s3785_s19 + $0x1e4] ss:$16 sps:$4 sm:$0xff]  }
 0x119   : > { %2033 = vmatpush1.bf16.msra.mxu1 %v3258_v39  ;;  %v3276_v39 = vld [vmem:[%s3785_s19 + $0x1e0] ss:$16 sps:$4 sm:$0xff]  }
 0x11a   : > { %1529 = vmatpush1.bf16.msra.mxu0 %v3077_v44  ;;  %v3121_v44 = vld [vmem:[%s3760_s20 + $0x3b4] ss:$8 sps:$4 sm:$0xff]   ;;  %2034 = vmatprep.subr.bf16.mxu1 %v3263_v42 }
 0x11b   : > { %1530 = vmatprep.subr.bf16.mxu0 %v3082_v45  ;;  %v3261_v45 = vld [vmem:[%s3785_s19 + $0x140] ss:$16 sps:$4 sm:$0xff]  }
 0x11d   : > { %2035 = vmatpush1.bf16.msra.mxu1 %v3261_v45  ;;  %v612_v45 = vsub.s32 0, %v3800_v16 }
 0x11e   : > { %1531 = vmatpush1.bf16.msra.mxu0 %v3080_v50  ;;  %v3122_v50 = vld [vmem:[%s3760_s20 + $0x3c0] ss:$8 sps:$4 sm:$0xff]   ;;  %2036 = vmatprep.subr.bf16.mxu1 %v3266_v47  ;;  %v616_v47 = vsub.s32 1, %v3800_v16 }
 0x11f   : > { %1532 = vmatprep.subr.bf16.mxu0 %v3085_v51  ;;  %v3269_v51 = vld [vmem:[%s3785_s19 + $0x184] ss:$16 sps:$4 sm:$0xff]  }
 0x121   : > { %2037 = vmatpush1.bf16.msra.mxu1 %v3264_v49 }
 0x122   : > { %1533 = vmatpush1.bf16.msra.mxu0 %v3083_v56  ;;  %2038 = vmatprep.subr.bf16.mxu1 %v3269_v51  ;;  %v3128_v56 = vld [vmem:[%s3760_s20 + $0x3e0] ss:$8 sps:$4 sm:$0xff]  }
 0x123   : > { %1543 = vmatprep.subr.bf16.mxu0 %v3088_v57  ;;  %v3136_v57 = vld [vmem:[%s3760_s20 + $0x3f4] ss:$8 sps:$4 sm:$0xff]  }
 0x125   : > { %1535 = vmatmul.mubr.bf16.vlgmr.msra.gmra.mrb[0].mxu0 %v442_v60  ;;  %2039 = vmatpush1.bf16.msra.mxu1 %v3267_v41  ;;  %v3143_v60 = vld [vmem:[%s3760_s20 + $0x404] ss:$8 sps:$4 sm:$0xff]  }
 0x126   : > { %1544 = vmatpush1.bf16.msra.mxu0 %v3086_v59  ;;  %1575 = vmatprep.mubr.bf16.mxu0 %v445_v62  ;;  %v427_v59 = vcombine.high %v3980_v20, %v3980_v20  ;;  %v3141_v62 = vld [vmem:[%s3760_s20 + $0x400] ss:$8 sps:$4 sm:$0xff]  }
 0x127   : > { %1545 = vmatprep.subr.bf16.mxu0 %v3091_v61  ;;  %v444_v61 = vpack.c.bf16 %v3910_v52, %v3910_v52  ;;  %v3161_v52 = vld [vmem:[%s3760_s20 + $0x434] ss:$8 sps:$4 sm:$0xff]   ;;  %2040 = vmatprep.subr.bf16.mxu1 %v3272_v12 }
 0x128   : > { %v447_v63 = vpack.c.bf16 %v427_v59, %v427_v59  ;;  %v3308_v12 = vld [vmem:[%s3785_s19 + $0x12c] ss:$16 sps:$4 sm:$0xff]  }
 0x12a   : > { %1546 = vmatpush1.bf16.msra.mxu0 %v3089_v2  ;;  %v3155_v2 = vld [vmem:[%s3760_s20 + $0x424] ss:$8 sps:$4 sm:$0xff]  }
 0x12b   : > { %1547 = vmatprep.subr.bf16.mxu0 %v3094_v43  ;;  %v3159_v43 = vld [vmem:[%s3760_s20 + $0x430] ss:$8 sps:$4 sm:$0xff]  }
 0x12e   : > { %1548 = vmatpush1.bf16.msra.mxu0 %v3092_v5  ;;  %v3165_v5 = vld [vmem:[%s3760_s20 + $0x440] ss:$8 sps:$4 sm:$0xff]  }
 0x12f   : > { %1549 = vmatprep.subr.bf16.mxu0 %v3097_v7  ;;  %v3171_v7 = vld [vmem:[%s3760_s20 + $0x450] ss:$8 sps:$4 sm:$0xff]  }
 0x132   : > { %1550 = vmatpush1.bf16.msra.mxu0 %v3095_v9  ;;  %v3177_v9 = vld [vmem:[%s3760_s20 + $0x460] ss:$8 sps:$4 sm:$0xff]  }
 0x133   : > { %1551 = vmatprep.subr.bf16.mxu0 %v3100_v11  ;;  %v3270_v11 = vld [vmem:[%s3785_s19 + $0x1a0] ss:$16 sps:$4 sm:$0xff]  }
 0x134   : > { %2041 = vmatpush1.bf16.msra.mxu1 %v3270_v11  ;;  %v3303_v11 = vld [vmem:[%s3785_s19 + $0x108] ss:$16 sps:$4 sm:$0xff]  }
 0x136   : > { %1552 = vmatpush1.bf16.msra.mxu0 %v3098_v13  ;;  %v3183_v13 = vld [vmem:[%s3760_s20 + $0x470] ss:$8 sps:$4 sm:$0xff]  }
 0x137   : > { %1553 = vmatprep.subr.bf16.mxu0 %v3103_v15  ;;  %v3189_v15 = vld [vmem:[%s3760_s20 + $0x480] ss:$8 sps:$4 sm:$0xff]  }
 0x13a   : > { %1554 = vmatpush1.bf16.msra.mxu0 %v3101_v18  ;;  %v3195_v18 = vld [vmem:[%s3760_s20 + $0x490] ss:$8 sps:$4 sm:$0xff]  }
 0x13b   : > { %1555 = vmatprep.subr.bf16.mxu0 %v3106_v22  ;;  %v3201_v22 = vld [vmem:[%s3760_s20 + $0x4a0] ss:$8 sps:$4 sm:$0xff]  }
 0x13e   : > { %1556 = vmatpush1.bf16.msra.mxu0 %v3104_v24  ;;  %v3207_v24 = vld [vmem:[%s3760_s20 + $0x4b0] ss:$8 sps:$4 sm:$0xff]  }
 0x13f   : > { %1557 = vmatprep.subr.bf16.mxu0 %v3109_v26  ;;  %v3213_v26 = vld [vmem:[%s3760_s20 + $0x4c0] ss:$8 sps:$4 sm:$0xff]  }
 0x142   : > { %1558 = vmatpush1.bf16.msra.mxu0 %v3107_v28  ;;  %v3219_v28 = vld [vmem:[%s3760_s20 + $0x4d0] ss:$8 sps:$4 sm:$0xff]  }
 0x143   : > { %1559 = vmatprep.subr.bf16.mxu0 %v3112_v30  ;;  %v3225_v30 = vld [vmem:[%s3760_s20 + $0x4e0] ss:$8 sps:$4 sm:$0xff]  }
 0x146   : > { %1560 = vmatpush1.bf16.msra.mxu0 %v3110_v32  ;;  %v3228_v32 = vld [vmem:[%s3760_s20 + $0x4f0] ss:$8 sps:$4 sm:$0xff]  }
 0x147   : > { %1561 = vmatprep.subr.bf16.mxu0 %v3115_v34  ;;  %v3275_v34 = vld [vmem:[%s3785_s19 + $0x1c4] ss:$16 sps:$4 sm:$0xff]  }
 0x148   : > { %2042 = vmatprep.subr.bf16.mxu1 %v3275_v34 }
 0x149   : > { %2043 = vmatpush1.bf16.msra.mxu1 %v3273_v35 }
 0x14a   : > { %1562 = vmatpush1.bf16.msra.mxu0 %v3113_v36  ;;  %2044 = vmatprep.subr.bf16.mxu1 %v3278_v37 }
 0x14b   : > { %1563 = vmatprep.subr.bf16.mxu0 %v3118_v38 }
 0x14d   : > { %2045 = vmatpush1.bf16.msra.mxu1 %v3276_v39 }
 0x14e   : > { %1564 = vmatpush1.bf16.msra.mxu0 %v3116_v40 }
 0x14f   : > { %1565 = vmatprep.subr.bf16.mxu0 %v3121_v44  ;;  %v3281_v44 = vld [vmem:[%s3785_s19 + $0xc] ss:$16 sps:$4 sm:$0xff]  }
 0x150   : > { %2055 = vmatprep.subr.bf16.mxu1 %v3281_v44 }
 0x152   : > { %1566 = vmatpush1.bf16.msra.mxu0 %v3119_v46  ;;  %v608_v46 = vld [vmem:[%s3767_s8] sm:$0x3] }
 0x153   : > { %1567 = vmatprep.subr.bf16.mxu0 %v3124_v48  ;;  %v613_v48 = vrot.slane %v608_v46, %v612_v45  ;;  %v617_v49 = vrot.slane %v608_v46, %v616_v47 }
 0x156   : > { %1568 = vmatpush1.bf16.msra.mxu0 %v3122_v50 }
 0x157   : > { %1569 = vmatprep.subr.bf16.mxu0 %v3127_v53 }
 0x15a   : > { %1570 = vmatpush1.bf16.msra.mxu0 %v3125_v54 }
 0x15b   : > { %1571 = vmatprep.subr.bf16.mxu0 %v3130_v55 }
 0x15e   : > { %1572 = vmatpush1.bf16.msra.mxu0 %v3128_v56 }
 0x15f   : > { %1573 = vmatprep.subr.bf16.mxu0 %v3136_v57 }
 0x162   : > { %1574 = vmatpush1.bf16.msra.mxu0 %v3134_v58 }
 0x163   : > { %1584 = vmatprep.subr.bf16.mxu0 %v3143_v60  ;;  %v3279_v60 = vld [vmem:[%s3785_s19 + $0x8] ss:$16 sps:$4 sm:$0xff]  }
 0x165   : > { %1576 = vmatmul.mubr.bf16.vlgmr.msra.gmra.mrb[0].mxu0 %v444_v61 }
 0x166   : > { %1585 = vmatpush1.bf16.msra.mxu0 %v3141_v62  ;;  %1616 = vmatprep.mubr.bf16.mxu0 %v447_v63  ;;  %v3284_v62 = vld [vmem:[%s3785_s19 + $0x2c] ss:$16 sps:$4 sm:$0xff]   ;;  %v3282_v63 = vld [vmem:[%s3785_s19 + $0x28] ss:$16 sps:$4 sm:$0xff]  }
 0x167   : > { %1586 = vmatprep.subr.bf16.mxu0 %v3149_v0  ;;  %v3287_v0 = vld [vmem:[%s3785_s19 + $0x4c] ss:$16 sps:$4 sm:$0xff]  }
 0x16a   : > { %1587 = vmatpush1.bf16.msra.mxu0 %v3147_v1  ;;  %v3285_v1 = vld [vmem:[%s3785_s19 + $0x48] ss:$16 sps:$4 sm:$0xff]  }
 0x16b   : > { %1588 = vmatprep.subr.bf16.mxu0 %v3155_v2  ;;  %v3290_v2 = vld [vmem:[%s3785_s19 + $0x6c] ss:$16 sps:$4 sm:$0xff]  }
 0x16e   : > { %1589 = vmatpush1.bf16.msra.mxu0 %v3153_v3  ;;  %v3288_v3 = vld [vmem:[%s3785_s19 + $0x68] ss:$16 sps:$4 sm:$0xff]  }
 0x16f   : > { %1590 = vmatprep.subr.bf16.mxu0 %v3161_v52  ;;  %v3293_v52 = vld [vmem:[%s3785_s19 + $0x8c] ss:$16 sps:$4 sm:$0xff]  }
 0x172   : > { %1591 = vmatpush1.bf16.msra.mxu0 %v3159_v43  ;;  %v3291_v43 = vld [vmem:[%s3785_s19 + $0x88] ss:$16 sps:$4 sm:$0xff]  }
 0x173   : > { %1592 = vmatprep.subr.bf16.mxu0 %v3167_v4  ;;  %v3296_v4 = vld [vmem:[%s3785_s19 + $0xac] ss:$16 sps:$4 sm:$0xff]  }
 0x176   : > { %1593 = vmatpush1.bf16.msra.mxu0 %v3165_v5  ;;  %v3294_v5 = vld [vmem:[%s3785_s19 + $0xa8] ss:$16 sps:$4 sm:$0xff]  }
 0x177   : > { %1594 = vmatprep.subr.bf16.mxu0 %v3173_v6  ;;  %v3299_v6 = vld [vmem:[%s3785_s19 + $0xcc] ss:$16 sps:$4 sm:$0xff]  }
 0x17a   : > { %1595 = vmatpush1.bf16.msra.mxu0 %v3171_v7  ;;  %v3297_v7 = vld [vmem:[%s3785_s19 + $0xc8] ss:$16 sps:$4 sm:$0xff]  }
 0x17b   : > { %1596 = vmatprep.subr.bf16.mxu0 %v3179_v8  ;;  %v3302_v8 = vld [vmem:[%s3785_s19 + $0xec] ss:$16 sps:$4 sm:$0xff]  }
 0x17e   : > { %1597 = vmatpush1.bf16.msra.mxu0 %v3177_v9  ;;  %v3300_v9 = vld [vmem:[%s3785_s19 + $0xe8] ss:$16 sps:$4 sm:$0xff]  }
 0x17f   : > { %1598 = vmatprep.subr.bf16.mxu0 %v3185_v10  ;;  %v3305_v10 = vld [vmem:[%s3785_s19 + $0x10c] ss:$16 sps:$4 sm:$0xff]  }
 0x182   : > { %1599 = vmatpush1.bf16.msra.mxu0 %v3183_v13  ;;  %v3306_v13 = vld [vmem:[%s3785_s19 + $0x128] ss:$16 sps:$4 sm:$0xff]  }
 0x183   : > { %1600 = vmatprep.subr.bf16.mxu0 %v3191_v14  ;;  %v3311_v14 = vld [vmem:[%s3785_s19 + $0x14c] ss:$16 sps:$4 sm:$0xff]  }
 0x186   : > { %1601 = vmatpush1.bf16.msra.mxu0 %v3189_v15  ;;  %v3309_v15 = vld [vmem:[%s3785_s19 + $0x148] ss:$16 sps:$4 sm:$0xff]  }
 0x187   : > { %1602 = vmatprep.subr.bf16.mxu0 %v3197_v17  ;;  %v3314_v17 = vld [vmem:[%s3785_s19 + $0x16c] ss:$16 sps:$4 sm:$0xff]  }
 0x18a   : > { %1603 = vmatpush1.bf16.msra.mxu0 %v3195_v18  ;;  %v3312_v18 = vld [vmem:[%s3785_s19 + $0x168] ss:$16 sps:$4 sm:$0xff]  }
 0x18b   : > { %1604 = vmatprep.subr.bf16.mxu0 %v3203_v21  ;;  %v3317_v21 = vld [vmem:[%s3785_s19 + $0x18c] ss:$16 sps:$4 sm:$0xff]  }
 0x18e   : > { %1605 = vmatpush1.bf16.msra.mxu0 %v3201_v22  ;;  %v3315_v22 = vld [vmem:[%s3785_s19 + $0x188] ss:$16 sps:$4 sm:$0xff]  }
 0x18f   : > { %1606 = vmatprep.subr.bf16.mxu0 %v3209_v23  ;;  %v3320_v23 = vld [vmem:[%s3785_s19 + $0x1ac] ss:$16 sps:$4 sm:$0xff]  }
 0x192   : > { %1607 = vmatpush1.bf16.msra.mxu0 %v3207_v24  ;;  %v3318_v24 = vld [vmem:[%s3785_s19 + $0x1a8] ss:$16 sps:$4 sm:$0xff]  }
 0x193   : > { %1608 = vmatprep.subr.bf16.mxu0 %v3215_v25  ;;  %v3323_v25 = vld [vmem:[%s3785_s19 + $0x1cc] ss:$16 sps:$4 sm:$0xff]  }
 0x196   : > { %1609 = vmatpush1.bf16.msra.mxu0 %v3213_v26  ;;  %v3321_v26 = vld [vmem:[%s3785_s19 + $0x1c8] ss:$16 sps:$4 sm:$0xff]  }
 0x197   : > { %1610 = vmatprep.subr.bf16.mxu0 %v3221_v27  ;;  %v3326_v27 = vld [vmem:[%s3785_s19 + $0x1ec] ss:$16 sps:$4 sm:$0xff]  }
 0x19a   : > { %1611 = vmatpush1.bf16.msra.mxu0 %v3219_v28  ;;  %v3324_v28 = vld [vmem:[%s3785_s19 + $0x1e8] ss:$16 sps:$4 sm:$0xff]  }
 0x19b   : > { %1612 = vmatprep.subr.bf16.mxu0 %v3227_v29 }
 0x19e   : > { %1613 = vmatpush1.bf16.msra.mxu0 %v3225_v30 }
 0x19f   : > { %1614 = vmatprep.subr.bf16.mxu0 %v3230_v31 }
 0x1a2   : > { %1615 = vmatpush1.bf16.msra.mxu0 %v3228_v32 }
 0x1a5   : > { %1617 = vmatmul.mubr.bf16.vlgmr.msra.gmra.mrb[0].mxu0 %v446_v33 }
 0x1c7   : > { %v1454_v36 = vpop.f32.mrb[0].mxu1 }
 0x1c8   : > { %v1456_v38 = vpop.f32.mrb[1].mxu1  ;;  %v1455_v50 = vadd.f32 %v1454_v36, %v613_v48  ;;  %v2178_v48 = vld [vmem:[%s4316_s5 + $0x80] sm:$0xff] (!%p2751_p9) }
 0x1c9   : > { %v1458_v40 = vpop.f32.mrb[2].mxu1  ;;  %v1457_v51 = vadd.f32 %v1456_v38, %v617_v49  ;;  %v2179_v49 = vld [vmem:[%s4316_s5 + $0x88] sm:$0xff] (!%p2751_p9) }
 0x1ca   : > { %v1459_v42 = vpop.f32.mrb[3].mxu1 }
 0x1cb   : > { %v1627_v42 = vld [vmem:[#allocation2] sm:$0xff] }
 0x278   : > { %v1618_v53 = vpop.f32.mrb[0].mxu0 }
 0x279   : > { %v2895_v41 = vadd.f32 %v1618_v53, %v1455_v50  ;;  %v1620_v54 = vpop.f32.mrb[1].mxu0  ;;  %v2162_v50 = vld [vmem:[%s4316_s5] sm:$0xff] (!%p2751_p9)  ;;  %v2163_v53 = vld [vmem:[%s4316_s5 + $0x8] sm:$0xff] (!%p2751_p9) }
 0x27a   : > { %v2897_v55 = vadd.f32 %v1620_v54, %v1457_v51  ;;  %v1622_v56 = vpop.f32.mrb[2].mxu0  ;;  %v2830_v51 = vpack.c.bf16 (!%p2751_p9), %v2179_v49, %v2178_v48  ;;  %v2211_v54 = vld [vmem:[%s4316_s5 + $0x188] sm:$0xff] (!%p2751_p9)  ;;  %v2220_v48 = vld [vmem:[%s4316_s5 + $0x1d0] sm:$0xff] (!%p2751_p9)  ;;  %v2221_v49 = vld [vmem:[%s4316_s5 + $0x1d8] sm:$0xff] (!%p2751_p9) }
 0x27b   : > { %v1625_v57 = vmax.f32 %v2895_v41, 0.0  ;;  %v1623_v20 = vpop.f32.mrb[3].mxu0  ;;  %v2210_v41 = vld [vmem:[%s4316_s5 + $0x180] sm:$0xff] (!%p2751_p9) }
 0x27c   : > { %v1626_v58 = vmax.f32 %v2897_v55, 0.0  ;;  %v2832_v55 = vpack.c.bf16 (!%p2751_p9), %v2163_v53, %v2162_v50  ;;  %v2862_v56 = vpack.c.bf16 (!%p2751_p9), %v2211_v54, %v2210_v41  ;;  %v2195_v20 = vld [vmem:[%s4316_s5 + $0x108] sm:$0xff] (!%p2751_p9)  ;;  %2831 = vmatprep.subr.bf16.mxu0 (!%p2751_p9), %v2830_v51  ;;  %v2172_v41 = vld [vmem:[%s4316_s5 + $0x50] sm:$0xff] (!%p2751_p9)  ;;  %v2173_v54 = vld [vmem:[%s4316_s5 + $0x58] sm:$0xff] (!%p2751_p9) }
 0x27d   : > { %v4036_v61 = vpack.c.bf16 %v1625_v57, %v1625_v57  ;;  %v2194_v57 = vld [vmem:[%s4316_s5 + $0x100] sm:$0xff] (!%p2751_p9) }
 0x27e   : > { %v1629_v59 = vpack.c.bf16 %v1626_v58, %v1626_v58  ;;  %v2180_v58 = vld [vmem:[%s4316_s5 + $0x90] sm:$0xff] (!%p2751_p9)  ;;  %2833 = vmatpush3.bf16.msra.mxu0 (!%p2751_p9), %v2832_v55 }
 0x27f   : > { %v2204_v55 = vld [vmem:[%s4316_s5 + $0x150] sm:$0xff] (!%p2751_p9) }
 0x280   : > { %2046 = vmatprep.mubr.bf16.mxu1 %v1629_v59 }
 0x281   : > { %2047 = vmatmul.mubr.bf16.vlgmr.msra.gmra.mrb[4].mxu1 %v4036_v61 }
 0x282   : > { %2056 = vmatpush1.bf16.msra.mxu1 %v3279_v60  ;;  %2087 = vmatprep.mubr.bf16.mxu1 %v1629_v59  ;;  %v2864_v59 = vpack.c.bf16 (!%p2751_p9), %v2195_v20, %v2194_v57  ;;  %v2181_v60 = vld [vmem:[%s4316_s5 + $0x98] sm:$0xff] (!%p2751_p9)  ;;  %v2190_v20 = vld [vmem:[%s4316_s5 + $0xe0] sm:$0xff] (!%p2751_p9) }
 0x283   : > { %2057 = vmatprep.subr.bf16.mxu1 %v3284_v62  ;;  %v2165_v62 = vld [vmem:[%s4316_s5 + $0x18] sm:$0xff] (!%p2751_p9) }
 0x284   : > { %v2205_v57 = vld [vmem:[%s4316_s5 + $0x158] sm:$0xff] (!%p2751_p9) }
 0x286   : > { %2058 = vmatpush1.bf16.msra.mxu1 %v3282_v63  ;;  %v2834_v63 = vpack.c.bf16 (!%p2751_p9), %v2181_v60, %v2180_v58  ;;  %v2191_v58 = vld [vmem:[%s4316_s5 + $0xe8] sm:$0xff] (!%p2751_p9)  ;;  %v2222_v60 = vld [vmem:[%s4316_s5 + $0x1e0] sm:$0xff] (!%p2751_p9) }
 0x287   : > { %2059 = vmatprep.subr.bf16.mxu1 %v3287_v0 }
 0x288   : > { %2835 = vmatprep.subr.bf16.mxu0 (!%p2751_p9), %v2834_v63  ;;  %v2852_v63 = vpack.c.bf16 (!%p2751_p9), %v2173_v54, %v2172_v41 }
 0x28a   : > { %2060 = vmatpush1.bf16.msra.mxu1 %v3285_v1  ;;  %v2212_v1 = vld [vmem:[%s4316_s5 + $0x190] sm:$0xff] (!%p2751_p9) }
 0x28b   : > { %2061 = vmatprep.subr.bf16.mxu1 %v3290_v2  ;;  %v2213_v2 = vld [vmem:[%s4316_s5 + $0x198] sm:$0xff] (!%p2751_p9) }
 0x28e   : > { %2062 = vmatpush1.bf16.msra.mxu1 %v3288_v3  ;;  %v2196_v3 = vld [vmem:[%s4316_s5 + $0x110] sm:$0xff] (!%p2751_p9) }
 0x28f   : > { %2063 = vmatprep.subr.bf16.mxu1 %v3293_v52  ;;  %v2866_v52 = vpack.c.bf16 (!%p2751_p9), %v2213_v2, %v2212_v1  ;;  %v2884_v1 = vpack.c.bf16 (!%p2751_p9), %v2205_v57, %v2204_v55  ;;  %v2854_v2 = vpack.c.bf16 (!%p2751_p9), %v2191_v58, %v2190_v20 }
 0x292   : > { %2064 = vmatpush1.bf16.msra.mxu1 %v3291_v43  ;;  %v2197_v43 = vld [vmem:[%s4316_s5 + $0x118] sm:$0xff] (!%p2751_p9) }
 0x293   : > { %2065 = vmatprep.subr.bf16.mxu1 %v3296_v4  ;;  %v2182_v4 = vld [vmem:[%s4316_s5 + $0xa0] sm:$0xff] (!%p2751_p9) }
 0x296   : > { %2066 = vmatpush1.bf16.msra.mxu1 %v3294_v5  ;;  %v2183_v5 = vld [vmem:[%s4316_s5 + $0xa8] sm:$0xff] (!%p2751_p9) }
 0x297   : > { %2067 = vmatprep.subr.bf16.mxu1 %v3299_v6  ;;  %v2868_v6 = vpack.c.bf16 (!%p2751_p9), %v2197_v43, %v2196_v3  ;;  %v2175_v3 = vld [vmem:[%s4316_s5 + $0x68] sm:$0xff] (!%p2751_p9) }
 0x298   : > { %v2125_v43 = vld [vmem:[#allocation8] sm:$0xf] (!%p2751_p9) }
 0x29a   : > { %2068 = vmatpush1.bf16.msra.mxu1 %v3297_v7  ;;  %v2838_v7 = vpack.c.bf16 (!%p2751_p9), %v2183_v5, %v2182_v4  ;;  %v2207_v5 = vld [vmem:[%s4316_s5 + $0x168] sm:$0xff] (!%p2751_p9) }
 0x29b   : > { %2069 = vmatprep.subr.bf16.mxu1 %v3302_v8  ;;  %v2166_v8 = vld [vmem:[%s4316_s5 + $0x20] sm:$0xff] (!%p2751_p9) }
 0x29e   : > { %2070 = vmatpush1.bf16.msra.mxu1 %v3300_v9  ;;  %v2167_v9 = vld [vmem:[%s4316_s5 + $0x28] sm:$0xff] (!%p2751_p9) }
 0x29f   : > { %2071 = vmatprep.subr.bf16.mxu1 %v3305_v10  ;;  %v2214_v10 = vld [vmem:[%s4316_s5 + $0x1a0] sm:$0xff] (!%p2751_p9) }
 0x2a2   : > { %2072 = vmatpush1.bf16.msra.mxu1 %v3303_v11  ;;  %v2215_v11 = vld [vmem:[%s4316_s5 + $0x1a8] sm:$0xff] (!%p2751_p9) }
 0x2a3   : > { %2073 = vmatprep.subr.bf16.mxu1 %v3308_v12  ;;  %v2198_v12 = vld [vmem:[%s4316_s5 + $0x120] sm:$0xff] (!%p2751_p9) }
 0x2a6   : > { %2074 = vmatpush1.bf16.msra.mxu1 %v3306_v13  ;;  %v2199_v13 = vld [vmem:[%s4316_s5 + $0x128] sm:$0xff] (!%p2751_p9) }
 0x2a7   : > { %2075 = vmatprep.subr.bf16.mxu1 %v3311_v14  ;;  %v2840_v14 = vpack.c.bf16 (!%p2751_p9), %v2167_v9, %v2166_v8  ;;  %v2130_v8 = vrot.slane (!%p2751_p9), %v2125_v43, %v612_v45  ;;  %v2134_v9 = vrot.slane (!%p2751_p9), %v2125_v43, %v616_v47  ;;  %v2177_v47 = vld [vmem:[%s4316_s5 + $0x78] sm:$0xff] (!%p2751_p9) }
 0x2aa   : > { %2076 = vmatpush1.bf16.msra.mxu1 %v3309_v15  ;;  %v2870_v15 = vpack.c.bf16 (!%p2751_p9), %v2215_v11, %v2214_v10  ;;  %v2224_v11 = vld [vmem:[%s4316_s5 + $0x1f0] sm:$0xff] (!%p2751_p9) }
 0x2ab   : > { %2077 = vmatprep.subr.bf16.mxu1 %v3314_v17  ;;  %v2184_v17 = vld [vmem:[%s4316_s5 + $0xb0] sm:$0xff] (!%p2751_p9) }
 0x2ae   : > { %2078 = vmatpush1.bf16.msra.mxu1 %v3312_v18  ;;  %v2185_v18 = vld [vmem:[%s4316_s5 + $0xb8] sm:$0xff] (!%p2751_p9) }
 0x2af   : > { %2079 = vmatprep.subr.bf16.mxu1 %v3317_v21  ;;  %v2168_v21 = vld [vmem:[%s4316_s5 + $0x30] sm:$0xff] (!%p2751_p9) }
 0x2b2   : > { %2080 = vmatpush1.bf16.msra.mxu1 %v3315_v22  ;;  %v2872_v22 = vpack.c.bf16 (!%p2751_p9), %v2199_v13, %v2198_v12  ;;  %v2225_v12 = vld [vmem:[%s4316_s5 + $0x1f8] sm:$0xff] (!%p2751_p9) }
 0x2b3   : > { %2081 = vmatprep.subr.bf16.mxu1 %v3320_v23  ;;  %v2842_v23 = vpack.c.bf16 (!%p2751_p9), %v2185_v18, %v2184_v17 }
 0x2b6   : > { %2082 = vmatpush1.bf16.msra.mxu1 %v3318_v24  ;;  %v2169_v24 = vld [vmem:[%s4316_s5 + $0x38] sm:$0xff] (!%p2751_p9) }
 0x2b7   : > { %2083 = vmatprep.subr.bf16.mxu1 %v3323_v25  ;;  %v2216_v25 = vld [vmem:[%s4316_s5 + $0x1b0] sm:$0xff] (!%p2751_p9) }
 0x2ba   : > { %2084 = vmatpush1.bf16.msra.mxu1 %v3321_v26  ;;  %v2217_v26 = vld [vmem:[%s4316_s5 + $0x1b8] sm:$0xff] (!%p2751_p9) }
 0x2bb   : > { %2085 = vmatprep.subr.bf16.mxu1 %v3326_v27  ;;  %v2874_v27 = vpack.c.bf16 (!%p2751_p9), %v2217_v26, %v2216_v25 }
 0x2be   : > { %2086 = vmatpush1.bf16.msra.mxu1 %v3324_v28  ;;  %v2200_v28 = vld [vmem:[%s4316_s5 + $0x130] sm:$0xff] (!%p2751_p9) }
 0x2bf   : > { %2863 = vmatprep.subr.bf16.mxu1 (!%p2751_p9), %v2862_v56  ;;  %v2882_v56 = vpack.c.bf16 (!%p2751_p9), %v2221_v49, %v2220_v48 }
 0x2c1   : > { %2088 = vmatmul.mubr.bf16.vlgmr.msra.gmra.mrb[8].mxu1 %v4036_v61  ;;  %v2164_v61 = vld [vmem:[%s4316_s5 + $0x10] sm:$0xff] (!%p2751_p9) }
 0x2c2   : > { %v2836_v0 = vpack.c.bf16 (!%p2751_p9), %v2165_v62, %v2164_v61  ;;  %2865 = vmatpush3.bf16.msra.mxu1 (!%p2751_p9), %v2864_v59  ;;  %v2137_v59 = vsub.s32 (!%p2751_p9), 2, %v3800_v16  ;;  %v2223_v61 = vld [vmem:[%s4316_s5 + $0x1e8] sm:$0xff] (!%p2751_p9)  ;;  %v2141_v62 = vsub.s32 (!%p2751_p9), 3, %v3800_v16  ;;  %v2176_v16 = vld [vmem:[%s4316_s5 + $0x70] sm:$0xff] (!%p2751_p9) }
 0x2c3   : > { %2867 = vmatprep.subr.bf16.mxu1 (!%p2751_p9), %v2866_v52  ;;  %v2206_v52 = vld [vmem:[%s4316_s5 + $0x160] sm:$0xff] (!%p2751_p9)  ;;  %v2886_v4 = vpack.c.bf16 (!%p2751_p9), %v2223_v61, %v2222_v60  ;;  %v2860_v26 = vpack.c.bf16 (!%p2751_p9), %v2177_v47, %v2176_v16 }
 0x2c4   : > { %2837 = vmatpush3.bf16.msra.mxu0 (!%p2751_p9), %v2836_v0  ;;  %v2174_v0 = vld [vmem:[%s4316_s5 + $0x60] sm:$0xff] (!%p2751_p9)  ;;  %v2138_v10 = vrot.slane (!%p2751_p9), %v2125_v43, %v2137_v59  ;;  %v2142_v13 = vrot.slane (!%p2751_p9), %v2125_v43, %v2141_v62  ;;  %v2888_v17 = vpack.c.bf16 (!%p2751_p9), %v2207_v5, %v2206_v52 }
 0x2c5   : > { %2839 = vmatprep.subr.bf16.mxu0 (!%p2751_p9), %v2838_v7  ;;  %v2193_v7 = vld [vmem:[%s4316_s5 + $0xf8] sm:$0xff] (!%p2751_p9) }
 0x2c6   : > { %2869 = vmatpush3.bf16.msra.mxu1 (!%p2751_p9), %v2868_v6  ;;  %v2192_v6 = vld [vmem:[%s4316_s5 + $0xf0] sm:$0xff] (!%p2751_p9)  ;;  %v2144_v18 = vcombine.low (!%p2751_p9), %v2138_v10, %v2142_v13 }
 0x2c7   : > { %2871 = vmatprep.subr.bf16.mxu1 (!%p2751_p9), %v2870_v15  ;;  %v2143_v15 = vcombine.low (!%p2751_p9), %v2130_v8, %v2134_v9  ;;  %v2858_v45 = vpack.c.bf16 (!%p2751_p9), %v2193_v7, %v2192_v6 }
 0x2c8   : > { %2841 = vmatpush3.bf16.msra.mxu0 (!%p2751_p9), %v2840_v14  ;;  %v2856_v14 = vpack.c.bf16 (!%p2751_p9), %v2175_v3, %v2174_v0  ;;  %v2158_v25 = vrot.slane (!%p2751_p9), %v2144_v18, %v3805_v19 }
 0x2c9   : > { %2843 = vmatprep.subr.bf16.mxu0 (!%p2751_p9), %v2842_v23  ;;  %v2209_v23 = vld [vmem:[%s4316_s5 + $0x178] sm:$0xff] (!%p2751_p9) }
 0x2ca   : > { %2873 = vmatpush3.bf16.msra.mxu1 (!%p2751_p9), %v2872_v22  ;;  %v2208_v22 = vld [vmem:[%s4316_s5 + $0x170] sm:$0xff] (!%p2751_p9) }
 0x2cb   : > { %2875 = vmatprep.subr.bf16.mxu1 (!%p2751_p9), %v2874_v27 }
 0x354   : > { %v2048_v29 = vpop.f32.mrb[4].mxu1 }
 0x355   : > { %v2050_v30 = vpop.f32.mrb[5].mxu1 }
 0x356   : > { %v2100_v31 = vcombine.low %v2048_v29, %v2050_v30  ;;  %v2052_v32 = vpop.f32.mrb[6].mxu1  ;;  %v2201_v29 = vld [vmem:[%s4316_s5 + $0x138] sm:$0xff] (!%p2751_p9)  ;;  %v2186_v30 = vld [vmem:[%s4316_s5 + $0xc0] sm:$0xff] (!%p2751_p9) }
 0x357   : > { %v2053_v33 = vpop.f32.mrb[7].mxu1  ;;  %v2844_v32 = vpack.c.bf16 (!%p2751_p9), %v2169_v24, %v2168_v21  ;;  %v2890_v21 = vpack.c.bf16 (!%p2751_p9), %v2225_v12, %v2224_v11  ;;  %v2151_v24 = vrot.slane (!%p2751_p9), %v2143_v15, %v3805_v19 }
 0x358   : > { %v2108_v39 = vrot.slane %v2100_v31, %v3805_v19  ;;  %v2187_v31 = vld [vmem:[%s4316_s5 + $0xc8] sm:$0xff] (!%p2751_p9)  ;;  %v2218_v33 = vld [vmem:[%s4316_s5 + $0x1c0] sm:$0xff] (!%p2751_p9) }
 0x359   : > { %2845 = vmatpush3.bf16.msra.mxu0 (!%p2751_p9), %v2844_v32 }
 0x394   : > { %v2089_v34 = vpop.f32.mrb[8].mxu1 }
 0x395   : > { %v2091_v35 = vpop.f32.mrb[9].mxu1 }
 0x396   : > { %v2101_v36 = vcombine.low %v2089_v34, %v2091_v35  ;;  %v2093_v37 = vpop.f32.mrb[10].mxu1  ;;  %v2219_v34 = vld [vmem:[%s4316_s5 + $0x1c8] sm:$0xff] (!%p2751_p9)  ;;  %v2876_v35 = vpack.c.bf16 (!%p2751_p9), %v2201_v29, %v2200_v28  ;;  %v2892_v28 = vpack.c.bf16 (!%p2751_p9), %v2209_v23, %v2208_v22  ;;  %v2159_v29 = vcombine.low (!%p2751_p9), %v2151_v24, %v2158_v25 }
 0x397   : > { %v2094_v38 = vpop.f32.mrb[11].mxu1  ;;  %v2170_v37 = vld [vmem:[%s4316_s5 + $0x40] sm:$0xff] (!%p2751_p9) }
 0x398   : > { %v2115_v40 = vrot.slane %v2101_v36, %v3805_v19  ;;  %2123 = sbr.rel (%p2751_p9) target bundleno = 1161 (0x489), region = 72  ;;  %v2846_v36 = vpack.c.bf16 (!%p2751_p9), %v2187_v31, %v2186_v30  ;;  %v2171_v38 = vld [vmem:[%s4316_s5 + $0x48] sm:$0xff] (!%p2751_p9)  ;;  %2877 = vmatpush3.bf16.msra.mxu1 (!%p2751_p9), %v2876_v35 }
 0x399   : > { %v2848_v50 = vpack.c.bf16 (!%p2751_p9), %v2171_v38, %v2170_v37  ;;  %v2752_v37 = vld [vmem:[#allocation9] ss:$0 sm:$0xff] (!%p2751_p9) }
 0x39a   : > { %v2116_v44 = vcombine.low %v2108_v39, %v2115_v40  ;;  %v2202_v39 = vld [vmem:[%s4316_s5 + $0x140] sm:$0xff] (!%p2751_p9)  ;;  %v2878_v40 = vpack.c.bf16 (!%p2751_p9), %v2219_v34, %v2218_v33  ;;  %2847 = vmatprep.subr.bf16.mxu0 (!%p2751_p9), %v2846_v36 }
 0x39b   : > { %2849 = vmatpush3.bf16.msra.mxu0 (!%p2751_p9), %v2848_v50 }
 0x39c   : > { %v2118_v46 = vadd.f32 %v2116_v44, %v1627_v42  ;;  %v2203_v42 = vld [vmem:[%s4316_s5 + $0x148] sm:$0xff] (!%p2751_p9)  ;;  %v2188_v44 = vld [vmem:[%s4316_s5 + $0xd0] sm:$0xff] (!%p2751_p9)  ;;  %2879 = vmatprep.subr.bf16.mxu1 (!%p2751_p9), %v2878_v40 }
 0x39d   : > { %v2880_v51 = vpack.c.bf16 (!%p2751_p9), %v2203_v42, %v2202_v39 }
 0x39e   : > { %2119 = vst [vmem:[#allocation2] sm:$0xff] %v2118_v46  ;;  %v2189_v46 = vld [vmem:[%s4316_s5 + $0xd8] sm:$0xff] (!%p2751_p9) }
 0x39f   : > { %v2850_v53 = vpack.c.bf16 %v2189_v46, %v2188_v44  ;;  %2881 = vmatpush3.bf16.msra.mxu1 %v2880_v51 }
 0x3a0   : > { %2883 = vmatprep.subr.bf16.mxu1 %v2882_v56 }
 0x3a1   : > { %2851 = vmatprep.subr.bf16.mxu0 %v2850_v53 }
 0x3a2   : > { %2853 = vmatpush3.bf16.msra.mxu0 %v2852_v63 }
 0x3a3   : > { %2885 = vmatpush3.bf16.msra.mxu1 %v2884_v1  ;;  %2855 = vmatprep.subr.bf16.mxu0 %v2854_v2 }
 0x3a4   : > { %2887 = vmatprep.subr.bf16.mxu1 %v2886_v4 }
 0x3a5   : > { %v2124_v27 = vld [vmem:[#allocation2] sm:$0xff] }
 0x3a6   : > { %2857 = vmatpush3.bf16.msra.mxu0 %v2856_v14  ;;  %v2161_v30 = vadd.f32 %v2159_v29, %v2124_v27 }
 0x3a7   : > { %2889 = vmatpush3.bf16.msra.mxu1 %v2888_v17  ;;  %2859 = vmatprep.subr.bf16.mxu0 %v2858_v45 }
 0x3a8   : > { %2891 = vmatprep.subr.bf16.mxu1 %v2890_v21  ;;  %v2241_v31 = vrot.slane %v2161_v30, %v3805_v19  ;;  %v2234_v32 = vcombine.high %v2161_v30, %v2161_v30 }
 0x3aa   : > { %2861 = vmatpush3.bf16.msra.mxu0 %v2860_v26  ;;  %v2249_v33 = vcombine.high %v2241_v31, %v2241_v31  ;;  %v2248_v34 = vrot.slane %v2234_v32, %v3805_v19 }
 0x3ab   : > { %2893 = vmatpush3.bf16.msra.mxu1 %v2892_v28 }
 0x3ac   : > { %2319 = vmatprep.mubr.f32.mxu0 %v2249_v33  ;;  %v2250_v35 = vcombine.high %v2248_v34, %v2248_v34 }
 0x3ad   : > { %2320 = vmatmul.mubr.f32.vlgmr.msra.gmra.mrb[0].mxu0 %v2241_v31 }
 0x3ae   : > { %2389 = vmatprep.mubr.f32.mxu1 %v2250_v35 }
 0x3af   : > { %2390 = vmatmul.mubr.f32.vlgmr.msra.gmra.mrb[0].mxu1 %v2248_v34 }
 0x480   : > { %v2792_v36 = vpop.f32.mrb[0].mxu0 }
 0x481   : > { %v2793_v38 = vpop.f32.mrb[1].mxu0 }
 0x482   : > { %v2794_v39 = vadd.f32 %v2793_v38, %v2792_v36  ;;  %v2827_v40 = vpop.f32.mrb[0].mxu1 }
 0x483   : > { %v2828_v42 = vpop.f32.mrb[1].mxu1 }
 0x484   : > { %v2322_v44 = vadd.f32 %v2794_v39, %v2752_v37  ;;  %v2829_v46 = vadd.f32 %v2828_v42, %v2827_v40 }
 0x486   : > { %v2392_v48 = vadd.f32 %v2829_v46, %v2322_v44 }
 0x488   : > { %2396 = vst.msk [vmem:[#allocation11] sm:$0x3] %vm2395_vm0, %v2392_v48 }
 0x489 PF: > { %p2947_p10 = scmp.eq.s32.totalorder %s3590_s28, 3  ;;  %s3530_s6 = smov [#allocation11]  }
 0x48a   : > { %s2404_s21 = sshll.u32 %s3530_s6, 4  ;;  %s2405_s21 = int_to_ptr.vmem [resolvable:$true] %s2404_s21 }
 0x48b   : > { %s3443_s22 = scalar_lea.vmem %s2405_s21, 32  ;;  %p3450_p6 = scmp.lt.s32.totalorder %s2405_s21, %s2405_s21 }
 0x48c   : > { %p3444_p8 = scmp.ne.s32.totalorder %s2405_s21, %s3443_s22  ;;  %p3451_p3 = scmp.lt.s32.totalorder %s3443_s22, %s3443_s22 }
 0x48e   : > { %p3445_p0 = pnand %p3444_p8, %p2947_p10  ;;  %p3452_p1 = por %p3451_p3, %p3450_p6 }
 0x490   : > { %p3446_p4 = pneg %p3445_p0 }
 0x492   : > { %p3453_p13 = pnand %p3452_p1, %p3446_p4 }
 0x494   : > { %3456 = shalt.err (!%p3453_p13)
}
 0x495   : > { %s3457_s23 = scalar_lea.hbm %s4318_s7, 32 }
 0x496   : > { %p3458_p7 = scmp.ne.s32.totalorder %s4318_s7, %s3457_s23  ;;  %p3463_p2 = scmp.lt.u32.totalorder %s3457_s23, %s4318_s7 }
 0x498   : > { %p3459_p11 = pnand %p3458_p7, %p2947_p10 }
 0x49a   : > { %p3460_p12 = pneg %p3459_p11 }
 0x49c   : > { %p3465_p5 = pnand %p3463_p2, %p3460_p12 }
 0x49e   : > { %3468 = shalt.err (!%p3465_p5)
}
 0x49f   : > { %2925 = dma.vmem_to_hbm [thread:$0]  (%p2947_p10), %s2405_s21, 32, %s4318_s7, [#allocation5]  }
 0x4a0   : > { %3502 = dma.done.wait (%p2947_p10), [#allocation5], 32  }
 0x4a1   : > { %3504 = vsyncadd (%p2947_p10), [#allocation5], 4294967264 }
 0x4a2 PF: > { %p22_p9 = scmp.ge.s32.totalorder %s3593_s29, 6   ;;  %s4343_s24 = smov %s3511_s25 }
 0x4a3   : > { %s4344_s25 = smov %s3515_s26  ;;  %s4345_s26 = smov %s3603_s9 }
 0x4a4   : > { %s4346_s27 = smov %s3593_s29  ;;  %24 = sbr.rel (!%p22_p9) target bundleno = 11 (0xb), region = 117 }
 0x4ab   :  { %2417 = vsyncpa [#allocation4], 1 }
 0x4ac   :  { %2419 = vsyncpa [#allocation4 + $0x1], 1 }
 0x4ad   :  { %2420 = vsyncpa [#allocation7], 1 }
 0x4ae   :  { %2422 = vsyncpa [#allocation7 + $0x1], 1 }
 0x4af   :  { %2423 = vsyncpa [#allocation10], 1 }
 0x4b0   :  { %2424 = vsyncpa [#allocation5], 1 }
 0x4b1   :  { %2426 = vsyncpa [#allocation5 + $0x1], 1 }

// kernel: custom_model_forward.2
= control target key start
LH: loop header
LB: loop body
LE: loop exit
PB: predicated region body
PF: predicated region fallthrough
CT: control target
= control target key end

     0   :  { %10 = vsyncpa [#allocation4], 0  ;;  %s10449_s0 = inlined_call_operand.vmem [shape: bf16[512,32], index: 0, kind: input, shape index: {}]   ;;  %s10450_s1 = inlined_call_operand.hbm [shape: bf16[32,32], index: 1, kind: input, shape index: {}]   ;;  %s10451_s2 = inlined_call_operand.hbm [shape: f32[1,32], index: 2, kind: input, shape index: {}]   ;;  %s10452_s3 = inlined_call_operand.hbm [shape: bf16[32,1280], index: 3, kind: input, shape index: {}]   ;;  %s10453_s4 = inlined_call_operand.hbm [shape: f32[1,1280], index: 4, kind: input, shape index: {}]   ;;  %s10454_s5 = inlined_call_operand.vmem [shape: f32[2,1,1280], index: 5, kind: output, shape index: {}]  }
   0x1   :  { %11 = vsyncpa [#allocation6], 0 }
   0x2   :  { %12 = vsyncpa [#allocation9], 0  ;;  %s7172_s18 = smov 0   ;;  %s7174_s19 = smov 0  }
   0x3   :  { %s7176_s20 = smov 0  }
   0x4 LB: > { %s7131_s21 = smov [#allocation5]   ;;  %s4890_s23 = sadd.s32 4294967295, %s7129_s20   ;;  %s7129_s20 = sphi %s7176_s20, %s18_s20   ;;  %s7125_s19 = sphi %s7174_s19, %s10899_s19   ;;  %s7121_s18 = sphi %s7172_s18, %s10898_s18  }
   0x5   : > { %s199_s22 = sshll.u32 %s7131_s21, 4  ;;  %p4892_p0 = scmp.ge.s32.totalorder %s7129_s20, 1  ;;  %s200_s22 = int_to_ptr.vmem [resolvable:$true] %s199_s22 }
   0x6   : > { %p173_p1 = scmp.lt.s32.totalorder %s7129_s20, 3  ;;  %p7190_p2 = scmp.eq.s32.totalorder %s4890_s23, 0 }
   0x7   : > { %s30_s26 = sadd.s32 1, %s7125_s19  ;;  %s7132_s29 = smov [#allocation3]  }
   0x8   : > { %s10481_s24 = scalar_select %p7190_p2, 1, 0 }
   0x9   : > { %p7194_p3 = pnand %p4892_p0, %p173_p1  ;;  %p7207_p6 = scmp.ge.s32.totalorder %s30_s26, 2 }
   0xa   : > { %s185_s30 = sshll.u32 %s7132_s29, 4  ;;  %s6983_s8 = scalar_lea.hbm %s10451_s2, 16  ;;  %s7211_s30 = int_to_ptr.vmem [resolvable:$true] %s185_s30 }
   0xb   : > { %s10482_s25 = scalar_select %p7194_p3, 1, 0 }
   0xc   : > { %p5469_p4 = pneg %p7194_p3  ;;  %p6984_p7 = scmp.ne.s32.totalorder %s10451_s2, %s6983_s8 }
   0xd   : > { %s10484_s28 = scalar_select %p7207_p6, 1, 0 }
   0xe   : > { %p7203_p5 = pnand %p7190_p2, %p5469_p4  ;;  %p6990_p11 = scmp.lt.u32.totalorder %s6983_s8, %s10451_s2 }
  0x10   : > { %p7221_p8 = pneg %p7203_p5 }
  0x12   : > { %p6986_p9 = pnand %p7221_p8, %p6984_p7 }
  0x14   : > { %p6987_p10 = pneg %p6986_p9 }
  0x16   : > { %p6992_p12 = pnand %p6990_p11, %p6987_p10 }
  0x18   : > { %6995 = shalt.err (!%p6992_p12)
}
  0x19   : > { %s6996_s14 = scalar_lea.vmem %s200_s22, 16  ;;  %s7003_s15 = scalar_lea.vmem %s200_s22, 32 }
  0x1a   : > { %p6997_p13 = scmp.ne.s32.totalorder %s200_s22, %s6996_s14  ;;  %p7004_p4 = scmp.lt.s32.totalorder %s200_s22, %s200_s22 }
  0x1b   : > { %p7005_p2 = scmp.lt.s32.totalorder %s7003_s15, %s6996_s14 }
  0x1c   : > { %p6999_p0 = pnand %p6997_p13, %p7221_p8 }
  0x1d   : > { %p7006_p3 = por %p7005_p2, %p7004_p4 }
  0x1e   : > { %p7000_p1 = pneg %p6999_p0 }
  0x20   : > { %p7007_p6 = pnand %p7006_p3, %p7000_p1 }
  0x22   : > { %7010 = shalt.err (!%p7007_p6)
}
  0x23   : > { %5475 = dma.hbm_to_vmem [thread:$0]  (!%p7203_p5), %s10451_s2, 16, %s200_s22, [#allocation6]  }
  0x24   : > { %p10486_p7 = scmp.ne.s32.totalorder %s10484_s28, 0  ;;  %s7011_s29 = scalar_lea.hbm %s10450_s1, 256 }
  0x25   : > { %p7012_p2 = scmp.ne.s32.totalorder %s10450_s1, %s7011_s29  ;;  %p7018_p9 = scmp.lt.u32.totalorder %s7011_s29, %s10450_s1 }
  0x26   : > { %s10901_s26 = smov (%p10486_p7, %s30_s26), 0 }
  0x27   : > { %p7014_p3 = pnand %p7012_p2, %p7221_p8 }
  0x29   : > { %p7015_p6 = pneg %p7014_p3 }
  0x2b   : > { %p7020_p10 = pnand %p7018_p9, %p7015_p6 }
  0x2d   : > { %7023 = shalt.err (!%p7020_p10)
}
  0x2e   : > { %s7024_s22 = scalar_lea.vmem %s7211_s30, 256  ;;  %p7032_p0 = scmp.lt.s32.totalorder %s7211_s30, %s7211_s30 }
  0x2f   : > { %p7025_p11 = scmp.ne.s32.totalorder %s7211_s30, %s7024_s22  ;;  %p7033_p1 = scmp.lt.s32.totalorder %s7024_s22, %s7024_s22 }
  0x31   : > { %p7027_p12 = pnand %p7025_p11, %p7221_p8  ;;  %p7034_p4 = por %p7033_p1, %p7032_p0 }
  0x33   : > { %p7028_p13 = pneg %p7027_p12 }
  0x35   : > { %p7035_p7 = pnand %p7034_p4, %p7028_p13 }
  0x37   : > { %7038 = shalt.err (!%p7035_p7)
}
  0x38   : > { %s7133_s28 = smov 64   ;;  %s7134_s10 = smov 4  }
  0x39   : > { %5472 = dma.hbm_to_vmem [thread:$0]  (!%p7203_p5), %s10450_s1, 256, %s7211_s30, [#allocation4], %s7133_s28, %s7133_s28, %s7134_s10  }
  0x3a   : > { %s7135_s14 = smov [#allocation7]   ;;  %s7039_s21 = scalar_lea.hbm %s10452_s3, 2560 }
  0x3b   : > { %s209_s15 = sshll.u32 %s7135_s14, 4  ;;  %p7040_p2 = scmp.ne.s32.totalorder %s10452_s3, %s7039_s21  ;;  %s210_s15 = int_to_ptr.vmem [resolvable:$true] %s209_s15 }
  0x3c   : > { %p7046_p9 = scmp.lt.u32.totalorder %s7039_s21, %s10452_s3 }
  0x3d   : > { %p7042_p3 = pnand %p7040_p2, %p7221_p8 }
  0x3f   : > { %p7043_p6 = pneg %p7042_p3 }
  0x41   : > { %p7048_p10 = pnand %p7046_p9, %p7043_p6 }
  0x43   : > { %7051 = shalt.err (!%p7048_p10)
}
  0x44   : > { %s7052_s30 = scalar_lea.vmem %s210_s15, 2560  ;;  %p7060_p0 = scmp.lt.s32.totalorder %s210_s15, %s210_s15 }
  0x45   : > { %p7053_p11 = scmp.ne.s32.totalorder %s210_s15, %s7052_s30  ;;  %p7061_p1 = scmp.lt.s32.totalorder %s7052_s30, %s7052_s30 }
  0x47   : > { %p7055_p12 = pnand %p7053_p11, %p7221_p8  ;;  %p7062_p4 = por %p7061_p1, %p7060_p0 }
  0x49   : > { %p7056_p13 = pneg %p7055_p12 }
  0x4b   : > { %p7063_p7 = pnand %p7062_p4, %p7056_p13 }
  0x4d   : > { %7066 = shalt.err (!%p7063_p7)
}
  0x4e   : > { %s7136_s8 = smov 640   ;;  %s7137_s9 = smov 40  }
  0x4f   : > { %5478 = dma.hbm_to_vmem [thread:$0]  (!%p7203_p5), %s10452_s3, 2560, %s210_s15, [#allocation6], %s7136_s8, %s7136_s8, %s7137_s9  }
  0x50   : > { %s7138_s10 = smov [#allocation8]   ;;  %s7067_s16 = scalar_lea.hbm %s10453_s4, 160 }
  0x51   : > { %s223_s12 = sshll.u32 %s7138_s10, 4  ;;  %p7068_p2 = scmp.ne.s32.totalorder %s10453_s4, %s7067_s16  ;;  %s224_s12 = int_to_ptr.vmem [resolvable:$true] %s223_s12 }
  0x52   : > { %p7074_p9 = scmp.lt.u32.totalorder %s7067_s16, %s10453_s4 }
  0x53   : > { %p7070_p3 = pnand %p7068_p2, %p7221_p8 }
  0x55   : > { %p7071_p6 = pneg %p7070_p3 }
  0x57   : > { %p7076_p10 = pnand %p7074_p9, %p7071_p6 }
  0x59   : > { %7079 = shalt.err (!%p7076_p10)
}
  0x5a   : > { %s7080_s15 = scalar_lea.vmem %s224_s12, 160  ;;  %p7088_p0 = scmp.lt.s32.totalorder %s224_s12, %s224_s12 }
  0x5b   : > { %p7081_p11 = scmp.ne.s32.totalorder %s224_s12, %s7080_s15  ;;  %p7089_p1 = scmp.lt.s32.totalorder %s7080_s15, %s7080_s15 }
  0x5d   : > { %p7083_p12 = pnand %p7081_p11, %p7221_p8  ;;  %p7090_p4 = por %p7089_p1, %p7088_p0 }
  0x5f   : > { %p7084_p13 = pneg %p7083_p12 }
  0x61   : > { %p7091_p7 = pnand %p7090_p4, %p7084_p13 }
  0x63   : > { %7094 = shalt.err (!%p7091_p7)
}
  0x64   : > { %5481 = dma.hbm_to_vmem [thread:$0]  (!%p7203_p5), %s10453_s4, 160, %s224_s12, [#allocation9]  }
  0x65   : > { %p10487_p2 = scmp.ne.s32.totalorder %s10482_s25, 0 }
  0x67   : > { %247 = sbr.rel (%p10487_p2) target bundleno = 1290 (0x50a), region = 40 }
  0x6e   : > { %p10488_p3 = scmp.ne.s32.totalorder %s10481_s24, 0 }
  0x70   : > { %7108 = dma.done.wait (%p10488_p3), [#allocation4], 256  }
  0x71   : > { %7110 = vsyncadd (%p10488_p3), [#allocation4], 4294967040 }
  0x72   : > { %7112 = dma.done.wait (%p10488_p3), [#allocation6], 2576  }
  0x73   : > { %7114 = vsyncadd (%p10488_p3), [#allocation6], 4294964720 }
  0x74   : > { %7116 = dma.done.wait (%p10488_p3), [#allocation9], 160  }
  0x75   : > { %7118 = vsyncadd (%p10488_p3), [#allocation9], 4294967136  ;;  %s4903_s25 = sshll.u32 %s7121_s18, 5  ;;  %v5525_v0 = vld [vmem:[#allocation3] sm:$0xff]   ;;  %v5526_v1 = vld [vmem:[#allocation3 + $0x8] sm:$0xff]   ;;  %vm445_vm0 = vcmask 261120  }
  0x76   : > { %p289_p5 = scmp.lt.s32.totalorder %s4903_s25, 63  ;;  %5412 = vmatprep.subr.bf16.mxu0 %v5525_v0  ;;  %v5545_v18 = vld [vmem:[#allocation7 + $0x4] ss:$40 sps:$4 sm:$0xff]   ;;  %v5543_v19 = vld [vmem:[#allocation7] ss:$40 sps:$4 sm:$0xff]   ;;  %v10462_v22 = vmov 0  }
  0x77   : > { %5413 = vmatpush3.bf16.msra.mxu0 %v5525_v0  ;;  %5448 = vmatprep.subr.bf16.mxu1 %v5545_v18  ;;  %v5548_v20 = vld [vmem:[#allocation7 + $0x54] ss:$40 sps:$4 sm:$0xff]   ;;  %v5546_v21 = vld [vmem:[#allocation7 + $0x50] ss:$40 sps:$4 sm:$0xff]   ;;  %p295_p8 = scmp.lt.s32.totalorder %s7121_s18, 1 }
  0x78   : > { %s10903_s25 = smov (!%p289_p5, %s4903_s25), 63  ;;  %5414 = vmatprep.subr.bf16.mxu0 %v5526_v1  ;;  %5450 = vmatpush1.bf16.msra.mxu1 %v5543_v19  ;;  %v5554_v23 = vld [vmem:[#allocation7 + $0xc] ss:$40 sps:$4 sm:$0xff]   ;;  %v7354_v25 = vld [vmem:[#allocation5] ss:$0 sm:$0xff] }
  0x79   : > { %s4904_s27 = sshll.u32 %s10903_s25, 2  ;;  %5449 = vmatprep.subr.bf16.mxu1 %v5548_v20  ;;  %1189 = vmatprep.mubr.bf16.mxu1 %v10462_v22  ;;  %v5551_v24 = vld [vmem:[#allocation7 + $0x14] ss:$40 sps:$4 sm:$0xff]   ;;  %s10905_s18 = smov (!%p295_p8, %s7121_s18), 1 }
  0x7a   : > { %s7318_s8 = scalar_lea.vmem %s10449_s0, %s4904_s27  ;;  %s5452_s24 = smul.u32 10, %s10905_s18 }
  0x7b   : > { %v5527_v2 = vld [vmem:[%s7318_s8] sm:$0xff]   ;;  %v5528_v3 = vld [vmem:[%s7318_s8 + $0x8] sm:$0xff]   ;;  %5415 = vmatpush3.bf16.msra.mxu0 %v5526_v1  ;;  %v5529_v4 = vld [vmem:[%s7318_s8 + $0x10] sm:$0xff]  }
  0x7c   : > { %5416 = vmatprep.mubr.msk.bf16.mxu0 %vm445_vm0, %v5527_v2  ;;  %v5530_v5 = vld [vmem:[%s7318_s8 + $0x18] sm:$0xff]   ;;  %v5531_v6 = vld [vmem:[%s7318_s8 + $0x20] sm:$0xff]   ;;  %v5532_v7 = vld [vmem:[%s7318_s8 + $0x28] sm:$0xff]   ;;  %1117 = vmatprep.subr.bf16.mxu0 %v5545_v18  ;;  %s10342_s22 = scalar_lea.vmem %s10454_s5, %s5452_s24 }
  0x7d   : > { %v5533_v8 = vld [vmem:[%s7318_s8 + $0x30] sm:$0xff]   ;;  %v5534_v9 = vld [vmem:[%s7318_s8 + $0x38] sm:$0xff]   ;;  %v5535_v10 = vld [vmem:[%s7318_s8 + $0x40] sm:$0xff]   ;;  %5451 = vmatpush1.bf16.msra.mxu1 %v5546_v21 }
  0x7e   : > { %5417 = vmatmul.mubr.msk.bf16.vlgmr.msra.gmra.mrb[0].mxu0 %vm445_vm0, %v5528_v3  ;;  %v5536_v11 = vld [vmem:[%s7318_s8 + $0x48] sm:$0xff]   ;;  %v5537_v12 = vld [vmem:[%s7318_s8 + $0x50] sm:$0xff]   ;;  %v5538_v13 = vld [vmem:[%s7318_s8 + $0x58] sm:$0xff]   ;;  %1503 = vmatprep.subr.bf16.mxu1 %v5551_v24 }
  0x7f   : > { %5420 = vmatprep.mubr.msk.bf16.mxu0 %vm445_vm0, %v5529_v4  ;;  %v5539_v14 = vld [vmem:[%s7318_s8 + $0x60] sm:$0xff]   ;;  %v5540_v15 = vld [vmem:[%s7318_s8 + $0x68] sm:$0xff]   ;;  %v5541_v16 = vld [vmem:[%s7318_s8 + $0x70] sm:$0xff]   ;;  %1118 = vmatpush1.bf16.msra.mxu0 %v5543_v19 }
  0x80   : > { %v5542_v17 = vld [vmem:[%s7318_s8 + $0x78] sm:$0xff]   ;;  %1119 = vmatprep.subr.bf16.mxu0 %v5548_v20 }
  0x83   : > { %1120 = vmatpush1.bf16.msra.mxu0 %v5546_v21 }
  0x84   : > { %1310 = vmatprep.subr.bf16.mxu0 %v5554_v23 }
  0x86   : > { %5421 = vmatmul.mubr.msk.bf16.gmra.mrb[4].mxu0 %vm445_vm0, %v5530_v5 }
  0x87   : > { %5424 = vmatprep.mubr.msk.bf16.mxu0 %vm445_vm0, %v5531_v6 }
  0x8e   : > { %5425 = vmatmul.mubr.msk.bf16.gmra.mrb[8].mxu0 %vm445_vm0, %v5532_v7 }
  0x8f   : > { %5428 = vmatprep.mubr.msk.bf16.mxu0 %vm445_vm0, %v5533_v8 }
  0x96   : > { %5429 = vmatmul.mubr.msk.bf16.gmra.mrb[12].mxu0 %vm445_vm0, %v5534_v9 }
  0x97   : > { %5432 = vmatprep.mubr.msk.bf16.mxu0 %vm445_vm0, %v5535_v10 }
  0x9e   : > { %5433 = vmatmul.mubr.msk.bf16.gmra.mrb[16].mxu0 %vm445_vm0, %v5536_v11 }
  0x9f   : > { %5436 = vmatprep.mubr.msk.bf16.mxu0 %vm445_vm0, %v5537_v12 }
  0xa6   : > { %5437 = vmatmul.mubr.msk.bf16.gmra.mrb[20].mxu0 %vm445_vm0, %v5538_v13 }
  0xa7   : > { %5440 = vmatprep.mubr.msk.bf16.mxu0 %vm445_vm0, %v5539_v14 }
  0xae   : > { %5441 = vmatmul.mubr.msk.bf16.gmra.mrb[24].mxu0 %vm445_vm0, %v5540_v15 }
  0xaf   : > { %5444 = vmatprep.mubr.msk.bf16.mxu0 %vm445_vm0, %v5541_v16 }
  0xb6   : > { %5445 = vmatmul.mubr.msk.bf16.gmra.mrb[28].mxu0 %vm445_vm0, %v5542_v17 }
  0xb7   : > { %1149 = vmatprep.mubr.bf16.mxu0 %v10462_v22 }
 0x151   : > { %v5418_v26 = vpop.f32.mrb[0].mxu0 }
 0x152   : > { %v7357_v27 = vadd.f32 %v5418_v26, %v7354_v25  ;;  %v528_v28 = vpop.f32.mrb[1].mxu0 }
 0x153   : > { %v7360_v29 = vadd.f32 %v7354_v25, %v528_v28  ;;  %v5419_v30 = vpop.f32.mrb[2].mxu0 }
 0x154   : > { %v4942_v31 = vmul.f32 -1.442695, %v7357_v27  ;;  %v7364_v32 = vadd.f32 %v5419_v30, %v7354_v25  ;;  %v531_v33 = vpop.f32.mrb[3].mxu0 }
 0x155   : > { %v4940_v34 = vmul.f32 -1.442695, %v7360_v29  ;;  %v7368_v35 = vadd.f32 %v7354_v25, %v531_v33 }
 0x156   : > { %5573 = vpow2.f32 %v4942_v31  ;;  %v4943_v36 = vmul.f32 -1.442695, %v7364_v32 }
 0x157   : > { %5575 = vpow2.f32 %v4940_v34  ;;  %v4941_v37 = vmul.f32 -1.442695, %v7368_v35 }
 0x158   : > { %5577 = vpow2.f32 %v4943_v36 }
 0x159   : > { %5579 = vpow2.f32 %v4941_v37  ;;  %v5422_v38 = vpop.f32.mrb[4].mxu0 }
 0x15a   : > { %v7373_v39 = vadd.f32 %v5422_v38, %v7354_v25  ;;  %v544_v40 = vpop.f32.mrb[5].mxu0 }
 0x15b   : > { %v7376_v41 = vadd.f32 %v7354_v25, %v544_v40  ;;  %v5423_v42 = vpop.f32.mrb[6].mxu0 }
 0x15c   : > { %v4946_v43 = vmul.f32 -1.442695, %v7373_v39  ;;  %v7380_v44 = vadd.f32 %v5423_v42, %v7354_v25  ;;  %v547_v45 = vpop.f32.mrb[7].mxu0 }
 0x15d   : > { %v4944_v46 = vmul.f32 -1.442695, %v7376_v41  ;;  %v7384_v47 = vadd.f32 %v7354_v25, %v547_v45 }
 0x15e   : > { %5581 = vpow2.f32 %v4946_v43  ;;  %v4947_v48 = vmul.f32 -1.442695, %v7380_v44 }
 0x15f   : > { %5583 = vpow2.f32 %v4944_v46  ;;  %v4945_v49 = vmul.f32 -1.442695, %v7384_v47 }
 0x160   : > { %v5574_v50 = vpop.eup %5573  ;;  %5585 = vpow2.f32 %v4947_v48 }
 0x161   : > { %v5576_v51 = vpop.eup %5575  ;;  %v753_v52 = vadd.f32 1.0, %v5574_v50  ;;  %5587 = vpow2.f32 %v4945_v49  ;;  %v5426_v53 = vpop.f32.mrb[8].mxu0 }
 0x162   : > { %v5578_v54 = vpop.eup %5577  ;;  %v751_v55 = vadd.f32 1.0, %v5576_v51  ;;  %v7389_v56 = vadd.f32 %v5426_v53, %v7354_v25  ;;  %v560_v57 = vpop.f32.mrb[9].mxu0  ;;  %v5557_v53 = vld [vmem:[#allocation7 + $0x5c] ss:$40 sps:$4 sm:$0xff]  }
 0x163   : > { %v5580_v58 = vpop.eup %5579  ;;  %5589 = vrcp.f32 %v753_v52  ;;  %v754_v59 = vadd.f32 1.0, %v5578_v54  ;;  %v7392_v60 = vadd.f32 %v7354_v25, %v560_v57  ;;  %v5427_v61 = vpop.f32.mrb[10].mxu0 }
 0x164   : > { %5591 = vrcp.f32 %v751_v55  ;;  %v752_v62 = vadd.f32 1.0, %v5580_v58  ;;  %v4950_v63 = vmul.f32 -1.442695, %v7389_v56  ;;  %v7396_v0 = vadd.f32 %v5427_v61, %v7354_v25  ;;  %v563_v1 = vpop.f32.mrb[11].mxu0 }
 0x165   : > { %5593 = vrcp.f32 %v754_v59  ;;  %v4948_v2 = vmul.f32 -1.442695, %v7392_v60  ;;  %v7400_v3 = vadd.f32 %v7354_v25, %v563_v1 }
 0x166   : > { %5595 = vrcp.f32 %v752_v62  ;;  %v4951_v4 = vmul.f32 -1.442695, %v7396_v0 }
 0x167   : > { %5597 = vpow2.f32 %v4950_v63  ;;  %v4949_v5 = vmul.f32 -1.442695, %v7400_v3 }
 0x168   : > { %v5582_v6 = vpop.eup %5581  ;;  %5599 = vpow2.f32 %v4948_v2 }
 0x169   : > { %v5584_v7 = vpop.eup %5583  ;;  %v757_v8 = vadd.f32 1.0, %v5582_v6  ;;  %5601 = vpow2.f32 %v4951_v4  ;;  %v5430_v9 = vpop.f32.mrb[12].mxu0 }
 0x16a   : > { %v5586_v10 = vpop.eup %5585  ;;  %v755_v11 = vadd.f32 1.0, %v5584_v7  ;;  %5603 = vpow2.f32 %v4949_v5  ;;  %v7405_v12 = vadd.f32 %v5430_v9, %v7354_v25  ;;  %v576_v13 = vpop.f32.mrb[13].mxu0  ;;  %v5555_v5 = vld [vmem:[#allocation7 + $0x58] ss:$40 sps:$4 sm:$0xff]  }
 0x16b   : > { %v5588_v14 = vpop.eup %5587  ;;  %5605 = vrcp.f32 %v757_v8  ;;  %v758_v15 = vadd.f32 1.0, %v5586_v10  ;;  %v7408_v16 = vadd.f32 %v7354_v25, %v576_v13  ;;  %v5431_v17 = vpop.f32.mrb[14].mxu0  ;;  %v5563_v8 = vld [vmem:[#allocation7 + $0x1c] ss:$40 sps:$4 sm:$0xff]  }
 0x16c   : > { %5607 = vrcp.f32 %v755_v11  ;;  %v756_v18 = vadd.f32 1.0, %v5588_v14  ;;  %v4954_v19 = vmul.f32 -1.442695, %v7405_v12  ;;  %v7412_v20 = vadd.f32 %v5431_v17, %v7354_v25  ;;  %v579_v21 = vpop.f32.mrb[15].mxu0 }
 0x16d   : > { %v5590_v23 = vpop.eup %5589  ;;  %5609 = vrcp.f32 %v758_v15  ;;  %v4952_v24 = vmul.f32 -1.442695, %v7408_v16  ;;  %v7416_v26 = vadd.f32 %v7354_v25, %v579_v21 }
 0x16e   : > { %v5592_v28 = vpop.eup %5591  ;;  %5611 = vrcp.f32 %v756_v18  ;;  %v4955_v30 = vmul.f32 -1.442695, %v7412_v20  ;;  %v849_v36 = vmul.f32 %v5590_v23, %v7357_v27  ;;  %v5552_v27 = vld [vmem:[#allocation7 + $0x8] ss:$40 sps:$4 sm:$0xff]  }
 0x16f   : > { %v5594_v31 = vpop.eup %5593  ;;  %5613 = vpow2.f32 %v4954_v19  ;;  %v4953_v33 = vmul.f32 -1.442695, %v7416_v26  ;;  %v847_v40 = vmul.f32 %v5592_v28, %v7360_v29 }
 0x170   : > { %v5596_v34 = vpop.eup %5595  ;;  %v850_v37 = vmul.f32 %v5594_v31, %v7364_v32  ;;  %5615 = vpow2.f32 %v4952_v24 }
 0x171   : > { %v5598_v38 = vpop.eup %5597  ;;  %v848_v42 = vmul.f32 %v5596_v34, %v7368_v35  ;;  %5617 = vpow2.f32 %v4955_v30  ;;  %v5434_v43 = vpop.f32.mrb[16].mxu0 }
 0x172   : > { %v5600_v45 = vpop.eup %5599  ;;  %v7424_v46 = vpack.c.bf16 %v850_v37, %v849_v36  ;;  %v761_v48 = vadd.f32 1.0, %v5598_v38  ;;  %5619 = vpow2.f32 %v4953_v33  ;;  %v7427_v49 = vadd.f32 %v5434_v43, %v7354_v25  ;;  %v592_v50 = vpop.f32.mrb[17].mxu0 }
 0x173   : > { %v5602_v51 = vpop.eup %5601  ;;  %v7429_v32 = vpack.c.bf16 %v848_v42, %v847_v40  ;;  %v759_v52 = vadd.f32 1.0, %v5600_v45  ;;  %v7432_v29 = vadd.f32 %v7354_v25, %v592_v50  ;;  %v5435_v35 = vpop.f32.mrb[18].mxu0 }
 0x174   : > { %v5604_v54 = vpop.eup %5603  ;;  %5621 = vrcp.f32 %v761_v48  ;;  %v762_v55 = vadd.f32 1.0, %v5602_v51  ;;  %v4958_v57 = vmul.f32 -1.442695, %v7427_v49  ;;  %v7436_v58 = vadd.f32 %v5435_v35, %v7354_v25  ;;  %v595_v59 = vpop.f32.mrb[19].mxu0 }
 0x175   : > { %v5606_v61 = vpop.eup %5605  ;;  %5623 = vrcp.f32 %v759_v52  ;;  %v760_v62 = vadd.f32 1.0, %v5604_v54  ;;  %v4956_v63 = vmul.f32 -1.442695, %v7432_v29  ;;  %v7440_v1 = vadd.f32 %v7354_v25, %v595_v59  ;;  %4992 = vmatmul.mubr.msk.bf16.vlgmr.msra.gmra.mrb[32].mxu0 %vm445_vm0, %v7429_v32 }
 0x176   : > { %v5608_v2 = vpop.eup %5607  ;;  %5625 = vrcp.f32 %v762_v55  ;;  %v4959_v4 = vmul.f32 -1.442695, %v7436_v58  ;;  %1159 = vmatprep.mubr.bf16.mxu0 %v10462_v22  ;;  %1311 = vmatpush1.bf16.msra.mxu0 %v5552_v27  ;;  %v853_v10 = vmul.f32 %v5606_v61, %v7373_v39 }
 0x177   : > { %v5610_v6 = vpop.eup %5609  ;;  %5627 = vrcp.f32 %v760_v62  ;;  %v4957_v7 = vmul.f32 -1.442695, %v7440_v1  ;;  %1312 = vmatprep.subr.bf16.mxu0 %v5557_v53  ;;  %v851_v14 = vmul.f32 %v5608_v2, %v7376_v41 }
 0x178   : > { %v5612_v9 = vpop.eup %5611  ;;  %v854_v11 = vmul.f32 %v5610_v6, %v7380_v44  ;;  %5629 = vpow2.f32 %v4958_v57 }
 0x179   : > { %v5614_v13 = vpop.eup %5613  ;;  %v852_v15 = vmul.f32 %v5612_v9, %v7384_v47  ;;  %5631 = vpow2.f32 %v4956_v63  ;;  %v5438_v17 = vpop.f32.mrb[20].mxu0 }
 0x17a   : > { %v5616_v18 = vpop.eup %5615  ;;  %v7451_v19 = vpack.c.bf16 %v854_v11, %v853_v10  ;;  %v765_v21 = vadd.f32 1.0, %v5614_v13  ;;  %5633 = vpow2.f32 %v4959_v4  ;;  %v7454_v23 = vadd.f32 %v5438_v17, %v7354_v25  ;;  %v608_v24 = vpop.f32.mrb[21].mxu0  ;;  %1313 = vmatpush1.bf16.msra.mxu0 %v5555_v5 }
 0x17b   : > { %v5618_v39 = vpop.eup %5617  ;;  %v7456_v44 = vpack.c.bf16 %v852_v15, %v851_v14  ;;  %v763_v28 = vadd.f32 1.0, %v5616_v18  ;;  %5635 = vpow2.f32 %v4957_v7  ;;  %v7459_v41 = vadd.f32 %v7354_v25, %v608_v24  ;;  %v5439_v47 = vpop.f32.mrb[22].mxu0  ;;  %1696 = vmatprep.subr.bf16.mxu0 %v5563_v8  ;;  %v5560_v7 = vld [vmem:[#allocation7 + $0x64] ss:$40 sps:$4 sm:$0xff]  }
 0x17c   : > { %v5620_v30 = vpop.eup %5619  ;;  %5637 = vrcp.f32 %v765_v21  ;;  %v766_v31 = vadd.f32 1.0, %v5618_v39  ;;  %v4962_v33 = vmul.f32 -1.442695, %v7454_v23  ;;  %v7463_v34 = vadd.f32 %v5439_v47, %v7354_v25  ;;  %v611_v36 = vpop.f32.mrb[23].mxu0  ;;  %v5558_v21 = vld [vmem:[#allocation7 + $0x60] ss:$40 sps:$4 sm:$0xff]  }
 0x17d   : > { %5639 = vrcp.f32 %v763_v28  ;;  %v764_v37 = vadd.f32 1.0, %v5620_v30  ;;  %v4960_v38 = vmul.f32 -1.442695, %v7459_v41  ;;  %v7467_v40 = vadd.f32 %v7354_v25, %v611_v36  ;;  %4993 = vmatmul.mubr.msk.bf16.gmra.mrb[36].mxu0 %vm445_vm0, %v7424_v46  ;;  %v5566_v28 = vld [vmem:[#allocation7 + $0x24] ss:$40 sps:$4 sm:$0xff]  }
 0x17e   : > { %v5622_v42 = vpop.eup %5621  ;;  %5641 = vrcp.f32 %v766_v31  ;;  %v4963_v43 = vmul.f32 -1.442695, %v7463_v34  ;;  %1169 = vmatprep.mubr.bf16.mxu0 %v10462_v22 }
 0x17f   : > { %v5624_v45 = vpop.eup %5623  ;;  %5643 = vrcp.f32 %v764_v37  ;;  %v4961_v48 = vmul.f32 -1.442695, %v7467_v40  ;;  %v857_v51 = vmul.f32 %v5622_v42, %v7389_v56  ;;  %v5549_v56 = vld [vmem:[#allocation7 + $0x10] ss:$40 sps:$4 sm:$0xff]  }
 0x180   : > { %v5626_v50 = vpop.eup %5625  ;;  %5645 = vpow2.f32 %v4962_v33  ;;  %v855_v54 = vmul.f32 %v5624_v45, %v7392_v60 }
 0x181   : > { %v5628_v27 = vpop.eup %5627  ;;  %v858_v52 = vmul.f32 %v5626_v50, %v7396_v0  ;;  %5647 = vpow2.f32 %v4960_v38  ;;  %v5442_v35 = vpop.f32.mrb[24].mxu0 }
 0x182   : > { %v5630_v53 = vpop.eup %5629  ;;  %v856_v55 = vmul.f32 %v5628_v27, %v7400_v3  ;;  %5649 = vpow2.f32 %v4963_v43  ;;  %v7479_v57 = vadd.f32 %v5442_v35, %v7354_v25  ;;  %v624_v59 = vpop.f32.mrb[25].mxu0 }
 0x183   : > { %v5632_v61 = vpop.eup %5631  ;;  %v7481_v62 = vpack.c.bf16 %v858_v52, %v857_v51  ;;  %v769_v63 = vadd.f32 1.0, %v5630_v53  ;;  %5651 = vpow2.f32 %v4961_v48  ;;  %v7484_v0 = vadd.f32 %v7354_v25, %v624_v59  ;;  %v5443_v2 = vpop.f32.mrb[26].mxu0 }
 0x184   : > { %v5634_v4 = vpop.eup %5633  ;;  %v7486_v5 = vpack.c.bf16 %v856_v55, %v855_v54  ;;  %v767_v60 = vadd.f32 1.0, %v5632_v61  ;;  %v7489_v3 = vadd.f32 %v5443_v2, %v7354_v25  ;;  %v627_v6 = vpop.f32.mrb[27].mxu0  ;;  %v4966_v10 = vmul.f32 -1.442695, %v7479_v57 }
 0x185   : > { %v5636_v8 = vpop.eup %5635  ;;  %5653 = vrcp.f32 %v769_v63  ;;  %v770_v9 = vadd.f32 1.0, %v5634_v4  ;;  %4994 = vmatmul.mubr.msk.bf16.gmra.mrb[40].mxu0 %vm445_vm0, %v7456_v44  ;;  %v7495_v11 = vadd.f32 %v7354_v25, %v627_v6  ;;  %v4964_v15 = vmul.f32 -1.442695, %v7484_v0 }
 0x186   : > { %v5638_v13 = vpop.eup %5637  ;;  %5655 = vrcp.f32 %v767_v60  ;;  %v768_v14 = vadd.f32 1.0, %v5636_v8  ;;  %4996 = vmatmul.mubr.msk.bf16.vlgmr.msra.gmra.mrb[0].mxu1 %vm445_vm0, %v7486_v5  ;;  %1179 = vmatprep.mubr.bf16.mxu0 %v10462_v22  ;;  %v4967_v18 = vmul.f32 -1.442695, %v7489_v3 }
 0x187   : > { %v5640_v17 = vpop.eup %5639  ;;  %5657 = vrcp.f32 %v770_v9  ;;  %1504 = vmatpush1.bf16.msra.mxu1 %v5549_v56  ;;  %1199 = vmatprep.mubr.bf16.mxu1 %v10462_v22  ;;  %v4965_v39 = vmul.f32 -1.442695, %v7495_v11  ;;  %v861_v30 = vmul.f32 %v5638_v13, %v7405_v12  ;;  %v5561_v13 = vld [vmem:[#allocation7 + $0x18] ss:$40 sps:$4 sm:$0xff]  }
 0x188   : > { %v5642_v24 = vpop.eup %5641  ;;  %5659 = vrcp.f32 %v768_v14  ;;  %1505 = vmatprep.subr.bf16.mxu1 %v5560_v7  ;;  %v859_v37 = vmul.f32 %v5640_v17, %v7408_v16 }
 0x189   : > { %v5644_v47 = vpop.eup %5643  ;;  %v862_v31 = vmul.f32 %v5642_v24, %v7412_v20  ;;  %5661 = vpow2.f32 %v4966_v10  ;;  %v5446_v33 = vpop.f32.mrb[28].mxu0 }
 0x18a   : > { %v5646_v36 = vpop.eup %5645  ;;  %v860_v38 = vmul.f32 %v5644_v47, %v7416_v26  ;;  %5663 = vpow2.f32 %v4964_v15  ;;  %v7509_v42 = vadd.f32 %v5446_v33, %v7354_v25  ;;  %v640_v43 = vpop.f32.mrb[29].mxu0 }
 0x18b   : > { %v5648_v45 = vpop.eup %5647  ;;  %v7511_v48 = vpack.c.bf16 %v862_v31, %v861_v30  ;;  %v773_v50 = vadd.f32 1.0, %v5646_v36  ;;  %5665 = vpow2.f32 %v4967_v18  ;;  %v7514_v12 = vadd.f32 %v7354_v25, %v640_v43  ;;  %v5447_v20 = vpop.f32.mrb[30].mxu0  ;;  %1506 = vmatpush1.bf16.msra.mxu1 %v5558_v21  ;;  %v5569_v18 = vld [vmem:[#allocation7 + $0x6c] ss:$40 sps:$4 sm:$0xff]  }
 0x18c   : > { %v5650_v27 = vpop.eup %5649  ;;  %v7516_v51 = vpack.c.bf16 %v860_v38, %v859_v37  ;;  %v771_v16 = vadd.f32 1.0, %v5648_v45  ;;  %5667 = vpow2.f32 %v4965_v39  ;;  %v643_v26 = vpop.f32.mrb[31].mxu0  ;;  %1889 = vmatprep.subr.bf16.mxu1 %v5566_v28  ;;  %v4970_v53 = vmul.f32 -1.442695, %v7509_v42  ;;  %v5567_v28 = vld [vmem:[#allocation7 + $0x68] ss:$40 sps:$4 sm:$0xff]  }
 0x18d   : > { %10489 = vst [vmem:[#allocation13_spill] sm:$0xff] %v7511_v48  ;;  %v5652_v52 = vpop.eup %5651  ;;  %5669 = vrcp.f32 %v773_v50  ;;  %v774_v35 = vadd.f32 1.0, %v5650_v27  ;;  %4995 = vmatmul.mubr.msk.bf16.gmra.mrb[44].mxu0 %vm445_vm0, %v7451_v19  ;;  %v7522_v54 = vadd.f32 %v5447_v20, %v7354_v25  ;;  %v4968_v59 = vmul.f32 -1.442695, %v7514_v12 }
 0x18e   : > { %5671 = vrcp.f32 %v771_v16  ;;  %v772_v55 = vadd.f32 1.0, %v5652_v52  ;;  %4997 = vmatmul.mubr.msk.bf16.gmra.mrb[4].mxu1 %vm445_vm0, %v7481_v62  ;;  %1342 = vmatprep.mubr.bf16.mxu0 %v10462_v22  ;;  %v7529_v61 = vadd.f32 %v7354_v25, %v643_v26 }
 0x18f   : > { %v5654_v63 = vpop.eup %5653  ;;  %5673 = vrcp.f32 %v774_v35  ;;  %1209 = vmatprep.mubr.bf16.mxu1 %v10462_v22  ;;  %v4971_v56 = vmul.f32 -1.442695, %v7522_v54 }
 0x190   : > { %v5656_v2 = vpop.eup %5655  ;;  %5675 = vrcp.f32 %v772_v55  ;;  %v4969_v4 = vmul.f32 -1.442695, %v7529_v61  ;;  %v865_v7 = vmul.f32 %v5654_v63, %v7427_v49 }
 0x191   : > { %v5658_v60 = vpop.eup %5657  ;;  %5677 = vpow2.f32 %v4970_v53  ;;  %v863_v9 = vmul.f32 %v5656_v2, %v7432_v29 }
 0x192   : > { %v5660_v6 = vpop.eup %5659  ;;  %v866_v8 = vmul.f32 %v5658_v60, %v7436_v58  ;;  %5679 = vpow2.f32 %v4968_v59 }
 0x193   : > { %v5662_v25 = vpop.eup %5661  ;;  %v864_v10 = vmul.f32 %v5660_v6, %v7440_v1  ;;  %5681 = vpow2.f32 %v4971_v56 }
 0x194   : > { %v5664_v14 = vpop.eup %5663  ;;  %v7538_v15 = vpack.c.bf16 %v866_v8, %v865_v7  ;;  %v777_v17 = vadd.f32 1.0, %v5662_v25  ;;  %5683 = vpow2.f32 %v4969_v4 }
 0x195   : > { %v5666_v21 = vpop.eup %5665  ;;  %v7540_v24 = vpack.c.bf16 %v864_v10, %v863_v9  ;;  %v775_v49 = vadd.f32 1.0, %v5664_v14  ;;  %5008 = vmatmul.mubr.msk.bf16.vlgmr.msra.gmra.mrb[48].mxu0 %vm445_vm0, %v7429_v32  ;;  %v7702_v14 = vld [vmem:[#allocation8] sm:$0xff] }
 0x196   : > { %10490 = vst [vmem:[#allocation14_spill] sm:$0xff] %v7538_v15  ;;  %v5668_v58 = vpop.eup %5667  ;;  %5685 = vrcp.f32 %v777_v17  ;;  %v778_v29 = vadd.f32 1.0, %v5666_v21  ;;  %4998 = vmatmul.mubr.msk.bf16.gmra.mrb[8].mxu1 %vm445_vm0, %v7516_v51  ;;  %1352 = vmatprep.mubr.bf16.mxu0 %v10462_v22 }
 0x197   : > { %10491 = vst [vmem:[#allocation15_spill] sm:$0xff] %v7540_v24  ;;  %v5670_v1 = vpop.eup %5669  ;;  %5687 = vrcp.f32 %v775_v49  ;;  %v776_v39 = vadd.f32 1.0, %v5668_v58  ;;  %1219 = vmatprep.mubr.bf16.mxu1 %v10462_v22  ;;  %1697 = vmatpush1.bf16.msra.mxu0 %v5561_v13 }
 0x198   : > { %v5672_v47 = vpop.eup %5671  ;;  %5689 = vrcp.f32 %v778_v29  ;;  %1698 = vmatprep.subr.bf16.mxu0 %v5569_v18  ;;  %v869_v33 = vmul.f32 %v5670_v1, %v7454_v23 }
 0x199   : > { %v5674_v30 = vpop.eup %5673  ;;  %5691 = vrcp.f32 %v776_v39  ;;  %v867_v38 = vmul.f32 %v5672_v47, %v7459_v41 }
 0x19a   : > { %v5676_v31 = vpop.eup %5675  ;;  %v870_v36 = vmul.f32 %v5674_v30, %v7463_v34 }
 0x19b   : > { %v5678_v37 = vpop.eup %5677  ;;  %v868_v43 = vmul.f32 %v5676_v31, %v7467_v40  ;;  %1699 = vmatpush1.bf16.msra.mxu0 %v5567_v28 }
 0x19c   : > { %v5680_v45 = vpop.eup %5679  ;;  %v7552_v50 = vpack.c.bf16 %v870_v36, %v869_v33  ;;  %v781_v20 = vadd.f32 1.0, %v5678_v37 }
 0x19d   : > { %v5682_v27 = vpop.eup %5681  ;;  %v7554_v16 = vpack.c.bf16 %v868_v43, %v867_v38  ;;  %v779_v26 = vadd.f32 1.0, %v5680_v45  ;;  %5009 = vmatmul.mubr.msk.bf16.gmra.mrb[52].mxu0 %vm445_vm0, %v7424_v46 }
 0x19e   : > { %10492 = vst [vmem:[#allocation16_spill] sm:$0xff] %v7552_v50  ;;  %v5684_v23 = vpop.eup %5683  ;;  %5693 = vrcp.f32 %v781_v20  ;;  %v782_v34 = vadd.f32 1.0, %v5682_v27  ;;  %4999 = vmatmul.mubr.msk.bf16.gmra.mrb[12].mxu1 %vm445_vm0, %v7511_v48  ;;  %1362 = vmatprep.mubr.bf16.mxu0 %v10462_v22 }
 0x19f   : > { %10493 = vst [vmem:[#allocation17_spill] sm:$0xff] %v7554_v16  ;;  %5695 = vrcp.f32 %v779_v26  ;;  %v780_v41 = vadd.f32 1.0, %v5684_v23  ;;  %1229 = vmatprep.mubr.bf16.mxu1 %v10462_v22 }
 0x1a0   : > { %v5686_v40 = vpop.eup %5685  ;;  %5697 = vrcp.f32 %v782_v34 }
 0x1a1   : > { %v5688_v52 = vpop.eup %5687  ;;  %v873_v35 = vmul.f32 %v5686_v40, %v7479_v57  ;;  %5699 = vrcp.f32 %v780_v41 }
 0x1a2   : > { %v5690_v53 = vpop.eup %5689  ;;  %v871_v55 = vmul.f32 %v5688_v52, %v7484_v0 }
 0x1a3   : > { %v5692_v59 = vpop.eup %5691  ;;  %v874_v63 = vmul.f32 %v5690_v53, %v7489_v3 }
 0x1a4   : > { %v872_v56 = vmul.f32 %v5692_v59, %v7495_v11 }
 0x1a5   : > { %v7566_v2 = vpack.c.bf16 %v874_v63, %v873_v35  ;;  %5010 = vmatmul.mubr.msk.bf16.gmra.mrb[56].mxu0 %vm445_vm0, %v7456_v44 }
 0x1a6   : > { %v7570_v4 = vpack.c.bf16 %v872_v56, %v871_v55  ;;  %5000 = vmatmul.mubr.msk.bf16.gmra.mrb[16].mxu1 %vm445_vm0, %v7540_v24  ;;  %1372 = vmatprep.mubr.bf16.mxu0 %v10462_v22 }
 0x1a7   : > { %10494 = vst [vmem:[#allocation18_spill] sm:$0xff] %v7566_v2  ;;  %1239 = vmatprep.mubr.bf16.mxu1 %v10462_v22 }
 0x1a8   : > { %10495 = vst [vmem:[#allocation19_spill] sm:$0xff] %v7570_v4  ;;  %v5694_v57 = vpop.eup %5693 }
 0x1a9   : > { %v5696_v0 = vpop.eup %5695  ;;  %v877_v3 = vmul.f32 %v5694_v57, %v7509_v42  ;;  %v5564_v42 = vld [vmem:[#allocation7 + $0x20] ss:$40 sps:$4 sm:$0xff]  }
 0x1aa   : > { %v5698_v60 = vpop.eup %5697  ;;  %v875_v11 = vmul.f32 %v5696_v0, %v7514_v12  ;;  %v5572_v12 = vld [vmem:[#allocation7 + $0x74] ss:$40 sps:$4 sm:$0xff]  }
 0x1ab   : > { %v5700_v6 = vpop.eup %5699  ;;  %v878_v7 = vmul.f32 %v5698_v60, %v7522_v54  ;;  %v5570_v54 = vld [vmem:[#allocation7 + $0x70] ss:$40 sps:$4 sm:$0xff]  }
 0x1ac   : > { %v876_v8 = vmul.f32 %v5700_v6, %v7529_v61  ;;  %v10458_v61 = vlaneseq }
 0x1ad   : > { %v7580_v25 = vpack.c.bf16 %v878_v7, %v877_v3  ;;  %5011 = vmatmul.mubr.msk.bf16.gmra.mrb[60].mxu0 %vm445_vm0, %v7451_v19 }
 0x1ae   : > { %v7584_v9 = vpack.c.bf16 %v876_v8, %v875_v11  ;;  %5001 = vmatmul.mubr.msk.bf16.gmra.mrb[20].mxu1 %vm445_vm0, %v7538_v15  ;;  %1382 = vmatprep.mubr.bf16.mxu0 %v10462_v22  ;;  %v7695_v10 = vshrl.u32 %v10458_v61, 7 }
 0x1af   : > { %10496 = vst [vmem:[#allocation20_spill] sm:$0xff] %v7580_v25  ;;  %1249 = vmatprep.mubr.bf16.mxu1 %v10462_v22 }
 0x1b0   : > { %10497 = vst [vmem:[#allocation21_spill] sm:$0xff] %v7584_v9  ;;  %10498 = vst [vmem:[#allocation22_spill] sm:$0xff] %v7695_v10  ;;  %v10460_v13 = vsub.s32 0, %v7695_v10  ;;  %v10459_v17 = vsub.s32 1, %v7695_v10 }
 0x1b2   : > { %v7710_v18 = vrot.slane %v7702_v14, %v10460_v13  ;;  %v7717_v21 = vrot.slane %v7702_v14, %v10459_v17  ;;  %v933_v17 = vsub.s32 3, %v7695_v10 }
 0x1b5   : > { %5012 = vmatmul.mubr.msk.bf16.gmra.mrb[64].mxu0 %vm445_vm0, %v7486_v5 }
 0x1b6   : > { %5002 = vmatmul.mubr.msk.bf16.gmra.mrb[24].mxu1 %vm445_vm0, %v7554_v16  ;;  %1392 = vmatprep.mubr.bf16.mxu0 %v10462_v22 }
 0x1b7   : > { %1259 = vmatprep.mubr.bf16.mxu1 %v10462_v22 }
 0x1bd   : > { %5013 = vmatmul.mubr.msk.bf16.gmra.mrb[68].mxu0 %vm445_vm0, %v7481_v62 }
 0x1be   : > { %5003 = vmatmul.mubr.msk.bf16.gmra.mrb[28].mxu1 %vm445_vm0, %v7552_v50  ;;  %1402 = vmatprep.mubr.bf16.mxu0 %v10462_v22 }
 0x1bf   : > { %1269 = vmatprep.mubr.bf16.mxu1 %v10462_v22 }
 0x1c5   : > { %5014 = vmatmul.mubr.msk.bf16.gmra.mrb[72].mxu0 %vm445_vm0, %v7516_v51 }
 0x1c6   : > { %5004 = vmatmul.mubr.msk.bf16.gmra.mrb[32].mxu1 %vm445_vm0, %v7570_v4  ;;  %1412 = vmatprep.mubr.bf16.mxu0 %v10462_v22 }
 0x1c7   : > { %1279 = vmatprep.mubr.bf16.mxu1 %v10462_v22 }
 0x1cd   : > { %5015 = vmatmul.mubr.msk.bf16.gmra.mrb[76].mxu0 %vm445_vm0, %v7511_v48 }
 0x1ce   : > { %5005 = vmatmul.mubr.msk.bf16.gmra.mrb[36].mxu1 %vm445_vm0, %v7566_v2  ;;  %1422 = vmatprep.mubr.bf16.mxu0 %v10462_v22 }
 0x1cf   : > { %1289 = vmatprep.mubr.bf16.mxu1 %v10462_v22 }
 0x1d5   : > { %5016 = vmatmul.mubr.msk.bf16.gmra.mrb[80].mxu0 %vm445_vm0, %v7540_v24 }
 0x1d6   : > { %5006 = vmatmul.mubr.msk.bf16.gmra.mrb[40].mxu1 %vm445_vm0, %v7584_v9  ;;  %1432 = vmatprep.mubr.bf16.mxu0 %v10462_v22 }
 0x1d7   : > { %1299 = vmatprep.mubr.bf16.mxu1 %v10462_v22 }
 0x1dd   : > { %5017 = vmatmul.mubr.msk.bf16.gmra.mrb[84].mxu0 %vm445_vm0, %v7538_v15 }
 0x1de   : > { %5007 = vmatmul.mubr.msk.bf16.gmra.mrb[44].mxu1 %vm445_vm0, %v7580_v25  ;;  %1442 = vmatprep.mubr.bf16.mxu0 %v10462_v22 }
 0x1df   : > { %1535 = vmatprep.mubr.bf16.mxu1 %v10462_v22 }
 0x1e5   : > { %5018 = vmatmul.mubr.msk.bf16.gmra.mrb[88].mxu0 %vm445_vm0, %v7554_v16 }
 0x1e6   : > { %5024 = vmatmul.mubr.msk.bf16.vlgmr.msra.gmra.mrb[48].mxu1 %vm445_vm0, %v7429_v32  ;;  %1452 = vmatprep.mubr.bf16.mxu0 %v10462_v22 }
 0x1e7   : > { %1890 = vmatpush1.bf16.msra.mxu1 %v5564_v42  ;;  %1545 = vmatprep.mubr.bf16.mxu1 %v10462_v22 }
 0x1e8   : > { %1891 = vmatprep.subr.bf16.mxu1 %v5572_v12 }
 0x1eb   : > { %1892 = vmatpush1.bf16.msra.mxu1 %v5570_v54 }
 0x1ed   : > { %5019 = vmatmul.mubr.msk.bf16.gmra.mrb[92].mxu0 %vm445_vm0, %v7552_v50 }
 0x1ee   : > { %5025 = vmatmul.mubr.msk.bf16.gmra.mrb[52].mxu1 %vm445_vm0, %v7424_v46  ;;  %1462 = vmatprep.mubr.bf16.mxu0 %v10462_v22 }
 0x1ef   : > { %1555 = vmatprep.mubr.bf16.mxu1 %v10462_v22 }
 0x1f5   : > { %5020 = vmatmul.mubr.msk.bf16.gmra.mrb[96].mxu0 %vm445_vm0, %v7570_v4 }
 0x1f6   : > { %5026 = vmatmul.mubr.msk.bf16.gmra.mrb[56].mxu1 %vm445_vm0, %v7456_v44  ;;  %1472 = vmatprep.mubr.bf16.mxu0 %v10462_v22 }
 0x1f7   : > { %1565 = vmatprep.mubr.bf16.mxu1 %v10462_v22 }
 0x1fd   : > { %5021 = vmatmul.mubr.msk.bf16.gmra.mrb[100].mxu0 %vm445_vm0, %v7566_v2 }
 0x1fe   : > { %5027 = vmatmul.mubr.msk.bf16.gmra.mrb[60].mxu1 %vm445_vm0, %v7451_v19  ;;  %1482 = vmatprep.mubr.bf16.mxu0 %v10462_v22 }
 0x1ff   : > { %1575 = vmatprep.mubr.bf16.mxu1 %v10462_v22 }
 0x205   : > { %5022 = vmatmul.mubr.msk.bf16.gmra.mrb[104].mxu0 %vm445_vm0, %v7584_v9 }
 0x206   : > { %5028 = vmatmul.mubr.msk.bf16.gmra.mrb[64].mxu1 %vm445_vm0, %v7486_v5  ;;  %1492 = vmatprep.mubr.bf16.mxu0 %v10462_v22 }
 0x207   : > { %1585 = vmatprep.mubr.bf16.mxu1 %v10462_v22 }
 0x20d   : > { %5023 = vmatmul.mubr.msk.bf16.gmra.mrb[108].mxu0 %vm445_vm0, %v7580_v25 }
 0x20e   : > { %5029 = vmatmul.mubr.msk.bf16.gmra.mrb[68].mxu1 %vm445_vm0, %v7481_v62  ;;  %1728 = vmatprep.mubr.bf16.mxu0 %v10462_v22 }
 0x20f   : > { %1595 = vmatprep.mubr.bf16.mxu1 %v10462_v22 }
 0x215   : > { %5040 = vmatmul.mubr.msk.bf16.vlgmr.msra.gmra.mrb[112].mxu0 %vm445_vm0, %v7429_v32 }
 0x216   : > { %5030 = vmatmul.mubr.msk.bf16.gmra.mrb[72].mxu1 %vm445_vm0, %v7516_v51  ;;  %1738 = vmatprep.mubr.bf16.mxu0 %v10462_v22 }
 0x217   : > { %1605 = vmatprep.mubr.bf16.mxu1 %v10462_v22 }
 0x21d   : > { %5041 = vmatmul.mubr.msk.bf16.gmra.mrb[116].mxu0 %vm445_vm0, %v7424_v46 }
 0x21e   : > { %5031 = vmatmul.mubr.msk.bf16.gmra.mrb[76].mxu1 %vm445_vm0, %v7511_v48  ;;  %1748 = vmatprep.mubr.bf16.mxu0 %v10462_v22 }
 0x21f   : > { %1615 = vmatprep.mubr.bf16.mxu1 %v10462_v22 }
 0x225   : > { %5042 = vmatmul.mubr.msk.bf16.gmra.mrb[120].mxu0 %vm445_vm0, %v7456_v44 }
 0x226   : > { %5032 = vmatmul.mubr.msk.bf16.gmra.mrb[80].mxu1 %vm445_vm0, %v7540_v24  ;;  %1758 = vmatprep.mubr.bf16.mxu0 %v10462_v22 }
 0x227   : > { %1625 = vmatprep.mubr.bf16.mxu1 %v10462_v22 }
 0x22d   : > { %5043 = vmatmul.mubr.msk.bf16.gmra.mrb[124].mxu0 %vm445_vm0, %v7451_v19 }
 0x22e   : > { %5033 = vmatmul.mubr.msk.bf16.gmra.mrb[84].mxu1 %vm445_vm0, %v7538_v15  ;;  %1768 = vmatprep.mubr.bf16.mxu0 %v10462_v22 }
 0x22f   : > { %1635 = vmatprep.mubr.bf16.mxu1 %v10462_v22 }
 0x235   : > { %5044 = vmatmul.mubr.msk.bf16.gmra.mrb[128].mxu0 %vm445_vm0, %v7486_v5 }
 0x236   : > { %5034 = vmatmul.mubr.msk.bf16.gmra.mrb[88].mxu1 %vm445_vm0, %v7554_v16  ;;  %1778 = vmatprep.mubr.bf16.mxu0 %v10462_v22 }
 0x237   : > { %1645 = vmatprep.mubr.bf16.mxu1 %v10462_v22 }
 0x23d   : > { %5045 = vmatmul.mubr.msk.bf16.gmra.mrb[132].mxu0 %vm445_vm0, %v7481_v62 }
 0x23e   : > { %5035 = vmatmul.mubr.msk.bf16.gmra.mrb[92].mxu1 %vm445_vm0, %v7552_v50  ;;  %1788 = vmatprep.mubr.bf16.mxu0 %v10462_v22 }
 0x23f   : > { %1655 = vmatprep.mubr.bf16.mxu1 %v10462_v22 }
 0x245   : > { %5046 = vmatmul.mubr.msk.bf16.gmra.mrb[136].mxu0 %vm445_vm0, %v7516_v51 }
 0x246   : > { %5036 = vmatmul.mubr.msk.bf16.gmra.mrb[96].mxu1 %vm445_vm0, %v7570_v4  ;;  %1798 = vmatprep.mubr.bf16.mxu0 %v10462_v22 }
 0x247   : > { %1665 = vmatprep.mubr.bf16.mxu1 %v10462_v22 }
 0x248   : > { %v1151_v49 = vpop.f32.mrb[32].mxu0 }
 0x249   : > { %v7722_v58 = vadd.f32 %v1151_v49, %v7710_v18  ;;  %v1153_v29 = vpop.f32.mrb[33].mxu0 }
 0x24a   : > { %v7725_v1 = vadd.f32 %v1153_v29, %v7717_v21  ;;  %v1155_v39 = vpop.f32.mrb[34].mxu0 }
 0x24b   : > { %v5072_v28 = vmul.f32 -1.442695, %v7722_v58  ;;  %v7729_v47 = vadd.f32 %v1155_v39, %v7710_v18  ;;  %v1157_v30 = vpop.f32.mrb[35].mxu0 }
 0x24c   : > { %v5073_v31 = vmul.f32 -1.442695, %v7725_v1  ;;  %v7733_v33 = vadd.f32 %v1157_v30, %v7717_v21 }
 0x24d   : > { %5701 = vpow2.f32 %v5072_v28  ;;  %v5082_v36 = vmul.f32 -1.442695, %v7729_v47  ;;  %5047 = vmatmul.mubr.msk.bf16.gmra.mrb[140].mxu0 %vm445_vm0, %v7511_v48 }
 0x24e   : > { %5703 = vpow2.f32 %v5073_v31  ;;  %v5083_v37 = vmul.f32 -1.442695, %v7733_v33  ;;  %5037 = vmatmul.mubr.msk.bf16.gmra.mrb[100].mxu1 %vm445_vm0, %v7566_v2  ;;  %1808 = vmatprep.mubr.bf16.mxu0 %v10462_v22 }
 0x24f   : > { %5705 = vpow2.f32 %v5082_v36  ;;  %1675 = vmatprep.mubr.bf16.mxu1 %v10462_v22 }
 0x250   : > { %5707 = vpow2.f32 %v5083_v37  ;;  %v1161_v38 = vpop.f32.mrb[36].mxu0 }
 0x251   : > { %v7744_v43 = vadd.f32 %v1161_v38, %v7710_v18  ;;  %v1163_v45 = vpop.f32.mrb[37].mxu0 }
 0x252   : > { %v7747_v20 = vadd.f32 %v1163_v45, %v7717_v21  ;;  %v1165_v27 = vpop.f32.mrb[38].mxu0 }
 0x253   : > { %v5092_v26 = vmul.f32 -1.442695, %v7744_v43  ;;  %v7751_v23 = vadd.f32 %v1165_v27, %v7710_v18  ;;  %v1167_v34 = vpop.f32.mrb[39].mxu0 }
 0x254   : > { %v5093_v41 = vmul.f32 -1.442695, %v7747_v20  ;;  %v7755_v40 = vadd.f32 %v1167_v34, %v7717_v21 }
 0x255   : > { %5709 = vpow2.f32 %v5092_v26  ;;  %v5102_v52 = vmul.f32 -1.442695, %v7751_v23  ;;  %5048 = vmatmul.mubr.msk.bf16.gmra.mrb[144].mxu0 %vm445_vm0, %v7540_v24 }
 0x256   : > { %5711 = vpow2.f32 %v5093_v41  ;;  %v5103_v35 = vmul.f32 -1.442695, %v7755_v40  ;;  %5038 = vmatmul.mubr.msk.bf16.gmra.mrb[104].mxu1 %vm445_vm0, %v7584_v9  ;;  %1818 = vmatprep.mubr.bf16.mxu0 %v10462_v22 }
 0x257   : > { %v5702_v53 = vpop.eup %5701  ;;  %5713 = vpow2.f32 %v5102_v52  ;;  %1685 = vmatprep.mubr.bf16.mxu1 %v10462_v22 }
 0x258   : > { %v5704_v55 = vpop.eup %5703  ;;  %v3042_v59 = vadd.f32 1.0, %v5702_v53  ;;  %5715 = vpow2.f32 %v5103_v35  ;;  %v1171_v63 = vpop.f32.mrb[40].mxu0 }
 0x259   : > { %v5706_v56 = vpop.eup %5705  ;;  %v3043_v57 = vadd.f32 1.0, %v5704_v55  ;;  %v7766_v0 = vadd.f32 %v1171_v63, %v7710_v18  ;;  %v1191_v3 = vpop.f32.mrb[0].mxu1 }
 0x25a   : > { %v1173_v60 = vpop.f32.mrb[41].mxu0  ;;  %v5708_v11 = vpop.eup %5707  ;;  %5717 = vrcp.f32 %v3042_v59  ;;  %v3052_v6 = vadd.f32 1.0, %v5706_v56  ;;  %v7769_v7 = vadd.f32 %v1191_v3, %v7710_v18 }
 0x25b   : > { %v7772_v8 = vadd.f32 %v1173_v60, %v7717_v21  ;;  %v1193_v42 = vpop.f32.mrb[1].mxu1  ;;  %v1175_v12 = vpop.f32.mrb[42].mxu0  ;;  %5719 = vrcp.f32 %v3043_v57  ;;  %v3053_v54 = vadd.f32 1.0, %v5708_v11  ;;  %v5112_v49 = vmul.f32 -1.442695, %v7766_v0 }
 0x25c   : > { %v7776_v29 = vadd.f32 %v1193_v42, %v7717_v21  ;;  %v1195_v39 = vpop.f32.mrb[2].mxu1  ;;  %v1177_v28 = vpop.f32.mrb[43].mxu0  ;;  %5721 = vrcp.f32 %v3052_v6  ;;  %v5152_v30 = vmul.f32 -1.442695, %v7769_v7  ;;  %v7784_v38 = vadd.f32 %v1175_v12, %v7710_v18 }
 0x25d   : > { %v5113_v31 = vmul.f32 -1.442695, %v7772_v8  ;;  %v1197_v36 = vpop.f32.mrb[3].mxu1  ;;  %5723 = vrcp.f32 %v3053_v54  ;;  %5049 = vmatmul.mubr.msk.bf16.gmra.mrb[148].mxu0 %vm445_vm0, %v7538_v15  ;;  %v7790_v27 = vadd.f32 %v1195_v39, %v7710_v18  ;;  %v7794_v41 = vadd.f32 %v1177_v28, %v7717_v21 }
 0x25e   : > { %v5153_v37 = vmul.f32 -1.442695, %v7776_v29  ;;  %5725 = vpow2.f32 %v5112_v49  ;;  %5039 = vmatmul.mubr.msk.bf16.gmra.mrb[108].mxu1 %vm445_vm0, %v7580_v25  ;;  %1828 = vmatprep.mubr.bf16.mxu0 %v10462_v22  ;;  %v7797_v55 = vadd.f32 %v1197_v36, %v7717_v21  ;;  %v5122_v3 = vmul.f32 -1.442695, %v7784_v38 }
 0x25f   : > { %v5710_v45 = vpop.eup %5709  ;;  %5727 = vpow2.f32 %v5152_v30  ;;  %1921 = vmatprep.mubr.bf16.mxu1 %v10462_v22  ;;  %v5162_v12 = vmul.f32 -1.442695, %v7790_v27  ;;  %v5123_v28 = vmul.f32 -1.442695, %v7794_v41 }
 0x260   : > { %v5712_v26 = vpop.eup %5711  ;;  %v3062_v34 = vadd.f32 1.0, %v5710_v45  ;;  %5729 = vpow2.f32 %v5113_v31  ;;  %v1181_v52 = vpop.f32.mrb[44].mxu0  ;;  %v5163_v36 = vmul.f32 -1.442695, %v7797_v55 }
 0x261   : > { %v5714_v35 = vpop.eup %5713  ;;  %v3063_v53 = vadd.f32 1.0, %v5712_v26  ;;  %5731 = vpow2.f32 %v5153_v37  ;;  %v1201_v59 = vpop.f32.mrb[4].mxu1  ;;  %v7801_v60 = vadd.f32 %v1181_v52, %v7710_v18 }
 0x262   : > { %v1183_v63 = vpop.f32.mrb[45].mxu0  ;;  %v5716_v56 = vpop.eup %5715  ;;  %5733 = vrcp.f32 %v3062_v34  ;;  %v3072_v57 = vadd.f32 1.0, %v5714_v35  ;;  %v7821_v35 = vadd.f32 %v1201_v59, %v7710_v18 }
 0x263   : > { %v1203_v11 = vpop.f32.mrb[5].mxu1  ;;  %v1185_v6 = vpop.f32.mrb[46].mxu0  ;;  %5735 = vrcp.f32 %v3063_v53  ;;  %v3073_v42 = vadd.f32 1.0, %v5716_v56  ;;  %v5132_v45 = vmul.f32 -1.442695, %v7801_v60 }
 0x264   : > { %v7804_v54 = vpop.f32.mrb[6].mxu1  ;;  %v7806_v49 = vpop.f32.mrb[47].mxu0  ;;  %5737 = vrcp.f32 %v3072_v57  ;;  %v7832_v59 = vadd.f32 %v1203_v11, %v7717_v21  ;;  %v5172_v11 = vmul.f32 -1.442695, %v7821_v35 }
 0x265   : > { %v5718_v39 = vpop.eup %5717  ;;  %v7809_v30 = vpop.f32.mrb[7].mxu1  ;;  %5739 = vrcp.f32 %v3073_v42  ;;  %5050 = vmatmul.mubr.msk.bf16.gmra.mrb[152].mxu0 %vm445_vm0, %v7554_v16  ;;  %v7867_v13 = vadd.f32 %v7804_v54, %v7710_v18 }
 0x266   : > { %v5720_v31 = vpop.eup %5719  ;;  %5741 = vpow2.f32 %v5122_v3  ;;  %5056 = vmatmul.mubr.msk.bf16.vlgmr.msra.gmra.mrb[112].mxu1 %vm445_vm0, %v7429_v32  ;;  %1838 = vmatprep.mubr.bf16.mxu0 %v10462_v22  ;;  %v4002_v34 = vmul.f32 %v5718_v39, %v7722_v58  ;;  %v7827_v32 = vadd.f32 %v1183_v63, %v7717_v21  ;;  %v7881_v54 = vadd.f32 %v7809_v30, %v7717_v21 }
 0x267   : > { %v5722_v37 = vpop.eup %5721  ;;  %5743 = vpow2.f32 %v5162_v12  ;;  %1931 = vmatprep.mubr.bf16.mxu1 %v10462_v22  ;;  %v4003_v56 = vmul.f32 %v5720_v31, %v7725_v1  ;;  %v5182_v30 = vmul.f32 -1.442695, %v7867_v13 }
 0x268   : > { %v5724_v26 = vpop.eup %5723  ;;  %v4012_v52 = vmul.f32 %v5722_v37, %v7729_v47  ;;  %5745 = vpow2.f32 %v5123_v28  ;;  %v7829_v3 = vpop.f32.mrb[48].mxu0 }
 0x269   : > { %v5726_v53 = vpop.eup %5725  ;;  %v4013_v57 = vmul.f32 %v5724_v26, %v7733_v33  ;;  %5747 = vpow2.f32 %v5163_v36  ;;  %v1211_v12 = vpop.f32.mrb[8].mxu1  ;;  %v7837_v33 = vadd.f32 %v1185_v6, %v7710_v18 }
 0x26a   : > { %v5728_v58 = vpop.eup %5727  ;;  %v4324_v42 = vadd.f32 %v4012_v52, %v4002_v34  ;;  %v3082_v47 = vadd.f32 1.0, %v5726_v53  ;;  %v7834_v39 = vpop.f32.mrb[49].mxu0  ;;  %5749 = vpow2.f32 %v5132_v45  ;;  %v5133_v45 = vmul.f32 -1.442695, %v7827_v32 }
 0x26b   : > { %v5730_v37 = vpop.eup %5729  ;;  %v4361_v1 = vadd.f32 %v4013_v57, %v4003_v56  ;;  %v3122_v31 = vadd.f32 1.0, %v5728_v58  ;;  %v7839_v63 = vpop.f32.mrb[9].mxu1 }
 0x26c   : > { %v7841_v28 = vpop.f32.mrb[50].mxu0  ;;  %v5732_v26 = vpop.eup %5731  ;;  %5751 = vrcp.f32 %v3082_v47  ;;  %v3083_v36 = vadd.f32 1.0, %v5730_v37  ;;  %v5173_v47 = vmul.f32 -1.442695, %v7832_v59 }
 0x26d   : > { %v7844_v34 = vpop.f32.mrb[10].mxu1  ;;  %v7846_v52 = vpop.f32.mrb[51].mxu0  ;;  %5753 = vrcp.f32 %v3122_v31  ;;  %v3123_v56 = vadd.f32 1.0, %v5732_v26  ;;  %5051 = vmatmul.mubr.msk.bf16.gmra.mrb[156].mxu0 %vm445_vm0, %v7552_v50  ;;  %v5142_v31 = vmul.f32 -1.442695, %v7837_v33  ;;  %v929_v26 = vsub.s32 2, %v7695_v10 }
 0x26e   : > { %v5734_v53 = vpop.eup %5733  ;;  %v7849_v6 = vpop.f32.mrb[11].mxu1  ;;  %5755 = vrcp.f32 %v3083_v36  ;;  %5057 = vmatmul.mubr.msk.bf16.gmra.mrb[116].mxu1 %vm445_vm0, %v7424_v46  ;;  %1848 = vmatprep.mubr.bf16.mxu0 %v10462_v22 }
 0x26f   : > { %v5736_v57 = vpop.eup %5735  ;;  %v4022_v58 = vmul.f32 %v5734_v53, %v7744_v43  ;;  %5757 = vrcp.f32 %v3123_v56  ;;  %1941 = vmatprep.mubr.bf16.mxu1 %v10462_v22 }
 0x270   : > { %v5738_v37 = vpop.eup %5737  ;;  %v4023_v61 = vmul.f32 %v5736_v57, %v7747_v20  ;;  %5759 = vpow2.f32 %v5172_v11  ;;  %v7869_v46 = vpop.f32.mrb[52].mxu0 }
 0x271   : > { %v5740_v43 = vpop.eup %5739  ;;  %v4325_v36 = vadd.f32 %v4324_v42, %v4022_v58  ;;  %v4032_v53 = vmul.f32 %v5738_v37, %v7751_v23  ;;  %5761 = vpow2.f32 %v5133_v45  ;;  %v7873_v23 = vadd.f32 %v7806_v49, %v7717_v21  ;;  %v7875_v11 = vpop.f32.mrb[12].mxu1 }
 0x272   : > { %v5742_v20 = vpop.eup %5741  ;;  %v4362_v56 = vadd.f32 %v4361_v1, %v4023_v61  ;;  %v4033_v57 = vmul.f32 %v5740_v43, %v7755_v40  ;;  %5763 = vpow2.f32 %v5173_v47  ;;  %v7877_v61 = vpop.f32.mrb[53].mxu0 }
 0x273   : > { %v5744_v50 = vpop.eup %5743  ;;  %v4326_v42 = vadd.f32 %v4325_v36, %v4032_v53  ;;  %v3092_v58 = vadd.f32 1.0, %v5742_v20  ;;  %5765 = vpow2.f32 %v5142_v31  ;;  %v7883_v37 = vpop.f32.mrb[13].mxu1  ;;  %v7888_v36 = vadd.f32 %v1211_v12, %v7710_v18 }
 0x274   : > { %v5746_v40 = vpop.eup %5745  ;;  %v4363_v1 = vadd.f32 %v4362_v56, %v4033_v57  ;;  %v3132_v45 = vadd.f32 1.0, %v5744_v50  ;;  %v7885_v43 = vpop.f32.mrb[54].mxu0  ;;  %v7896_v56 = vrot.slane %v7702_v14, %v929_v26  ;;  %v5143_v12 = vmul.f32 -1.442695, %v7873_v23 }
 0x275   : > { %v5748_v47 = vpop.eup %5747  ;;  %5767 = vrcp.f32 %v3092_v58  ;;  %v3093_v49 = vadd.f32 1.0, %v5746_v40  ;;  %v7890_v53 = vpop.f32.mrb[14].mxu1  ;;  %5052 = vmatmul.mubr.msk.bf16.gmra.mrb[160].mxu0 %vm445_vm0, %v7570_v4  ;;  %v7908_v26 = vrot.slane %v7702_v14, %v933_v17  ;;  %v5192_v10 = vmul.f32 -1.442695, %v7888_v36 }
 0x276   : > { %v7892_v20 = vpop.f32.mrb[55].mxu0  ;;  %v5750_v50 = vpop.eup %5749  ;;  %5769 = vrcp.f32 %v3132_v45  ;;  %v3133_v31 = vadd.f32 1.0, %v5748_v47  ;;  %v5183_v47 = vmul.f32 -1.442695, %v7881_v54  ;;  %5058 = vmatmul.mubr.msk.bf16.gmra.mrb[120].mxu1 %vm445_vm0, %v7456_v44  ;;  %v7920_v14 = vadd.f32 %v7829_v3, %v7896_v56 }
 0x277   : > { %v7898_v57 = vpop.f32.mrb[15].mxu1  ;;  %v5752_v22 = vpop.eup %5751  ;;  %5771 = vrcp.f32 %v3093_v49  ;;  %v3102_v58 = vadd.f32 1.0, %v5750_v50  ;;  %v10499_v49 = vmov 0   ;;  %v7934_v3 = vadd.f32 %v7834_v39, %v7908_v26 }
 0x278   : > { %v7903_v40 = vpop.eup %5753  ;;  %v4042_v45 = vmul.f32 %v5752_v22, %v7766_v0  ;;  %5773 = vrcp.f32 %v3133_v31  ;;  %1858 = vmatprep.mubr.bf16.mxu0 %v10499_v49  ;;  %1951 = vmatprep.mubr.bf16.mxu1 %v10499_v49  ;;  %10500 = vst [vmem:[#allocation23_spill] sm:$0xff] %v7920_v14  ;;  %v7922_v17 = vpop.f32.mrb[56].mxu0  ;;  %v7926_v31 = vadd.f32 %v7839_v63, %v7717_v21  ;;  %v5074_v39 = vmul.f32 -1.442695, %v7920_v14 }
 0x279   : > { %v5756_v50 = vpop.eup %5755  ;;  %5775 = vrcp.f32 %v3102_v58  ;;  %v7928_v58 = vpop.f32.mrb[16].mxu1  ;;  %10501 = vst [vmem:[#allocation24_spill] sm:$0xff] %v7934_v3  ;;  %v7942_v63 = vadd.f32 %v7844_v34, %v7710_v18 }
 0x27a   : > { %v7915_v4 = vpop.eup %5757  ;;  %v4327_v22 = vadd.f32 %v4326_v42, %v4042_v45  ;;  %v4043_v0 = vmul.f32 %v5756_v50, %v7772_v8  ;;  %5777 = vpow2.f32 %v5182_v30  ;;  %v7930_v16 = vpop.f32.mrb[57].mxu0  ;;  %v5193_v34 = vmul.f32 -1.442695, %v7926_v31 }
 0x27b   : > { %v5760_v44 = vpop.eup %5759  ;;  %5779 = vpow2.f32 %v5143_v12  ;;  %v7936_v30 = vpop.f32.mrb[17].mxu1 }
 0x27c   : > { %v5762_v42 = vpop.eup %5761  ;;  %v4364_v45 = vadd.f32 %v4363_v1, %v4043_v0  ;;  %v3142_v8 = vadd.f32 1.0, %v5760_v44  ;;  %5781 = vpow2.f32 %v5183_v47  ;;  %v7938_v50 = vpop.f32.mrb[58].mxu0  ;;  %v7951_v44 = vadd.f32 %v7841_v28, %v7896_v56 }
 0x27d   : > { %10502 = vst [vmem:[#allocation25_spill] sm:$0xff] %v7938_v50  ;;  %v5764_v12 = vpop.eup %5763  ;;  %v3103_v15 = vadd.f32 1.0, %v5762_v42  ;;  %5783 = vpow2.f32 %v5192_v10  ;;  %v7944_v24 = vpop.f32.mrb[18].mxu1  ;;  %5053 = vmatmul.mubr.msk.bf16.gmra.mrb[164].mxu0 %vm445_vm0, %v7566_v2 }
 0x27e   : > { %v7946_v1 = vpop.f32.mrb[59].mxu0  ;;  %v5766_v47 = vpop.eup %5765  ;;  %5785 = vrcp.f32 %v3142_v8  ;;  %v3143_v0 = vadd.f32 1.0, %v5764_v12  ;;  %v5075_v12 = vmul.f32 -1.442695, %v7934_v3  ;;  %5059 = vmatmul.mubr.msk.bf16.gmra.mrb[124].mxu1 %vm445_vm0, %v7451_v19  ;;  %1868 = vmatprep.mubr.bf16.mxu0 %v10499_v49  ;;  %v7975_v19 = vadd.f32 %v7849_v6, %v7717_v21 }
 0x27f   : > { %10503 = vst [vmem:[#allocation26_spill] sm:$0xff] %v7946_v1  ;;  %v7953_v48 = vpop.f32.mrb[19].mxu1  ;;  %v5768_v10 = vpop.eup %5767  ;;  %5787 = vrcp.f32 %v3103_v15  ;;  %v3112_v42 = vadd.f32 1.0, %v5766_v47  ;;  %v5202_v15 = vmul.f32 -1.442695, %v7942_v63  ;;  %1961 = vmatprep.mubr.bf16.mxu1 %v10499_v49 }
 0x280   : > { %10504 = vst [vmem:[#allocation27_spill] sm:$0xff] %v7953_v48  ;;  %v7958_v1 = vpop.eup %5769  ;;  %v4052_v8 = vmul.f32 %v5768_v10, %v7784_v38  ;;  %5789 = vrcp.f32 %v3143_v0  ;;  %v5084_v38 = vmul.f32 -1.442695, %v7951_v44  ;;  %v7971_v0 = vpop.f32.mrb[60].mxu0 }
 0x281   : > { %v5772_v28 = vpop.eup %5771  ;;  %5791 = vrcp.f32 %v3112_v42  ;;  %v7977_v42 = vpop.f32.mrb[20].mxu1 }
 0x282   : > { %v7967_v47 = vpop.eup %5773  ;;  %v4328_v2 = vadd.f32 %v4327_v22, %v4052_v8  ;;  %v4053_v48 = vmul.f32 %v5772_v28, %v7794_v41  ;;  %5793 = vpow2.f32 %v5074_v39  ;;  %v7979_v3 = vpop.f32.mrb[61].mxu0  ;;  %v7984_v41 = vadd.f32 %v7846_v52, %v7908_v26 }
 0x283   : > { %v5776_v10 = vpop.eup %5775  ;;  %5795 = vpow2.f32 %v5193_v34  ;;  %10505 = vst [vmem:[#allocation28_spill] sm:$0xff] %v7979_v3  ;;  %v7986_v39 = vpop.f32.mrb[21].mxu1  ;;  %v7992_v28 = vadd.f32 %v7875_v11, %v7710_v18  ;;  %v8000_v52 = vadd.f32 %v7869_v46, %v7896_v56  ;;  %v5203_v11 = vmul.f32 -1.442695, %v7975_v19 }
 0x284   : > { %v5778_v50 = vpop.eup %5777  ;;  %v4365_v14 = vadd.f32 %v4364_v45, %v4053_v48  ;;  %v4062_v22 = vmul.f32 %v5776_v10, %v7801_v60  ;;  %5797 = vpow2.f32 %v5075_v12  ;;  %v7988_v34 = vpop.f32.mrb[62].mxu0 }
 0x285   : > { %10506 = vst [vmem:[#allocation29_spill] sm:$0xff] %v7988_v34  ;;  %v5780_v8 = vpop.eup %5779  ;;  %v3152_v6 = vadd.f32 1.0, %v5778_v50  ;;  %5799 = vpow2.f32 %v5202_v15  ;;  %v7994_v3 = vpop.f32.mrb[22].mxu1  ;;  %5054 = vmatmul.mubr.msk.bf16.gmra.mrb[168].mxu0 %vm445_vm0, %v7584_v9 }
 0x286   : > { %10507 = vst [vmem:[#allocation30_spill] sm:$0xff] %v7994_v3  ;;  %v7996_v48 = vpop.f32.mrb[63].mxu0  ;;  %v5782_v60 = vpop.eup %5781  ;;  %v4329_v45 = vadd.f32 %v4328_v2, %v4062_v22  ;;  %v3113_v12 = vadd.f32 1.0, %v5780_v8  ;;  %5801 = vpow2.f32 %v5084_v38  ;;  %v5085_v2 = vmul.f32 -1.442695, %v7984_v41  ;;  %5060 = vmatmul.mubr.msk.bf16.gmra.mrb[128].mxu1 %vm445_vm0, %v7486_v5  ;;  %1878 = vmatprep.mubr.bf16.mxu0 %v10499_v49 }
 0x287   : > { %10508 = vst [vmem:[#allocation31_spill] sm:$0xff] %v7996_v48  ;;  %v8002_v10 = vpop.f32.mrb[23].mxu1  ;;  %v5784_v50 = vpop.eup %5783  ;;  %5803 = vrcp.f32 %v3152_v6  ;;  %v3153_v15 = vadd.f32 1.0, %v5782_v60  ;;  %v5212_v38 = vmul.f32 -1.442695, %v7992_v28  ;;  %v8014_v22 = vadd.f32 %v7883_v37, %v7717_v21  ;;  %1971 = vmatprep.mubr.bf16.mxu1 %v10499_v49 }
 0x288   : > { %10509 = vst [vmem:[#allocation32_spill] sm:$0xff] %v8002_v10  ;;  %v5786_v34 = vpop.eup %5785  ;;  %5805 = vrcp.f32 %v3113_v12  ;;  %v3162_v48 = vadd.f32 1.0, %v5784_v50  ;;  %v5094_v60 = vmul.f32 -1.442695, %v8000_v52  ;;  %v8021_v5 = vpop.f32.mrb[64].mxu0  ;;  %v4082_v50 = vmul.f32 %v7903_v40, %v7769_v7 }
 0x289   : > { %v5788_v46 = vpop.eup %5787  ;;  %5807 = vrcp.f32 %v3153_v15  ;;  %10510 = vst [vmem:[#allocation33_spill] sm:$0xff] %v8021_v5  ;;  %v8025_v15 = vpop.f32.mrb[24].mxu1  ;;  %v5213_v40 = vmul.f32 -1.442695, %v8014_v22 }
 0x28a   : > { %v8017_v8 = vpop.eup %5789  ;;  %v4063_v6 = vmul.f32 %v5788_v46, %v7827_v32  ;;  %5809 = vrcp.f32 %v3162_v48  ;;  %v8027_v37 = vpop.f32.mrb[65].mxu0  ;;  %v8032_v32 = vadd.f32 %v7877_v61, %v7908_v26  ;;  %v4083_v61 = vmul.f32 %v7915_v4, %v7776_v29 }
 0x28b   : > { %v5792_v12 = vpop.eup %5791  ;;  %5811 = vpow2.f32 %v5203_v11  ;;  %v8034_v48 = vpop.f32.mrb[25].mxu1  ;;  %v8041_v11 = vadd.f32 %v7890_v53, %v7710_v18  ;;  %v8053_v53 = vadd.f32 %v7885_v43, %v7896_v56  ;;  %v4092_v29 = vmul.f32 %v7958_v1, %v7790_v27 }
 0x28c   : > { %v5794_v9 = vpop.eup %5793  ;;  %v4366_v10 = vadd.f32 %v4365_v14, %v4063_v6  ;;  %v4072_v3 = vmul.f32 %v5792_v12, %v7837_v33  ;;  %5813 = vpow2.f32 %v5085_v2  ;;  %v8036_v46 = vpop.f32.mrb[66].mxu0  ;;  %v4102_v27 = vmul.f32 %v5786_v34, %v7821_v35 }
 0x28d   : > { %10511 = vst [vmem:[#allocation34_spill] sm:$0xff] %v8036_v46  ;;  %v5796_v5 = vpop.eup %5795  ;;  %v3044_v7 = vadd.f32 1.0, %v5794_v9  ;;  %5815 = vpow2.f32 %v5212_v38  ;;  %v8043_v14 = vpop.f32.mrb[26].mxu1  ;;  %5055 = vmatmul.mubr.msk.bf16.gmra.mrb[172].mxu0 %vm445_vm0, %v7580_v25 }
 0x28e   : > { %10512 = vst [vmem:[#allocation35_spill] sm:$0xff] %v8043_v14  ;;  %v8045_v33 = vpop.f32.mrb[67].mxu0  ;;  %v5798_v2 = vpop.eup %5797  ;;  %v4330_v6 = vadd.f32 %v4329_v45, %v4072_v3  ;;  %v3163_v12 = vadd.f32 1.0, %v5796_v5  ;;  %5817 = vpow2.f32 %v5094_v60  ;;  %v8057_v14 = vadd.f32 %v7898_v57, %v7717_v21  ;;  %5061 = vmatmul.mubr.msk.bf16.gmra.mrb[132].mxu1 %vm445_vm0, %v7481_v62 }
 0x28f   : > { %v8049_v46 = vpop.f32.mrb[27].mxu1  ;;  %v5800_v9 = vpop.eup %5799  ;;  %5819 = vrcp.f32 %v3044_v7  ;;  %v3045_v38 = vadd.f32 1.0, %v5798_v2  ;;  %v5095_v5 = vmul.f32 -1.442695, %v8032_v32  ;;  %v8068_v57 = vadd.f32 %v7892_v20, %v7908_v26  ;;  %1981 = vmatprep.mubr.bf16.mxu1 %v10499_v49 }
 0x290   : > { %v5802_v4 = vpop.eup %5801  ;;  %v4331_v3 = vadd.f32 %v4330_v6, %v4082_v50  ;;  %5821 = vrcp.f32 %v3163_v12  ;;  %v3172_v45 = vadd.f32 1.0, %v5800_v9  ;;  %v5222_v50 = vmul.f32 -1.442695, %v8041_v11  ;;  %v8073_v2 = vpop.f32.mrb[68].mxu0 }
 0x291   : > { %v5804_v60 = vpop.eup %5803  ;;  %5823 = vrcp.f32 %v3045_v38  ;;  %v3054_v43 = vadd.f32 1.0, %v5802_v4  ;;  %v5104_v12 = vmul.f32 -1.442695, %v8053_v53  ;;  %v8079_v20 = vadd.f32 %v7928_v58, %v7710_v18  ;;  %v8081_v9 = vpop.f32.mrb[28].mxu1 }
 0x292   : > { %v5806_v7 = vpop.eup %5805  ;;  %v4332_v1 = vadd.f32 %v4331_v3, %v4092_v29  ;;  %5825 = vrcp.f32 %v3172_v45  ;;  %v8083_v38 = vpop.f32.mrb[69].mxu0  ;;  %v4112_v34 = vmul.f32 %v5804_v60, %v7867_v13  ;;  %v5223_v29 = vmul.f32 -1.442695, %v8057_v14 }
 0x293   : > { %v5808_v62 = vpop.eup %5807  ;;  %v4073_v6 = vmul.f32 %v5806_v7, %v7873_v23  ;;  %5827 = vrcp.f32 %v3054_v43  ;;  %10513 = vst [vmem:[#allocation36_spill] sm:$0xff] %v8083_v38  ;;  %v8087_v3 = vpop.f32.mrb[29].mxu1  ;;  %v5105_v58 = vmul.f32 -1.442695, %v8068_v57  ;;  %v8094_v7 = vadd.f32 %v7922_v17, %v7896_v56 }
 0x294   : > { %v5810_v35 = vpop.eup %5809  ;;  %v4333_v4 = vadd.f32 %v4332_v1, %v4102_v27  ;;  %5829 = vpow2.f32 %v5213_v40  ;;  %10514 = vst [vmem:[#allocation37_spill] sm:$0xff] %v8087_v3  ;;  %v8089_v23 = vpop.f32.mrb[70].mxu0 }
 0x295   : > { %10515 = vst [vmem:[#allocation38_spill] sm:$0xff] %v8089_v23  ;;  %v5812_v45 = vpop.eup %5811  ;;  %v4367_v43 = vadd.f32 %v4366_v10, %v4073_v6  ;;  %5831 = vpow2.f32 %v5095_v5  ;;  %v8096_v25 = vpop.f32.mrb[30].mxu1  ;;  %v4122_v27 = vmul.f32 %v5810_v35, %v7888_v36  ;;  %v4093_v5 = vmul.f32 %v7967_v47, %v7797_v55 }
 0x296   : > { %10516 = vst [vmem:[#allocation39_spill] sm:$0xff] %v8096_v25  ;;  %v8098_v13 = vpop.f32.mrb[71].mxu0  ;;  %v5814_v40 = vpop.eup %5813  ;;  %v4334_v60 = vadd.f32 %v4333_v4, %v4112_v34  ;;  %v3173_v1 = vadd.f32 1.0, %v5812_v45  ;;  %5833 = vpow2.f32 %v5222_v50  ;;  %v8107_v34 = vadd.f32 %v7936_v30, %v7717_v21  ;;  %5062 = vmatmul.mubr.msk.bf16.gmra.mrb[136].mxu1 %vm445_vm0, %v7516_v51 }
 0x297   : > { %v8101_v23 = vpop.f32.mrb[31].mxu1  ;;  %v5816_v10 = vpop.eup %5815  ;;  %v4368_v6 = vadd.f32 %v4367_v43, %v4083_v61  ;;  %v3055_v38 = vadd.f32 1.0, %v5814_v40  ;;  %5835 = vpow2.f32 %v5104_v12  ;;  %v4103_v50 = vmul.f32 %v8017_v8, %v7832_v59  ;;  %1991 = vmatprep.mubr.bf16.mxu1 %v10499_v49 }
 0x298   : > { %v5818_v17 = vpop.eup %5817  ;;  %v4335_v3 = vadd.f32 %v4334_v60, %v4122_v27  ;;  %5837 = vrcp.f32 %v3173_v1  ;;  %v3182_v25 = vadd.f32 1.0, %v5816_v10  ;;  %v5232_v61 = vmul.f32 -1.442695, %v8079_v20  ;;  %v8115_v12 = vpop.f32.mrb[72].mxu0 }
 0x299   : > { %v5820_v36 = vpop.eup %5819  ;;  %v4369_v35 = vadd.f32 %v4368_v6, %v4093_v5  ;;  %5839 = vrcp.f32 %v3055_v38  ;;  %v3064_v55 = vadd.f32 1.0, %v5818_v17  ;;  %v4113_v4 = vmul.f32 %v5808_v62, %v7881_v54  ;;  %v8119_v43 = vpop.f32.mrb[32].mxu1  ;;  %v10517_v6 = vld [vmem:[#allocation23_spill] sm:$0xff] }
 0x29a   : > { %v5822_v47 = vpop.eup %5821  ;;  %5841 = vrcp.f32 %v3182_v25  ;;  %v5114_v51 = vmul.f32 -1.442695, %v8094_v7  ;;  %v8121_v59 = vpop.f32.mrb[73].mxu0  ;;  %v5233_v38 = vmul.f32 -1.442695, %v8107_v34  ;;  %v8126_v25 = vadd.f32 %v7930_v16, %v7908_v26 }
 0x29b   : > { %v5824_v30 = vpop.eup %5823  ;;  %v4370_v45 = vadd.f32 %v4369_v35, %v4103_v50  ;;  %5843 = vrcp.f32 %v3064_v55  ;;  %v8130_v40 = vadd.f32 %v7944_v24, %v7710_v18  ;;  %v8132_v54 = vpop.f32.mrb[33].mxu1  ;;  %v4123_v1 = vmul.f32 %v5822_v47, %v7926_v31  ;;  %v10518_v50 = vld [vmem:[#allocation25_spill] sm:$0xff] }
 0x29c   : > { %v5826_v8 = vpop.eup %5825  ;;  %5845 = vpow2.f32 %v5223_v29  ;;  %v8134_v62 = vpop.f32.mrb[74].mxu0  ;;  %v4004_v17 = vmul.f32 %v5820_v36, %v10517_v6  ;;  %v8146_v35 = vadd.f32 %v10518_v50, %v7896_v56  ;;  %v10519_v36 = vld [vmem:[#allocation27_spill] sm:$0xff]  ;;  %v5115_v50 = vmul.f32 -1.442695, %v8126_v25 }
 0x29d   : > { %v5828_v60 = vpop.eup %5827  ;;  %v4371_v27 = vadd.f32 %v4370_v45, %v4113_v4  ;;  %v4132_v29 = vmul.f32 %v5826_v8, %v7942_v63  ;;  %5847 = vpow2.f32 %v5105_v58  ;;  %v8138_v10 = vpop.f32.mrb[34].mxu1  ;;  %v8152_v6 = vadd.f32 %v10519_v36, %v7717_v21 }
 0x29e   : > { %v8140_v5 = vpop.f32.mrb[75].mxu0  ;;  %v5830_v16 = vpop.eup %5829  ;;  %v4014_v24 = vmul.f32 %v5828_v60, %v7951_v44  ;;  %5849 = vpow2.f32 %v5232_v61  ;;  %v10520_v44 = vld [vmem:[#allocation13_spill] sm:$0xff] }
 0x29f   : > { %v8148_v55 = vpop.f32.mrb[35].mxu1  ;;  %v5832_v31 = vpop.eup %5831  ;;  %v4372_v47 = vadd.f32 %v4371_v27, %v4123_v1  ;;  %v4336_v63 = vadd.f32 %v4335_v3, %v4132_v29  ;;  %v3183_v58 = vadd.f32 1.0, %v5830_v16  ;;  %5851 = vpow2.f32 %v5114_v51  ;;  %5063 = vmatmul.mubr.msk.bf16.gmra.mrb[140].mxu1 %vm445_vm0, %v10520_v44 }
 0x2a0   : > { %v5834_v4 = vpop.eup %5833  ;;  %v4398_v45 = vadd.f32 %v4014_v24, %v4004_v17  ;;  %v3065_v8 = vadd.f32 1.0, %v5832_v31  ;;  %5853 = vpow2.f32 %v5233_v38  ;;  %2001 = vmatprep.mubr.bf16.mxu1 %v10499_v49  ;;  %v5242_v27 = vmul.f32 -1.442695, %v8130_v40  ;;  %v8159_v38 = vpop.f32.mrb[76].mxu0 }
 0x2a1   : > { %v5836_v61 = vpop.eup %5835  ;;  %5855 = vrcp.f32 %v3183_v58  ;;  %v3192_v60 = vadd.f32 1.0, %v5834_v4  ;;  %10521 = vst [vmem:[#allocation23_spill] sm:$0xff] %v8159_v38  ;;  %v5124_v16 = vmul.f32 -1.442695, %v8146_v35  ;;  %v8163_v17 = vpop.f32.mrb[36].mxu1  ;;  %v10524_v58 = vld [vmem:[#allocation24_spill] sm:$0xff] }
 0x2a2   : > { %v5838_v3 = vpop.eup %5837  ;;  %5857 = vrcp.f32 %v3065_v8  ;;  %v3074_v51 = vadd.f32 1.0, %v5836_v61  ;;  %10522 = vst [vmem:[#allocation25_spill] sm:$0xff] %v8163_v17  ;;  %v8165_v24 = vpop.f32.mrb[77].mxu0  ;;  %v4005_v4 = vmul.f32 %v5824_v30, %v10524_v58  ;;  %v5243_v36 = vmul.f32 -1.442695, %v8152_v6 }
 0x2a3   : > { %v5840_v1 = vpop.eup %5839  ;;  %v4133_v29 = vmul.f32 %v5838_v3, %v7975_v19  ;;  %5859 = vrcp.f32 %v3192_v60  ;;  %10523 = vst [vmem:[#allocation27_spill] sm:$0xff] %v8165_v24  ;;  %v8170_v44 = vpop.f32.mrb[37].mxu1 }
 0x2a4   : > { %v5842_v31 = vpop.eup %5841  ;;  %v4015_v8 = vmul.f32 %v5840_v1, %v7984_v41  ;;  %5861 = vrcp.f32 %v3074_v51  ;;  %v8172_v61 = vpop.f32.mrb[78].mxu0  ;;  %v10527_v51 = vld [vmem:[#allocation26_spill] sm:$0xff] }
 0x2a5   : > { %10525 = vst [vmem:[#allocation13_spill] sm:$0xff] %v8172_v61  ;;  %v5844_v19 = vpop.eup %5843  ;;  %v4373_v60 = vadd.f32 %v4372_v47, %v4133_v29  ;;  %v4142_v3 = vmul.f32 %v5842_v31, %v7992_v28  ;;  %5863 = vpow2.f32 %v5115_v50  ;;  %v8175_v38 = vpop.f32.mrb[38].mxu1  ;;  %v8182_v1 = vadd.f32 %v10527_v51, %v7908_v26 }
 0x2a6   : > { %v8177_v24 = vpop.f32.mrb[79].mxu0  ;;  %v5846_v17 = vpop.eup %5845  ;;  %v4435_v30 = vadd.f32 %v4015_v8, %v4005_v4  ;;  %v4024_v41 = vmul.f32 %v5844_v19, %v8000_v52  ;;  %5865 = vpow2.f32 %v5242_v27  ;;  %v8188_v28 = vadd.f32 %v7977_v42, %v7710_v18  ;;  %v10528_v27 = vld [vmem:[#allocation15_spill] sm:$0xff] }
 0x2a7   : > { %10526 = vst [vmem:[#allocation24_spill] sm:$0xff] %v8177_v24  ;;  %v8184_v58 = vpop.f32.mrb[39].mxu1  ;;  %v5848_v61 = vpop.eup %5847  ;;  %v4337_v47 = vadd.f32 %v4336_v63, %v4142_v3  ;;  %v3193_v29 = vadd.f32 1.0, %v5846_v17  ;;  %5867 = vpow2.f32 %v5124_v16  ;;  %v8192_v52 = vadd.f32 %v7971_v0, %v7896_v56  ;;  %5064 = vmatmul.mubr.msk.bf16.gmra.mrb[144].mxu1 %vm445_vm0, %v10528_v27 }
 0x2a8   : > { %v5850_v50 = vpop.eup %5849  ;;  %v4399_v31 = vadd.f32 %v4398_v45, %v4024_v41  ;;  %v3075_v4 = vadd.f32 1.0, %v5848_v61  ;;  %5869 = vpow2.f32 %v5243_v36  ;;  %v8198_v16 = vadd.f32 %v7986_v39, %v7717_v21  ;;  %2011 = vmatprep.mubr.bf16.mxu1 %v10499_v49  ;;  %v8202_v36 = vpop.f32.mrb[80].mxu0 }
 0x2a9   : > { %v5852_v8 = vpop.eup %5851  ;;  %5871 = vrcp.f32 %v3193_v29  ;;  %v3202_v63 = vadd.f32 1.0, %v5850_v50  ;;  %v5125_v17 = vmul.f32 -1.442695, %v8182_v1  ;;  %10529 = vst [vmem:[#allocation26_spill] sm:$0xff] %v8202_v36  ;;  %v5252_v19 = vmul.f32 -1.442695, %v8188_v28 }
 0x2aa   : > { %v5854_v42 = vpop.eup %5853  ;;  %5873 = vrcp.f32 %v3075_v4  ;;  %v3084_v45 = vadd.f32 1.0, %v5852_v8  ;;  %v8205_v3 = vpop.f32.mrb[40].mxu1  ;;  %v5134_v29 = vmul.f32 -1.442695, %v8192_v52 }
 0x2ab   : > { %v5856_v0 = vpop.eup %5855  ;;  %5875 = vrcp.f32 %v3202_v63  ;;  %v3203_v61 = vadd.f32 1.0, %v5854_v42  ;;  %10530 = vst [vmem:[#allocation15_spill] sm:$0xff] %v8205_v3  ;;  %v8207_v41 = vpop.f32.mrb[81].mxu0  ;;  %v5253_v63 = vmul.f32 -1.442695, %v8198_v16 }
 0x2ac   : > { %10531 = vst [vmem:[#allocation40_spill] sm:$0xff] %v8207_v41  ;;  %v5858_v39 = vpop.eup %5857  ;;  %v4143_v51 = vmul.f32 %v5856_v0, %v8014_v22  ;;  %5877 = vrcp.f32 %v3084_v45  ;;  %v8211_v50 = vpop.f32.mrb[41].mxu1  ;;  %v10536_v45 = vld [vmem:[#allocation28_spill] sm:$0xff] }
 0x2ad   : > { %10532 = vst [vmem:[#allocation41_spill] sm:$0xff] %v8211_v50  ;;  %v8213_v4 = vpop.f32.mrb[82].mxu0  ;;  %v5860_v27 = vpop.eup %5859  ;;  %v4025_v8 = vmul.f32 %v5858_v39, %v8032_v32  ;;  %5879 = vrcp.f32 %v3203_v61  ;;  %v8224_v0 = vadd.f32 %v10536_v45, %v7908_v26  ;;  %v10538_v39 = vld [vmem:[#allocation30_spill] sm:$0xff] }
 0x2ae   : > { %10533 = vst [vmem:[#allocation42_spill] sm:$0xff] %v8213_v4  ;;  %v8217_v42 = vpop.f32.mrb[42].mxu1  ;;  %v8219_v36 = vpop.f32.mrb[83].mxu0  ;;  %v4374_v3 = vadd.f32 %v4373_v60, %v4143_v51  ;;  %v4152_v22 = vmul.f32 %v5860_v27, %v8041_v11  ;;  %5881 = vpow2.f32 %v5125_v17  ;;  %v10539_v11 = vld [vmem:[#allocation29_spill] sm:$0xff]  ;;  %v10540_v27 = vld [vmem:[#allocation14_spill] sm:$0xff] }
 0x2af   : > { %10534 = vst [vmem:[#allocation43_spill] sm:$0xff] %v8217_v42  ;;  %10535 = vst [vmem:[#allocation44_spill] sm:$0xff] %v8219_v36  ;;  %v5862_v41 = vpop.eup %5861  ;;  %v8226_v4 = vpop.f32.mrb[43].mxu1  ;;  %v4436_v32 = vadd.f32 %v4435_v30, %v4025_v8  ;;  %5883 = vpow2.f32 %v5252_v19  ;;  %v8231_v42 = vadd.f32 %v10538_v39, %v7710_v18  ;;  %v8235_v17 = vadd.f32 %v10539_v11, %v7896_v56 }
 0x2b0   : > { %10537 = vst [vmem:[#allocation28_spill] sm:$0xff] %v8226_v4  ;;  %v5864_v50 = vpop.eup %5863  ;;  %v4034_v61 = vmul.f32 %v5862_v41, %v8053_v53  ;;  %v4338_v60 = vadd.f32 %v4337_v47, %v4152_v22  ;;  %5885 = vpow2.f32 %v5134_v29  ;;  %5065 = vmatmul.mubr.msk.bf16.gmra.mrb[148].mxu1 %vm445_vm0, %v10540_v27  ;;  %v10541_v53 = vld [vmem:[#allocation32_spill] sm:$0xff]  ;;  %v5135_v29 = vmul.f32 -1.442695, %v8224_v0  ;;  %v8249_v39 = vpop.f32.mrb[84].mxu0 }
 0x2b1   : > { %v5866_v36 = vpop.eup %5865  ;;  %v3085_v51 = vadd.f32 1.0, %v5864_v50  ;;  %5887 = vpow2.f32 %v5253_v63  ;;  %v8241_v19 = vadd.f32 %v10541_v53, %v7717_v21  ;;  %2021 = vmatprep.mubr.bf16.mxu1 %v10499_v49  ;;  %v10542_v50 = vld [vmem:[#allocation31_spill] sm:$0xff]  ;;  %10543 = vst [vmem:[#allocation30_spill] sm:$0xff] %v8249_v39  ;;  %v5262_v63 = vmul.f32 -1.442695, %v8231_v42  ;;  %v8254_v11 = vpop.f32.mrb[85].mxu0 }
 0x2b2   : > { %v5868_v45 = vpop.eup %5867  ;;  %v4400_v30 = vadd.f32 %v4399_v31, %v4034_v61  ;;  %v3212_v8 = vadd.f32 1.0, %v5866_v36  ;;  %v8247_v22 = vadd.f32 %v10542_v50, %v7908_v26  ;;  %v8252_v61 = vpop.f32.mrb[44].mxu1  ;;  %10545 = vst [vmem:[#allocation14_spill] sm:$0xff] %v8254_v11 }
 0x2b3   : > { %v5870_v47 = vpop.eup %5869  ;;  %5889 = vrcp.f32 %v3085_v51  ;;  %v3094_v41 = vadd.f32 1.0, %v5868_v45  ;;  %10544 = vst [vmem:[#allocation29_spill] sm:$0xff] %v8252_v61  ;;  %v5144_v45 = vmul.f32 -1.442695, %v8235_v17  ;;  %v8258_v53 = vpop.f32.mrb[45].mxu1 }
 0x2b4   : > { %v5872_v31 = vpop.eup %5871  ;;  %5891 = vrcp.f32 %v3212_v8  ;;  %v3213_v36 = vadd.f32 1.0, %v5870_v47  ;;  %10546 = vst [vmem:[#allocation32_spill] sm:$0xff] %v8258_v53  ;;  %v8260_v50 = vpop.f32.mrb[86].mxu0  ;;  %v5263_v47 = vmul.f32 -1.442695, %v8241_v19 }
 0x2b5   : > { %v5874_v27 = vpop.eup %5873  ;;  %v4153_v51 = vmul.f32 %v5872_v31, %v8057_v14  ;;  %5893 = vrcp.f32 %v3094_v41  ;;  %10547 = vst [vmem:[#allocation31_spill] sm:$0xff] %v8260_v50  ;;  %v8264_v4 = vpop.f32.mrb[46].mxu1  ;;  %v5145_v41 = vmul.f32 -1.442695, %v8247_v22 }
 0x2b6   : > { %v5876_v39 = vpop.eup %5875  ;;  %v4035_v8 = vmul.f32 %v5874_v27, %v8068_v57  ;;  %5895 = vrcp.f32 %v3213_v36  ;;  %v8266_v61 = vpop.f32.mrb[87].mxu0  ;;  %v8275_v36 = vadd.f32 %v8025_v15, %v7710_v18  ;;  %v8286_v15 = vadd.f32 %v8034_v48, %v7717_v21 }
 0x2b7   : > { %10548 = vst [vmem:[#allocation45_spill] sm:$0xff] %v8266_v61  ;;  %v5878_v11 = vpop.eup %5877  ;;  %v4375_v24 = vadd.f32 %v4374_v3, %v4153_v51  ;;  %v4162_v14 = vmul.f32 %v5876_v39, %v8079_v20  ;;  %5897 = vpow2.f32 %v5135_v29  ;;  %v8270_v31 = vpop.f32.mrb[47].mxu1  ;;  %v10549_v20 = vld [vmem:[#allocation33_spill] sm:$0xff] }
 0x2b8   : > { %v5880_v50 = vpop.eup %5879  ;;  %v4437_v53 = vadd.f32 %v4436_v32, %v4035_v8  ;;  %v4044_v57 = vmul.f32 %v5878_v11, %v8094_v7  ;;  %5899 = vpow2.f32 %v5262_v63  ;;  %v8280_v29 = vadd.f32 %v10549_v20, %v7896_v56  ;;  %v10550_v39 = vld [vmem:[#allocation17_spill] sm:$0xff] }
 0x2b9   : > { %v5882_v27 = vpop.eup %5881  ;;  %v4339_v61 = vadd.f32 %v4338_v60, %v4162_v14  ;;  %v4163_v3 = vmul.f32 %v5880_v50, %v8107_v34  ;;  %5901 = vpow2.f32 %v5144_v45  ;;  %5066 = vmatmul.mubr.msk.bf16.gmra.mrb[152].mxu1 %vm445_vm0, %v10550_v39  ;;  %v8291_v11 = vadd.f32 %v8027_v37, %v7908_v26  ;;  %v8293_v45 = vpop.f32.mrb[88].mxu0 }
 0x2ba   : > { %v5884_v32 = vpop.eup %5883  ;;  %v4401_v51 = vadd.f32 %v4400_v30, %v4044_v57  ;;  %v3095_v7 = vadd.f32 1.0, %v5882_v27  ;;  %5903 = vpow2.f32 %v5263_v47  ;;  %2031 = vmatprep.mubr.bf16.mxu1 %v10499_v49  ;;  %v5272_v8 = vmul.f32 -1.442695, %v8275_v36  ;;  %v8296_v47 = vpop.f32.mrb[48].mxu1 }
 0x2bb   : > { %v5886_v60 = vpop.eup %5885  ;;  %v4376_v34 = vadd.f32 %v4375_v24, %v4163_v3  ;;  %v3222_v63 = vadd.f32 1.0, %v5884_v32  ;;  %5905 = vpow2.f32 %v5145_v41  ;;  %v8298_v48 = vpop.f32.mrb[89].mxu0  ;;  %v5154_v41 = vmul.f32 -1.442695, %v8280_v29 }
 0x2bc   : > { %v5888_v50 = vpop.eup %5887  ;;  %5907 = vrcp.f32 %v3095_v7  ;;  %v3104_v30 = vadd.f32 1.0, %v5886_v60  ;;  %10551 = vst [vmem:[#allocation33_spill] sm:$0xff] %v8298_v48  ;;  %v8301_v57 = vpop.f32.mrb[49].mxu1  ;;  %v5273_v20 = vmul.f32 -1.442695, %v8286_v15 }
 0x2bd   : > { %v5890_v14 = vpop.eup %5889  ;;  %5909 = vrcp.f32 %v3222_v63  ;;  %v3223_v24 = vadd.f32 1.0, %v5888_v50  ;;  %10552 = vst [vmem:[#allocation17_spill] sm:$0xff] %v8301_v57  ;;  %v8303_v37 = vpop.f32.mrb[90].mxu0  ;;  %v5155_v63 = vmul.f32 -1.442695, %v8291_v11 }
 0x2be   : > { %10553 = vst [vmem:[#allocation46_spill] sm:$0xff] %v8303_v37  ;;  %v5892_v27 = vpop.eup %5891  ;;  %v4045_v3 = vmul.f32 %v5890_v14, %v8126_v25  ;;  %5911 = vrcp.f32 %v3104_v30  ;;  %v8307_v39 = vpop.f32.mrb[50].mxu1 }
 0x2bf   : > { %10554 = vst [vmem:[#allocation47_spill] sm:$0xff] %v8307_v39  ;;  %v8309_v32 = vpop.f32.mrb[91].mxu0  ;;  %v5894_v7 = vpop.eup %5893  ;;  %v4172_v60 = vmul.f32 %v5892_v27, %v8130_v40  ;;  %5913 = vrcp.f32 %v3223_v24  ;;  %v10558_v40 = vld [vmem:[#allocation16_spill] sm:$0xff] }
 0x2c0   : > { %10555 = vst [vmem:[#allocation48_spill] sm:$0xff] %v8309_v32  ;;  %v8313_v50 = vpop.f32.mrb[51].mxu1  ;;  %v5896_v57 = vpop.eup %5895  ;;  %v4438_v37 = vadd.f32 %v4437_v53, %v4045_v3  ;;  %v4054_v48 = vmul.f32 %v5894_v7, %v8146_v35  ;;  %5915 = vpow2.f32 %v5272_v8  ;;  %v10557_v32 = vld [vmem:[#allocation35_spill] sm:$0xff]  ;;  %v10559_v53 = vld [vmem:[#allocation34_spill] sm:$0xff] }
 0x2c1   : > { %10556 = vst [vmem:[#allocation49_spill] sm:$0xff] %v8313_v50  ;;  %v5898_v25 = vpop.eup %5897  ;;  %v4340_v30 = vadd.f32 %v4339_v61, %v4172_v60  ;;  %v4173_v14 = vmul.f32 %v5896_v57, %v8152_v6  ;;  %5917 = vpow2.f32 %v5154_v41  ;;  %v8319_v39 = vadd.f32 %v10557_v32, %v7710_v18  ;;  %5067 = vmatmul.mubr.msk.bf16.gmra.mrb[156].mxu1 %vm445_vm0, %v10558_v40  ;;  %v8332_v57 = vpop.f32.mrb[92].mxu0 }
 0x2c2   : > { %v5900_v24 = vpop.eup %5899  ;;  %v4402_v27 = vadd.f32 %v4401_v51, %v4054_v48  ;;  %v3105_v50 = vadd.f32 1.0, %v5898_v25  ;;  %5919 = vpow2.f32 %v5273_v20  ;;  %v8325_v35 = vadd.f32 %v10559_v53, %v7896_v56  ;;  %2041 = vmatprep.mubr.bf16.mxu1 %v10499_v49  ;;  %v8338_v20 = vpop.f32.mrb[52].mxu1 }
 0x2c3   : > { %v5902_v61 = vpop.eup %5901  ;;  %v4377_v6 = vadd.f32 %v4376_v34, %v4173_v14  ;;  %v3232_v8 = vadd.f32 1.0, %v5900_v24  ;;  %5921 = vpow2.f32 %v5155_v63  ;;  %v8330_v41 = vadd.f32 %v8049_v46, %v7717_v21  ;;  %v8340_v32 = vpop.f32.mrb[93].mxu0 }
 0x2c4   : > { %v5904_v3 = vpop.eup %5903  ;;  %5923 = vrcp.f32 %v3105_v50  ;;  %v3114_v51 = vadd.f32 1.0, %v5902_v61  ;;  %v8336_v48 = vadd.f32 %v8045_v33, %v7908_v26  ;;  %v5282_v60 = vmul.f32 -1.442695, %v8319_v39  ;;  %v8343_v46 = vpop.f32.mrb[53].mxu1 }
 0x2c5   : > { %v5906_v34 = vpop.eup %5905  ;;  %5925 = vrcp.f32 %v3232_v8  ;;  %v3233_v7 = vadd.f32 1.0, %v5904_v3  ;;  %10560 = vst [vmem:[#allocation35_spill] sm:$0xff] %v8343_v46  ;;  %v8345_v63 = vpop.f32.mrb[94].mxu0  ;;  %v5164_v14 = vmul.f32 -1.442695, %v8325_v35 }
 0x2c6   : > { %10561 = vst [vmem:[#allocation16_spill] sm:$0xff] %v8345_v63  ;;  %v5908_v25 = vpop.eup %5907  ;;  %5927 = vrcp.f32 %v3114_v51  ;;  %v3115_v50 = vadd.f32 1.0, %v5906_v34  ;;  %v8348_v33 = vpop.f32.mrb[54].mxu1  ;;  %v5283_v61 = vmul.f32 -1.442695, %v8330_v41 }
 0x2c7   : > { %10562 = vst [vmem:[#allocation34_spill] sm:$0xff] %v8348_v33  ;;  %v8350_v40 = vpop.f32.mrb[95].mxu0  ;;  %v5910_v24 = vpop.eup %5909  ;;  %v4055_v53 = vmul.f32 %v5908_v25, %v8182_v1  ;;  %5929 = vrcp.f32 %v3233_v7  ;;  %v5165_v51 = vmul.f32 -1.442695, %v8336_v48  ;;  %v10565_v1 = vld [vmem:[#allocation19_spill] sm:$0xff] }
 0x2c8   : > { %10563 = vst [vmem:[#allocation50_spill] sm:$0xff] %v8350_v40  ;;  %v8354_v8 = vpop.f32.mrb[55].mxu1  ;;  %v5912_v3 = vpop.eup %5911  ;;  %v4182_v63 = vmul.f32 %v5910_v24, %v8188_v28  ;;  %5931 = vrcp.f32 %v3115_v50  ;;  %v8361_v40 = vadd.f32 %v8081_v9, %v7710_v18  ;;  %v8368_v28 = vadd.f32 %v8073_v2, %v7896_v56  ;;  %v10566_v9 = vld [vmem:[#allocation37_spill] sm:$0xff] }
 0x2c9   : > { %10564 = vst [vmem:[#allocation51_spill] sm:$0xff] %v8354_v8  ;;  %v5914_v34 = vpop.eup %5913  ;;  %v4439_v46 = vadd.f32 %v4438_v37, %v4055_v53  ;;  %v4064_v33 = vmul.f32 %v5912_v3, %v8192_v52  ;;  %5933 = vpow2.f32 %v5282_v60  ;;  %5068 = vmatmul.mubr.msk.bf16.gmra.mrb[160].mxu1 %vm445_vm0, %v10565_v1  ;;  %v8373_v50 = vadd.f32 %v10566_v9, %v7717_v21  ;;  %v8375_v24 = vpop.f32.mrb[96].mxu0 }
 0x2ca   : > { %v5916_v7 = vpop.eup %5915  ;;  %v4341_v25 = vadd.f32 %v4340_v30, %v4182_v63  ;;  %v4183_v8 = vmul.f32 %v5914_v34, %v8198_v16  ;;  %5935 = vpow2.f32 %v5164_v14  ;;  %2051 = vmatprep.mubr.bf16.mxu1 %v10499_v49  ;;  %10567 = vst [vmem:[#allocation19_spill] sm:$0xff] %v8375_v24  ;;  %v10568_v14 = vld [vmem:[#allocation36_spill] sm:$0xff]  ;;  %v8381_v53 = vpop.f32.mrb[56].mxu1  ;;  %v10571_v34 = vld [vmem:[#allocation39_spill] sm:$0xff]  ;;  %v10576_v24 = vld [vmem:[#allocation18_spill] sm:$0xff] }
 0x2cb   : > { %v5918_v52 = vpop.eup %5917  ;;  %v4403_v37 = vadd.f32 %v4402_v27, %v4064_v33  ;;  %v3242_v60 = vadd.f32 1.0, %v5916_v7  ;;  %5937 = vpow2.f32 %v5283_v61  ;;  %v8379_v2 = vadd.f32 %v10568_v14, %v7908_v26  ;;  %10569 = vst [vmem:[#allocation37_spill] sm:$0xff] %v8381_v53  ;;  %v8383_v3 = vpop.f32.mrb[97].mxu0 }
 0x2cc   : > { %v5920_v30 = vpop.eup %5919  ;;  %v4378_v63 = vadd.f32 %v4377_v6, %v4183_v8  ;;  %v3124_v16 = vadd.f32 1.0, %v5918_v52  ;;  %5939 = vpow2.f32 %v5165_v51  ;;  %10570 = vst [vmem:[#allocation36_spill] sm:$0xff] %v8383_v3  ;;  %v5292_v61 = vmul.f32 -1.442695, %v8361_v40  ;;  %v8390_v6 = vpop.f32.mrb[57].mxu1 }
 0x2cd   : > { %v5922_v27 = vpop.eup %5921  ;;  %5941 = vrcp.f32 %v3242_v60  ;;  %v3243_v33 = vadd.f32 1.0, %v5920_v30  ;;  %v8388_v1 = vadd.f32 %v10571_v34, %v7710_v18  ;;  %10572 = vst [vmem:[#allocation39_spill] sm:$0xff] %v8390_v6  ;;  %v8392_v8 = vpop.f32.mrb[98].mxu0  ;;  %v5174_v52 = vmul.f32 -1.442695, %v8368_v28 }
 0x2ce   : > { %10573 = vst [vmem:[#allocation52_spill] sm:$0xff] %v8392_v8  ;;  %v5924_v51 = vpop.eup %5923  ;;  %5943 = vrcp.f32 %v3124_v16  ;;  %v3125_v7 = vadd.f32 1.0, %v5922_v27  ;;  %v8395_v9 = vpop.f32.mrb[58].mxu1  ;;  %v5293_v34 = vmul.f32 -1.442695, %v8373_v50 }
 0x2cf   : > { %10574 = vst [vmem:[#allocation53_spill] sm:$0xff] %v8395_v9  ;;  %v8397_v14 = vpop.f32.mrb[99].mxu0  ;;  %v5926_v60 = vpop.eup %5925  ;;  %v4065_v30 = vmul.f32 %v5924_v51, %v8224_v0  ;;  %5945 = vrcp.f32 %v3243_v33  ;;  %v5175_v16 = vmul.f32 -1.442695, %v8379_v2 }
 0x2d0   : > { %10575 = vst [vmem:[#allocation54_spill] sm:$0xff] %v8397_v14  ;;  %v8401_v3 = vpop.f32.mrb[59].mxu1  ;;  %v5928_v6 = vpop.eup %5927  ;;  %v4192_v8 = vmul.f32 %v5926_v60, %v8231_v42  ;;  %5947 = vrcp.f32 %v3125_v7  ;;  %v5302_v14 = vmul.f32 -1.442695, %v8388_v1  ;;  %v10577_v42 = vld [vmem:[#allocation38_spill] sm:$0xff] }
 0x2d1   : > { %v5930_v27 = vpop.eup %5929  ;;  %v4440_v53 = vadd.f32 %v4439_v46, %v4065_v30  ;;  %v4074_v9 = vmul.f32 %v5928_v6, %v8235_v17  ;;  %5949 = vpow2.f32 %v5292_v61  ;;  %5069 = vmatmul.mubr.msk.bf16.gmra.mrb[164].mxu1 %vm445_vm0, %v10576_v24  ;;  %v8412_v7 = vadd.f32 %v10577_v42, %v7896_v56  ;;  %v8420_v24 = vpop.f32.mrb[100].mxu0 }
 0x2d2   : > { %v5932_v0 = vpop.eup %5931  ;;  %v4342_v33 = vadd.f32 %v4341_v25, %v4192_v8  ;;  %v4193_v51 = vmul.f32 %v5930_v27, %v8241_v19  ;;  %5951 = vpow2.f32 %v5174_v52  ;;  %2061 = vmatprep.mubr.bf16.mxu1 %v10499_v49  ;;  %v8418_v61 = vadd.f32 %v8101_v23, %v7717_v21  ;;  %v8426_v52 = vpop.f32.mrb[60].mxu1 }
 0x2d3   : > { %v5934_v46 = vpop.eup %5933  ;;  %v4404_v60 = vadd.f32 %v4403_v37, %v4074_v9  ;;  %v4075_v17 = vmul.f32 %v5932_v0, %v8247_v22  ;;  %5953 = vpow2.f32 %v5293_v34  ;;  %v8424_v8 = vadd.f32 %v8098_v13, %v7908_v26  ;;  %v8428_v37 = vpop.f32.mrb[101].mxu0 }
 0x2d4   : > { %v5936_v25 = vpop.eup %5935  ;;  %v4379_v19 = vadd.f32 %v4378_v63, %v4193_v51  ;;  %v3252_v6 = vadd.f32 1.0, %v5934_v46  ;;  %5955 = vpow2.f32 %v5175_v16  ;;  %v8432_v23 = vadd.f32 %v8119_v43, %v7710_v18  ;;  %v8434_v34 = vpop.f32.mrb[61].mxu1 }
 0x2d5   : > { %v5938_v22 = vpop.eup %5937  ;;  %v4441_v9 = vadd.f32 %v4440_v53, %v4075_v17  ;;  %v3134_v30 = vadd.f32 1.0, %v5936_v25  ;;  %5957 = vpow2.f32 %v5302_v14  ;;  %v8436_v63 = vpop.f32.mrb[102].mxu0  ;;  %v5184_v27 = vmul.f32 -1.442695, %v8412_v7 }
 0x2d6   : > { %10578 = vst [vmem:[#allocation18_spill] sm:$0xff] %v8436_v63  ;;  %v5940_v16 = vpop.eup %5939  ;;  %5959 = vrcp.f32 %v3252_v6  ;;  %v3253_v13 = vadd.f32 1.0, %v5938_v22  ;;  %v5303_v53 = vmul.f32 -1.442695, %v8418_v61  ;;  %v8440_v42 = vpop.f32.mrb[62].mxu1 }
 0x2d7   : > { %v5942_v0 = vpop.eup %5941  ;;  %5961 = vrcp.f32 %v3134_v30  ;;  %v3135_v51 = vadd.f32 1.0, %v5940_v16  ;;  %10579 = vst [vmem:[#allocation38_spill] sm:$0xff] %v8440_v42  ;;  %v5185_v46 = vmul.f32 -1.442695, %v8424_v8  ;;  %v5312_v6 = vmul.f32 -1.442695, %v8432_v23 }
 0x2d8   : > { %v5944_v14 = vpop.eup %5943  ;;  %v4202_v43 = vmul.f32 %v5942_v0, %v8275_v36  ;;  %5963 = vrcp.f32 %v3253_v13  ;;  %v8446_v22 = vpop.f32.mrb[103].mxu0  ;;  %v10582_v16 = vld [vmem:[#allocation21_spill] sm:$0xff] }
 0x2d9   : > { %v5946_v17 = vpop.eup %5945  ;;  %v4084_v25 = vmul.f32 %v5944_v14, %v8280_v29  ;;  %5965 = vrcp.f32 %v3135_v51  ;;  %10580 = vst [vmem:[#allocation55_spill] sm:$0xff] %v8446_v22  ;;  %v8448_v30 = vpop.f32.mrb[63].mxu1  ;;  %5070 = vmatmul.mubr.msk.bf16.gmra.mrb[168].mxu1 %vm445_vm0, %v10582_v16  ;;  %v8457_v51 = vadd.f32 %v8115_v12, %v7896_v56 }
 0x2da   : > { %10581 = vst [vmem:[#allocation56_spill] sm:$0xff] %v8448_v30  ;;  %v5948_v42 = vpop.eup %5947  ;;  %v4343_v63 = vadd.f32 %v4342_v33, %v4202_v43  ;;  %v4203_v36 = vmul.f32 %v5946_v17, %v8286_v15  ;;  %5967 = vpow2.f32 %v5184_v27  ;;  %2071 = vmatprep.mubr.bf16.mxu1 %v10499_v49  ;;  %v8461_v33 = vadd.f32 %v8132_v54, %v7717_v21  ;;  %v8472_v43 = vpop.f32.mrb[104].mxu0 }
 0x2db   : > { %v5950_v13 = vpop.eup %5949  ;;  %v4405_v0 = vadd.f32 %v4404_v60, %v4084_v25  ;;  %v4085_v29 = vmul.f32 %v5948_v42, %v8291_v11  ;;  %5969 = vpow2.f32 %v5303_v53  ;;  %v8465_v11 = vadd.f32 %v8121_v59, %v7908_v26  ;;  %v8477_v25 = vpop.f32.mrb[105].mxu0 }
 0x2dc   : > { %v5952_v14 = vpop.eup %5951  ;;  %v4380_v30 = vadd.f32 %v4379_v19, %v4203_v36  ;;  %v3262_v22 = vadd.f32 1.0, %v5950_v13  ;;  %5971 = vpow2.f32 %v5185_v46  ;;  %v8469_v19 = vadd.f32 %v8138_v10, %v7710_v18  ;;  %v10583_v36 = vld [vmem:[#allocation20_spill] sm:$0xff] }
 0x2dd   : > { %v5954_v15 = vpop.eup %5953  ;;  %v4442_v27 = vadd.f32 %v4441_v9, %v4085_v29  ;;  %v3144_v49 = vadd.f32 1.0, %v5952_v14  ;;  %5973 = vpow2.f32 %v5312_v6  ;;  %v5194_v54 = vmul.f32 -1.442695, %v8457_v51  ;;  %v8474_v9 = vpop.f32.mrb[64].mxu1 }
 0x2de   : > { %v5956_v60 = vpop.eup %5955  ;;  %5975 = vrcp.f32 %v3262_v22  ;;  %v3263_v12 = vadd.f32 1.0, %v5954_v15  ;;  %v5313_v17 = vmul.f32 -1.442695, %v8461_v33  ;;  %v8479_v6 = vpop.f32.mrb[65].mxu1  ;;  %v5195_v16 = vmul.f32 -1.442695, %v8465_v11 }
 0x2df   : > { %v5958_v53 = vpop.eup %5957  ;;  %5977 = vrcp.f32 %v3144_v49  ;;  %v3145_v42 = vadd.f32 1.0, %v5956_v60  ;;  %v5322_v14 = vmul.f32 -1.442695, %v8469_v19  ;;  %v8487_v15 = vpop.f32.mrb[106].mxu0 }
 0x2e0   : > { %v5960_v46 = vpop.eup %5959  ;;  %5979 = vrcp.f32 %v3263_v12  ;;  %v3272_v59 = vadd.f32 1.0, %v5958_v53  ;;  %v8489_v49 = vpop.f32.mrb[66].mxu1  ;;  %v8494_v53 = vadd.f32 %v8134_v62, %v7896_v56 }
 0x2e1   : > { %v5962_v10 = vpop.eup %5961  ;;  %v4212_v22 = vmul.f32 %v5960_v46, %v8319_v39  ;;  %5981 = vrcp.f32 %v3145_v42  ;;  %5071 = vmatmul.mubr.msk.bf16.gmra.mrb[172].mxu1 %vm445_vm0, %v10583_v36 }
 0x2e2   : > { %v5964_v13 = vpop.eup %5963  ;;  %v4094_v29 = vmul.f32 %v5962_v10, %v8325_v35  ;;  %5983 = vrcp.f32 %v3272_v59  ;;  %v8499_v59 = vadd.f32 %v8148_v55, %v7717_v21  ;;  %v8501_v10 = vpop.f32.mrb[107].mxu0 }
 0x2e3   : > { %v5966_v60 = vpop.eup %5965  ;;  %v4344_v12 = vadd.f32 %v4343_v63, %v4212_v22  ;;  %v4213_v39 = vmul.f32 %v5964_v13, %v8330_v41  ;;  %5985 = vpow2.f32 %v5194_v54  ;;  %10584 = vst [vmem:[#allocation21_spill] sm:$0xff] %v8501_v10  ;;  %v8505_v41 = vadd.f32 %v8140_v5, %v7908_v26 }
 0x2e4   : > { %v5968_v42 = vpop.eup %5967  ;;  %v4406_v46 = vadd.f32 %v4405_v0, %v4094_v29  ;;  %v4095_v35 = vmul.f32 %v5966_v60, %v8336_v48  ;;  %5987 = vpow2.f32 %v5313_v17  ;;  %v10585_v48 = vld [vmem:[#allocation25_spill] sm:$0xff]  ;;  %v5204_v29 = vmul.f32 -1.442695, %v8494_v53 }
 0x2e5   : > { %v5970_v36 = vpop.eup %5969  ;;  %v4381_v63 = vadd.f32 %v4380_v30, %v4213_v39  ;;  %v3154_v22 = vadd.f32 1.0, %v5968_v42  ;;  %5989 = vpow2.f32 %v5195_v16  ;;  %v8509_v17 = vadd.f32 %v10585_v48, %v7710_v18  ;;  %v10586_v30 = vld [vmem:[#allocation23_spill] sm:$0xff]  ;;  %v8517_v39 = vpop.f32.mrb[67].mxu1 }
 0x2e6   : > { %v5972_v62 = vpop.eup %5971  ;;  %v4443_v54 = vadd.f32 %v4442_v27, %v4095_v35  ;;  %v3273_v0 = vadd.f32 1.0, %v5970_v36  ;;  %5991 = vpow2.f32 %v5322_v14  ;;  %v8514_v16 = vadd.f32 %v10586_v30, %v7896_v56  ;;  %10587 = vst [vmem:[#allocation20_spill] sm:$0xff] %v8517_v39 }
 0x2e7   : > { %v5974_v55 = vpop.eup %5973  ;;  %5993 = vrcp.f32 %v3154_v22  ;;  %v3155_v13 = vadd.f32 1.0, %v5972_v62  ;;  %v5323_v27 = vmul.f32 -1.442695, %v8499_v59  ;;  %v5205_v35 = vmul.f32 -1.442695, %v8505_v41 }
 0x2e8   : > { %v5976_v60 = vpop.eup %5975  ;;  %5995 = vrcp.f32 %v3273_v0  ;;  %v3282_v5 = vadd.f32 1.0, %v5974_v55  ;;  %v5332_v62 = vmul.f32 -1.442695, %v8509_v17  ;;  %v5214_v55 = vmul.f32 -1.442695, %v8514_v16 }
 0x2e9   : > { %v5978_v14 = vpop.eup %5977  ;;  %v4222_v42 = vmul.f32 %v5976_v60, %v8361_v40  ;;  %5997 = vrcp.f32 %v3155_v13  ;;  %v8528_v13 = vadd.f32 %v8170_v44, %v7717_v21 }
 0x2ea   : > { %v5980_v36 = vpop.eup %5979  ;;  %v4104_v22 = vmul.f32 %v5978_v14, %v8368_v28  ;;  %5999 = vrcp.f32 %v3282_v5 }
 0x2eb   : > { %v5982_v48 = vpop.eup %5981  ;;  %v4345_v30 = vadd.f32 %v4344_v12, %v4222_v42  ;;  %v4223_v0 = vmul.f32 %v5980_v36, %v8373_v50  ;;  %6001 = vpow2.f32 %v5204_v29  ;;  %v10588_v12 = vld [vmem:[#allocation27_spill] sm:$0xff] }
 0x2ec   : > { %v5984_v39 = vpop.eup %5983  ;;  %v4407_v10 = vadd.f32 %v4406_v46, %v4104_v22  ;;  %v4105_v40 = vmul.f32 %v5982_v48, %v8379_v2  ;;  %6003 = vpow2.f32 %v5323_v27  ;;  %v8533_v50 = vadd.f32 %v10588_v12, %v7908_v26 }
 0x2ed   : > { %v5986_v28 = vpop.eup %5985  ;;  %v4382_v60 = vadd.f32 %v4381_v63, %v4223_v0  ;;  %v4232_v5 = vmul.f32 %v5984_v39, %v8388_v1  ;;  %6005 = vpow2.f32 %v5205_v35  ;;  %v8537_v2 = vadd.f32 %v8175_v38, %v7710_v18  ;;  %v10589_v63 = vld [vmem:[#allocation13_spill] sm:$0xff]  ;;  %v8543_v39 = vpop.f32.mrb[108].mxu0 }
 0x2ee   : > { %v5988_v29 = vpop.eup %5987  ;;  %v4444_v14 = vadd.f32 %v4443_v54, %v4105_v40  ;;  %v3164_v42 = vadd.f32 1.0, %v5986_v28  ;;  %6007 = vpow2.f32 %v5332_v62  ;;  %v8541_v1 = vadd.f32 %v10589_v63, %v7896_v56  ;;  %v8545_v35 = vpop.f32.mrb[68].mxu1 }
 0x2ef   : > { %v5990_v46 = vpop.eup %5989  ;;  %v4346_v44 = vadd.f32 %v4345_v30, %v4232_v5  ;;  %v3283_v27 = vadd.f32 1.0, %v5988_v29  ;;  %6009 = vpow2.f32 %v5214_v55  ;;  %v5333_v22 = vmul.f32 -1.442695, %v8528_v13  ;;  %v8551_v40 = vpop.f32.mrb[109].mxu0 }
 0x2f0   : > { %v5992_v36 = vpop.eup %5991  ;;  %6011 = vrcp.f32 %v3164_v42  ;;  %v3165_v54 = vadd.f32 1.0, %v5990_v46  ;;  %v5215_v48 = vmul.f32 -1.442695, %v8533_v50  ;;  %v5342_v55 = vmul.f32 -1.442695, %v8537_v2  ;;  %v8553_v28 = vpop.f32.mrb[69].mxu1 }
 0x2f1   : > { %v5994_v62 = vpop.eup %5993  ;;  %6013 = vrcp.f32 %v3283_v27  ;;  %v3292_v38 = vadd.f32 1.0, %v5992_v36  ;;  %10590 = vst [vmem:[#allocation25_spill] sm:$0xff] %v8553_v28  ;;  %v5224_v29 = vmul.f32 -1.442695, %v8541_v1  ;;  %v8558_v63 = vpop.f32.mrb[110].mxu0 }
 0x2f2   : > { %v5996_v30 = vpop.eup %5995  ;;  %v4114_v0 = vmul.f32 %v5994_v62, %v8412_v7  ;;  %6015 = vrcp.f32 %v3165_v54  ;;  %10591 = vst [vmem:[#allocation23_spill] sm:$0xff] %v8558_v63  ;;  %v8560_v7 = vpop.f32.mrb[70].mxu1 }
 0x2f3   : > { %v5998_v5 = vpop.eup %5997  ;;  %v4233_v12 = vmul.f32 %v5996_v30, %v8418_v61  ;;  %6017 = vrcp.f32 %v3292_v38  ;;  %10592 = vst [vmem:[#allocation27_spill] sm:$0xff] %v8560_v7  ;;  %v8565_v61 = vadd.f32 %v8184_v58, %v7717_v21 }
 0x2f4   : > { %v6000_v42 = vpop.eup %5999  ;;  %v4408_v46 = vadd.f32 %v4407_v10, %v4114_v0  ;;  %v4115_v27 = vmul.f32 %v5998_v5, %v8424_v8  ;;  %6019 = vpow2.f32 %v5333_v22  ;;  %v10593_v8 = vld [vmem:[#allocation24_spill] sm:$0xff] }
 0x2f5   : > { %v6002_v36 = vpop.eup %6001  ;;  %v4383_v54 = vadd.f32 %v4382_v60, %v4233_v12  ;;  %v4242_v62 = vmul.f32 %v6000_v42, %v8432_v23  ;;  %6021 = vpow2.f32 %v5215_v48  ;;  %v8569_v10 = vadd.f32 %v10593_v8, %v7908_v26  ;;  %v10594_v60 = vld [vmem:[#allocation15_spill] sm:$0xff]  ;;  %v8575_v48 = vpop.f32.mrb[111].mxu0 }
 0x2f6   : > { %v6004_v38 = vpop.eup %6003  ;;  %v4445_v30 = vadd.f32 %v4444_v14, %v4115_v27  ;;  %v3174_v28 = vadd.f32 1.0, %v6002_v36  ;;  %6023 = vpow2.f32 %v5342_v55  ;;  %v8573_v23 = vadd.f32 %v10594_v60, %v7710_v18  ;;  %10595 = vst [vmem:[#allocation13_spill] sm:$0xff] %v8575_v48  ;;  %v10596_v14 = vld [vmem:[#allocation26_spill] sm:$0xff]  ;;  %v8581_v42 = vpop.f32.mrb[71].mxu1 }
 0x2f7   : > { %v6006_v22 = vpop.eup %6005  ;;  %v4347_v0 = vadd.f32 %v4346_v44, %v4242_v62  ;;  %v3293_v5 = vadd.f32 1.0, %v6004_v38  ;;  %6025 = vpow2.f32 %v5224_v29  ;;  %v8579_v55 = vadd.f32 %v10596_v14, %v7896_v56  ;;  %10597 = vst [vmem:[#allocation24_spill] sm:$0xff] %v8581_v42 }
 0x2f8   : > { %v6008_v58 = vpop.eup %6007  ;;  %6027 = vrcp.f32 %v3174_v28  ;;  %v3175_v12 = vadd.f32 1.0, %v6006_v22  ;;  %v5343_v29 = vmul.f32 -1.442695, %v8565_v61  ;;  %v5225_v38 = vmul.f32 -1.442695, %v8569_v10 }
 0x2f9   : > { %v6010_v27 = vpop.eup %6009  ;;  %6029 = vrcp.f32 %v3293_v5  ;;  %v3302_v44 = vadd.f32 1.0, %v6008_v58  ;;  %v5352_v22 = vmul.f32 -1.442695, %v8573_v23  ;;  %v5234_v5 = vmul.f32 -1.442695, %v8579_v55 }
 0x2fa   : > { %v6012_v36 = vpop.eup %6011  ;;  %6031 = vrcp.f32 %v3175_v12  ;;  %v3184_v62 = vadd.f32 1.0, %v6010_v27  ;;  %v10598_v12 = vld [vmem:[#allocation41_spill] sm:$0xff] }
 0x2fb   : > { %v6014_v8 = vpop.eup %6013  ;;  %v4124_v28 = vmul.f32 %v6012_v36, %v8457_v51  ;;  %6033 = vrcp.f32 %v3302_v44  ;;  %v8592_v27 = vadd.f32 %v10598_v12, %v7717_v21  ;;  %v10599_v36 = vld [vmem:[#allocation40_spill] sm:$0xff] }
 0x2fc   : > { %v6016_v60 = vpop.eup %6015  ;;  %v4243_v14 = vmul.f32 %v6014_v8, %v8461_v33  ;;  %6035 = vrcp.f32 %v3184_v62  ;;  %v8597_v33 = vadd.f32 %v10599_v36, %v7908_v26  ;;  %v10606_v12 = vld [vmem:[#allocation28_spill] sm:$0xff] }
 0x2fd   : > { %v6018_v58 = vpop.eup %6017  ;;  %v4409_v42 = vadd.f32 %v4408_v46, %v4124_v28  ;;  %v4125_v48 = vmul.f32 %v6016_v60, %v8465_v11  ;;  %6037 = vpow2.f32 %v5343_v29  ;;  %v10600_v11 = vld [vmem:[#allocation43_spill] sm:$0xff]  ;;  %v8603_v29 = vpop.f32.mrb[72].mxu1  ;;  %v8618_v36 = vadd.f32 %v10606_v12, %v7717_v21 }
 0x2fe   : > { %v6020_v7 = vpop.eup %6019  ;;  %v4384_v51 = vadd.f32 %v4383_v54, %v4243_v14  ;;  %v4252_v44 = vmul.f32 %v6018_v58, %v8469_v19  ;;  %6039 = vpow2.f32 %v5225_v38  ;;  %v8601_v46 = vadd.f32 %v10600_v11, %v7710_v18  ;;  %10601 = vst [vmem:[#allocation15_spill] sm:$0xff] %v8603_v29  ;;  %v8605_v28 = vpop.f32.mrb[112].mxu0  ;;  %v10603_v38 = vld [vmem:[#allocation42_spill] sm:$0xff] }
 0x2ff   : > { %v6022_v62 = vpop.eup %6021  ;;  %v4446_v8 = vadd.f32 %v4445_v30, %v4125_v48  ;;  %v3303_v63 = vadd.f32 1.0, %v6020_v7  ;;  %6041 = vpow2.f32 %v5352_v22  ;;  %10602 = vst [vmem:[#allocation26_spill] sm:$0xff] %v8605_v28  ;;  %v8609_v14 = vadd.f32 %v10603_v38, %v7896_v56  ;;  %v8611_v58 = vpop.f32.mrb[73].mxu1 }
 0x300   : > { %v6024_v54 = vpop.eup %6023  ;;  %v4348_v60 = vadd.f32 %v4347_v0, %v4252_v44  ;;  %v3185_v19 = vadd.f32 1.0, %v6022_v62  ;;  %6043 = vpow2.f32 %v5234_v5  ;;  %10604 = vst [vmem:[#allocation41_spill] sm:$0xff] %v8611_v58  ;;  %v8613_v7 = vpop.f32.mrb[113].mxu0  ;;  %v5353_v22 = vmul.f32 -1.442695, %v8592_v27 }
 0x301   : > { %10605 = vst [vmem:[#allocation40_spill] sm:$0xff] %v8613_v7  ;;  %v6026_v30 = vpop.eup %6025  ;;  %6045 = vrcp.f32 %v3303_v63  ;;  %v3312_v48 = vadd.f32 1.0, %v6024_v54  ;;  %v5235_v44 = vmul.f32 -1.442695, %v8597_v33  ;;  %v5362_v38 = vmul.f32 -1.442695, %v8601_v46 }
 0x302   : > { %v6028_v0 = vpop.eup %6027  ;;  %6047 = vrcp.f32 %v3185_v19  ;;  %v3194_v5 = vadd.f32 1.0, %v6026_v30  ;;  %v8623_v7 = vpop.f32.mrb[74].mxu1  ;;  %v5244_v12 = vmul.f32 -1.442695, %v8609_v14 }
 0x303   : > { %v6030_v62 = vpop.eup %6029  ;;  %v4134_v11 = vmul.f32 %v6028_v0, %v8494_v53  ;;  %6049 = vrcp.f32 %v3312_v48  ;;  %10607 = vst [vmem:[#allocation43_spill] sm:$0xff] %v8623_v7  ;;  %v8627_v58 = vpop.f32.mrb[114].mxu0  ;;  %v5363_v53 = vmul.f32 -1.442695, %v8618_v36  ;;  %v10609_v7 = vld [vmem:[#allocation44_spill] sm:$0xff] }
 0x304   : > { %v6032_v63 = vpop.eup %6031  ;;  %v4253_v54 = vmul.f32 %v6030_v62, %v8499_v59  ;;  %6051 = vrcp.f32 %v3194_v5  ;;  %10608 = vst [vmem:[#allocation42_spill] sm:$0xff] %v8627_v58  ;;  %v8634_v59 = vadd.f32 %v10609_v7, %v7908_v26 }
 0x305   : > { %v6034_v19 = vpop.eup %6033  ;;  %v4410_v30 = vadd.f32 %v4409_v42, %v4134_v11  ;;  %v4135_v28 = vmul.f32 %v6032_v63, %v8505_v41  ;;  %6053 = vpow2.f32 %v5353_v22  ;;  %v10610_v42 = vld [vmem:[#allocation29_spill] sm:$0xff]  ;;  %v8641_v22 = vpop.f32.mrb[75].mxu1 }
 0x306   : > { %v6036_v48 = vpop.eup %6035  ;;  %v4385_v0 = vadd.f32 %v4384_v51, %v4253_v54  ;;  %v4262_v29 = vmul.f32 %v6034_v19, %v8509_v17  ;;  %6055 = vpow2.f32 %v5235_v44  ;;  %v8639_v41 = vadd.f32 %v10610_v42, %v7710_v18  ;;  %10611 = vst [vmem:[#allocation28_spill] sm:$0xff] %v8641_v22  ;;  %v10612_v17 = vld [vmem:[#allocation30_spill] sm:$0xff] }
 0x307   : > { %v6038_v5 = vpop.eup %6037  ;;  %v4447_v62 = vadd.f32 %v4446_v8, %v4135_v28  ;;  %v4144_v58 = vmul.f32 %v6036_v48, %v8514_v16  ;;  %6057 = vpow2.f32 %v5362_v38  ;;  %v8645_v44 = vadd.f32 %v10612_v17, %v7896_v56  ;;  %v10613_v16 = vld [vmem:[#allocation32_spill] sm:$0xff] }
 0x308   : > { %v6040_v11 = vpop.eup %6039  ;;  %v4349_v51 = vadd.f32 %v4348_v60, %v4262_v29  ;;  %v3313_v63 = vadd.f32 1.0, %v6038_v5  ;;  %6059 = vpow2.f32 %v5244_v12  ;;  %v8649_v28 = vadd.f32 %v10613_v16, %v7717_v21  ;;  %v8653_v5 = vpop.f32.mrb[115].mxu0  ;;  %v10615_v16 = vld [vmem:[#allocation14_spill] sm:$0xff] }
 0x309   : > { %v6042_v7 = vpop.eup %6041  ;;  %v4411_v54 = vadd.f32 %v4410_v30, %v4144_v58  ;;  %v3195_v8 = vadd.f32 1.0, %v6040_v11  ;;  %6061 = vpow2.f32 %v5363_v53  ;;  %v5245_v48 = vmul.f32 -1.442695, %v8634_v59  ;;  %10614 = vst [vmem:[#allocation44_spill] sm:$0xff] %v8653_v5 }
 0x30a   : > { %v6044_v38 = vpop.eup %6043  ;;  %6063 = vrcp.f32 %v3313_v63  ;;  %v3322_v19 = vadd.f32 1.0, %v6042_v7  ;;  %v5372_v12 = vmul.f32 -1.442695, %v8639_v41  ;;  %v5254_v30 = vmul.f32 -1.442695, %v8645_v44 }
 0x30b   : > { %v6046_v29 = vpop.eup %6045  ;;  %6065 = vrcp.f32 %v3195_v8  ;;  %v3204_v60 = vadd.f32 1.0, %v6044_v38  ;;  %v5373_v63 = vmul.f32 -1.442695, %v8649_v28  ;;  %v8662_v38 = vadd.f32 %v10615_v16, %v7908_v26 }
 0x30c   : > { %v6048_v42 = vpop.eup %6047  ;;  %v4263_v58 = vmul.f32 %v6046_v29, %v8528_v13  ;;  %6067 = vrcp.f32 %v3322_v19 }
 0x30d   : > { %v6050_v53 = vpop.eup %6049  ;;  %v4145_v11 = vmul.f32 %v6048_v42, %v8533_v50  ;;  %6069 = vrcp.f32 %v3204_v60  ;;  %v8667_v50 = vadd.f32 %v8264_v4, %v7710_v18 }
 0x30e   : > { %v6052_v17 = vpop.eup %6051  ;;  %v4386_v7 = vadd.f32 %v4385_v0, %v4263_v58  ;;  %v4272_v8 = vmul.f32 %v6050_v53, %v8537_v2  ;;  %6071 = vpow2.f32 %v5245_v48  ;;  %v10616_v2 = vld [vmem:[#allocation31_spill] sm:$0xff] }
 0x30f   : > { %v6054_v5 = vpop.eup %6053  ;;  %v4448_v13 = vadd.f32 %v4447_v62, %v4145_v11  ;;  %v4154_v19 = vmul.f32 %v6052_v17, %v8541_v1  ;;  %6073 = vpow2.f32 %v5372_v12  ;;  %v8671_v0 = vadd.f32 %v10616_v2, %v7896_v56  ;;  %v10617_v62 = vld [vmem:[#allocation22_spill] sm:$0xff]  ;;  %v8674_v1 = vpop.f32.mrb[76].mxu1 }
 0x310   : > { %v6056_v29 = vpop.eup %6055  ;;  %v4350_v60 = vadd.f32 %v4349_v51, %v4272_v8  ;;  %v3323_v42 = vadd.f32 1.0, %v6054_v5  ;;  %6075 = vpow2.f32 %v5254_v30  ;;  %v937_v11 = vsub.s32 4, %v10617_v62  ;;  %10618 = vst [vmem:[#allocation29_spill] sm:$0xff] %v8674_v1  ;;  %v8676_v12 = vpop.f32.mrb[116].mxu0 }
 0x311   : > { %v6058_v48 = vpop.eup %6057  ;;  %v4412_v58 = vadd.f32 %v4411_v54, %v4154_v19  ;;  %v3205_v53 = vadd.f32 1.0, %v6056_v29  ;;  %6077 = vpow2.f32 %v5373_v63  ;;  %10619 = vst [vmem:[#allocation30_spill] sm:$0xff] %v8676_v12  ;;  %v8680_v51 = vadd.f32 %v8270_v31, %v7717_v21  ;;  %v8682_v5 = vpop.f32.mrb[77].mxu1 }
 0x312   : > { %v6060_v18 = vpop.eup %6059  ;;  %6079 = vrcp.f32 %v3323_v42  ;;  %v3332_v4 = vadd.f32 1.0, %v6058_v48  ;;  %10620 = vst [vmem:[#allocation32_spill] sm:$0xff] %v8682_v5  ;;  %v8684_v30 = vpop.f32.mrb[117].mxu0  ;;  %v5255_v17 = vmul.f32 -1.442695, %v8662_v38  ;;  %v941_v8 = vsub.s32 5, %v10617_v62 }
 0x313   : > { %10621 = vst [vmem:[#allocation14_spill] sm:$0xff] %v8684_v30  ;;  %v6062_v54 = vpop.eup %6061  ;;  %6081 = vrcp.f32 %v3205_v53  ;;  %v3214_v63 = vadd.f32 1.0, %v6060_v18  ;;  %v8688_v16 = vpop.f32.mrb[78].mxu1  ;;  %v5382_v42 = vmul.f32 -1.442695, %v8667_v50  ;;  %v8693_v48 = vld [vmem:[#allocation8] sm:$0xff] }
 0x314   : > { %10622 = vst [vmem:[#allocation31_spill] sm:$0xff] %v8688_v16  ;;  %v6064_v19 = vpop.eup %6063  ;;  %6083 = vrcp.f32 %v3332_v4  ;;  %v3333_v29 = vadd.f32 1.0, %v6062_v54  ;;  %v5264_v2 = vmul.f32 -1.442695, %v8671_v0  ;;  %v8696_v53 = vrot.slane %v8693_v48, %v937_v11  ;;  %v8698_v18 = vpop.f32.mrb[118].mxu0  ;;  %v10624_v54 = vld [vmem:[#allocation45_spill] sm:$0xff] }
 0x315   : > { %v6066_v21 = vpop.eup %6065  ;;  %v4273_v31 = vmul.f32 %v6064_v19, %v8565_v61  ;;  %6085 = vrcp.f32 %v3214_v63  ;;  %10623 = vst [vmem:[#allocation57_spill] sm:$0xff] %v8698_v18  ;;  %v5383_v4 = vmul.f32 -1.442695, %v8680_v51  ;;  %v8704_v5 = vadd.f32 %v10624_v54, %v7908_v26  ;;  %v8710_v12 = vpop.f32.mrb[79].mxu1 }
 0x316   : > { %v6068_v30 = vpop.eup %6067  ;;  %v4155_v16 = vmul.f32 %v6066_v21, %v8569_v10  ;;  %6087 = vrcp.f32 %v3333_v29  ;;  %v8708_v11 = vrot.slane %v8693_v48, %v941_v8  ;;  %10625 = vst [vmem:[#allocation45_spill] sm:$0xff] %v8710_v12  ;;  %v8712_v18 = vpop.f32.mrb[119].mxu0  ;;  %v8717_v54 = vadd.f32 %v8293_v45, %v7896_v56 }
 0x317   : > { %v6070_v61 = vpop.eup %6069  ;;  %v4387_v63 = vadd.f32 %v4386_v7, %v4273_v31  ;;  %v4282_v19 = vmul.f32 %v6068_v30, %v8573_v23  ;;  %6089 = vpow2.f32 %v5255_v17  ;;  %10626 = vst [vmem:[#allocation58_spill] sm:$0xff] %v8712_v18  ;;  %v8721_v30 = vadd.f32 %v8296_v47, %v8696_v53 }
 0x318   : > { %v6072_v10 = vpop.eup %6071  ;;  %v4449_v29 = vadd.f32 %v4448_v13, %v4155_v16  ;;  %v4164_v21 = vmul.f32 %v6070_v61, %v8579_v55  ;;  %6091 = vpow2.f32 %v5382_v42  ;;  %v10627_v13 = vld [vmem:[#allocation33_spill] sm:$0xff]  ;;  %v5265_v42 = vmul.f32 -1.442695, %v8704_v5 }
 0x319   : > { %v6074_v7 = vpop.eup %6073  ;;  %v4351_v31 = vadd.f32 %v4350_v60, %v4282_v19  ;;  %v3215_v23 = vadd.f32 1.0, %v6072_v10  ;;  %6093 = vpow2.f32 %v5264_v2  ;;  %v8725_v55 = vadd.f32 %v10627_v13, %v7908_v26  ;;  %v10628_v60 = vld [vmem:[#allocation17_spill] sm:$0xff] }
 0x31a   : > { %v6076_v17 = vpop.eup %6075  ;;  %v4413_v8 = vadd.f32 %v4412_v58, %v4164_v21  ;;  %v3342_v18 = vadd.f32 1.0, %v6074_v7  ;;  %6095 = vpow2.f32 %v5383_v4  ;;  %v8730_v2 = vadd.f32 %v10628_v60, %v8708_v11 }
 0x31b   : > { %v6078_v16 = vpop.eup %6077  ;;  %6097 = vrcp.f32 %v3215_v23  ;;  %v3224_v45 = vadd.f32 1.0, %v6076_v17  ;;  %v5274_v58 = vmul.f32 -1.442695, %v8717_v54  ;;  %v5076_v10 = vmul.f32 -1.442695, %v8721_v30 }
 0x31c   : > { %v6080_v61 = vpop.eup %6079  ;;  %6099 = vrcp.f32 %v3342_v18  ;;  %v3343_v47 = vadd.f32 1.0, %v6078_v16  ;;  %v5275_v23 = vmul.f32 -1.442695, %v8725_v55  ;;  %v5077_v18 = vmul.f32 -1.442695, %v8730_v2 }
 0x31d   : > { %v6082_v19 = vpop.eup %6081  ;;  %v4283_v4 = vmul.f32 %v6080_v61, %v8592_v27  ;;  %6101 = vrcp.f32 %v3224_v45  ;;  %v10629_v45 = vld [vmem:[#allocation46_spill] sm:$0xff] }
 0x31e   : > { %v6084_v21 = vpop.eup %6083  ;;  %v4165_v7 = vmul.f32 %v6082_v19, %v8597_v33  ;;  %6103 = vrcp.f32 %v3343_v47  ;;  %v8742_v61 = vadd.f32 %v10629_v45, %v7896_v56 }
 0x31f   : > { %v6086_v17 = vpop.eup %6085  ;;  %v4388_v13 = vadd.f32 %v4387_v63, %v4283_v4  ;;  %v4292_v60 = vmul.f32 %v6084_v21, %v8601_v46  ;;  %6105 = vpow2.f32 %v5265_v42  ;;  %v10630_v63 = vld [vmem:[#allocation47_spill] sm:$0xff]  ;;  %v8749_v42 = vpop.f32.mrb[80].mxu1  ;;  %v10633_v21 = vld [vmem:[#allocation48_spill] sm:$0xff] }
 0x320   : > { %v6088_v16 = vpop.eup %6087  ;;  %v4450_v12 = vadd.f32 %v4449_v29, %v4165_v7  ;;  %v4174_v27 = vmul.f32 %v6086_v17, %v8609_v14  ;;  %6107 = vpow2.f32 %v5274_v58  ;;  %v8747_v46 = vadd.f32 %v10630_v63, %v8696_v53  ;;  %10631 = vst [vmem:[#allocation33_spill] sm:$0xff] %v8749_v42  ;;  %v8751_v4 = vpop.f32.mrb[120].mxu0 }
 0x321   : > { %v6090_v33 = vpop.eup %6089  ;;  %v4352_v47 = vadd.f32 %v4351_v31, %v4292_v60  ;;  %v4293_v19 = vmul.f32 %v6088_v16, %v8618_v36  ;;  %6109 = vpow2.f32 %v5076_v10  ;;  %10632 = vst [vmem:[#allocation17_spill] sm:$0xff] %v8751_v4  ;;  %v8755_v7 = vadd.f32 %v10633_v21, %v7908_v26  ;;  %v8757_v31 = vpop.f32.mrb[81].mxu1  ;;  %v10636_v16 = vld [vmem:[#allocation49_spill] sm:$0xff] }
 0x322   : > { %v6092_v29 = vpop.eup %6091  ;;  %v4414_v14 = vadd.f32 %v4413_v8, %v4174_v27  ;;  %v3225_v58 = vadd.f32 1.0, %v6090_v33  ;;  %6111 = vpow2.f32 %v5275_v23  ;;  %10634 = vst [vmem:[#allocation46_spill] sm:$0xff] %v8757_v31  ;;  %v8759_v36 = vpop.f32.mrb[121].mxu0  ;;  %v8763_v45 = vadd.f32 %v10636_v16, %v8708_v11 }
 0x323   : > { %10635 = vst [vmem:[#allocation47_spill] sm:$0xff] %v8759_v36  ;;  %v6094_v10 = vpop.eup %6093  ;;  %v4389_v17 = vadd.f32 %v4388_v13, %v4293_v19  ;;  %v3352_v60 = vadd.f32 1.0, %v6092_v29  ;;  %6113 = vpow2.f32 %v5077_v18  ;;  %v5284_v23 = vmul.f32 -1.442695, %v8742_v61  ;;  %v8769_v18 = vpop.f32.mrb[82].mxu1 }
 0x324   : > { %v6096_v63 = vpop.eup %6095  ;;  %6115 = vrcp.f32 %v3225_v58  ;;  %v3234_v8 = vadd.f32 1.0, %v6094_v10  ;;  %v5086_v21 = vmul.f32 -1.442695, %v8747_v46  ;;  %v5285_v13 = vmul.f32 -1.442695, %v8755_v7  ;;  %10637 = vst [vmem:[#allocation48_spill] sm:$0xff] %v8769_v18 }
 0x325   : > { %v6098_v27 = vpop.eup %6097  ;;  %6117 = vrcp.f32 %v3352_v60  ;;  %v3353_v33 = vadd.f32 1.0, %v6096_v63  ;;  %v8771_v19 = vpop.f32.mrb[122].mxu0  ;;  %v5087_v10 = vmul.f32 -1.442695, %v8763_v45 }
 0x326   : > { %v6100_v31 = vpop.eup %6099  ;;  %v4175_v36 = vmul.f32 %v6098_v27, %v8634_v59  ;;  %6119 = vrcp.f32 %v3234_v8  ;;  %10638 = vst [vmem:[#allocation49_spill] sm:$0xff] %v8771_v19  ;;  %v8776_v4 = vpop.f32.mrb[83].mxu1 }
 0x327   : > { %v6102_v29 = vpop.eup %6101  ;;  %v4302_v58 = vmul.f32 %v6100_v31, %v8639_v41  ;;  %6121 = vrcp.f32 %v3353_v33  ;;  %10639 = vst [vmem:[#allocation59_spill] sm:$0xff] %v8776_v4  ;;  %v8778_v59 = vpop.f32.mrb[123].mxu0  ;;  %v8783_v41 = vadd.f32 %v8332_v57, %v7896_v56 }
 0x328   : > { %v6104_v60 = vpop.eup %6103  ;;  %v4451_v16 = vadd.f32 %v4450_v12, %v4175_v36  ;;  %v4184_v63 = vmul.f32 %v6102_v29, %v8645_v44  ;;  %6123 = vpow2.f32 %v5284_v23  ;;  %10640 = vst [vmem:[#allocation60_spill] sm:$0xff] %v8778_v59  ;;  %v8787_v44 = vadd.f32 %v8338_v20, %v8696_v53 }
 0x329   : > { %v6106_v8 = vpop.eup %6105  ;;  %v4353_v27 = vadd.f32 %v4352_v47, %v4302_v58  ;;  %v4303_v18 = vmul.f32 %v6104_v60, %v8649_v28  ;;  %6125 = vpow2.f32 %v5086_v21  ;;  %v8791_v28 = vadd.f32 %v8340_v32, %v7908_v26  ;;  %v10641_v21 = vld [vmem:[#allocation35_spill] sm:$0xff]  ;;  %v8801_v60 = vpop.f32.mrb[84].mxu1 }
 0x32a   : > { %v6108_v31 = vpop.eup %6107  ;;  %v4415_v33 = vadd.f32 %v4414_v14, %v4184_v63  ;;  %v3235_v19 = vadd.f32 1.0, %v6106_v8  ;;  %6127 = vpow2.f32 %v5285_v13  ;;  %v8795_v14 = vadd.f32 %v10641_v21, %v8708_v11  ;;  %10642 = vst [vmem:[#allocation35_spill] sm:$0xff] %v8801_v60  ;;  %v8803_v63 = vpop.f32.mrb[124].mxu0 }
 0x32b   : > { %v6110_v12 = vpop.eup %6109  ;;  %v4390_v36 = vadd.f32 %v4389_v17, %v4303_v18  ;;  %v3244_v23 = vadd.f32 1.0, %v6108_v31  ;;  %6129 = vpow2.f32 %v5087_v10  ;;  %v5294_v20 = vmul.f32 -1.442695, %v8783_v41  ;;  %10643 = vst [vmem:[#allocation61_spill] sm:$0xff] %v8803_v63 }
 0x32c   : > { %v6112_v47 = vpop.eup %6111  ;;  %6131 = vrcp.f32 %v3235_v19  ;;  %v3046_v57 = vadd.f32 1.0, %v6110_v12  ;;  %v5096_v18 = vmul.f32 -1.442695, %v8787_v44  ;;  %v5295_v19 = vmul.f32 -1.442695, %v8791_v28 }
 0x32d   : > { %v6114_v13 = vpop.eup %6113  ;;  %6133 = vrcp.f32 %v3244_v23  ;;  %v3245_v29 = vadd.f32 1.0, %v6112_v47  ;;  %v5097_v12 = vmul.f32 -1.442695, %v8795_v14  ;;  %v10644_v23 = vld [vmem:[#allocation16_spill] sm:$0xff] }
 0x32e   : > { %v6116_v58 = vpop.eup %6115  ;;  %6135 = vrcp.f32 %v3046_v57  ;;  %v3047_v17 = vadd.f32 1.0, %v6114_v13  ;;  %v8809_v47 = vadd.f32 %v10644_v23, %v7896_v56  ;;  %v8811_v57 = vpop.f32.mrb[85].mxu1 }
 0x32f   : > { %v6118_v10 = vpop.eup %6117  ;;  %v4185_v32 = vmul.f32 %v6116_v58, %v8662_v38  ;;  %6137 = vrcp.f32 %v3245_v29  ;;  %10645 = vst [vmem:[#allocation16_spill] sm:$0xff] %v8811_v57  ;;  %v8813_v38 = vpop.f32.mrb[125].mxu0  ;;  %v10647_v58 = vld [vmem:[#allocation34_spill] sm:$0xff] }
 0x330   : > { %v6120_v8 = vpop.eup %6119  ;;  %v4312_v31 = vmul.f32 %v6118_v10, %v8667_v50  ;;  %6139 = vrcp.f32 %v3047_v17  ;;  %10646 = vst [vmem:[#allocation62_spill] sm:$0xff] %v8813_v38  ;;  %v8818_v63 = vadd.f32 %v10647_v58, %v8696_v53  ;;  %v8821_v23 = vpop.f32.mrb[86].mxu1 }
 0x331   : > { %v6122_v21 = vpop.eup %6121  ;;  %v4452_v13 = vadd.f32 %v4451_v16, %v4185_v32  ;;  %v4194_v29 = vmul.f32 %v6120_v8, %v8671_v0  ;;  %6141 = vpow2.f32 %v5294_v20  ;;  %10648 = vst [vmem:[#allocation34_spill] sm:$0xff] %v8821_v23  ;;  %v10649_v16 = vld [vmem:[#allocation50_spill] sm:$0xff] }
 0x332   : > { %v6124_v50 = vpop.eup %6123  ;;  %v4354_v17 = vadd.f32 %v4353_v27, %v4312_v31  ;;  %v4313_v10 = vmul.f32 %v6122_v21, %v8680_v51  ;;  %6143 = vpow2.f32 %v5096_v18  ;;  %v8825_v32 = vadd.f32 %v10649_v16, %v7908_v26 }
 0x333   : > { %v6126_v60 = vpop.eup %6125  ;;  %v4416_v57 = vadd.f32 %v4415_v33, %v4194_v29  ;;  %v3254_v59 = vadd.f32 1.0, %v6124_v50  ;;  %6145 = vpow2.f32 %v5295_v19  ;;  %v5304_v51 = vmul.f32 -1.442695, %v8809_v47  ;;  %v8829_v29 = vpop.f32.mrb[126].mxu0 }
 0x334   : > { %v6128_v0 = vpop.eup %6127  ;;  %v4355_v20 = vrot.slane %v4354_v17, 4  ;;  %v4391_v8 = vadd.f32 %v4390_v36, %v4313_v10  ;;  %v3056_v58 = vadd.f32 1.0, %v6126_v60  ;;  %6147 = vpow2.f32 %v5097_v12  ;;  %10650 = vst [vmem:[#allocation50_spill] sm:$0xff] %v8829_v29 }
 0x335   : > { %v6130_v38 = vpop.eup %6129  ;;  %6149 = vrcp.f32 %v3254_v59  ;;  %v3255_v27 = vadd.f32 1.0, %v6128_v0  ;;  %v5106_v18 = vmul.f32 -1.442695, %v8818_v63  ;;  %v5305_v36 = vmul.f32 -1.442695, %v8825_v32  ;;  %v10651_v59 = vld [vmem:[#allocation51_spill] sm:$0xff] }
 0x336   : > { %v6132_v31 = vpop.eup %6131  ;;  %v4356_v33 = vadd.f32 %v4355_v20, %v4354_v17  ;;  %v4392_v21 = vrot.slane %v4391_v8, 4  ;;  %6151 = vrcp.f32 %v3056_v58  ;;  %v3057_v19 = vadd.f32 1.0, %v6130_v38  ;;  %v10652_v58 = vld [vmem:[#allocation19_spill] sm:$0xff] }
 0x337   : > { %v6134_v50 = vpop.eup %6133  ;;  %v4195_v16 = vmul.f32 %v6132_v31, %v8704_v5  ;;  %6153 = vrcp.f32 %v3255_v27  ;;  %v8835_v60 = vadd.f32 %v10651_v59, %v8708_v11  ;;  %v8840_v29 = vadd.f32 %v10652_v58, %v7896_v56  ;;  %v10653_v5 = vld [vmem:[#allocation37_spill] sm:$0xff]  ;;  %v8846_v31 = vpop.f32.mrb[87].mxu1 }
 0x338   : > { %v6136_v12 = vpop.eup %6135  ;;  %v4357_v10 = vrot.slane %v4356_v33, 2  ;;  %v4393_v0 = vadd.f32 %v4392_v21, %v4391_v8  ;;  %v4204_v17 = vmul.f32 %v6134_v50, %v8717_v54  ;;  %6155 = vrcp.f32 %v3057_v19  ;;  %10654 = vst [vmem:[#allocation51_spill] sm:$0xff] %v8846_v31  ;;  %v8849_v21 = vpop.f32.mrb[127].mxu0  ;;  %v10656_v19 = vld [vmem:[#allocation36_spill] sm:$0xff] }
 0x339   : > { %v6138_v20 = vpop.eup %6137  ;;  %v4453_v38 = vadd.f32 %v4452_v13, %v4195_v16  ;;  %6157 = vpow2.f32 %v5304_v51  ;;  %v8844_v27 = vadd.f32 %v10653_v5, %v8696_v53  ;;  %10655 = vst [vmem:[#allocation19_spill] sm:$0xff] %v8849_v21  ;;  %v5107_v51 = vmul.f32 -1.442695, %v8835_v60  ;;  %v10657_v16 = vld [vmem:[#allocation39_spill] sm:$0xff] }
 0x33a   : > { %v6140_v59 = vpop.eup %6139  ;;  %v4358_v23 = vadd.f32 %v4357_v10, %v4356_v33  ;;  %v4394_v4 = vrot.slane %v4393_v0, 2  ;;  %v4417_v8 = vadd.f32 %v4416_v57, %v4204_v17  ;;  %v4205_v54 = vmul.f32 %v6138_v20, %v8725_v55 }
 0x33b   : > { %v6142_v13 = vpop.eup %6141  ;;  %6159 = vpow2.f32 %v5106_v18  ;;  %v8854_v50 = vadd.f32 %v10656_v19, %v7908_v26  ;;  %v8858_v58 = vadd.f32 %v10657_v16, %v8708_v11  ;;  %v5314_v18 = vmul.f32 -1.442695, %v8840_v29 }
 0x33c   : > { %v6144_v5 = vpop.eup %6143  ;;  %v4359_v33 = vrot.slane %v4358_v23, 1  ;;  %v4395_v10 = vadd.f32 %v4394_v4, %v4393_v0  ;;  %v4454_v57 = vadd.f32 %v4453_v38, %v4205_v54  ;;  %v3264_v17 = vadd.f32 1.0, %v6142_v13  ;;  %v10658_v13 = vld [vmem:[#allocation52_spill] sm:$0xff] }
 0x33d   : > { %v6146_v55 = vpop.eup %6145  ;;  %v3066_v20 = vadd.f32 1.0, %v6144_v5  ;;  %6161 = vpow2.f32 %v5305_v36  ;;  %v5116_v21 = vmul.f32 -1.442695, %v8844_v27  ;;  %v5315_v4 = vmul.f32 -1.442695, %v8854_v50  ;;  %v8873_v5 = vpop.f32.mrb[88].mxu1 }
 0x33e   : > { %v6148_v31 = vpop.eup %6147  ;;  %v8862_v42 = vadd.f32 %v4359_v33, %v4358_v23  ;;  %v4396_v19 = vrot.slane %v4395_v10, 1  ;;  %6163 = vrcp.f32 %v3264_v17  ;;  %v3265_v1 = vadd.f32 1.0, %v6146_v55  ;;  %10659 = vst [vmem:[#allocation37_spill] sm:$0xff] %v8873_v5  ;;  %v8875_v33 = vpop.f32.mrb[128].mxu0 }
 0x33f   : > { %v6150_v16 = vpop.eup %6149  ;;  %6165 = vrcp.f32 %v3066_v20  ;;  %v3067_v22 = vadd.f32 1.0, %v6148_v31  ;;  %v5117_v0 = vmul.f32 -1.442695, %v8858_v58  ;;  %v8871_v23 = vadd.f32 %v10658_v13, %v7896_v56  ;;  %10660 = vst [vmem:[#allocation36_spill] sm:$0xff] %v8875_v33 }
 0x340   : > { %v6152_v38 = vpop.eup %6151  ;;  %v8866_v54 = vadd.f32 %v4396_v19, %v4395_v10  ;;  %v4214_v36 = vmul.f32 %v6150_v16, %v8742_v61  ;;  %6167 = vrcp.f32 %v3265_v1  ;;  %v4006_v31 = vmul.f32 %v6136_v12, %v8721_v30  ;;  %v10661_v10 = vld [vmem:[#allocation53_spill] sm:$0xff]  ;;  %v8883_v61 = vpop.f32.mrb[89].mxu1 }
 0x341   : > { %v6154_v17 = vpop.eup %6153  ;;  %v4016_v55 = vmul.f32 %v6152_v38, %v8747_v46  ;;  %6169 = vrcp.f32 %v3067_v22  ;;  %v8881_v20 = vadd.f32 %v10661_v10, %v8696_v53  ;;  %10662 = vst [vmem:[#allocation39_spill] sm:$0xff] %v8883_v61  ;;  %v8885_v1 = vpop.f32.mrb[129].mxu0  ;;  %v4007_v46 = vmul.f32 %v6140_v59, %v8730_v2 }
 0x342   : > { %10663 = vst [vmem:[#allocation52_spill] sm:$0xff] %v8885_v1  ;;  %v6156_v19 = vpop.eup %6155  ;;  %v4418_v13 = vadd.f32 %v4417_v8, %v4214_v36  ;;  %v4215_v33 = vmul.f32 %v6154_v17, %v8755_v7  ;;  %6171 = vpow2.f32 %v5107_v51  ;;  %v8892_v38 = vpop.f32.mrb[90].mxu1  ;;  %v10664_v1 = vld [vmem:[#allocation54_spill] sm:$0xff]  ;;  %v5324_v2 = vmul.f32 -1.442695, %v8871_v23 }
 0x343   : > { %v6158_v30 = vpop.eup %6157  ;;  %v4472_v22 = vadd.f32 %v4016_v55, %v4006_v31  ;;  %v4017_v12 = vmul.f32 %v6156_v19, %v8763_v45  ;;  %6173 = vpow2.f32 %v5314_v18  ;;  %v8896_v5 = vadd.f32 %v10664_v1, %v7908_v26  ;;  %v8898_v8 = vpop.f32.mrb[130].mxu0 }
 0x344   : > { %v4455_v10 = vadd.f32 %v4454_v57, %v4215_v33  ;;  %v3274_v61 = vadd.f32 1.0, %v6158_v30  ;;  %6175 = vpow2.f32 %v5116_v21  ;;  %v8903_v45 = vadd.f32 %v8401_v3, %v8708_v11  ;;  %v8910_v36 = vpop.f32.mrb[91].mxu1 }
 0x345   : > { %v6160_v7 = vpop.eup %6159  ;;  %v4509_v51 = vadd.f32 %v4017_v12, %v4007_v46  ;;  %6177 = vpow2.f32 %v5315_v4  ;;  %v8907_v21 = vadd.f32 %v8420_v24, %v7896_v56  ;;  %v5126_v18 = vmul.f32 -1.442695, %v8881_v20 }
 0x346   : > { %6179 = vrcp.f32 %v3274_v61  ;;  %v3076_v59 = vadd.f32 1.0, %v6160_v7  ;;  %v5325_v17 = vmul.f32 -1.442695, %v8896_v5  ;;  %v5127_v55 = vmul.f32 -1.442695, %v8903_v45  ;;  %v8915_v61 = vpop.f32.mrb[131].mxu0 }
 0x347   : > { %v6162_v57 = vpop.eup %6161  ;;  %6181 = vpow2.f32 %v5117_v0  ;;  %v5334_v1 = vmul.f32 -1.442695, %v8907_v21  ;;  %v8922_v12 = vadd.f32 %v8426_v52, %v8696_v53 }
 0x348   : > { %v6164_v33 = vpop.eup %6163  ;;  %6183 = vrcp.f32 %v3076_v59  ;;  %v3275_v4 = vadd.f32 1.0, %v6162_v57 }
 0x349   : > { %v6166_v31 = vpop.eup %6165  ;;  %v4224_v3 = vmul.f32 %v6164_v33, %v8783_v41  ;;  %6185 = vpow2.f32 %v5324_v2  ;;  %v8927_v33 = vadd.f32 %v8428_v37, %v7908_v26 }
 0x34a   : > { %v6168_v24 = vpop.eup %6167  ;;  %v4026_v0 = vmul.f32 %v6166_v31, %v8787_v44  ;;  %6187 = vrcp.f32 %v3275_v4 }
 0x34b   : > { %v6170_v19 = vpop.eup %6169  ;;  %v4419_v30 = vadd.f32 %v4418_v13, %v4224_v3  ;;  %v4225_v46 = vmul.f32 %v6168_v24, %v8791_v28  ;;  %6189 = vpow2.f32 %v5126_v18 }
 0x34c   : > { %v6172_v41 = vpop.eup %6171  ;;  %v4473_v7 = vadd.f32 %v4472_v22, %v4026_v0  ;;  %v4027_v2 = vmul.f32 %v6170_v19, %v8795_v14  ;;  %6191 = vpow2.f32 %v5325_v17  ;;  %v5136_v22 = vmul.f32 -1.442695, %v8922_v12  ;;  %v8938_v17 = vpop.f32.mrb[132].mxu0 }
 0x34d   : > { %v6174_v59 = vpop.eup %6173  ;;  %v4456_v57 = vadd.f32 %v4455_v10, %v4225_v46  ;;  %v3077_v44 = vadd.f32 1.0, %v6172_v41  ;;  %6193 = vpow2.f32 %v5127_v55  ;;  %v8934_v14 = vadd.f32 %v8434_v34, %v8708_v11  ;;  %v8936_v10 = vpop.f32.mrb[92].mxu1 }
 0x34e   : > { %v6176_v13 = vpop.eup %6175  ;;  %v8929_v28 = vadd.f32 %v4509_v51, %v4027_v2  ;;  %v3284_v18 = vadd.f32 1.0, %v6174_v59  ;;  %6195 = vpow2.f32 %v5334_v1  ;;  %v5335_v55 = vmul.f32 -1.442695, %v8927_v33  ;;  %v8942_v24 = vpop.f32.mrb[93].mxu1 }
 0x34f   : > { %v6178_v52 = vpop.eup %6177  ;;  %6197 = vrcp.f32 %v3077_v44  ;;  %v3086_v4 = vadd.f32 1.0, %v6176_v13  ;;  %v8944_v34 = vpop.f32.mrb[133].mxu0  ;;  %v5137_v2 = vmul.f32 -1.442695, %v8934_v14  ;;  %v10665_v44 = vld [vmem:[#allocation18_spill] sm:$0xff] }
 0x350   : > { %v6180_v37 = vpop.eup %6179  ;;  %6199 = vrcp.f32 %v3284_v18  ;;  %v3285_v31 = vadd.f32 1.0, %v6178_v52  ;;  %v8950_v13 = vadd.f32 %v10665_v44, %v7896_v56 }
 0x351   : > { %v6182_v51 = vpop.eup %6181  ;;  %v4234_v3 = vmul.f32 %v6180_v37, %v8809_v47  ;;  %6201 = vrcp.f32 %v3086_v4  ;;  %v10666_v37 = vld [vmem:[#allocation38_spill] sm:$0xff] }
 0x352   : > { %v6184_v0 = vpop.eup %6183  ;;  %6203 = vrcp.f32 %v3285_v31  ;;  %v3087_v1 = vadd.f32 1.0, %v6182_v51  ;;  %v5344_v44 = vmul.f32 -1.442695, %v8950_v13 }
 0x353   : > { %v6186_v19 = vpop.eup %6185  ;;  %v4420_v46 = vadd.f32 %v4419_v30, %v4234_v3  ;;  %v4036_v41 = vmul.f32 %v6184_v0, %v8818_v63  ;;  %6205 = vpow2.f32 %v5136_v22  ;;  %v8955_v30 = vadd.f32 %v10666_v37, %v8696_v53  ;;  %v8957_v63 = vpop.f32.mrb[94].mxu1  ;;  %v10668_v3 = vld [vmem:[#allocation55_spill] sm:$0xff] }
 0x354   : > { %v6188_v59 = vpop.eup %6187  ;;  %6207 = vrcp.f32 %v3087_v1  ;;  %v3294_v47 = vadd.f32 1.0, %v6186_v19  ;;  %v8959_v22 = vpop.f32.mrb[134].mxu0  ;;  %v8963_v0 = vadd.f32 %v10668_v3, %v7908_v26 }
 0x355   : > { %v6190_v18 = vpop.eup %6189  ;;  %v4474_v52 = vadd.f32 %v4473_v7, %v4036_v41  ;;  %v4235_v4 = vmul.f32 %v6188_v59, %v8825_v32  ;;  %6209 = vpow2.f32 %v5335_v55  ;;  %10667 = vst [vmem:[#allocation53_spill] sm:$0xff] %v8959_v22  ;;  %v10669_v7 = vld [vmem:[#allocation56_spill] sm:$0xff]  ;;  %v8971_v41 = vadd.f32 %v8472_v43, %v7896_v56 }
 0x356   : > { %v6192_v31 = vpop.eup %6191  ;;  %6211 = vrcp.f32 %v3294_v47  ;;  %v3096_v51 = vadd.f32 1.0, %v6190_v18  ;;  %v8967_v1 = vadd.f32 %v10669_v7, %v8708_v11  ;;  %v5146_v3 = vmul.f32 -1.442695, %v8955_v30 }
 0x357   : > { %v6194_v32 = vpop.eup %6193  ;;  %v4457_v55 = vadd.f32 %v4456_v57, %v4235_v4  ;;  %v3295_v19 = vadd.f32 1.0, %v6192_v31  ;;  %6213 = vpow2.f32 %v5137_v2  ;;  %v8977_v7 = vadd.f32 %v8474_v9, %v8696_v53  ;;  %v8981_v4 = vpop.f32.mrb[95].mxu1 }
 0x358   : > { %v6196_v59 = vpop.eup %6195  ;;  %6215 = vrcp.f32 %v3096_v51  ;;  %v3097_v47 = vadd.f32 1.0, %v6194_v32  ;;  %v5345_v43 = vmul.f32 -1.442695, %v8963_v0  ;;  %10670 = vst [vmem:[#allocation54_spill] sm:$0xff] %v8981_v4  ;;  %v8983_v31 = vpop.f32.mrb[135].mxu0 }
 0x359   : > { %v6198_v18 = vpop.eup %6197  ;;  %6217 = vrcp.f32 %v3295_v19  ;;  %v3304_v37 = vadd.f32 1.0, %v6196_v59  ;;  %10671 = vst [vmem:[#allocation18_spill] sm:$0xff] %v8983_v31  ;;  %v5147_v19 = vmul.f32 -1.442695, %v8967_v1  ;;  %v5354_v59 = vmul.f32 -1.442695, %v8971_v41 }
 0x35a   : > { %v6200_v57 = vpop.eup %6199  ;;  %v4037_v2 = vmul.f32 %v6198_v18, %v8835_v60  ;;  %6219 = vrcp.f32 %v3097_v47  ;;  %v8992_v47 = vadd.f32 %v8477_v25, %v7908_v26 }
 0x35b   : > { %v6202_v51 = vpop.eup %6201  ;;  %v4244_v32 = vmul.f32 %v6200_v57, %v8840_v29  ;;  %6221 = vrcp.f32 %v3304_v37  ;;  %v5156_v29 = vmul.f32 -1.442695, %v8977_v7 }
 0x35c   : > { %v6204_v9 = vpop.eup %6203  ;;  %v4511_v16 = vadd.f32 %v8929_v28, %v4037_v2  ;;  %v4046_v60 = vmul.f32 %v6202_v51, %v8844_v27  ;;  %6223 = vpow2.f32 %v5344_v44  ;;  %v8998_v28 = vadd.f32 %v8479_v6, %v8708_v11  ;;  %v9009_v2 = vpop.f32.mrb[96].mxu1 }
 0x35d   : > { %v6206_v18 = vpop.eup %6205  ;;  %v4421_v31 = vadd.f32 %v4420_v46, %v4244_v32  ;;  %v4245_v4 = vmul.f32 %v6204_v9, %v8854_v50  ;;  %6225 = vpow2.f32 %v5146_v3  ;;  %v9003_v46 = vadd.f32 %v8487_v15, %v7896_v56  ;;  %v9011_v6 = vpop.f32.mrb[136].mxu0 }
 0x35e   : > { %v6208_v37 = vpop.eup %6207  ;;  %v4475_v57 = vadd.f32 %v4474_v52, %v4046_v60  ;;  %v3106_v22 = vadd.f32 1.0, %v6206_v18  ;;  %6227 = vpow2.f32 %v5345_v43  ;;  %v9007_v52 = vadd.f32 %v8489_v49, %v8696_v53  ;;  %v9015_v15 = vpop.f32.mrb[97].mxu1 }
 0x35f   : > { %v6210_v27 = vpop.eup %6209  ;;  %v4458_v44 = vadd.f32 %v4457_v55, %v4245_v4  ;;  %v4047_v25 = vmul.f32 %v6208_v37, %v8858_v58  ;;  %6229 = vpow2.f32 %v5147_v19  ;;  %v5355_v4 = vmul.f32 -1.442695, %v8992_v47  ;;  %v9017_v51 = vpop.f32.mrb[137].mxu0 }
 0x360   : > { %v6212_v50 = vpop.eup %6211  ;;  %6231 = vrcp.f32 %v3106_v22  ;;  %v3305_v3 = vadd.f32 1.0, %v6210_v27  ;;  %10672 = vst [vmem:[#allocation38_spill] sm:$0xff] %v9017_v51  ;;  %v5157_v49 = vmul.f32 -1.442695, %v8998_v28  ;;  %v5166_v18 = vmul.f32 -1.442695, %v9007_v52 }
 0x361   : > { %v6214_v43 = vpop.eup %6213  ;;  %v4512_v55 = vadd.f32 %v4511_v16, %v4047_v25  ;;  %v4254_v58 = vmul.f32 %v6212_v50, %v8871_v23  ;;  %6233 = vpow2.f32 %v5354_v59  ;;  %v5364_v16 = vmul.f32 -1.442695, %v9003_v46  ;;  %v9024_v37 = vpop.f32.mrb[98].mxu1 }
 0x362   : > { %v6216_v22 = vpop.eup %6215  ;;  %6235 = vrcp.f32 %v3305_v3  ;;  %v3107_v32 = vadd.f32 1.0, %v6214_v43  ;;  %10673 = vst [vmem:[#allocation55_spill] sm:$0xff] %v9024_v37  ;;  %v9026_v27 = vpop.f32.mrb[138].mxu0  ;;  %v10714_v37 = vld [vmem:[#allocation45_spill] sm:$0xff] }
 0x363   : > { %v6218_v19 = vpop.eup %6217  ;;  %v4422_v9 = vadd.f32 %v4421_v31, %v4254_v58  ;;  %v4056_v60 = vmul.f32 %v6216_v22, %v8881_v20  ;;  %6237 = vpow2.f32 %v5156_v29  ;;  %10674 = vst [vmem:[#allocation56_spill] sm:$0xff] %v9026_v27  ;;  %v10675_v20 = vld [vmem:[#allocation21_spill] sm:$0xff]  ;;  %v9034_v58 = vpop.f32.mrb[99].mxu1  ;;  %v9222_v51 = vadd.f32 %v10714_v37, %v8708_v11 }
 0x364   : > { %v6220_v23 = vpop.eup %6219  ;;  %v4255_v59 = vmul.f32 %v6218_v19, %v8896_v5  ;;  %6239 = vrcp.f32 %v3107_v32  ;;  %v9031_v31 = vadd.f32 %v10675_v20, %v7908_v26  ;;  %10676 = vst [vmem:[#allocation21_spill] sm:$0xff] %v9034_v58 }
 0x365   : > { %v6222_v25 = vpop.eup %6221  ;;  %v4476_v50 = vadd.f32 %v4475_v57, %v4056_v60  ;;  %v4057_v3 = vmul.f32 %v6220_v23, %v8903_v45  ;;  %6241 = vpow2.f32 %v5355_v4  ;;  %v10677_v57 = vld [vmem:[#allocation20_spill] sm:$0xff] }
 0x366   : > { %v6224_v29 = vpop.eup %6223  ;;  %v4459_v43 = vadd.f32 %v4458_v44, %v4255_v59  ;;  %v4264_v5 = vmul.f32 %v6222_v25, %v8907_v21  ;;  %6243 = vpow2.f32 %v5157_v49  ;;  %v9038_v60 = vadd.f32 %v10677_v57, %v8708_v11  ;;  %v9047_v25 = vpop.f32.mrb[139].mxu0 }
 0x367   : > { %v6226_v22 = vpop.eup %6225  ;;  %v4513_v32 = vadd.f32 %v4512_v55, %v4057_v3  ;;  %v3314_v19 = vadd.f32 1.0, %v6224_v29  ;;  %6245 = vpow2.f32 %v5364_v16  ;;  %v9044_v44 = vadd.f32 %v8543_v39, %v7896_v56  ;;  %10678 = vst [vmem:[#allocation20_spill] sm:$0xff] %v9047_v25 }
 0x368   : > { %v6228_v45 = vpop.eup %6227  ;;  %v9040_v4 = vadd.f32 %v4422_v9, %v4264_v5  ;;  %v3116_v23 = vadd.f32 1.0, %v6226_v22  ;;  %6247 = vpow2.f32 %v5166_v18  ;;  %v5365_v55 = vmul.f32 -1.442695, %v9031_v31 }
 0x369   : > { %v6230_v21 = vpop.eup %6229  ;;  %6249 = vrcp.f32 %v3314_v19  ;;  %v3315_v49 = vadd.f32 1.0, %v6228_v45  ;;  %v5167_v18 = vmul.f32 -1.442695, %v9038_v60  ;;  %v5374_v29 = vmul.f32 -1.442695, %v9044_v44 }
 0x36a   : > { %v6232_v59 = vpop.eup %6231  ;;  %6251 = vrcp.f32 %v3116_v23  ;;  %v3117_v16 = vadd.f32 1.0, %v6230_v21  ;;  %v9055_v57 = vadd.f32 %v8545_v35, %v8696_v53  ;;  %v9059_v23 = vadd.f32 %v8551_v40, %v7908_v26  ;;  %v10679_v21 = vld [vmem:[#allocation25_spill] sm:$0xff] }
 0x36b   : > { %v6234_v3 = vpop.eup %6233  ;;  %v4066_v9 = vmul.f32 %v6232_v59, %v8922_v12  ;;  %6253 = vrcp.f32 %v3315_v49  ;;  %v9063_v49 = vadd.f32 %v10679_v21, %v8708_v11 }
 0x36c   : > { %v6236_v20 = vpop.eup %6235  ;;  %6255 = vrcp.f32 %v3117_v16  ;;  %v3324_v39 = vadd.f32 1.0, %v6234_v3  ;;  %v5176_v21 = vmul.f32 -1.442695, %v9055_v57 }
 0x36d   : > { %v6238_v5 = vpop.eup %6237  ;;  %v4477_v22 = vadd.f32 %v4476_v50, %v4066_v9  ;;  %v4265_v19 = vmul.f32 %v6236_v20, %v8927_v33  ;;  %6257 = vpow2.f32 %v5365_v55  ;;  %v10680_v55 = vld [vmem:[#allocation23_spill] sm:$0xff]  ;;  %v10682_v20 = vld [vmem:[#allocation13_spill] sm:$0xff] }
 0x36e   : > { %v6240_v45 = vpop.eup %6239  ;;  %6259 = vrcp.f32 %v3324_v39  ;;  %v3126_v12 = vadd.f32 1.0, %v6238_v5  ;;  %v9068_v35 = vadd.f32 %v10680_v55, %v7896_v56  ;;  %v10681_v9 = vld [vmem:[#allocation27_spill] sm:$0xff]  ;;  %v9076_v39 = vadd.f32 %v10682_v20, %v7908_v26  ;;  %v9081_v56 = vpop.f32.mrb[140].mxu0 }
 0x36f   : > { %v6242_v59 = vpop.eup %6241  ;;  %v4460_v50 = vadd.f32 %v4459_v43, %v4265_v19  ;;  %v4067_v33 = vmul.f32 %v6240_v45, %v8934_v14  ;;  %6261 = vpow2.f32 %v5167_v18  ;;  %v9072_v40 = vadd.f32 %v10681_v9, %v8696_v53  ;;  %v9079_v18 = vpop.f32.mrb[100].mxu1  ;;  %10684 = vst [vmem:[#allocation23_spill] sm:$0xff] %v9081_v56 }
 0x370   : > { %v6244_v16 = vpop.eup %6243  ;;  %6263 = vrcp.f32 %v3126_v12  ;;  %v3325_v3 = vadd.f32 1.0, %v6242_v59  ;;  %v945_v14 = vsub.s32 6, %v10617_v62  ;;  %10683 = vst [vmem:[#allocation25_spill] sm:$0xff] %v9079_v18  ;;  %v9084_v59 = vpop.f32.mrb[101].mxu1 }
 0x371   : > { %v6246_v5 = vpop.eup %6245  ;;  %v4514_v43 = vadd.f32 %v4513_v32, %v4067_v33  ;;  %v3127_v19 = vadd.f32 1.0, %v6244_v16  ;;  %6265 = vpow2.f32 %v5374_v29  ;;  %10685 = vst [vmem:[#allocation27_spill] sm:$0xff] %v9084_v59  ;;  %v5375_v32 = vmul.f32 -1.442695, %v9059_v23  ;;  %v9088_v33 = vpop.f32.mrb[141].mxu0 }
 0x372   : > { %v6248_v45 = vpop.eup %6247  ;;  %6267 = vrcp.f32 %v3325_v3  ;;  %v3334_v12 = vadd.f32 1.0, %v6246_v5  ;;  %v5177_v29 = vmul.f32 -1.442695, %v9063_v49  ;;  %10686 = vst [vmem:[#allocation13_spill] sm:$0xff] %v9088_v33  ;;  %v5384_v3 = vmul.f32 -1.442695, %v9068_v35 }
 0x373   : > { %v6250_v55 = vpop.eup %6249  ;;  %6269 = vrcp.f32 %v3127_v19  ;;  %v3136_v26 = vadd.f32 1.0, %v6248_v45  ;;  %v5186_v20 = vmul.f32 -1.442695, %v9072_v40  ;;  %v5385_v19 = vmul.f32 -1.442695, %v9076_v39  ;;  %v9098_v56 = vpop.f32.mrb[102].mxu1 }
 0x374   : > { %v6252_v16 = vpop.eup %6251  ;;  %v4274_v9 = vmul.f32 %v6250_v55, %v8950_v13  ;;  %6271 = vrcp.f32 %v3334_v12  ;;  %v9096_v45 = vrot.slane %v8693_v48, %v945_v14  ;;  %10687 = vst [vmem:[#allocation63_spill] sm:$0xff] %v9098_v56  ;;  %v9100_v33 = vpop.f32.mrb[142].mxu0  ;;  %v10689_v55 = vld [vmem:[#allocation24_spill] sm:$0xff]  ;;  %v949_v48 = vsub.s32 7, %v10617_v62 }
 0x375   : > { %v6254_v5 = vpop.eup %6253  ;;  %v4076_v59 = vmul.f32 %v6252_v16, %v8955_v30  ;;  %6273 = vrcp.f32 %v3136_v26  ;;  %10688 = vst [vmem:[#allocation64_spill] sm:$0xff] %v9100_v33  ;;  %v9106_v25 = vadd.f32 %v10689_v55, %v8708_v11  ;;  %v9110_v14 = vpop.f32.mrb[103].mxu1 }
 0x376   : > { %v6256_v18 = vpop.eup %6255  ;;  %v4424_v13 = vadd.f32 %v9040_v4, %v4274_v9  ;;  %v4275_v12 = vmul.f32 %v6254_v5, %v8963_v0  ;;  %6275 = vpow2.f32 %v5176_v21  ;;  %10690 = vst [vmem:[#allocation24_spill] sm:$0xff] %v9110_v14  ;;  %v10691_v0 = vld [vmem:[#allocation15_spill] sm:$0xff]  ;;  %v9116_v21 = vpop.f32.mrb[143].mxu0 }
 0x377   : > { %v6258_v30 = vpop.eup %6257  ;;  %v4478_v26 = vadd.f32 %v4477_v22, %v4076_v59  ;;  %v4077_v16 = vmul.f32 %v6256_v18, %v8967_v1  ;;  %6277 = vpow2.f32 %v5375_v32  ;;  %v9114_v4 = vadd.f32 %v10691_v0, %v8696_v53  ;;  %10692 = vst [vmem:[#allocation15_spill] sm:$0xff] %v9116_v21  ;;  %v10693_v1 = vld [vmem:[#allocation26_spill] sm:$0xff] }
 0x378   : > { %v6260_v33 = vpop.eup %6259  ;;  %v4461_v56 = vadd.f32 %v4460_v50, %v4275_v12  ;;  %v3335_v58 = vadd.f32 1.0, %v6258_v30  ;;  %6279 = vpow2.f32 %v5177_v29  ;;  %v9121_v18 = vadd.f32 %v10693_v1, %v9096_v45  ;;  %v10694_v29 = vld [vmem:[#allocation41_spill] sm:$0xff] }
 0x379   : > { %v6262_v9 = vpop.eup %6261  ;;  %v4515_v5 = vadd.f32 %v4514_v43, %v4077_v16  ;;  %v4284_v22 = vmul.f32 %v6260_v33, %v8971_v41  ;;  %6281 = vpow2.f32 %v5384_v3  ;;  %v5187_v32 = vmul.f32 -1.442695, %v9106_v25  ;;  %v6982_v41 = vld [vmem:[#allocation8] sm:$0xff] }
 0x37a   : > { %v6264_v59 = vpop.eup %6263  ;;  %6283 = vrcp.f32 %v3335_v58  ;;  %v3137_v50 = vadd.f32 1.0, %v6262_v9  ;;  %v9126_v12 = vadd.f32 %v10694_v29, %v8708_v11  ;;  %v9129_v33 = vrot.slane %v6982_v41, %v949_v48 }
 0x37b   : > { %v6266_v55 = vpop.eup %6265  ;;  %v4425_v30 = vadd.f32 %v4424_v13, %v4284_v22  ;;  %v4086_v43 = vmul.f32 %v6264_v59, %v8977_v7  ;;  %6285 = vpow2.f32 %v5186_v20  ;;  %v5196_v58 = vmul.f32 -1.442695, %v9114_v4  ;;  %v10695_v59 = vld [vmem:[#allocation40_spill] sm:$0xff] }
 0x37c   : > { %v6268_v3 = vpop.eup %6267  ;;  %6287 = vrcp.f32 %v3137_v50  ;;  %v3344_v16 = vadd.f32 1.0, %v6266_v55  ;;  %v5078_v29 = vmul.f32 -1.442695, %v9121_v18  ;;  %v5197_v7 = vmul.f32 -1.442695, %v9126_v12 }
 0x37d   : > { %v6270_v0 = vpop.eup %6269  ;;  %v4479_v9 = vadd.f32 %v4478_v26, %v4086_v43  ;;  %v4285_v1 = vmul.f32 %v6268_v3, %v8992_v47  ;;  %6289 = vpow2.f32 %v5385_v19  ;;  %v9139_v50 = vadd.f32 %v10695_v59, %v9129_v33  ;;  %v9141_v26 = vpop.f32.mrb[104].mxu1 }
 0x37e   : > { %v6272_v21 = vpop.eup %6271  ;;  %v4087_v13 = vmul.f32 %v6270_v0, %v8998_v28  ;;  %6291 = vrcp.f32 %v3344_v16  ;;  %10696 = vst [vmem:[#allocation26_spill] sm:$0xff] %v9141_v26  ;;  %v9143_v47 = vpop.f32.mrb[144].mxu0 }
 0x37f   : > { %v6274_v20 = vpop.eup %6273  ;;  %v4462_v48 = vadd.f32 %v4461_v56, %v4285_v1  ;;  %v4294_v22 = vmul.f32 %v6272_v21, %v9003_v46  ;;  %6293 = vpow2.f32 %v5187_v32  ;;  %10697 = vst [vmem:[#allocation41_spill] sm:$0xff] %v9143_v47  ;;  %v9146_v43 = vpop.f32.mrb[105].mxu1  ;;  %v10700_v32 = vld [vmem:[#allocation43_spill] sm:$0xff] }
 0x380   : > { %v6276_v19 = vpop.eup %6275  ;;  %v4516_v55 = vadd.f32 %v4515_v5, %v4087_v13  ;;  %v4096_v28 = vmul.f32 %v6274_v20, %v9007_v52  ;;  %6295 = vpow2.f32 %v5196_v58  ;;  %10698 = vst [vmem:[#allocation40_spill] sm:$0xff] %v9146_v43  ;;  %v9148_v41 = vpop.f32.mrb[145].mxu0  ;;  %v9152_v3 = vadd.f32 %v10700_v32, %v8696_v53  ;;  %v10701_v13 = vld [vmem:[#allocation42_spill] sm:$0xff] }
 0x381   : > { %10699 = vst [vmem:[#allocation65_spill] sm:$0xff] %v9148_v41  ;;  %v6278_v56 = vpop.eup %6277  ;;  %v4426_v46 = vadd.f32 %v4425_v30, %v4294_v22  ;;  %v3146_v21 = vadd.f32 1.0, %v6276_v19  ;;  %6297 = vpow2.f32 %v5078_v29  ;;  %v5079_v58 = vmul.f32 -1.442695, %v9139_v50  ;;  %v9163_v19 = vpop.f32.mrb[106].mxu1 }
 0x382   : > { %v6280_v16 = vpop.eup %6279  ;;  %v9154_v0 = vadd.f32 %v4479_v9, %v4096_v28  ;;  %v3345_v1 = vadd.f32 1.0, %v6278_v56  ;;  %6299 = vpow2.f32 %v5197_v7  ;;  %v9159_v20 = vadd.f32 %v10701_v13, %v9096_v45  ;;  %10702 = vst [vmem:[#allocation43_spill] sm:$0xff] %v9163_v19  ;;  %v9165_v56 = vpop.f32.mrb[146].mxu0 }
 0x383   : > { %v6282_v5 = vpop.eup %6281  ;;  %6301 = vrcp.f32 %v3146_v21  ;;  %v3147_v52 = vadd.f32 1.0, %v6280_v16  ;;  %v5206_v9 = vmul.f32 -1.442695, %v9152_v3  ;;  %10703 = vst [vmem:[#allocation42_spill] sm:$0xff] %v9165_v56  ;;  %v7140_v13 = vmov 1966171168  }
 0x384   : > { %v6284_v30 = vpop.eup %6283  ;;  %6303 = vrcp.f32 %v3345_v1  ;;  %v3354_v29 = vadd.f32 1.0, %v6282_v5  ;;  %v5088_v1 = vmul.f32 -1.442695, %v9159_v20 }
 0x385   : > { %v6286_v22 = vpop.eup %6285  ;;  %v4295_v59 = vmul.f32 %v6284_v30, %v9031_v31  ;;  %6305 = vrcp.f32 %v3147_v52  ;;  %v9169_v31 = vunpack.c.l.s4 %v7140_v13  ;;  %v10704_v30 = vld [vmem:[#allocation28_spill] sm:$0xff] }
 0x386   : > { %v6288_v7 = vpop.eup %6287  ;;  %6307 = vrcp.f32 %v3354_v29  ;;  %v3156_v28 = vadd.f32 1.0, %v6286_v22  ;;  %v9173_v19 = vadd.f32 %v10704_v30, %v8708_v11 }
 0x387   : > { %v6290_v21 = vpop.eup %6289  ;;  %v4463_v32 = vadd.f32 %v4462_v48, %v4295_v59  ;;  %v4097_v16 = vmul.f32 %v6288_v7, %v9038_v60  ;;  %6309 = vpow2.f32 %v5079_v58  ;;  %v10705_v60 = vld [vmem:[#allocation44_spill] sm:$0xff]  ;;  %v9180_v58 = vpop.f32.mrb[107].mxu1 }
 0x388   : > { %v6292_v5 = vpop.eup %6291  ;;  %6311 = vrcp.f32 %v3156_v28  ;;  %v3355_v52 = vadd.f32 1.0, %v6290_v21  ;;  %v9178_v48 = vadd.f32 %v10705_v60, %v9129_v33  ;;  %10706 = vst [vmem:[#allocation28_spill] sm:$0xff] %v9180_v58  ;;  %v9182_v59 = vpop.f32.mrb[147].mxu0  ;;  %v10708_v21 = vld [vmem:[#allocation29_spill] sm:$0xff]  ;;  %v10710_v58 = vld [vmem:[#allocation32_spill] sm:$0xff] }
 0x389   : > { %v6294_v29 = vpop.eup %6293  ;;  %v4517_v22 = vadd.f32 %v4516_v55, %v4097_v16  ;;  %v4304_v56 = vmul.f32 %v6292_v5, %v9044_v44  ;;  %6313 = vpow2.f32 %v5206_v9  ;;  %10707 = vst [vmem:[#allocation44_spill] sm:$0xff] %v9182_v59  ;;  %v9186_v13 = vadd.f32 %v10708_v21, %v8696_v53  ;;  %v10709_v55 = vld [vmem:[#allocation30_spill] sm:$0xff] }
 0x38a   : > { %v6296_v7 = vpop.eup %6295  ;;  %6315 = vrcp.f32 %v3355_v52  ;;  %v3157_v28 = vadd.f32 1.0, %v6294_v29  ;;  %v9190_v16 = vadd.f32 %v10709_v55, %v9096_v45  ;;  %v5207_v59 = vmul.f32 -1.442695, %v9173_v19 }
 0x38b   : > { %v6298_v44 = vpop.eup %6297  ;;  %v4427_v9 = vadd.f32 %v4426_v46, %v4304_v56  ;;  %v3166_v5 = vadd.f32 1.0, %v6296_v7  ;;  %6317 = vpow2.f32 %v5088_v1  ;;  %v5089_v21 = vmul.f32 -1.442695, %v9178_v48  ;;  %v10711_v7 = vld [vmem:[#allocation14_spill] sm:$0xff] }
 0x38c   : > { %v6300_v30 = vpop.eup %6299  ;;  %6319 = vrcp.f32 %v3157_v28  ;;  %v9197_v41 = vadd.f32 %v10710_v58, %v8708_v11  ;;  %v5216_v56 = vmul.f32 -1.442695, %v9186_v13  ;;  %v5098_v1 = vmul.f32 -1.442695, %v9190_v16  ;;  %v10713_v58 = vld [vmem:[#allocation57_spill] sm:$0xff] }
 0x38d   : > { %v6302_v52 = vpop.eup %6301  ;;  %6321 = vrcp.f32 %v3166_v5  ;;  %v3167_v29 = vadd.f32 1.0, %v6300_v30  ;;  %v9204_v28 = vadd.f32 %v10711_v7, %v9129_v33  ;;  %v10712_v30 = vld [vmem:[#allocation31_spill] sm:$0xff]  ;;  %v9213_v47 = vadd.f32 %v10713_v58, %v9096_v45 }
 0x38e   : > { %v6304_v55 = vpop.eup %6303  ;;  %v4106_v46 = vmul.f32 %v6302_v52, %v9055_v57  ;;  %v9209_v43 = vadd.f32 %v10712_v30, %v8696_v53  ;;  %v3048_v14 = vadd.f32 1.0, %v6298_v44 }
 0x38f   : > { %v6306_v60 = vpop.eup %6305  ;;  %v4305_v5 = vmul.f32 %v6304_v55, %v9059_v23  ;;  %6323 = vrcp.f32 %v3167_v29  ;;  %v5217_v29 = vmul.f32 -1.442695, %v9197_v41  ;;  %v5099_v58 = vmul.f32 -1.442695, %v9204_v28 }
 0x390   : > { %v6308_v57 = vpop.eup %6307  ;;  %v4481_v52 = vadd.f32 %v9154_v0, %v4106_v46  ;;  %v4107_v26 = vmul.f32 %v6306_v60, %v9063_v49  ;;  %6325 = vpow2.f32 %v5207_v59  ;;  %v9224_v0 = vpop.f32.mrb[108].mxu1  ;;  %v5226_v44 = vmul.f32 -1.442695, %v9209_v43 }
 0x391   : > { %v6310_v7 = vpop.eup %6309  ;;  %v4464_v27 = vadd.f32 %v4463_v32, %v4305_v5  ;;  %v4314_v23 = vmul.f32 %v6308_v57, %v9068_v35  ;;  %6327 = vpow2.f32 %v5089_v21  ;;  %v9226_v49 = vpop.f32.mrb[148].mxu0  ;;  %v5108_v46 = vmul.f32 -1.442695, %v9213_v47 }
 0x392   : > { %v6312_v55 = vpop.eup %6311  ;;  %v4518_v30 = vadd.f32 %v4517_v22, %v4107_v26  ;;  %6329 = vpow2.f32 %v5216_v56  ;;  %10715 = vst [vmem:[#allocation29_spill] sm:$0xff] %v9226_v49  ;;  %v9230_v60 = vpop.f32.mrb[109].mxu1  ;;  %v3049_v21 = vadd.f32 1.0, %v6310_v7 }
 0x393   : > { %v6314_v59 = vpop.eup %6313  ;;  %v4428_v32 = vadd.f32 %v4427_v9, %v4314_v23  ;;  %v4116_v35 = vmul.f32 %v6312_v55, %v9072_v40  ;;  %6331 = vpow2.f32 %v5098_v1  ;;  %10716 = vst [vmem:[#allocation30_spill] sm:$0xff] %v9230_v60  ;;  %v9232_v26 = vpop.f32.mrb[149].mxu0 }
 0x394   : > { %10717 = vst [vmem:[#allocation32_spill] sm:$0xff] %v9232_v26  ;;  %v6316_v22 = vpop.eup %6315  ;;  %6333 = vrcp.f32 %v3048_v14  ;;  %v3176_v37 = vadd.f32 1.0, %v6314_v59  ;;  %v9235_v56 = vpop.f32.mrb[110].mxu1  ;;  %v5227_v26 = vmul.f32 -1.442695, %v9222_v51  ;;  %v10720_v14 = vld [vmem:[#allocation58_spill] sm:$0xff] }
 0x395   : > { %10718 = vst [vmem:[#allocation14_spill] sm:$0xff] %v9235_v56  ;;  %v9237_v5 = vpop.f32.mrb[150].mxu0  ;;  %v6318_v9 = vpop.eup %6317  ;;  %v4429_v57 = vrot.slane %v4428_v32, 4  ;;  %v4482_v40 = vadd.f32 %v4481_v52, %v4116_v35  ;;  %v4315_v1 = vmul.f32 %v6316_v22, %v9076_v39  ;;  %6335 = vpow2.f32 %v5217_v29  ;;  %v10721_v39 = vld [vmem:[#allocation33_spill] sm:$0xff] }
 0x396   : > { %10719 = vst [vmem:[#allocation31_spill] sm:$0xff] %v9237_v5  ;;  %v6320_v23 = vpop.eup %6319  ;;  %6337 = vrcp.f32 %v3176_v37  ;;  %v3058_v55 = vadd.f32 1.0, %v6318_v9  ;;  %v9243_v7 = vadd.f32 %v10720_v14, %v9129_v33  ;;  %v9249_v29 = vadd.f32 %v10721_v39, %v8696_v53  ;;  %v10722_v35 = vld [vmem:[#allocation17_spill] sm:$0xff]  ;;  %v9255_v37 = vpop.f32.mrb[111].mxu1 }
 0x397   : > { %v6322_v59 = vpop.eup %6321  ;;  %v4430_v60 = vadd.f32 %v4429_v57, %v4428_v32  ;;  %v4465_v56 = vadd.f32 %v4464_v27, %v4315_v1  ;;  %v4117_v5 = vmul.f32 %v6320_v23, %v9106_v25  ;;  %6339 = vpow2.f32 %v5099_v58  ;;  %10723 = vst [vmem:[#allocation57_spill] sm:$0xff] %v9255_v37  ;;  %v9257_v9 = vpop.f32.mrb[151].mxu0  ;;  %v10725_v23 = vld [vmem:[#allocation46_spill] sm:$0xff] }
 0x398   : > { %v4126_v52 = vmul.f32 %v6322_v59, %v9114_v4  ;;  %6341 = vrcp.f32 %v3058_v55  ;;  %v9253_v22 = vadd.f32 %v10722_v35, %v9096_v45  ;;  %10724 = vst [vmem:[#allocation45_spill] sm:$0xff] %v9257_v9  ;;  %v9262_v55 = vadd.f32 %v10725_v23, %v8708_v11  ;;  %v10731_v23 = vld [vmem:[#allocation48_spill] sm:$0xff] }
 0x399   : > { %v6324_v32 = vpop.eup %6323  ;;  %v4431_v27 = vrot.slane %v4430_v60, 2  ;;  %v4466_v57 = vrot.slane %v4465_v56, 4  ;;  %v4519_v25 = vadd.f32 %v4518_v30, %v4117_v5  ;;  %6343 = vrcp.f32 %v3049_v21 }
 0x39a   : > { %v6326_v58 = vpop.eup %6325  ;;  %v4483_v4 = vadd.f32 %v4482_v40, %v4126_v52  ;;  %v4127_v1 = vmul.f32 %v6324_v32, %v9126_v12  ;;  %6345 = vpow2.f32 %v5226_v44  ;;  %v5109_v30 = vmul.f32 -1.442695, %v9243_v7  ;;  %v9273_v32 = vpop.f32.mrb[152].mxu0 }
 0x39b   : > { %v6328_v14 = vpop.eup %6327  ;;  %v4432_v59 = vadd.f32 %v4431_v27, %v4430_v60  ;;  %v4467_v39 = vadd.f32 %v4466_v57, %v4465_v56  ;;  %v3177_v35 = vadd.f32 1.0, %v6326_v58  ;;  %6347 = vpow2.f32 %v5108_v46  ;;  %10728 = vst [vmem:[#allocation33_spill] sm:$0xff] %v9273_v32 }
 0x39c   : > { %v6330_v9 = vpop.eup %6329  ;;  %v9264_v37 = vadd.f32 %v4519_v25, %v4127_v1  ;;  %v3059_v49 = vadd.f32 1.0, %v6328_v14  ;;  %6349 = vpow2.f32 %v5227_v26  ;;  %v10726_v52 = vunpack.c.0.s8 %v9169_v31  ;;  %v9275_v26 = vpop.f32.mrb[112].mxu1  ;;  %v10730_v1 = vld [vmem:[#allocation47_spill] sm:$0xff] }
 0x39d   : > { %v6332_v21 = vpop.eup %6331  ;;  %v4433_v5 = vrot.slane %v4432_v59, 1  ;;  %v4468_v12 = vrot.slane %v4467_v39, 2  ;;  %6351 = vrcp.f32 %v3177_v35  ;;  %v3186_v44 = vadd.f32 1.0, %v6330_v9  ;;  %10729 = vst [vmem:[#allocation17_spill] sm:$0xff] %v9275_v26  ;;  %v9295_v32 = vpop.f32.mrb[113].mxu1 }
 0x39e   : > { %v6334_v40 = vpop.eup %6333  ;;  %v9270_v60 = vsub.s32 %v10726_v52, %v10617_v62  ;;  %6353 = vrcp.f32 %v3059_v49  ;;  %v3068_v46 = vadd.f32 1.0, %v6332_v21  ;;  %v5236_v56 = vmul.f32 -1.442695, %v9249_v29  ;;  %10733 = vst [vmem:[#allocation46_spill] sm:$0xff] %v9295_v32 }
 0x39f   : > { %v6336_v27 = vpop.eup %6335  ;;  %v4469_v57 = vadd.f32 %v4468_v12, %v4467_v39  ;;  %6355 = vrcp.f32 %v3186_v44  ;;  %v5118_v25 = vmul.f32 -1.442695, %v9253_v22  ;;  %v5237_v9 = vmul.f32 -1.442695, %v9262_v55  ;;  %v9288_v12 = vpop.f32.mrb[153].mxu0 }
 0x3a0   : > { %10727 = vst [vmem:[#allocation58_spill] sm:$0xff] %v9270_v60  ;;  %v6338_v58 = vpop.eup %6337  ;;  %6357 = vrcp.f32 %v3068_v46  ;;  %v3187_v31 = vadd.f32 1.0, %v6336_v27  ;;  %v9281_v49 = vadd.f32 %v10730_v1, %v9129_v33  ;;  %v9285_v14 = vadd.f32 %v10731_v23, %v8696_v53  ;;  %v10732_v1 = vld [vmem:[#allocation49_spill] sm:$0xff] }
 0x3a1   : > { %v6340_v35 = vpop.eup %6339  ;;  %v4434_v21 = vadd.f32 %v4433_v5, %v4432_v59  ;;  %v4470_v52 = vrot.slane %v4469_v57, 1  ;;  %v4136_v39 = vmul.f32 %v6338_v58, %v9152_v3  ;;  %6359 = vpow2.f32 %v5109_v30 }
 0x3a2   : > { %v6342_v44 = vpop.eup %6341  ;;  %v4008_v46 = vmul.f32 %v6334_v40, %v9121_v18  ;;  %6361 = vrcp.f32 %v3187_v31  ;;  %v3069_v27 = vadd.f32 1.0, %v6340_v35  ;;  %v9293_v26 = vadd.f32 %v10732_v1, %v9096_v45  ;;  %v10734_v40 = vld [vmem:[#allocation59_spill] sm:$0xff]  ;;  %v9304_v31 = vpop.f32.mrb[154].mxu0 }
 0x3a3   : > { %v6344_v23 = vpop.eup %6343  ;;  %v4471_v62 = vadd.f32 %v4470_v52, %v4469_v57  ;;  %v4484_v59 = vadd.f32 %v4483_v4, %v4136_v39  ;;  %v4018_v5 = vmul.f32 %v6342_v44, %v9159_v20  ;;  %6363 = vpow2.f32 %v5236_v56  ;;  %v10735_v52 = vld [vmem:[#allocation60_spill] sm:$0xff] }
 0x3a4   : > { %v6346_v3 = vpop.eup %6345  ;;  %6365 = vrcp.f32 %v3069_v27  ;;  %v5119_v30 = vmul.f32 -1.442695, %v9281_v49  ;;  %v5246_v18 = vmul.f32 -1.442695, %v9285_v14  ;;  %v9302_v58 = vadd.f32 %v10734_v40, %v8708_v11 }
 0x3a5   : > { %v6348_v35 = vpop.eup %6347  ;;  %v4705_v1 = vcombine.low %v4434_v21, %v4471_v62  ;;  %v4546_v32 = vadd.f32 %v4018_v5, %v4008_v46  ;;  %v3196_v57 = vadd.f32 1.0, %v6346_v3  ;;  %6367 = vpow2.f32 %v5118_v25  ;;  %v9320_v21 = vpop.f32.mrb[114].mxu1  ;;  %v10739_v3 = vld [vmem:[#allocation35_spill] sm:$0xff] }
 0x3a6   : > { %v6350_v4 = vpop.eup %6349  ;;  %v3078_v20 = vadd.f32 1.0, %v6348_v35  ;;  %6369 = vpow2.f32 %v5237_v9  ;;  %v5128_v56 = vmul.f32 -1.442695, %v9293_v26  ;;  %v9309_v39 = vadd.f32 %v10735_v52, %v9129_v33  ;;  %v9334_v52 = vpop.f32.mrb[115].mxu1 }
 0x3a7   : > { %v6352_v44 = vpop.eup %6351  ;;  %v10736_v27 = vcombine.low %v8862_v42, %v8866_v54  ;;  %v9318_v62 = vrot.slane %v4705_v1, %v9270_v60  ;;  %6371 = vrcp.f32 %v3196_v57  ;;  %v3197_v25 = vadd.f32 1.0, %v6350_v4  ;;  %v9332_v4 = vpop.f32.mrb[155].mxu0 }
 0x3a8   : > { %v6354_v9 = vpop.eup %6353  ;;  %v4137_v46 = vmul.f32 %v6352_v44, %v9173_v19  ;;  %6373 = vrcp.f32 %v3078_v20  ;;  %v5247_v5 = vmul.f32 -1.442695, %v9302_v58  ;;  %v9326_v35 = vadd.f32 %v10739_v3, %v8696_v53 }
 0x3a9   : > { %v9315_v40 = vrot.slane %v10736_v27, %v9270_v60  ;;  %10738 = vst [vmem:[#allocation48_spill] sm:$0xff] %v9318_v62  ;;  %v6356_v42 = vpop.eup %6355  ;;  %v4009_v1 = vmul.f32 %v6344_v23, %v9139_v50  ;;  %v4019_v57 = vmul.f32 %v6354_v9, %v9178_v48  ;;  %6375 = vrcp.f32 %v3197_v25  ;;  %v10740_v50 = vld [vmem:[#allocation61_spill] sm:$0xff] }
 0x3aa   : > { %v6358_v19 = vpop.eup %6357  ;;  %v4521_v20 = vadd.f32 %v9264_v37, %v4137_v46  ;;  %v4146_v44 = vmul.f32 %v6356_v42, %v9186_v13  ;;  %6377 = vpow2.f32 %v5119_v30  ;;  %v5129_v27 = vmul.f32 -1.442695, %v9309_v39  ;;  %v10741_v37 = vld [vmem:[#allocation16_spill] sm:$0xff] }
 0x3ab   : > { %10737 = vst [vmem:[#allocation47_spill] sm:$0xff] %v9315_v40  ;;  %v6360_v3 = vpop.eup %6359  ;;  %v4583_v60 = vadd.f32 %v4019_v57, %v4009_v1  ;;  %v4028_v54 = vmul.f32 %v6358_v19, %v9190_v16  ;;  %6379 = vpow2.f32 %v5246_v18  ;;  %v9342_v48 = vadd.f32 %v10740_v50, %v9096_v45  ;;  %v10742_v57 = vld [vmem:[#allocation62_spill] sm:$0xff] }
 0x3ac   : > { %v6362_v23 = vpop.eup %6361  ;;  %v4485_v25 = vadd.f32 %v4484_v59, %v4146_v44  ;;  %v3079_v9 = vadd.f32 1.0, %v6360_v3  ;;  %6381 = vpow2.f32 %v5128_v56  ;;  %v9346_v46 = vadd.f32 %v10741_v37, %v8708_v11  ;;  %v9355_v3 = vpop.f32.mrb[156].mxu0 }
 0x3ad   : > { %v6364_v13 = vpop.eup %6363  ;;  %v4547_v30 = vadd.f32 %v4546_v32, %v4028_v54  ;;  %v4147_v42 = vmul.f32 %v6362_v23, %v9197_v41  ;;  %6383 = vpow2.f32 %v5247_v5  ;;  %v5256_v16 = vmul.f32 -1.442695, %v9326_v35  ;;  %v9357_v32 = vpop.f32.mrb[116].mxu1 }
 0x3ae   : > { %v6366_v18 = vpop.eup %6365  ;;  %6385 = vrcp.f32 %v3079_v9  ;;  %v3206_v1 = vadd.f32 1.0, %v6364_v13  ;;  %v9352_v19 = vadd.f32 %v10742_v57, %v9129_v33  ;;  %v5138_v54 = vmul.f32 -1.442695, %v9342_v48  ;;  %v9360_v50 = vpop.f32.mrb[157].mxu0  ;;  %v10743_v57 = vld [vmem:[#allocation34_spill] sm:$0xff] }
 0x3af   : > { %v6368_v59 = vpop.eup %6367  ;;  %v4522_v56 = vadd.f32 %v4521_v20, %v4147_v42  ;;  %v4029_v44 = vmul.f32 %v6366_v18, %v9204_v28  ;;  %6387 = vpow2.f32 %v5129_v27  ;;  %v5257_v20 = vmul.f32 -1.442695, %v9346_v46  ;;  %v9363_v13 = vpop.f32.mrb[117].mxu1 }
 0x3b0   : > { %v6370_v41 = vpop.eup %6369  ;;  %6389 = vrcp.f32 %v3206_v1  ;;  %v3088_v5 = vadd.f32 1.0, %v6368_v59  ;;  %v5139_v42 = vmul.f32 -1.442695, %v9352_v19  ;;  %v9370_v59 = vadd.f32 %v10743_v57, %v8696_v53 }
 0x3b1   : > { %v6372_v23 = vpop.eup %6371  ;;  %v4584_v9 = vadd.f32 %v4583_v60, %v4029_v44  ;;  %v3207_v37 = vadd.f32 1.0, %v6370_v41  ;;  %6391 = vpow2.f32 %v5256_v16  ;;  %v9372_v60 = vpop.f32.mrb[158].mxu0 }
 0x3b2   : > { %v6374_v28 = vpop.eup %6373  ;;  %v4156_v27 = vmul.f32 %v6372_v23, %v9209_v43  ;;  %6393 = vrcp.f32 %v3088_v5  ;;  %10744 = vst [vmem:[#allocation49_spill] sm:$0xff] %v9372_v60  ;;  %v9374_v16 = vpop.f32.mrb[118].mxu1 }
 0x3b3   : > { %v6376_v18 = vpop.eup %6375  ;;  %v4038_v1 = vmul.f32 %v6374_v28, %v9213_v47  ;;  %6395 = vrcp.f32 %v3207_v37  ;;  %10745 = vst [vmem:[#allocation59_spill] sm:$0xff] %v9374_v16  ;;  %v10746_v47 = vld [vmem:[#allocation50_spill] sm:$0xff] }
 0x3b4   : > { %v6378_v44 = vpop.eup %6377  ;;  %v4486_v41 = vadd.f32 %v4485_v25, %v4156_v27  ;;  %v4157_v62 = vmul.f32 %v6376_v18, %v9222_v51  ;;  %6397 = vpow2.f32 %v5138_v54  ;;  %v9379_v37 = vadd.f32 %v10746_v47, %v9096_v45  ;;  %v10747_v51 = vld [vmem:[#allocation51_spill] sm:$0xff] }
 0x3b5   : > { %v6380_v43 = vpop.eup %6379  ;;  %v4548_v5 = vadd.f32 %v4547_v30, %v4038_v1  ;;  %v3089_v23 = vadd.f32 1.0, %v6378_v44  ;;  %6399 = vpow2.f32 %v5257_v20  ;;  %v5266_v25 = vmul.f32 -1.442695, %v9370_v59  ;;  %v10748_v27 = vld [vmem:[#allocation19_spill] sm:$0xff] }
 0x3b6   : > { %v6382_v28 = vpop.eup %6381  ;;  %v4523_v57 = vadd.f32 %v4522_v56, %v4157_v62  ;;  %v3216_v40 = vadd.f32 1.0, %v6380_v43  ;;  %6401 = vpow2.f32 %v5139_v42  ;;  %v9384_v54 = vadd.f32 %v10747_v51, %v8708_v11  ;;  %v10749_v43 = vld [vmem:[#allocation37_spill] sm:$0xff]  ;;  %v9398_v51 = vpop.f32.mrb[159].mxu0 }
 0x3b7   : > { %v6384_v60 = vpop.eup %6383  ;;  %6403 = vrcp.f32 %v3089_v23  ;;  %v3098_v16 = vadd.f32 1.0, %v6382_v28  ;;  %v9388_v18 = vadd.f32 %v10748_v27, %v9129_v33  ;;  %v5148_v56 = vmul.f32 -1.442695, %v9379_v37  ;;  %10750 = vst [vmem:[#allocation60_spill] sm:$0xff] %v9398_v51 }
 0x3b8   : > { %v6386_v30 = vpop.eup %6385  ;;  %6405 = vrcp.f32 %v3216_v40  ;;  %v3217_v20 = vadd.f32 1.0, %v6384_v60  ;;  %v9394_v23 = vadd.f32 %v10749_v43, %v8696_v53  ;;  %v5267_v28 = vmul.f32 -1.442695, %v9384_v54 }
 0x3b9   : > { %v6388_v1 = vpop.eup %6387  ;;  %v4039_v62 = vmul.f32 %v6386_v30, %v9243_v7  ;;  %6407 = vrcp.f32 %v3098_v16  ;;  %v5149_v30 = vmul.f32 -1.442695, %v9388_v18 }
 0x3ba   : > { %v6390_v42 = vpop.eup %6389  ;;  %6409 = vrcp.f32 %v3217_v20  ;;  %v3099_v44 = vadd.f32 1.0, %v6388_v1  ;;  %v9401_v20 = vpop.f32.mrb[119].mxu1 }
 0x3bb   : > { %v6392_v47 = vpop.eup %6391  ;;  %v4585_v40 = vadd.f32 %v4584_v9, %v4039_v62  ;;  %v4166_v60 = vmul.f32 %v6390_v42, %v9249_v29  ;;  %6411 = vpow2.f32 %v5266_v25  ;;  %10751 = vst [vmem:[#allocation35_spill] sm:$0xff] %v9401_v20  ;;  %v10752_v9 = vld [vmem:[#allocation36_spill] sm:$0xff]  ;;  %v5276_v42 = vmul.f32 -1.442695, %v9394_v23 }
 0x3bc   : > { %v6394_v7 = vpop.eup %6393  ;;  %6413 = vrcp.f32 %v3099_v44  ;;  %v3226_v16 = vadd.f32 1.0, %v6392_v47  ;;  %v9406_v29 = vadd.f32 %v10752_v9, %v9096_v45  ;;  %v10753_v44 = vld [vmem:[#allocation39_spill] sm:$0xff] }
 0x3bd   : > { %v6396_v27 = vpop.eup %6395  ;;  %v4487_v1 = vadd.f32 %v4486_v41, %v4166_v60  ;;  %v4048_v43 = vmul.f32 %v6394_v7, %v9253_v22  ;;  %6415 = vpow2.f32 %v5148_v56  ;;  %v9412_v47 = vadd.f32 %v10753_v44, %v8708_v11  ;;  %v10754_v22 = vld [vmem:[#allocation52_spill] sm:$0xff] }
 0x3be   : > { %v6398_v25 = vpop.eup %6397  ;;  %v4167_v62 = vmul.f32 %v6396_v27, %v9262_v55  ;;  %6417 = vrcp.f32 %v3226_v16  ;;  %v9416_v56 = vadd.f32 %v10754_v22, %v9129_v33  ;;  %v9420_v55 = vadd.f32 %v8892_v38, %v8696_v53 }
 0x3bf   : > { %v6400_v20 = vpop.eup %6399  ;;  %v4549_v51 = vadd.f32 %v4548_v5, %v4048_v43  ;;  %v3108_v41 = vadd.f32 1.0, %v6398_v25  ;;  %6419 = vpow2.f32 %v5267_v28  ;;  %v5158_v44 = vmul.f32 -1.442695, %v9406_v29 }
 0x3c0   : > { %v6402_v60 = vpop.eup %6401  ;;  %v4524_v7 = vadd.f32 %v4523_v57, %v4167_v62  ;;  %v3227_v9 = vadd.f32 1.0, %v6400_v20  ;;  %6421 = vpow2.f32 %v5149_v30  ;;  %v5277_v43 = vmul.f32 -1.442695, %v9412_v47  ;;  %v9429_v30 = vpop.f32.mrb[160].mxu0 }
 0x3c1   : > { %v6404_v16 = vpop.eup %6403  ;;  %6423 = vrcp.f32 %v3108_v41  ;;  %v3109_v27 = vadd.f32 1.0, %v6402_v60  ;;  %v9427_v57 = vadd.f32 %v8898_v8, %v9096_v45  ;;  %10755 = vst [vmem:[#allocation61_spill] sm:$0xff] %v9429_v30  ;;  %v9431_v20 = vpop.f32.mrb[120].mxu1  ;;  %v5159_v62 = vmul.f32 -1.442695, %v9416_v56 }
 0x3c2   : > { %v6406_v5 = vpop.eup %6405  ;;  %v4049_v28 = vmul.f32 %v6404_v16, %v9281_v49  ;;  %6425 = vrcp.f32 %v3227_v9  ;;  %10756 = vst [vmem:[#allocation16_spill] sm:$0xff] %v9431_v20  ;;  %v9435_v41 = vpop.f32.mrb[161].mxu0  ;;  %v5286_v8 = vmul.f32 -1.442695, %v9420_v55 }
 0x3c3   : > { %v6408_v38 = vpop.eup %6407  ;;  %v4176_v25 = vmul.f32 %v6406_v5, %v9285_v14  ;;  %6427 = vrcp.f32 %v3109_v27  ;;  %v9437_v49 = vpop.f32.mrb[121].mxu1  ;;  %v9444_v14 = vadd.f32 %v8910_v36, %v8708_v11 }
 0x3c4   : > { %10757 = vst [vmem:[#allocation62_spill] sm:$0xff] %v9437_v49  ;;  %v6410_v22 = vpop.eup %6409  ;;  %v4586_v60 = vadd.f32 %v4585_v40, %v4049_v28  ;;  %v4058_v9 = vmul.f32 %v6408_v38, %v9293_v26  ;;  %6429 = vpow2.f32 %v5276_v42  ;;  %v9446_v27 = vpop.f32.mrb[162].mxu0  ;;  %v5168_v26 = vmul.f32 -1.442695, %v9427_v57 }
 0x3c5   : > { %v6412_v16 = vpop.eup %6411  ;;  %v4488_v30 = vadd.f32 %v4487_v1, %v4176_v25  ;;  %v4177_v20 = vmul.f32 %v6410_v22, %v9302_v58  ;;  %6431 = vpow2.f32 %v5158_v44  ;;  %v9448_v5 = vpop.f32.mrb[122].mxu1  ;;  %v9454_v58 = vadd.f32 %v8915_v61, %v9129_v33 }
 0x3c6   : > { %v6414_v49 = vpop.eup %6413  ;;  %v4550_v40 = vadd.f32 %v4549_v51, %v4058_v9  ;;  %v3236_v28 = vadd.f32 1.0, %v6412_v16  ;;  %6433 = vpow2.f32 %v5277_v43  ;;  %v9456_v36 = vpop.f32.mrb[163].mxu0  ;;  %v9460_v51 = vadd.f32 %v8936_v10, %v8696_v53 }
 0x3c7   : > { %v6416_v42 = vpop.eup %6415  ;;  %v4525_v38 = vadd.f32 %v4524_v7, %v4177_v20  ;;  %v4059_v1 = vmul.f32 %v6414_v49, %v9309_v39  ;;  %6435 = vpow2.f32 %v5159_v62  ;;  %v9462_v43 = vpop.f32.mrb[123].mxu1  ;;  %v5287_v62 = vmul.f32 -1.442695, %v9444_v14 }
 0x3c8   : > { %v6418_v44 = vpop.eup %6417  ;;  %6437 = vrcp.f32 %v3236_v28  ;;  %v3118_v25 = vadd.f32 1.0, %v6416_v42  ;;  %v5169_v28 = vmul.f32 -1.442695, %v9454_v58 }
 0x3c9   : > { %v6420_v22 = vpop.eup %6419  ;;  %v4587_v7 = vadd.f32 %v4586_v60, %v4059_v1  ;;  %v4186_v39 = vmul.f32 %v6418_v44, %v9326_v35  ;;  %6439 = vpow2.f32 %v5286_v8  ;;  %v5296_v60 = vmul.f32 -1.442695, %v9460_v51 }
 0x3ca   : > { %v6422_v20 = vpop.eup %6421  ;;  %6441 = vrcp.f32 %v3118_v25  ;;  %v3237_v61 = vadd.f32 1.0, %v6420_v22  ;;  %v9472_v8 = vadd.f32 %v8938_v17, %v9096_v45  ;;  %v9481_v17 = vpop.f32.mrb[124].mxu1 }
 0x3cb   : > { %v6424_v49 = vpop.eup %6423  ;;  %v4489_v9 = vadd.f32 %v4488_v30, %v4186_v39  ;;  %v3119_v16 = vadd.f32 1.0, %v6422_v20  ;;  %6443 = vpow2.f32 %v5168_v26 }
 0x3cc   : > { %v6426_v10 = vpop.eup %6425  ;;  %v4068_v42 = vmul.f32 %v6424_v49, %v9342_v48  ;;  %6445 = vrcp.f32 %v3237_v61  ;;  %v9477_v48 = vadd.f32 %v8942_v24, %v8708_v11  ;;  %v9479_v49 = vpop.f32.mrb[164].mxu0 }
 0x3cd   : > { %v6428_v1 = vpop.eup %6427  ;;  %v4187_v35 = vmul.f32 %v6426_v10, %v9346_v46  ;;  %6447 = vrcp.f32 %v3119_v16  ;;  %v9488_v16 = vpop.f32.mrb[165].mxu0 }
 0x3ce   : > { %v6430_v44 = vpop.eup %6429  ;;  %v4551_v30 = vadd.f32 %v4550_v40, %v4068_v42  ;;  %v4069_v26 = vmul.f32 %v6428_v1, %v9352_v19  ;;  %6449 = vpow2.f32 %v5287_v62  ;;  %v5178_v62 = vmul.f32 -1.442695, %v9472_v8 }
 0x3cf   : > { %v6432_v25 = vpop.eup %6431  ;;  %v4526_v22 = vadd.f32 %v4525_v38, %v4187_v35  ;;  %v3246_v39 = vadd.f32 1.0, %v6430_v44  ;;  %6451 = vpow2.f32 %v5169_v28  ;;  %v9486_v38 = vadd.f32 %v8944_v34, %v9129_v33  ;;  %v10758_v34 = vld [vmem:[#allocation53_spill] sm:$0xff] }
 0x3d0   : > { %v6434_v20 = vpop.eup %6433  ;;  %v4588_v46 = vadd.f32 %v4587_v7, %v4069_v26  ;;  %v3128_v61 = vadd.f32 1.0, %v6432_v25  ;;  %6453 = vpow2.f32 %v5296_v60  ;;  %v9492_v28 = vadd.f32 %v8957_v63, %v8696_v53  ;;  %v9500_v26 = vpop.f32.mrb[125].mxu1 }
 0x3d1   : > { %v6436_v40 = vpop.eup %6435  ;;  %6455 = vrcp.f32 %v3246_v39  ;;  %v3247_v19 = vadd.f32 1.0, %v6434_v20  ;;  %v5297_v60 = vmul.f32 -1.442695, %v9477_v48  ;;  %v9498_v44 = vadd.f32 %v10758_v34, %v9096_v45 }
 0x3d2   : > { %v6438_v24 = vpop.eup %6437  ;;  %6457 = vrcp.f32 %v3128_v61  ;;  %v3129_v7 = vadd.f32 1.0, %v6436_v40  ;;  %v5179_v20 = vmul.f32 -1.442695, %v9486_v38  ;;  %v5306_v40 = vmul.f32 -1.442695, %v9492_v28 }
 0x3d3   : > { %v6440_v10 = vpop.eup %6439  ;;  %v4196_v42 = vmul.f32 %v6438_v24, %v9370_v59  ;;  %6459 = vrcp.f32 %v3247_v19 }
 0x3d4   : > { %v6442_v1 = vpop.eup %6441  ;;  %6461 = vrcp.f32 %v3129_v7  ;;  %v3256_v35 = vadd.f32 1.0, %v6440_v10  ;;  %v10759_v10 = vld [vmem:[#allocation54_spill] sm:$0xff] }
 0x3d5   : > { %v6444_v25 = vpop.eup %6443  ;;  %v4490_v39 = vadd.f32 %v4489_v9, %v4196_v42  ;;  %v4078_v63 = vmul.f32 %v6442_v1, %v9379_v37  ;;  %6463 = vpow2.f32 %v5178_v62  ;;  %v9508_v34 = vadd.f32 %v10759_v10, %v8708_v11  ;;  %v9510_v9 = vpop.f32.mrb[166].mxu0 }
 0x3d6   : > { %v6446_v59 = vpop.eup %6445  ;;  %6465 = vrcp.f32 %v3256_v35  ;;  %v3138_v61 = vadd.f32 1.0, %v6444_v25  ;;  %10760 = vst [vmem:[#allocation34_spill] sm:$0xff] %v9510_v9  ;;  %v9512_v37 = vpop.f32.mrb[126].mxu1  ;;  %v5188_v1 = vmul.f32 -1.442695, %v9498_v44  ;;  %v10762_v35 = vld [vmem:[#allocation18_spill] sm:$0xff] }
 0x3d7   : > { %v6448_v19 = vpop.eup %6447  ;;  %v4552_v24 = vadd.f32 %v4551_v30, %v4078_v63  ;;  %v4197_v7 = vmul.f32 %v6446_v59, %v9384_v54  ;;  %6467 = vpow2.f32 %v5297_v60  ;;  %10761 = vst [vmem:[#allocation50_spill] sm:$0xff] %v9512_v37  ;;  %v9518_v30 = vadd.f32 %v10762_v35, %v9129_v33 }
 0x3d8   : > { %v6450_v62 = vpop.eup %6449  ;;  %v4079_v42 = vmul.f32 %v6448_v19, %v9388_v18  ;;  %6469 = vrcp.f32 %v3138_v61  ;;  %v9522_v63 = vadd.f32 %v9009_v2, %v8696_v53  ;;  %v9526_v18 = vadd.f32 %v9011_v6, %v9096_v45 }
 0x3d9   : > { %v6452_v54 = vpop.eup %6451  ;;  %v4527_v60 = vadd.f32 %v4526_v22, %v4197_v7  ;;  %v3257_v25 = vadd.f32 1.0, %v6450_v62  ;;  %6471 = vpow2.f32 %v5179_v20  ;;  %v5307_v35 = vmul.f32 -1.442695, %v9508_v34  ;;  %v9537_v7 = vpop.f32.mrb[127].mxu1 }
 0x3da   : > { %v6454_v59 = vpop.eup %6453  ;;  %v4589_v10 = vadd.f32 %v4588_v46, %v4079_v42  ;;  %v3139_v37 = vadd.f32 1.0, %v6452_v54  ;;  %6473 = vpow2.f32 %v5306_v40  ;;  %v9531_v22 = vadd.f32 %v9015_v15, %v8708_v11  ;;  %v9535_v40 = vpop.f32.mrb[167].mxu0  ;;  %10764 = vst [vmem:[#allocation19_spill] sm:$0xff] %v9537_v7 }
 0x3db   : > { %v6456_v61 = vpop.eup %6455  ;;  %6475 = vrcp.f32 %v3257_v25  ;;  %v3266_v19 = vadd.f32 1.0, %v6454_v59  ;;  %v5189_v46 = vmul.f32 -1.442695, %v9518_v30  ;;  %10763 = vst [vmem:[#allocation51_spill] sm:$0xff] %v9535_v40  ;;  %v5316_v42 = vmul.f32 -1.442695, %v9522_v63 }
 0x3dc   : > { %v6458_v20 = vpop.eup %6457  ;;  %v4206_v2 = vmul.f32 %v6456_v61, %v9394_v23  ;;  %6477 = vrcp.f32 %v3139_v37  ;;  %v5198_v23 = vmul.f32 -1.442695, %v9526_v18  ;;  %v5317_v7 = vmul.f32 -1.442695, %v9531_v22 }
 0x3dd   : > { %v6460_v6 = vpop.eup %6459  ;;  %v4088_v62 = vmul.f32 %v6458_v20, %v9406_v29  ;;  %6479 = vrcp.f32 %v3266_v19  ;;  %v10765_v19 = vld [vmem:[#allocation38_spill] sm:$0xff] }
 0x3de   : > { %v6462_v54 = vpop.eup %6461  ;;  %v4491_v25 = vadd.f32 %v4490_v39, %v4206_v2  ;;  %v4207_v15 = vmul.f32 %v6460_v6, %v9412_v47  ;;  %6481 = vpow2.f32 %v5188_v1  ;;  %v9547_v20 = vadd.f32 %v10765_v19, %v9129_v33 }
 0x3df   : > { %v6464_v37 = vpop.eup %6463  ;;  %v4553_v59 = vadd.f32 %v4552_v24, %v4088_v62  ;;  %v4089_v61 = vmul.f32 %v6462_v54, %v9416_v56  ;;  %6483 = vpow2.f32 %v5307_v35  ;;  %v10766_v24 = vld [vmem:[#allocation55_spill] sm:$0xff]  ;;  %v9560_v62 = vpop.f32.mrb[128].mxu1 }
 0x3e0   : > { %v6466_v40 = vpop.eup %6465  ;;  %v4528_v9 = vadd.f32 %v4527_v60, %v4207_v15  ;;  %v3148_v29 = vadd.f32 1.0, %v6464_v37  ;;  %6485 = vpow2.f32 %v5189_v46  ;;  %v9552_v2 = vadd.f32 %v10766_v24, %v8696_v53  ;;  %v10767_v60 = vld [vmem:[#allocation56_spill] sm:$0xff]  ;;  %v9558_v46 = vpop.f32.mrb[168].mxu0  ;;  %10769 = vst [vmem:[#allocation36_spill] sm:$0xff] %v9560_v62 }
 0x3e1   : > { %v6468_v39 = vpop.eup %6467  ;;  %v4590_v47 = vadd.f32 %v4589_v10, %v4089_v61  ;;  %v4216_v1 = vmul.f32 %v6466_v40, %v9420_v55  ;;  %6487 = vpow2.f32 %v5316_v42  ;;  %v9556_v6 = vadd.f32 %v10767_v60, %v9096_v45  ;;  %10768 = vst [vmem:[#allocation37_spill] sm:$0xff] %v9558_v46  ;;  %v9563_v40 = vpop.f32.mrb[169].mxu0 }
 0x3e2   : > { %v6470_v56 = vpop.eup %6469  ;;  %6489 = vrcp.f32 %v3148_v29  ;;  %v3267_v35 = vadd.f32 1.0, %v6468_v39  ;;  %10770 = vst [vmem:[#allocation39_spill] sm:$0xff] %v9563_v40  ;;  %v9565_v42 = vpop.f32.mrb[129].mxu1  ;;  %v5199_v61 = vmul.f32 -1.442695, %v9547_v20 }
 0x3e3   : > { %v6472_v54 = vpop.eup %6471  ;;  %v4492_v10 = vadd.f32 %v4491_v25, %v4216_v1  ;;  %v4098_v55 = vmul.f32 %v6470_v56, %v9427_v57  ;;  %6491 = vpow2.f32 %v5198_v23  ;;  %10771 = vst [vmem:[#allocation52_spill] sm:$0xff] %v9565_v42  ;;  %v9568_v29 = vpop.f32.mrb[170].mxu0  ;;  %v5326_v25 = vmul.f32 -1.442695, %v9552_v2 }
 0x3e4   : > { %v6474_v15 = vpop.eup %6473  ;;  %6493 = vrcp.f32 %v3267_v35  ;;  %v3149_v37 = vadd.f32 1.0, %v6472_v54  ;;  %10772 = vst [vmem:[#allocation53_spill] sm:$0xff] %v9568_v29  ;;  %v9571_v1 = vpop.f32.mrb[130].mxu1  ;;  %v5208_v56 = vmul.f32 -1.442695, %v9556_v6  ;;  %v10774_v54 = vld [vmem:[#allocation21_spill] sm:$0xff] }
 0x3e5   : > { %v6476_v19 = vpop.eup %6475  ;;  %v4554_v39 = vadd.f32 %v4553_v59, %v4098_v55  ;;  %v3276_v24 = vadd.f32 1.0, %v6474_v15  ;;  %6495 = vpow2.f32 %v5317_v7  ;;  %10773 = vst [vmem:[#allocation54_spill] sm:$0xff] %v9571_v1  ;;  %v9578_v29 = vadd.f32 %v10774_v54, %v8708_v11  ;;  %v9580_v59 = vpop.f32.mrb[171].mxu0 }
 0x3e6   : > { %v6478_v57 = vpop.eup %6477  ;;  %v4217_v23 = vmul.f32 %v6476_v19, %v9444_v14  ;;  %6497 = vrcp.f32 %v3149_v37  ;;  %10775 = vst [vmem:[#allocation18_spill] sm:$0xff] %v9580_v59  ;;  %v9582_v7 = vpop.f32.mrb[131].mxu1 }
 0x3e7   : > { %v6480_v35 = vpop.eup %6479  ;;  %v4099_v60 = vmul.f32 %v6478_v57, %v9454_v58  ;;  %6499 = vrcp.f32 %v3276_v24  ;;  %10776 = vst [vmem:[#allocation38_spill] sm:$0xff] %v9582_v7  ;;  %v10777_v58 = vld [vmem:[#allocation20_spill] sm:$0xff] }
 0x3e8   : > { %v6482_v55 = vpop.eup %6481  ;;  %v4529_v15 = vadd.f32 %v4528_v9, %v4217_v23  ;;  %v4226_v1 = vmul.f32 %v6480_v35, %v9460_v51  ;;  %6501 = vpow2.f32 %v5199_v61  ;;  %v9587_v24 = vadd.f32 %v10777_v58, %v9129_v33  ;;  %v10778_v51 = vld [vmem:[#allocation25_spill] sm:$0xff]  ;;  %v10779_v23 = vld [vmem:[#allocation23_spill] sm:$0xff] }
 0x3e9   : > { %v6484_v14 = vpop.eup %6483  ;;  %v4591_v37 = vadd.f32 %v4590_v47, %v4099_v60  ;;  %v3158_v19 = vadd.f32 1.0, %v6482_v55  ;;  %6503 = vpow2.f32 %v5326_v25  ;;  %v5327_v9 = vmul.f32 -1.442695, %v9578_v29 }
 0x3ea   : > { %v6486_v57 = vpop.eup %6485  ;;  %v4493_v54 = vadd.f32 %v4492_v10, %v4226_v1  ;;  %v3277_v42 = vadd.f32 1.0, %v6484_v14  ;;  %6505 = vpow2.f32 %v5208_v56  ;;  %v9592_v61 = vadd.f32 %v10778_v51, %v8696_v53  ;;  %v10780_v14 = vld [vmem:[#allocation27_spill] sm:$0xff] }
 0x3eb   : > { %v6488_v59 = vpop.eup %6487  ;;  %6507 = vrcp.f32 %v3158_v19  ;;  %v3159_v7 = vadd.f32 1.0, %v6486_v57  ;;  %v9596_v35 = vadd.f32 %v10779_v23, %v9096_v45  ;;  %v5209_v1 = vmul.f32 -1.442695, %v9587_v24 }
 0x3ec   : > { %v6490_v47 = vpop.eup %6489  ;;  %6509 = vrcp.f32 %v3277_v42  ;;  %v3286_v25 = vadd.f32 1.0, %v6488_v59  ;;  %v9602_v19 = vadd.f32 %v10780_v14, %v8708_v11  ;;  %v5336_v57 = vmul.f32 -1.442695, %v9592_v61 }
 0x3ed   : > { %v6492_v60 = vpop.eup %6491  ;;  %v4108_v10 = vmul.f32 %v6490_v47, %v9472_v8  ;;  %6511 = vrcp.f32 %v3159_v7  ;;  %v5218_v7 = vmul.f32 -1.442695, %v9596_v35 }
 0x3ee   : > { %v6494_v56 = vpop.eup %6493  ;;  %6513 = vrcp.f32 %v3286_v25  ;;  %v3168_v55 = vadd.f32 1.0, %v6492_v60  ;;  %v10781_v60 = vld [vmem:[#allocation13_spill] sm:$0xff] }
 0x3ef   : > { %v6496_v58 = vpop.eup %6495  ;;  %v4555_v42 = vadd.f32 %v4554_v39, %v4108_v10  ;;  %v4227_v59 = vmul.f32 %v6494_v56, %v9477_v48  ;;  %6515 = vpow2.f32 %v5327_v9  ;;  %v9610_v14 = vadd.f32 %v10781_v60, %v9129_v33  ;;  %v10782_v10 = vld [vmem:[#allocation63_spill] sm:$0xff]  ;;  %v10786_v60 = vld [vmem:[#allocation24_spill] sm:$0xff] }
 0x3f0   : > { %v6498_v51 = vpop.eup %6497  ;;  %6517 = vrcp.f32 %v3168_v55  ;;  %v3287_v8 = vadd.f32 1.0, %v6496_v58  ;;  %v5337_v9 = vmul.f32 -1.442695, %v9602_v19  ;;  %v9616_v56 = vadd.f32 %v10782_v10, %v8696_v53 }
 0x3f1   : > { %v6500_v47 = vpop.eup %6499  ;;  %v4530_v23 = vadd.f32 %v4529_v15, %v4227_v59  ;;  %v4109_v25 = vmul.f32 %v6498_v51, %v9486_v38  ;;  %6519 = vpow2.f32 %v5209_v1  ;;  %v10783_v38 = vld [vmem:[#allocation64_spill] sm:$0xff]  ;;  %v9622_v59 = vpop.f32.mrb[172].mxu0  ;;  %v9628_v10 = vadd.f32 %v10786_v60, %v8708_v11 }
 0x3f2   : > { %v6502_v39 = vpop.eup %6501  ;;  %v4236_v48 = vmul.f32 %v6500_v47, %v9492_v28  ;;  %6521 = vrcp.f32 %v3287_v8  ;;  %v9620_v1 = vadd.f32 %v10783_v38, %v9096_v45  ;;  %10784 = vst [vmem:[#allocation55_spill] sm:$0xff] %v9622_v59  ;;  %v9624_v51 = vpop.f32.mrb[132].mxu1 }
 0x3f3   : > { %v6504_v55 = vpop.eup %6503  ;;  %v4592_v58 = vadd.f32 %v4591_v37, %v4109_v25  ;;  %v3169_v15 = vadd.f32 1.0, %v6502_v39  ;;  %6523 = vpow2.f32 %v5336_v57  ;;  %10785 = vst [vmem:[#allocation56_spill] sm:$0xff] %v9624_v51  ;;  %v9630_v40 = vpop.f32.mrb[173].mxu0  ;;  %v5219_v25 = vmul.f32 -1.442695, %v9610_v14  ;;  %v10788_v39 = vld [vmem:[#allocation15_spill] sm:$0xff] }
 0x3f4   : > { %v6506_v28 = vpop.eup %6505  ;;  %v4494_v8 = vadd.f32 %v4493_v54, %v4236_v48  ;;  %v3296_v47 = vadd.f32 1.0, %v6504_v55  ;;  %6525 = vpow2.f32 %v5218_v7  ;;  %10787 = vst [vmem:[#allocation21_spill] sm:$0xff] %v9630_v40  ;;  %v9635_v38 = vadd.f32 %v10788_v39, %v9129_v33  ;;  %v9637_v51 = vpop.f32.mrb[133].mxu1 }
 0x3f5   : > { %v6508_v37 = vpop.eup %6507  ;;  %6527 = vrcp.f32 %v3169_v15  ;;  %v3178_v57 = vadd.f32 1.0, %v6506_v28  ;;  %10789 = vst [vmem:[#allocation20_spill] sm:$0xff] %v9637_v51  ;;  %v5346_v48 = vmul.f32 -1.442695, %v9616_v56  ;;  %v5228_v15 = vmul.f32 -1.442695, %v9620_v1 }
 0x3f6   : > { %v6510_v54 = vpop.eup %6509  ;;  %v4118_v7 = vmul.f32 %v6508_v37, %v9498_v44  ;;  %6529 = vrcp.f32 %v3296_v47  ;;  %v9643_v28 = vpop.f32.mrb[174].mxu0  ;;  %v5347_v44 = vmul.f32 -1.442695, %v9628_v10 }
 0x3f7   : > { %v6512_v55 = vpop.eup %6511  ;;  %v4237_v60 = vmul.f32 %v6510_v54, %v9508_v34  ;;  %6531 = vrcp.f32 %v3178_v57  ;;  %10790 = vst [vmem:[#allocation25_spill] sm:$0xff] %v9643_v28  ;;  %v9645_v40 = vpop.f32.mrb[134].mxu1  ;;  %v5229_v34 = vmul.f32 -1.442695, %v9635_v38 }
 0x3f8   : > { %10791 = vst [vmem:[#allocation23_spill] sm:$0xff] %v9645_v40  ;;  %v6514_v39 = vpop.eup %6513  ;;  %v4556_v59 = vadd.f32 %v4555_v42, %v4118_v7  ;;  %v4119_v51 = vmul.f32 %v6512_v55, %v9518_v30  ;;  %6533 = vpow2.f32 %v5337_v9  ;;  %v9651_v57 = vpop.f32.mrb[175].mxu0  ;;  %v10792_v30 = vld [vmem:[#allocation26_spill] sm:$0xff] }
 0x3f9   : > { %v6516_v47 = vpop.eup %6515  ;;  %v4531_v37 = vadd.f32 %v4530_v23, %v4237_v60  ;;  %v4246_v62 = vmul.f32 %v6514_v39, %v9522_v63  ;;  %6535 = vpow2.f32 %v5219_v25  ;;  %v9653_v54 = vpop.f32.mrb[135].mxu1  ;;  %v9657_v42 = vadd.f32 %v10792_v30, %v8696_v53  ;;  %v10793_v63 = vld [vmem:[#allocation41_spill] sm:$0xff] }
 0x3fa   : > { %v6518_v28 = vpop.eup %6517  ;;  %v4593_v40 = vadd.f32 %v4592_v58, %v4119_v51  ;;  %v3297_v46 = vadd.f32 1.0, %v6516_v47  ;;  %6537 = vpow2.f32 %v5346_v48  ;;  %v9662_v25 = vadd.f32 %v10793_v63, %v9096_v45  ;;  %v10794_v58 = vld [vmem:[#allocation40_spill] sm:$0xff] }
 0x3fb   : > { %v6520_v9 = vpop.eup %6519  ;;  %v4495_v7 = vadd.f32 %v4494_v8, %v4246_v62  ;;  %v4128_v23 = vmul.f32 %v6518_v28, %v9526_v18  ;;  %6539 = vpow2.f32 %v5228_v15  ;;  %v9666_v51 = vadd.f32 %v10794_v58, %v8708_v11 }
 0x3fc   : > { %v6522_v55 = vpop.eup %6521  ;;  %6541 = vrcp.f32 %v3297_v46  ;;  %v3179_v60 = vadd.f32 1.0, %v6520_v9  ;;  %v5356_v8 = vmul.f32 -1.442695, %v9657_v42  ;;  %v5238_v46 = vmul.f32 -1.442695, %v9662_v25  ;;  %v9671_v9 = vpop.f32.mrb[136].mxu1 }
 0x3fd   : > { %v6524_v48 = vpop.eup %6523  ;;  %v4557_v39 = vadd.f32 %v4556_v59, %v4128_v23  ;;  %v4247_v47 = vmul.f32 %v6522_v55, %v9531_v22  ;;  %6543 = vpow2.f32 %v5347_v44  ;;  %10795 = vst [vmem:[#allocation27_spill] sm:$0xff] %v9671_v9  ;;  %v5357_v22 = vmul.f32 -1.442695, %v9666_v51  ;;  %v9675_v59 = vpop.f32.mrb[137].mxu1 }
 0x3fe   : > { %v6526_v62 = vpop.eup %6525  ;;  %6545 = vrcp.f32 %v3179_v60  ;;  %v3306_v18 = vadd.f32 1.0, %v6524_v48  ;;  %10796 = vst [vmem:[#allocation13_spill] sm:$0xff] %v9675_v59 }
 0x3ff   : > { %v6528_v15 = vpop.eup %6527  ;;  %v4532_v28 = vadd.f32 %v4531_v37, %v4247_v47  ;;  %v3188_v30 = vadd.f32 1.0, %v6526_v62  ;;  %6547 = vpow2.f32 %v5229_v34  ;;  %v10797_v37 = vld [vmem:[#allocation65_spill] sm:$0xff]  ;;  %v9682_v34 = vpop.f32.mrb[138].mxu1 }
 0x400   : > { %v6530_v63 = vpop.eup %6529  ;;  %v4129_v58 = vmul.f32 %v6528_v15, %v9547_v20  ;;  %6549 = vrcp.f32 %v3306_v18  ;;  %v9680_v55 = vadd.f32 %v10797_v37, %v9129_v33  ;;  %10798 = vst [vmem:[#allocation63_spill] sm:$0xff] %v9682_v34  ;;  %v9685_v20 = vpop.f32.mrb[139].mxu1 }
 0x401   : > { %v6532_v44 = vpop.eup %6531  ;;  %v4256_v23 = vmul.f32 %v6530_v63, %v9552_v2  ;;  %6551 = vrcp.f32 %v3188_v30  ;;  %10799 = vst [vmem:[#allocation64_spill] sm:$0xff] %v9685_v20  ;;  %v10800_v2 = vld [vmem:[#allocation43_spill] sm:$0xff] }
 0x402   : > { %v6534_v60 = vpop.eup %6533  ;;  %v4594_v48 = vadd.f32 %v4593_v40, %v4129_v58  ;;  %v4138_v47 = vmul.f32 %v6532_v44, %v9556_v6  ;;  %6553 = vpow2.f32 %v5356_v8  ;;  %v9689_v30 = vadd.f32 %v10800_v2, %v8696_v53  ;;  %v10801_v8 = vld [vmem:[#allocation42_spill] sm:$0xff]  ;;  %v10802_v44 = vld [vmem:[#allocation28_spill] sm:$0xff] }
 0x403   : > { %v6536_v62 = vpop.eup %6535  ;;  %v4496_v18 = vadd.f32 %v4495_v7, %v4256_v23  ;;  %v3307_v15 = vadd.f32 1.0, %v6534_v60  ;;  %6555 = vpow2.f32 %v5238_v46  ;;  %v5239_v6 = vmul.f32 -1.442695, %v9680_v55  ;;  %v10804_v2 = vld [vmem:[#allocation44_spill] sm:$0xff] }
 0x404   : > { %v6538_v63 = vpop.eup %6537  ;;  %v4558_v37 = vadd.f32 %v4557_v39, %v4138_v47  ;;  %v3189_v59 = vadd.f32 1.0, %v6536_v62  ;;  %6557 = vpow2.f32 %v5357_v22  ;;  %v9694_v58 = vadd.f32 %v10801_v8, %v9096_v45  ;;  %v9702_v47 = vpop.f32.mrb[140].mxu1 }
 0x405   : > { %v6540_v34 = vpop.eup %6539  ;;  %6559 = vrcp.f32 %v3307_v15  ;;  %v3316_v40 = vadd.f32 1.0, %v6538_v63  ;;  %v9698_v23 = vadd.f32 %v10802_v44, %v8708_v11  ;;  %v5366_v22 = vmul.f32 -1.442695, %v9689_v30  ;;  %10803 = vst [vmem:[#allocation24_spill] sm:$0xff] %v9702_v47 }
 0x406   : > { %v6542_v7 = vpop.eup %6541  ;;  %6561 = vrcp.f32 %v3189_v59  ;;  %v3198_v46 = vadd.f32 1.0, %v6540_v34  ;;  %v9706_v63 = vadd.f32 %v10804_v2, %v9129_v33  ;;  %v5248_v44 = vmul.f32 -1.442695, %v9694_v58 }
 0x407   : > { %v6544_v60 = vpop.eup %6543  ;;  %v4257_v39 = vmul.f32 %v6542_v7, %v9578_v29  ;;  %6563 = vrcp.f32 %v3316_v40  ;;  %v9710_v29 = vpop.f32.mrb[141].mxu1  ;;  %v5367_v47 = vmul.f32 -1.442695, %v9698_v23 }
 0x408   : > { %v6546_v62 = vpop.eup %6545  ;;  %6565 = vrcp.f32 %v3198_v46  ;;  %v3317_v15 = vadd.f32 1.0, %v6544_v60  ;;  %10805 = vst [vmem:[#allocation15_spill] sm:$0xff] %v9710_v29 }
 0x409   : > { %v6548_v59 = vpop.eup %6547  ;;  %v4533_v34 = vadd.f32 %v4532_v28, %v4257_v39  ;;  %v4139_v8 = vmul.f32 %v6546_v62, %v9587_v24  ;;  %6567 = vpow2.f32 %v5239_v6  ;;  %v9716_v28 = vadd.f32 %v9224_v0, %v8696_v53  ;;  %v9718_v24 = vpop.f32.mrb[142].mxu1  ;;  %v10809_v0 = vld [vmem:[#allocation30_spill] sm:$0xff] }
 0x40a   : > { %v6550_v40 = vpop.eup %6549  ;;  %6569 = vrcp.f32 %v3317_v15  ;;  %v3199_v7 = vadd.f32 1.0, %v6548_v59  ;;  %10806 = vst [vmem:[#allocation26_spill] sm:$0xff] %v9718_v24  ;;  %v5249_v62 = vmul.f32 -1.442695, %v9706_v63  ;;  %v10807_v15 = vld [vmem:[#allocation29_spill] sm:$0xff] }
 0x40b   : > { %v6552_v46 = vpop.eup %6551  ;;  %v4595_v60 = vadd.f32 %v4594_v48, %v4139_v8  ;;  %v4266_v20 = vmul.f32 %v6550_v40, %v9592_v61  ;;  %6571 = vpow2.f32 %v5366_v22  ;;  %v9724_v2 = vadd.f32 %v10807_v15, %v9096_v45  ;;  %v9726_v48 = vpop.f32.mrb[143].mxu1 }
 0x40c   : > { %v6554_v6 = vpop.eup %6553  ;;  %v4148_v39 = vmul.f32 %v6552_v46, %v9596_v35  ;;  %6573 = vrcp.f32 %v3199_v7  ;;  %10808 = vst [vmem:[#allocation41_spill] sm:$0xff] %v9726_v48  ;;  %v9730_v8 = vadd.f32 %v10809_v0, %v8708_v11  ;;  %v10810_v7 = vld [vmem:[#allocation32_spill] sm:$0xff]  ;;  %v5376_v48 = vmul.f32 -1.442695, %v9716_v28 }
 0x40d   : > { %v6556_v61 = vpop.eup %6555  ;;  %v4497_v22 = vadd.f32 %v4496_v18, %v4266_v20  ;;  %v3326_v59 = vadd.f32 1.0, %v6554_v6  ;;  %6575 = vpow2.f32 %v5248_v44  ;;  %v9734_v46 = vadd.f32 %v10810_v7, %v9129_v33 }
 0x40e   : > { %v6558_v40 = vpop.eup %6557  ;;  %v4559_v24 = vadd.f32 %v4558_v37, %v4148_v39  ;;  %v3208_v35 = vadd.f32 1.0, %v6556_v61  ;;  %6577 = vpow2.f32 %v5367_v47  ;;  %v5258_v44 = vmul.f32 -1.442695, %v9724_v2  ;;  %v10811_v39 = vld [vmem:[#allocation14_spill] sm:$0xff] }
 0x40f   : > { %v6560_v15 = vpop.eup %6559  ;;  %6579 = vrcp.f32 %v3326_v59  ;;  %v3327_v29 = vadd.f32 1.0, %v6558_v40  ;;  %v5377_v47 = vmul.f32 -1.442695, %v9730_v8  ;;  %v9743_v61 = vadd.f32 %v10811_v39, %v8696_v53 }
 0x410   : > { %v6562_v20 = vpop.eup %6561  ;;  %v4267_v18 = vmul.f32 %v6560_v15, %v9602_v19  ;;  %6581 = vrcp.f32 %v3208_v35  ;;  %v5259_v19 = vmul.f32 -1.442695, %v9734_v46 }
 0x411   : > { %v6564_v6 = vpop.eup %6563  ;;  %v4149_v37 = vmul.f32 %v6562_v20, %v9610_v14  ;;  %6583 = vrcp.f32 %v3327_v29  ;;  %v10812_v14 = vld [vmem:[#allocation31_spill] sm:$0xff] }
 0x412   : > { %v6566_v59 = vpop.eup %6565  ;;  %v4534_v0 = vadd.f32 %v4533_v34, %v4267_v18  ;;  %v4276_v40 = vmul.f32 %v6564_v6, %v9616_v56  ;;  %6585 = vpow2.f32 %v5249_v62  ;;  %v9750_v29 = vadd.f32 %v10812_v14, %v9096_v45  ;;  %v10813_v34 = vld [vmem:[#allocation57_spill] sm:$0xff]  ;;  %v9756_v56 = vpop.f32.mrb[144].mxu1 }
 0x413   : > { %v6568_v35 = vpop.eup %6567  ;;  %v4596_v7 = vadd.f32 %v4595_v60, %v4149_v37  ;;  %v4158_v15 = vmul.f32 %v6566_v59, %v9620_v1  ;;  %6587 = vpow2.f32 %v5376_v48  ;;  %v9754_v18 = vadd.f32 %v10813_v34, %v8708_v11  ;;  %v9760_v48 = vpop.f32.mrb[145].mxu1  ;;  %v916_v11 = vld [vmem:[#allocation8 + $0x8] sm:$0x3] }
 0x414   : > { %v6570_v20 = vpop.eup %6569  ;;  %v4498_v9 = vadd.f32 %v4497_v22, %v4276_v40  ;;  %v3209_v53 = vadd.f32 1.0, %v6568_v35  ;;  %6589 = vpow2.f32 %v5258_v44  ;;  %v5386_v1 = vmul.f32 -1.442695, %v9743_v61  ;;  %10814 = vst [vmem:[#allocation40_spill] sm:$0xff] %v9760_v48  ;;  %v10815_v44 = vld [vmem:[#allocation45_spill] sm:$0xff]  ;;  %v9766_v59 = vpop.f32.mrb[146].mxu1 }
 0x415   : > { %v6572_v62 = vpop.eup %6571  ;;  %v4560_v6 = vadd.f32 %v4559_v24, %v4158_v15  ;;  %v4277_v60 = vmul.f32 %v6570_v20, %v9628_v10  ;;  %6591 = vpow2.f32 %v5377_v47  ;;  %v9764_v39 = vadd.f32 %v10815_v44, %v9129_v33  ;;  %10816 = vst [vmem:[#allocation65_spill] sm:$0xff] %v9766_v59  ;;  %v9769_v10 = vpop.f32.mrb[147].mxu1  ;;  %v10818_v44 = vld [vmem:[#allocation22_spill] sm:$0xff] }
 0x416   : > { %v6574_v37 = vpop.eup %6573  ;;  %6593 = vrcp.f32 %v3209_v53  ;;  %v3336_v22 = vadd.f32 1.0, %v6572_v62  ;;  %10817 = vst [vmem:[#allocation43_spill] sm:$0xff] %v9769_v10  ;;  %v5268_v14 = vmul.f32 -1.442695, %v9750_v29  ;;  %v5387_v20 = vmul.f32 -1.442695, %v9754_v18 }
 0x417   : > { %v6576_v40 = vpop.eup %6575  ;;  %v4535_v35 = vadd.f32 %v4534_v0, %v4277_v60  ;;  %v4159_v24 = vmul.f32 %v6574_v37, %v9635_v38  ;;  %6595 = vpow2.f32 %v5259_v19  ;;  %v10819_v59 = vsub.s32 0, %v10818_v44 }
 0x418   : > { %v6578_v47 = vpop.eup %6577  ;;  %6597 = vrcp.f32 %v3336_v22  ;;  %v3218_v15 = vadd.f32 1.0, %v6576_v40  ;;  %v5269_v19 = vmul.f32 -1.442695, %v9764_v39  ;;  %v10820_v22 = vld [vmem:[#allocation33_spill] sm:$0xff] }
 0x419   : > { %v6580_v53 = vpop.eup %6579  ;;  %v4597_v34 = vadd.f32 %v4596_v7, %v4159_v24  ;;  %v3337_v62 = vadd.f32 1.0, %v6578_v47  ;;  %6599 = vpow2.f32 %v5386_v1  ;;  %v9775_v48 = vrot.slane %v916_v11, %v10819_v59 }
 0x41a   : > { %v6582_v0 = vpop.eup %6581  ;;  %v4286_v38 = vmul.f32 %v6580_v53, %v9657_v42  ;;  %6601 = vrcp.f32 %v3218_v15  ;;  %v9782_v40 = vadd.f32 %v10820_v22, %v9096_v45  ;;  %v10821_v59 = vsub.s32 1, %v10818_v44  ;;  %v9789_v42 = vpop.f32.mrb[148].mxu1 }
 0x41b   : > { %v6584_v60 = vpop.eup %6583  ;;  %v4168_v37 = vmul.f32 %v6582_v0, %v9662_v25  ;;  %6603 = vrcp.f32 %v3337_v62  ;;  %v10822_v25 = vld [vmem:[#allocation17_spill] sm:$0xff]  ;;  %v9795_v0 = vpop.f32.mrb[149].mxu1 }
 0x41c   : > { %v6586_v7 = vpop.eup %6585  ;;  %v4499_v1 = vadd.f32 %v4498_v9, %v4286_v38  ;;  %v4287_v24 = vmul.f32 %v6584_v60, %v9666_v51  ;;  %6605 = vpow2.f32 %v5268_v14  ;;  %v9787_v47 = vrot.slane %v916_v11, %v10821_v59  ;;  %v9797_v14 = vpop.f32.mrb[150].mxu1 }
 0x41d   : > { %v6588_v15 = vpop.eup %6587  ;;  %v4561_v53 = vadd.f32 %v4560_v6, %v4168_v37  ;;  %v3219_v10 = vadd.f32 1.0, %v6586_v7  ;;  %6607 = vpow2.f32 %v5387_v20  ;;  %v9793_v62 = vadd.f32 %v10822_v25, %v9775_v48  ;;  %v9804_v20 = vpop.f32.mrb[151].mxu1 }
 0x41e   : > { %v6590_v9 = vpop.eup %6589  ;;  %v4536_v38 = vadd.f32 %v4535_v35, %v4287_v24  ;;  %v3346_v51 = vadd.f32 1.0, %v6588_v15  ;;  %6609 = vpow2.f32 %v5269_v19  ;;  %v5278_v60 = vmul.f32 -1.442695, %v9782_v40  ;;  %10823 = vst [vmem:[#allocation42_spill] sm:$0xff] %v9804_v20  ;;  %v10824_v35 = vld [vmem:[#allocation46_spill] sm:$0xff] }
 0x41f   : > { %v6592_v11 = vpop.eup %6591  ;;  %6611 = vrcp.f32 %v3219_v10  ;;  %v3228_v44 = vadd.f32 1.0, %v6590_v9  ;;  %v9802_v6 = vadd.f32 %v9288_v12, %v9129_v33  ;;  %v9808_v7 = vadd.f32 %v10824_v35, %v9787_v47 }
 0x420   : > { %v6594_v37 = vpop.eup %6593  ;;  %6613 = vrcp.f32 %v3346_v51  ;;  %v3347_v22 = vadd.f32 1.0, %v6592_v11  ;;  %v5080_v10 = vmul.f32 -1.442695, %v9793_v62 }
 0x421   : > { %v6596_v19 = vpop.eup %6595  ;;  %v4169_v24 = vmul.f32 %v6594_v37, %v9680_v55  ;;  %6615 = vrcp.f32 %v3228_v44  ;;  %v5279_v51 = vmul.f32 -1.442695, %v9802_v6  ;;  %v5081_v20 = vmul.f32 -1.442695, %v9808_v7 }
 0x422   : > { %v6598_v59 = vpop.eup %6597  ;;  %6617 = vrcp.f32 %v3347_v22  ;;  %v3229_v15 = vadd.f32 1.0, %v6596_v19  ;;  %v9817_v55 = vadd.f32 %v9304_v31, %v9096_v45  ;;  %v9827_v19 = vadd.f32 %v9332_v4, %v9129_v33 }
 0x423   : > { %v6600_v12 = vpop.eup %6599  ;;  %v4598_v25 = vadd.f32 %v4597_v34, %v4169_v24  ;;  %v4296_v9 = vmul.f32 %v6598_v59, %v9689_v30  ;;  %6619 = vpow2.f32 %v5278_v60  ;;  %v9822_v30 = vadd.f32 %v9320_v21, %v9775_v48 }
 0x424   : > { %v6602_v11 = vpop.eup %6601  ;;  %6621 = vrcp.f32 %v3229_v15  ;;  %v3356_v35 = vadd.f32 1.0, %v6600_v12 }
 0x425   : > { %v6604_v44 = vpop.eup %6603  ;;  %v4500_v37 = vadd.f32 %v4499_v1, %v4296_v9  ;;  %v4178_v22 = vmul.f32 %v6602_v11, %v9694_v58  ;;  %6623 = vpow2.f32 %v5080_v10  ;;  %v9831_v58 = vadd.f32 %v9334_v52, %v9787_v47  ;;  %v9833_v1 = vpop.f32.mrb[152].mxu1 }
 0x426   : > { %v6606_v34 = vpop.eup %6605  ;;  %v4297_v60 = vmul.f32 %v6604_v44, %v9698_v23  ;;  %6625 = vrcp.f32 %v3356_v35  ;;  %v5288_v23 = vmul.f32 -1.442695, %v9817_v55  ;;  %v9836_v12 = vpop.f32.mrb[153].mxu1 }
 0x427   : > { %v6608_v24 = vpop.eup %6607  ;;  %v4562_v31 = vadd.f32 %v4561_v53, %v4178_v22  ;;  %v3238_v59 = vadd.f32 1.0, %v6606_v34  ;;  %6627 = vpow2.f32 %v5279_v51  ;;  %v5090_v53 = vmul.f32 -1.442695, %v9822_v30  ;;  %v9843_v52 = vpop.f32.mrb[154].mxu1 }
 0x428   : > { %v6610_v21 = vpop.eup %6609  ;;  %v4537_v10 = vadd.f32 %v4536_v38, %v4297_v60  ;;  %v3357_v15 = vadd.f32 1.0, %v6608_v24  ;;  %6629 = vpow2.f32 %v5081_v20  ;;  %v9841_v51 = vadd.f32 %v9355_v3, %v9096_v45  ;;  %v9847_v35 = vpop.f32.mrb[155].mxu1 }
 0x429   : > { %v6612_v4 = vpop.eup %6611  ;;  %6631 = vrcp.f32 %v3238_v59  ;;  %v3239_v9 = vadd.f32 1.0, %v6610_v21  ;;  %v5289_v20 = vmul.f32 -1.442695, %v9827_v19  ;;  %10825 = vst [vmem:[#allocation28_spill] sm:$0xff] %v9847_v35  ;;  %v5091_v34 = vmul.f32 -1.442695, %v9831_v58 }
 0x42a   : > { %v6614_v11 = vpop.eup %6613  ;;  %v4179_v38 = vmul.f32 %v6612_v4, %v9706_v63  ;;  %6633 = vrcp.f32 %v3357_v15  ;;  %v9853_v3 = vadd.f32 %v9357_v32, %v9775_v48  ;;  %v9858_v63 = vadd.f32 %v9360_v50, %v9129_v33 }
 0x42b   : > { %v6616_v44 = vpop.eup %6615  ;;  %v4306_v22 = vmul.f32 %v6614_v11, %v9716_v28  ;;  %6635 = vrcp.f32 %v3239_v9  ;;  %v5298_v4 = vmul.f32 -1.442695, %v9841_v51 }
 0x42c   : > { %v6618_v60 = vpop.eup %6617  ;;  %v4599_v24 = vadd.f32 %v4598_v25, %v4179_v38  ;;  %v4188_v59 = vmul.f32 %v6616_v44, %v9724_v2  ;;  %6637 = vpow2.f32 %v5288_v23  ;;  %v9864_v25 = vadd.f32 %v9363_v13, %v9787_v47  ;;  %v9868_v38 = vpop.f32.mrb[156].mxu1 }
 0x42d   : > { %v6620_v21 = vpop.eup %6619  ;;  %v4501_v15 = vadd.f32 %v4500_v37, %v4306_v22  ;;  %v4307_v28 = vmul.f32 %v6618_v60, %v9730_v8  ;;  %6639 = vpow2.f32 %v5090_v53  ;;  %v5100_v37 = vmul.f32 -1.442695, %v9853_v3  ;;  %10826 = vst [vmem:[#allocation44_spill] sm:$0xff] %v9868_v38 }
 0x42e   : > { %v6622_v9 = vpop.eup %6621  ;;  %v4563_v11 = vadd.f32 %v4562_v31, %v4188_v59  ;;  %v3248_v32 = vadd.f32 1.0, %v6620_v21  ;;  %6641 = vpow2.f32 %v5289_v20  ;;  %v10827_v31 = vld [vmem:[#allocation49_spill] sm:$0xff]  ;;  %v9874_v20 = vpop.f32.mrb[157].mxu1  ;;  %v5299_v59 = vmul.f32 -1.442695, %v9858_v63 }
 0x42f   : > { %v6624_v2 = vpop.eup %6623  ;;  %v4538_v23 = vadd.f32 %v4537_v10, %v4307_v28  ;;  %v4189_v50 = vmul.f32 %v6622_v9, %v9734_v46  ;;  %6643 = vpow2.f32 %v5091_v34  ;;  %v9872_v44 = vadd.f32 %v10827_v31, %v9096_v45  ;;  %10828 = vst [vmem:[#allocation29_spill] sm:$0xff] %v9874_v20  ;;  %v9877_v46 = vpop.f32.mrb[158].mxu1 }
 0x430   : > { %v6626_v8 = vpop.eup %6625  ;;  %6645 = vrcp.f32 %v3248_v32  ;;  %v3050_v53 = vadd.f32 1.0, %v6624_v2  ;;  %10829 = vst [vmem:[#allocation30_spill] sm:$0xff] %v9877_v46  ;;  %v9880_v21 = vpop.f32.mrb[159].mxu1  ;;  %v5101_v2 = vmul.f32 -1.442695, %v9864_v25 }
 0x431   : > { %v6628_v13 = vpop.eup %6627  ;;  %v4600_v22 = vadd.f32 %v4599_v24, %v4189_v50  ;;  %v4316_v10 = vmul.f32 %v6626_v8, %v9743_v61  ;;  %6647 = vpow2.f32 %v5298_v4  ;;  %10830 = vst [vmem:[#allocation32_spill] sm:$0xff] %v9880_v21  ;;  %v5308_v61 = vmul.f32 -1.442695, %v9872_v44 }
 0x432   : > { %v6630_v34 = vpop.eup %6629  ;;  %6649 = vrcp.f32 %v3050_v53  ;;  %v3249_v60 = vadd.f32 1.0, %v6628_v13  ;;  %v10831_v53 = vld [vmem:[#allocation59_spill] sm:$0xff] }
 0x433   : > { %v6632_v28 = vpop.eup %6631  ;;  %v4502_v9 = vadd.f32 %v4501_v15, %v4316_v10  ;;  %v3051_v32 = vadd.f32 1.0, %v6630_v34  ;;  %6651 = vpow2.f32 %v5100_v37  ;;  %v9888_v13 = vadd.f32 %v10831_v53, %v9775_v48  ;;  %v10832_v34 = vld [vmem:[#allocation60_spill] sm:$0xff] }
 0x434   : > { %v6634_v31 = vpop.eup %6633  ;;  %v4198_v24 = vmul.f32 %v6632_v28, %v9750_v29  ;;  %6653 = vrcp.f32 %v3249_v60  ;;  %v9893_v29 = vadd.f32 %v10832_v34, %v9129_v33 }
 0x435   : > { %v6636_v4 = vpop.eup %6635  ;;  %v4503_v50 = vrot.slane %v4502_v9, 4  ;;  %v4317_v8 = vmul.f32 %v6634_v31, %v9754_v18  ;;  %6655 = vrcp.f32 %v3051_v32  ;;  %v9895_v18 = vpop.f32.mrb[160].mxu1 }
 0x436   : > { %v6638_v15 = vpop.eup %6637  ;;  %v4564_v10 = vadd.f32 %v4563_v11, %v4198_v24  ;;  %v4199_v37 = vmul.f32 %v6636_v4, %v9764_v39  ;;  %6657 = vpow2.f32 %v5299_v59  ;;  %10833 = vst [vmem:[#allocation14_spill] sm:$0xff] %v9895_v18  ;;  %v10834_v11 = vld [vmem:[#allocation35_spill] sm:$0xff]  ;;  %v9901_v39 = vpop.f32.mrb[161].mxu1 }
 0x437   : > { %v6640_v60 = vpop.eup %6639  ;;  %v4504_v28 = vadd.f32 %v4503_v50, %v4502_v9  ;;  %v4539_v21 = vadd.f32 %v4538_v23, %v4317_v8  ;;  %v3258_v46 = vadd.f32 1.0, %v6638_v15  ;;  %6659 = vpow2.f32 %v5101_v2  ;;  %10835 = vst [vmem:[#allocation31_spill] sm:$0xff] %v9901_v39  ;;  %v9903_v23 = vpop.f32.mrb[162].mxu1 }
 0x438   : > { %v6642_v32 = vpop.eup %6641  ;;  %v4601_v31 = vadd.f32 %v4600_v22, %v4199_v37  ;;  %v3060_v53 = vadd.f32 1.0, %v6640_v60  ;;  %6661 = vpow2.f32 %v5308_v61  ;;  %v9899_v24 = vadd.f32 %v10834_v11, %v9787_v47  ;;  %10836 = vst [vmem:[#allocation57_spill] sm:$0xff] %v9903_v23  ;;  %v10837_v61 = vld [vmem:[#allocation61_spill] sm:$0xff]  ;;  %v9910_v15 = vpop.f32.mrb[163].mxu1 }
 0x439   : > { %v6644_v59 = vpop.eup %6643  ;;  %v4505_v4 = vrot.slane %v4504_v28, 2  ;;  %v4540_v34 = vrot.slane %v4539_v21, 4  ;;  %6663 = vrcp.f32 %v3258_v46  ;;  %v3259_v9 = vadd.f32 1.0, %v6642_v32  ;;  %10838 = vst [vmem:[#allocation45_spill] sm:$0xff] %v9910_v15 }
 0x43a   : > { %v6646_v2 = vpop.eup %6645  ;;  %6665 = vrcp.f32 %v3060_v53  ;;  %v3061_v50 = vadd.f32 1.0, %v6644_v59  ;;  %v5110_v22 = vmul.f32 -1.442695, %v9888_v13  ;;  %v9908_v8 = vadd.f32 %v10837_v61, %v9096_v45  ;;  %v10839_v59 = vld [vmem:[#allocation16_spill] sm:$0xff] }
 0x43b   : > { %v6648_v37 = vpop.eup %6647  ;;  %v4506_v60 = vadd.f32 %v4505_v4, %v4504_v28  ;;  %v4541_v11 = vadd.f32 %v4540_v34, %v4539_v21  ;;  %v4208_v39 = vmul.f32 %v6646_v2, %v9782_v40  ;;  %6667 = vrcp.f32 %v3259_v9 }
 0x43c   : > { %v6650_v46 = vpop.eup %6649  ;;  %6669 = vrcp.f32 %v3061_v50  ;;  %v3268_v32 = vadd.f32 1.0, %v6648_v37  ;;  %v5309_v53 = vmul.f32 -1.442695, %v9893_v29  ;;  %v9916_v23 = vadd.f32 %v10839_v59, %v9775_v48  ;;  %v10840_v50 = vld [vmem:[#allocation62_spill] sm:$0xff] }
 0x43d   : > { %v6652_v18 = vpop.eup %6651  ;;  %v4507_v61 = vrot.slane %v4506_v60, 1  ;;  %v4542_v20 = vrot.slane %v4541_v11, 2  ;;  %v4565_v38 = vadd.f32 %v4564_v10, %v4208_v39  ;;  %v5111_v15 = vmul.f32 -1.442695, %v9899_v24  ;;  %v9929_v10 = vpop.f32.mrb[164].mxu1 }
 0x43e   : > { %v6654_v28 = vpop.eup %6653  ;;  %6671 = vrcp.f32 %v3268_v32  ;;  %v3070_v21 = vadd.f32 1.0, %v6652_v18  ;;  %v5318_v40 = vmul.f32 -1.442695, %v9908_v8  ;;  %v9922_v4 = vadd.f32 %v9435_v41, %v9129_v33  ;;  %10841 = vst [vmem:[#allocation22_spill] sm:$0xff] %v9929_v10 }
 0x43f   : > { %v6656_v34 = vpop.eup %6655  ;;  %v4543_v9 = vadd.f32 %v4542_v20, %v4541_v11  ;;  %v4209_v2 = vmul.f32 %v6654_v28, %v9802_v6  ;;  %6673 = vpow2.f32 %v5110_v22  ;;  %v9927_v37 = vadd.f32 %v10840_v50, %v9787_v47  ;;  %v9938_v20 = vpop.f32.mrb[165].mxu1 }
 0x440   : > { %v6658_v39 = vpop.eup %6657  ;;  %v9931_v32 = vadd.f32 %v4507_v61, %v4506_v60  ;;  %6675 = vrcp.f32 %v3070_v21  ;;  %v5120_v18 = vmul.f32 -1.442695, %v9916_v23  ;;  %v9936_v41 = vadd.f32 %v9446_v27, %v9096_v45  ;;  %10842 = vst [vmem:[#allocation33_spill] sm:$0xff] %v9938_v20  ;;  %v9940_v28 = vpop.f32.mrb[166].mxu1 }
 0x441   : > { %v6660_v6 = vpop.eup %6659  ;;  %v4544_v22 = vrot.slane %v4543_v9, 1  ;;  %v4602_v11 = vadd.f32 %v4601_v31, %v4209_v2  ;;  %v3269_v59 = vadd.f32 1.0, %v6658_v39  ;;  %6677 = vpow2.f32 %v5309_v53  ;;  %10843 = vst [vmem:[#allocation17_spill] sm:$0xff] %v9940_v28  ;;  %v9947_v27 = vpop.f32.mrb[167].mxu1 }
 0x442   : > { %v6662_v50 = vpop.eup %6661  ;;  %v3071_v10 = vadd.f32 1.0, %v6660_v6  ;;  %6679 = vpow2.f32 %v5111_v15  ;;  %v5319_v60 = vmul.f32 -1.442695, %v9922_v4  ;;  %v9945_v61 = vadd.f32 %v9448_v5, %v9775_v48  ;;  %10844 = vst [vmem:[#allocation46_spill] sm:$0xff] %v9947_v27  ;;  %v9966_v35 = vpop.f32.mrb[168].mxu1 }
 0x443   : > { %v6664_v21 = vpop.eup %6663  ;;  %v9949_v20 = vadd.f32 %v4544_v22, %v4543_v9  ;;  %6681 = vrcp.f32 %v3269_v59  ;;  %v3278_v31 = vadd.f32 1.0, %v6662_v50  ;;  %v5121_v53 = vmul.f32 -1.442695, %v9927_v37 }
 0x444   : > { %v6666_v2 = vpop.eup %6665  ;;  %v4218_v39 = vmul.f32 %v6664_v21, %v9817_v55  ;;  %6683 = vrcp.f32 %v3071_v10  ;;  %v5328_v15 = vmul.f32 -1.442695, %v9936_v41  ;;  %v9956_v6 = vadd.f32 %v9456_v36, %v9129_v33 }
 0x445   : > { %v6668_v5 = vpop.eup %6667  ;;  %v4010_v9 = vmul.f32 %v6650_v46, %v9793_v62  ;;  %v4020_v22 = vmul.f32 %v6666_v2, %v9822_v30  ;;  %6685 = vrcp.f32 %v3278_v31  ;;  %v5130_v10 = vmul.f32 -1.442695, %v9945_v61 }
 0x446   : > { %v6670_v59 = vpop.eup %6669  ;;  %v4566_v50 = vadd.f32 %v4565_v38, %v4218_v39  ;;  %v4219_v55 = vmul.f32 %v6668_v5, %v9827_v19  ;;  %6687 = vpow2.f32 %v5318_v40  ;;  %v4011_v21 = vmul.f32 %v6656_v34, %v9808_v7  ;;  %v9973_v19 = vpop.f32.mrb[169].mxu1 }
 0x447   : > { %v4620_v36 = vadd.f32 %v4020_v22, %v4010_v9  ;;  %v4021_v28 = vmul.f32 %v6670_v59, %v9831_v58  ;;  %6689 = vpow2.f32 %v5120_v18  ;;  %v5329_v30 = vmul.f32 -1.442695, %v9956_v6  ;;  %v9980_v34 = vpop.f32.mrb[170].mxu1 }
 0x448   : > { %v6672_v27 = vpop.eup %6671  ;;  %v4603_v62 = vadd.f32 %v4602_v11, %v4219_v55  ;;  %6691 = vpow2.f32 %v5319_v60  ;;  %v9971_v38 = vadd.f32 %v9462_v43, %v9787_v47  ;;  %v9978_v58 = vadd.f32 %v9479_v49, %v9096_v45  ;;  %v9986_v60 = vpop.f32.mrb[171].mxu1 }
 0x449   : > { %v6674_v46 = vpop.eup %6673  ;;  %v4657_v40 = vadd.f32 %v4021_v28, %v4011_v21  ;;  %v4228_v7 = vmul.f32 %v6672_v27, %v9841_v51  ;;  %6693 = vpow2.f32 %v5121_v53  ;;  %v9984_v43 = vadd.f32 %v9481_v17, %v9775_v48 }
 0x44a   : > { %v6676_v18 = vpop.eup %6675  ;;  %v3080_v11 = vadd.f32 1.0, %v6674_v46  ;;  %6695 = vpow2.f32 %v5328_v15  ;;  %v5131_v53 = vmul.f32 -1.442695, %v9971_v38  ;;  %v5338_v15 = vmul.f32 -1.442695, %v9978_v58 }
 0x44b   : > { %v6678_v31 = vpop.eup %6677  ;;  %v4567_v28 = vadd.f32 %v4566_v50, %v4228_v7  ;;  %v4030_v51 = vmul.f32 %v6676_v18, %v9853_v3  ;;  %6697 = vpow2.f32 %v5130_v10  ;;  %v5140_v22 = vmul.f32 -1.442695, %v9984_v43  ;;  %v9994_v50 = vpop.f32.mrb[172].mxu1 }
 0x44c   : > { %v6680_v27 = vpop.eup %6679  ;;  %6699 = vrcp.f32 %v3080_v11  ;;  %v3279_v49 = vadd.f32 1.0, %v6678_v31 }
 0x44d   : > { %v6682_v2 = vpop.eup %6681  ;;  %v4621_v39 = vadd.f32 %v4620_v36, %v4030_v51  ;;  %v3081_v5 = vadd.f32 1.0, %v6680_v27  ;;  %6701 = vpow2.f32 %v5329_v30  ;;  %v9997_v36 = vpop.f32.mrb[173].mxu1 }
 0x44e   : > { %v6684_v17 = vpop.eup %6683  ;;  %v4229_v9 = vmul.f32 %v6682_v2, %v9858_v63  ;;  %6703 = vrcp.f32 %v3279_v49  ;;  %v10001_v63 = vadd.f32 %v9488_v16, %v9129_v33  ;;  %v10003_v18 = vpop.f32.mrb[174].mxu1  ;;  %v10846_v49 = vld [vmem:[#allocation34_spill] sm:$0xff] }
 0x44f   : > { %v6686_v59 = vpop.eup %6685  ;;  %v4031_v3 = vmul.f32 %v6684_v17, %v9864_v25  ;;  %6705 = vrcp.f32 %v3081_v5 }
 0x450   : > { %v6688_v55 = vpop.eup %6687  ;;  %v4604_v10 = vadd.f32 %v4603_v62, %v4229_v9  ;;  %v4238_v21 = vmul.f32 %v6686_v59, %v9872_v44  ;;  %6707 = vpow2.f32 %v5131_v53  ;;  %v10007_v62 = vpop.f32.mrb[175].mxu1  ;;  %v10015_v53 = vadd.f32 %v10846_v49, %v9096_v45  ;;  %v10849_v49 = vld [vmem:[#allocation19_spill] sm:$0xff] }
 0x451   : > { %v6690_v30 = vpop.eup %6689  ;;  %v4658_v46 = vadd.f32 %v4657_v40, %v4031_v3  ;;  %v3288_v7 = vadd.f32 1.0, %v6688_v55  ;;  %6709 = vpow2.f32 %v5338_v15  ;;  %10845 = vst [vmem:[#allocation49_spill] sm:$0xff] %v10007_v62  ;;  %v10011_v40 = vadd.f32 %v9500_v26, %v9787_v47 }
 0x452   : > { %v6692_v25 = vpop.eup %6691  ;;  %v10005_v11 = vadd.f32 %v4567_v28, %v4238_v21  ;;  %v3090_v31 = vadd.f32 1.0, %v6690_v30  ;;  %6711 = vpow2.f32 %v5140_v22  ;;  %v10847_v28 = vld [vmem:[#allocation50_spill] sm:$0xff]  ;;  %v5339_v17 = vmul.f32 -1.442695, %v10001_v63 }
 0x453   : > { %v6694_v44 = vpop.eup %6693  ;;  %6713 = vrcp.f32 %v3288_v7  ;;  %v3289_v51 = vadd.f32 1.0, %v6692_v25  ;;  %v10019_v2 = vadd.f32 %v10847_v28, %v9775_v48  ;;  %v5141_v3 = vmul.f32 -1.442695, %v10011_v40 }
 0x454   : > { %v6696_v27 = vpop.eup %6695  ;;  %6715 = vrcp.f32 %v3090_v31  ;;  %v3091_v16 = vadd.f32 1.0, %v6694_v44  ;;  %v5348_v30 = vmul.f32 -1.442695, %v10015_v53  ;;  %v10034_v28 = vadd.f32 %v10849_v49, %v9787_v47 }
 0x455   : > { %v6698_v5 = vpop.eup %6697  ;;  %6717 = vrcp.f32 %v3289_v51  ;;  %v3298_v15 = vadd.f32 1.0, %v6696_v27  ;;  %v5150_v7 = vmul.f32 -1.442695, %v10019_v2  ;;  %v10848_v51 = vld [vmem:[#allocation51_spill] sm:$0xff] }
 0x456   : > { %v6700_v9 = vpop.eup %6699  ;;  %6719 = vrcp.f32 %v3091_v16  ;;  %v3100_v26 = vadd.f32 1.0, %v6698_v5  ;;  %v10029_v27 = vadd.f32 %v10848_v51, %v9129_v33  ;;  %v10850_v5 = vld [vmem:[#allocation37_spill] sm:$0xff] }
 0x457   : > { %v6702_v22 = vpop.eup %6701  ;;  %v4040_v59 = vmul.f32 %v6700_v9, %v9888_v13  ;;  %6721 = vrcp.f32 %v3298_v15  ;;  %v10038_v15 = vadd.f32 %v10850_v5, %v9096_v45  ;;  %v10853_v5 = vld [vmem:[#allocation52_spill] sm:$0xff] }
 0x458   : > { %v6704_v55 = vpop.eup %6703  ;;  %6723 = vrcp.f32 %v3100_v26  ;;  %v3299_v21 = vadd.f32 1.0, %v6702_v22  ;;  %v5349_v49 = vmul.f32 -1.442695, %v10029_v27 }
 0x459   : > { %v6706_v25 = vpop.eup %6705  ;;  %v4622_v31 = vadd.f32 %v4621_v39, %v4040_v59  ;;  %v4239_v44 = vmul.f32 %v6704_v55, %v9893_v29  ;;  %6725 = vpow2.f32 %v5339_v17  ;;  %v10851_v17 = vld [vmem:[#allocation36_spill] sm:$0xff]  ;;  %v10852_v55 = vld [vmem:[#allocation39_spill] sm:$0xff] }
 0x45a   : > { %v6708_v13 = vpop.eup %6707  ;;  %v4041_v16 = vmul.f32 %v6706_v25, %v9899_v24  ;;  %6727 = vrcp.f32 %v3299_v21  ;;  %v10042_v26 = vadd.f32 %v10851_v17, %v9775_v48  ;;  %v10046_v21 = vadd.f32 %v10852_v55, %v9129_v33 }
 0x45b   : > { %v6710_v39 = vpop.eup %6709  ;;  %v4605_v9 = vadd.f32 %v4604_v10, %v4239_v44  ;;  %v3101_v29 = vadd.f32 1.0, %v6708_v13  ;;  %6729 = vpow2.f32 %v5141_v3  ;;  %v5151_v44 = vmul.f32 -1.442695, %v10034_v28 }
 0x45c   : > { %v6712_v22 = vpop.eup %6711  ;;  %v4659_v59 = vadd.f32 %v4658_v46, %v4041_v16  ;;  %v3308_v24 = vadd.f32 1.0, %v6710_v39  ;;  %6731 = vpow2.f32 %v5348_v30  ;;  %v5358_v13 = vmul.f32 -1.442695, %v10038_v15 }
 0x45d   : > { %v6714_v25 = vpop.eup %6713  ;;  %6733 = vrcp.f32 %v3101_v29  ;;  %v3110_v51 = vadd.f32 1.0, %v6712_v22  ;;  %v5160_v16 = vmul.f32 -1.442695, %v10042_v26  ;;  %v10056_v39 = vadd.f32 %v10853_v5, %v9787_v47 }
 0x45e   : > { %v6716_v10 = vpop.eup %6715  ;;  %v4248_v3 = vmul.f32 %v6714_v25, %v9908_v8  ;;  %6735 = vrcp.f32 %v3308_v24  ;;  %v5359_v22 = vmul.f32 -1.442695, %v10046_v21 }
 0x45f   : > { %v6718_v46 = vpop.eup %6717  ;;  %v4050_v30 = vmul.f32 %v6716_v10, %v9916_v23  ;;  %6737 = vrcp.f32 %v3110_v51  ;;  %v10854_v23 = vld [vmem:[#allocation53_spill] sm:$0xff] }
 0x460   : > { %v6720_v29 = vpop.eup %6719  ;;  %v4569_v17 = vadd.f32 %v10005_v11, %v4248_v3  ;;  %v4249_v8 = vmul.f32 %v6718_v46, %v9922_v4  ;;  %6739 = vpow2.f32 %v5150_v7  ;;  %v10064_v51 = vadd.f32 %v10854_v23, %v9096_v45  ;;  %v10855_v11 = vld [vmem:[#allocation54_spill] sm:$0xff] }
 0x461   : > { %v6722_v24 = vpop.eup %6721  ;;  %v4623_v55 = vadd.f32 %v4622_v31, %v4050_v30  ;;  %v4051_v25 = vmul.f32 %v6720_v29, %v9927_v37  ;;  %6741 = vpow2.f32 %v5349_v49  ;;  %v10069_v4 = vadd.f32 %v10855_v11, %v9775_v48 }
 0x462   : > { %v6724_v10 = vpop.eup %6723  ;;  %v4606_v5 = vadd.f32 %v4605_v9, %v4249_v8  ;;  %v4258_v62 = vmul.f32 %v6722_v24, %v9936_v41  ;;  %6743 = vpow2.f32 %v5151_v44  ;;  %v5161_v37 = vmul.f32 -1.442695, %v10056_v39  ;;  %v10856_v9 = vld [vmem:[#allocation18_spill] sm:$0xff] }
 0x463   : > { %v6726_v7 = vpop.eup %6725  ;;  %v4660_v3 = vadd.f32 %v4659_v59, %v4051_v25  ;;  %v4060_v31 = vmul.f32 %v6724_v10, %v9945_v61  ;;  %6745 = vpow2.f32 %v5358_v13  ;;  %v10075_v29 = vadd.f32 %v10856_v9, %v9129_v33 }
 0x464   : > { %v6728_v49 = vpop.eup %6727  ;;  %v4570_v46 = vadd.f32 %v4569_v17, %v4258_v62  ;;  %v3309_v30 = vadd.f32 1.0, %v6726_v7  ;;  %6747 = vpow2.f32 %v5160_v16  ;;  %v5368_v61 = vmul.f32 -1.442695, %v10064_v51 }
 0x465   : > { %v6730_v41 = vpop.eup %6729  ;;  %v4624_v44 = vadd.f32 %v4623_v55, %v4060_v31  ;;  %v4259_v8 = vmul.f32 %v6728_v49, %v9956_v6  ;;  %6749 = vpow2.f32 %v5359_v22  ;;  %v5170_v62 = vmul.f32 -1.442695, %v10069_v4  ;;  %v10857_v49 = vld [vmem:[#allocation38_spill] sm:$0xff] }
 0x466   : > { %v6732_v24 = vpop.eup %6731  ;;  %6751 = vrcp.f32 %v3309_v30  ;;  %v3111_v59 = vadd.f32 1.0, %v6730_v41  ;;  %v5369_v55 = vmul.f32 -1.442695, %v10075_v29  ;;  %v10086_v30 = vadd.f32 %v10857_v49, %v9787_v47 }
 0x467   : > { %v6734_v13 = vpop.eup %6733  ;;  %v4607_v25 = vadd.f32 %v4606_v5, %v4259_v8  ;;  %v3318_v23 = vadd.f32 1.0, %v6732_v24  ;;  %6753 = vpow2.f32 %v5161_v37 }
 0x468   : > { %v6736_v16 = vpop.eup %6735  ;;  %v4061_v17 = vmul.f32 %v6734_v13, %v9971_v38  ;;  %6755 = vrcp.f32 %v3111_v59  ;;  %v10860_v13 = vld [vmem:[#allocation21_spill] sm:$0xff] }
 0x469   : > { %v6738_v10 = vpop.eup %6737  ;;  %v4268_v6 = vmul.f32 %v6736_v16, %v9978_v58  ;;  %6757 = vrcp.f32 %v3318_v23  ;;  %v10858_v58 = vld [vmem:[#allocation55_spill] sm:$0xff]  ;;  %v5171_v16 = vmul.f32 -1.442695, %v10086_v30 }
 0x46a   : > { %v6740_v22 = vpop.eup %6739  ;;  %v4661_v11 = vadd.f32 %v4660_v3, %v4061_v17  ;;  %v4070_v7 = vmul.f32 %v6738_v10, %v9984_v43  ;;  %6759 = vpow2.f32 %v5368_v61  ;;  %v10092_v8 = vadd.f32 %v10858_v58, %v9096_v45 }
 0x46b   : > { %v6742_v5 = vpop.eup %6741  ;;  %v4571_v31 = vadd.f32 %v4570_v46, %v4268_v6  ;;  %v3120_v37 = vadd.f32 1.0, %v6740_v22  ;;  %6761 = vpow2.f32 %v5170_v62  ;;  %v10859_v46 = vld [vmem:[#allocation56_spill] sm:$0xff] }
 0x46c   : > { %v6744_v38 = vpop.eup %6743  ;;  %v10088_v9 = vadd.f32 %v4624_v44, %v4070_v7  ;;  %v3319_v41 = vadd.f32 1.0, %v6742_v5  ;;  %6763 = vpow2.f32 %v5369_v55  ;;  %v10096_v24 = vadd.f32 %v10859_v46, %v9775_v48  ;;  %v10861_v5 = vld [vmem:[#allocation20_spill] sm:$0xff] }
 0x46d   : > { %v6746_v3 = vpop.eup %6745  ;;  %6765 = vrcp.f32 %v3120_v37  ;;  %v3121_v43 = vadd.f32 1.0, %v6744_v38  ;;  %v10100_v44 = vadd.f32 %v10860_v13, %v9129_v33  ;;  %v5378_v10 = vmul.f32 -1.442695, %v10092_v8  ;;  %v10865_v13 = vld [vmem:[#allocation25_spill] sm:$0xff] }
 0x46e   : > { %v6748_v59 = vpop.eup %6747  ;;  %6767 = vrcp.f32 %v3319_v41  ;;  %v3328_v61 = vadd.f32 1.0, %v6746_v3  ;;  %v5180_v7 = vmul.f32 -1.442695, %v10096_v24  ;;  %v10108_v37 = vadd.f32 %v10861_v5, %v9787_v47 }
 0x46f   : > { %v6750_v23 = vpop.eup %6749  ;;  %6769 = vrcp.f32 %v3121_v43  ;;  %v3130_v62 = vadd.f32 1.0, %v6748_v59  ;;  %v5379_v41 = vmul.f32 -1.442695, %v10100_v44  ;;  %v10862_v46 = vlaneseq }
 0x470   : > { %v6752_v17 = vpop.eup %6751  ;;  %6771 = vrcp.f32 %v3328_v61  ;;  %v3329_v55 = vadd.f32 1.0, %v6750_v23  ;;  %v10120_v23 = vadd.f32 %v10865_v13, %v9096_v45  ;;  %v10134_v5 = vadd.f32 %v9653_v54, %v9787_v47 }
 0x471   : > { %v6754_v6 = vpop.eup %6753  ;;  %v4269_v22 = vmul.f32 %v6752_v17, %v10001_v63  ;;  %6773 = vrcp.f32 %v3130_v62  ;;  %vm10113_vm1 = vcmp.lt.s32.totalorder %v10862_v46, 256  ;;  %v10866_v62 = vld [vmem:[#allocation23_spill] sm:$0xff] }
 0x472   : > { %v6756_v49 = vpop.eup %6755  ;;  %6775 = vrcp.f32 %v3329_v55  ;;  %v3131_v38 = vadd.f32 1.0, %v6754_v6  ;;  %v10124_v17 = vadd.f32 %v10866_v62, %v9775_v48  ;;  %v5191_v13 = vmul.f32 -1.442695, %v10134_v5 }
 0x473   : > { %v6758_v58 = vpop.eup %6757  ;;  %v4608_v3 = vadd.f32 %v4607_v25, %v4269_v22  ;;  %v4071_v43 = vmul.f32 %v6756_v49, %v10011_v40  ;;  %6777 = vpow2.f32 %v5171_v16  ;;  %v7141_v25 = vmov 0.0  }
 0x474   : > { %v6760_v59 = vpop.eup %6759  ;;  %v4278_v61 = vmul.f32 %v6758_v58, %v10015_v53  ;;  %6779 = vrcp.f32 %v3131_v38  ;;  %309 = vst.msk [vmem:[#allocation2 + $0x8] sm:$0x3] %vm10113_vm1, %v7141_v25  ;;  %v10130_v53 = vadd.f32 %v9651_v57, %v9129_v33  ;;  %v5181_v58 = vmul.f32 -1.442695, %v10108_v37  ;;  %v10867_v57 = vld [vmem:[#allocation27_spill] sm:$0xff] }
 0x475   : > { %v6762_v40 = vpop.eup %6761  ;;  %v4662_v16 = vadd.f32 %v4661_v11, %v4071_v43  ;;  %v3338_v55 = vadd.f32 1.0, %v6760_v59  ;;  %6781 = vpow2.f32 %v5378_v10  ;;  %v5388_v33 = vmul.f32 -1.442695, %v10120_v23 }
 0x476   : > { %v6764_v6 = vpop.eup %6763  ;;  %v4572_v22 = vadd.f32 %v4571_v31, %v4278_v61  ;;  %v3140_v45 = vadd.f32 1.0, %v6762_v40  ;;  %6783 = vpow2.f32 %v5180_v7  ;;  %v10141_v31 = vadd.f32 %v10867_v57, %v9775_v48 }
 0x477   : > { %v6766_v49 = vpop.eup %6765  ;;  %6785 = vrcp.f32 %v3338_v55  ;;  %v3339_v38 = vadd.f32 1.0, %v6764_v6  ;;  %v5190_v54 = vmul.f32 -1.442695, %v10124_v17  ;;  %v5389_v46 = vmul.f32 -1.442695, %v10130_v53 }
 0x478   : > { %v6768_v11 = vpop.eup %6767  ;;  %v4080_v10 = vmul.f32 %v6766_v49, %v10019_v2  ;;  %6787 = vrcp.f32 %v3140_v45 }
 0x479   : > { %v6770_v7 = vpop.eup %6769  ;;  %v4279_v43 = vmul.f32 %v6768_v11, %v10029_v27  ;;  %6789 = vrcp.f32 %v3339_v38  ;;  %v10868_v27 = vld [vmem:[#allocation13_spill] sm:$0xff] }
 0x47a   : > { %v6772_v59 = vpop.eup %6771  ;;  %v4626_v61 = vadd.f32 %v10088_v9, %v4080_v10  ;;  %v4081_v2 = vmul.f32 %v6770_v7, %v10034_v28  ;;  %6791 = vpow2.f32 %v5379_v41  ;;  %v10152_v55 = vadd.f32 %v10868_v27, %v9787_v47 }
 0x47b   : > { %v6774_v62 = vpop.eup %6773  ;;  %v4609_v25 = vadd.f32 %v4608_v3, %v4279_v43  ;;  %v4288_v40 = vmul.f32 %v6772_v59, %v10038_v15  ;;  %6793 = vpow2.f32 %v5181_v58  ;;  %v5200_v9 = vmul.f32 -1.442695, %v10141_v31  ;;  %v10869_v3 = vld [vmem:[#allocation63_spill] sm:$0xff] }
 0x47c   : > { %v6776_v6 = vpop.eup %6775  ;;  %v4663_v45 = vadd.f32 %v4662_v16, %v4081_v2  ;;  %v4090_v49 = vmul.f32 %v6774_v62, %v10042_v26  ;;  %6795 = vpow2.f32 %v5388_v33  ;;  %v10159_v15 = vadd.f32 %v10869_v3, %v9775_v48  ;;  %v10870_v16 = vld [vmem:[#allocation64_spill] sm:$0xff] }
 0x47d   : > { %v6778_v28 = vpop.eup %6777  ;;  %v4573_v41 = vadd.f32 %v4572_v22, %v4288_v40  ;;  %v4289_v38 = vmul.f32 %v6776_v6, %v10046_v21  ;;  %6797 = vpow2.f32 %v5190_v54  ;;  %v10163_v57 = vadd.f32 %v10870_v16, %v9787_v47 }
 0x47e   : > { %v6780_v58 = vpop.eup %6779  ;;  %v4627_v11 = vadd.f32 %v4626_v61, %v4090_v49  ;;  %v3141_v10 = vadd.f32 1.0, %v6778_v28  ;;  %6799 = vpow2.f32 %v5389_v46  ;;  %v5201_v43 = vmul.f32 -1.442695, %v10152_v55  ;;  %v10871_v28 = vld [vmem:[#allocation24_spill] sm:$0xff] }
 0x47f   : > { %v6782_v26 = vpop.eup %6781  ;;  %v4610_v33 = vadd.f32 %v4609_v25, %v4289_v38  ;;  %v4091_v7 = vmul.f32 %v6780_v58, %v10056_v39  ;;  %6801 = vpow2.f32 %v5191_v13  ;;  %v5210_v46 = vmul.f32 -1.442695, %v10159_v15 }
 0x480   : > { %v6784_v22 = vpop.eup %6783  ;;  %6803 = vrcp.f32 %v3141_v10  ;;  %v3348_v21 = vadd.f32 1.0, %v6782_v26  ;;  %v5211_v25 = vmul.f32 -1.442695, %v10163_v57  ;;  %v10174_v38 = vadd.f32 %v10871_v28, %v9775_v48  ;;  %v10873_v26 = vld [vmem:[#allocation26_spill] sm:$0xff] }
 0x481   : > { %v6786_v54 = vpop.eup %6785  ;;  %v4664_v59 = vadd.f32 %v4663_v45, %v4091_v7  ;;  %v3150_v2 = vadd.f32 1.0, %v6784_v22  ;;  %6805 = vpow2.f32 %v5200_v9  ;;  %v10184_v7 = vadd.f32 %v10873_v26, %v9775_v48 }
 0x482   : > { %v6788_v61 = vpop.eup %6787  ;;  %v4298_v62 = vmul.f32 %v6786_v54, %v10064_v51  ;;  %6807 = vrcp.f32 %v3348_v21  ;;  %v5220_v21 = vmul.f32 -1.442695, %v10174_v38 }
 0x483   : > { %v6790_v40 = vpop.eup %6789  ;;  %v4100_v39 = vmul.f32 %v6788_v61, %v10069_v4  ;;  %6809 = vrcp.f32 %v3150_v2  ;;  %v10874_v2 = vld [vmem:[#allocation41_spill] sm:$0xff] }
 0x484   : > { %v6792_v13 = vpop.eup %6791  ;;  %v4574_v27 = vadd.f32 %v4573_v41, %v4298_v62  ;;  %v4299_v6 = vmul.f32 %v6790_v40, %v10075_v29  ;;  %6811 = vpow2.f32 %v5201_v43  ;;  %v10872_v41 = vld [vmem:[#allocation15_spill] sm:$0xff]  ;;  %v10875_v62 = vld [vmem:[#allocation58_spill] sm:$0xff]  ;;  %v10877_v40 = vld [vmem:[#allocation48_spill] sm:$0xff] }
 0x485   : > { %v6794_v45 = vpop.eup %6793  ;;  %v4628_v49 = vadd.f32 %v4627_v11, %v4100_v39  ;;  %v3349_v9 = vadd.f32 1.0, %v6792_v13  ;;  %6813 = vpow2.f32 %v5210_v46  ;;  %v10180_v29 = vadd.f32 %v10872_v41, %v9787_v47 }
 0x486   : > { %v6796_v51 = vpop.eup %6795  ;;  %v10176_v3 = vadd.f32 %v4610_v33, %v4299_v6  ;;  %v3151_v58 = vadd.f32 1.0, %v6794_v45  ;;  %6815 = vpow2.f32 %v5211_v25  ;;  %v10189_v46 = vadd.f32 %v10874_v2, %v9787_v47  ;;  %v10876_v25 = vld [vmem:[#allocation47_spill] sm:$0xff] }
 0x487   : > { %v6798_v4 = vpop.eup %6797  ;;  %6817 = vrcp.f32 %v3349_v9  ;;  %v3358_v10 = vadd.f32 1.0, %v6796_v51  ;;  %v10878_v39 = vcombine.low %v10876_v25, %v10877_v40  ;;  %v5221_v45 = vmul.f32 -1.442695, %v10180_v29 }
 0x488   : > { %v6800_v16 = vpop.eup %6799  ;;  %6819 = vrcp.f32 %v3151_v58  ;;  %v3160_v11 = vadd.f32 1.0, %v6798_v4  ;;  %v5230_v51 = vmul.f32 -1.442695, %v10184_v7  ;;  %v10202_v58 = vadd.f32 %v9756_v56, %v9775_v48 }
 0x489   : > { %v6802_v22 = vpop.eup %6801  ;;  %6821 = vrcp.f32 %v3358_v10  ;;  %v3359_v33 = vadd.f32 1.0, %v6800_v16  ;;  %v10195_v13 = vrot.slane %v10878_v39, %v10875_v62  ;;  %v10879_v16 = vld [vmem:[#allocation40_spill] sm:$0xff] }
 0x48a   : > { %v6804_v43 = vpop.eup %6803  ;;  %6823 = vrcp.f32 %v3160_v11  ;;  %v3161_v54 = vadd.f32 1.0, %v6802_v22  ;;  %v5231_v22 = vmul.f32 -1.442695, %v10189_v46 }
 0x48b   : > { %v6806_v61 = vpop.eup %6805  ;;  %v4101_v6 = vmul.f32 %v6804_v43, %v10086_v30  ;;  %6825 = vrcp.f32 %v3359_v33  ;;  %v10207_v30 = vadd.f32 %v10879_v16, %v9787_v47  ;;  %v10880_v33 = vld [vmem:[#allocation65_spill] sm:$0xff] }
 0x48c   : > { %v6808_v9 = vpop.eup %6807  ;;  %6827 = vrcp.f32 %v3161_v54  ;;  %v3170_v28 = vadd.f32 1.0, %v6806_v61  ;;  %v10213_v43 = vadd.f32 %v10880_v33, %v9775_v48 }
 0x48d   : > { %v6810_v4 = vpop.eup %6809  ;;  %v4665_v10 = vadd.f32 %v4664_v59, %v4101_v6  ;;  %v4308_v41 = vmul.f32 %v6808_v9, %v10092_v8  ;;  %6829 = vpow2.f32 %v5220_v21  ;;  %v10881_v8 = vld [vmem:[#allocation43_spill] sm:$0xff]  ;;  %v5240_v6 = vmul.f32 -1.442695, %v10202_v58 }
 0x48e   : > { %v6812_v11 = vpop.eup %6811  ;;  %v4110_v26 = vmul.f32 %v6810_v4, %v10096_v24  ;;  %6831 = vrcp.f32 %v3170_v28  ;;  %v10217_v21 = vadd.f32 %v10881_v8, %v9787_v47  ;;  %v10221_v24 = vadd.f32 %v9789_v42, %v9775_v48 }
 0x48f   : > { %v6814_v56 = vpop.eup %6813  ;;  %v4575_v54 = vadd.f32 %v4574_v27, %v4308_v41  ;;  %v3171_v59 = vadd.f32 1.0, %v6812_v11  ;;  %6833 = vpow2.f32 %v5221_v45  ;;  %v5241_v27 = vmul.f32 -1.442695, %v10207_v30 }
 0x490   : > { %v6816_v2 = vpop.eup %6815  ;;  %v4629_v61 = vadd.f32 %v4628_v49, %v4110_v26  ;;  %v3180_v25 = vadd.f32 1.0, %v6814_v56  ;;  %6835 = vpow2.f32 %v5230_v51  ;;  %v5250_v28 = vmul.f32 -1.442695, %v10213_v43 }
 0x491   : > { %v6818_v40 = vpop.eup %6817  ;;  %6837 = vrcp.f32 %v3171_v59  ;;  %v3181_v39 = vadd.f32 1.0, %v6816_v2  ;;  %v10229_v49 = vadd.f32 %v9795_v0, %v9787_v47  ;;  %v5251_v4 = vmul.f32 -1.442695, %v10217_v21 }
 0x492   : > { %v6820_v45 = vpop.eup %6819  ;;  %v4309_v9 = vmul.f32 %v6818_v40, %v10100_v44  ;;  %6839 = vrcp.f32 %v3180_v25  ;;  %v10235_v41 = vadd.f32 %v9797_v14, %v9775_v48  ;;  %v5260_v26 = vmul.f32 -1.442695, %v10221_v24 }
 0x493   : > { %v6822_v51 = vpop.eup %6821  ;;  %v4111_v42 = vmul.f32 %v6820_v45, %v10108_v37  ;;  %6841 = vrcp.f32 %v3181_v39  ;;  %v10882_v37 = vld [vmem:[#allocation42_spill] sm:$0xff] }
 0x494   : > { %v6824_v16 = vpop.eup %6823  ;;  %v4612_v44 = vadd.f32 %v10176_v3, %v4309_v9  ;;  %v4318_v11 = vmul.f32 %v6822_v51, %v10120_v23  ;;  %6843 = vpow2.f32 %v5231_v22  ;;  %v10243_v59 = vadd.f32 %v10882_v37, %v9787_v47 }
 0x495   : > { %v6826_v0 = vpop.eup %6825  ;;  %v4666_v33 = vadd.f32 %v4665_v10, %v4111_v42  ;;  %v4120_v56 = vmul.f32 %v6824_v16, %v10124_v17  ;;  %6845 = vpow2.f32 %v5240_v6  ;;  %v5261_v3 = vmul.f32 -1.442695, %v10229_v49 }
 0x496   : > { %v6828_v8 = vpop.eup %6827  ;;  %v4576_v14 = vadd.f32 %v4575_v54, %v4318_v11  ;;  %v4319_v2 = vmul.f32 %v6826_v0, %v10130_v53  ;;  %6847 = vpow2.f32 %v5241_v27  ;;  %v5270_v10 = vmul.f32 -1.442695, %v10235_v41 }
 0x497   : > { %v6830_v23 = vpop.eup %6829  ;;  %v4630_v22 = vadd.f32 %v4629_v61, %v4120_v56  ;;  %v4121_v25 = vmul.f32 %v6828_v8, %v10134_v5  ;;  %6849 = vpow2.f32 %v5250_v28  ;;  %v10251_v53 = vmul.f32 -1.442695, %v10243_v59 }
 0x498   : > { %v6832_v17 = vpop.eup %6831  ;;  %v4577_v40 = vrot.slane %v4576_v14, 4  ;;  %v4613_v39 = vadd.f32 %v4612_v44, %v4319_v2  ;;  %v3190_v6 = vadd.f32 1.0, %v6830_v23  ;;  %6851 = vpow2.f32 %v5251_v4 }
 0x499   : > { %v6834_v45 = vpop.eup %6833  ;;  %v4667_v9 = vadd.f32 %v4666_v33, %v4121_v25  ;;  %v4130_v54 = vmul.f32 %v6832_v17, %v10141_v31  ;;  %6853 = vpow2.f32 %v5260_v26  ;;  %v10255_v4 = vadd.f32 %v9833_v1, %v9775_v48 }
 0x49a   : > { %v6836_v27 = vpop.eup %6835  ;;  %v4578_v61 = vadd.f32 %v4577_v40, %v4576_v14  ;;  %v4614_v51 = vrot.slane %v4613_v39, 4  ;;  %6855 = vrcp.f32 %v3190_v6  ;;  %v3191_v5 = vadd.f32 1.0, %v6834_v45 }
 0x49b   : > { %v6838_v28 = vpop.eup %6837  ;;  %v4631_v42 = vadd.f32 %v4630_v22, %v4130_v54  ;;  %v3200_v16 = vadd.f32 1.0, %v6836_v27  ;;  %6857 = vpow2.f32 %v5261_v3  ;;  %v10261_v56 = vadd.f32 %v9836_v12, %v9787_v47 }
 0x49c   : > { %v6840_v44 = vpop.eup %6839  ;;  %v4579_v11 = vrot.slane %v4578_v61, 2  ;;  %v4615_v31 = vadd.f32 %v4614_v51, %v4613_v39  ;;  %v4131_v26 = vmul.f32 %v6838_v28, %v10152_v55  ;;  %6859 = vrcp.f32 %v3191_v5 }
 0x49d   : > { %v6842_v0 = vpop.eup %6841  ;;  %v4140_v33 = vmul.f32 %v6840_v44, %v10159_v15  ;;  %6861 = vrcp.f32 %v3200_v16  ;;  %v10265_v37 = vadd.f32 %v9843_v52, %v9775_v48  ;;  %v10883_v15 = vld [vmem:[#allocation28_spill] sm:$0xff] }
 0x49e   : > { %v6844_v1 = vpop.eup %6843  ;;  %v4580_v8 = vadd.f32 %v4579_v11, %v4578_v61  ;;  %v4616_v14 = vrot.slane %v4615_v31, 2  ;;  %v4668_v2 = vadd.f32 %v4667_v9, %v4131_v26  ;;  %v4141_v3 = vmul.f32 %v6842_v0, %v10163_v57  ;;  %v10884_v57 = vld [vmem:[#allocation44_spill] sm:$0xff] }
 0x49f   : > { %v6846_v55 = vpop.eup %6845  ;;  %v4632_v23 = vadd.f32 %v4631_v42, %v4140_v33  ;;  %v3201_v22 = vadd.f32 1.0, %v6844_v1  ;;  %6863 = vpow2.f32 %v5270_v10  ;;  %v10270_v25 = vadd.f32 %v10883_v15, %v9787_v47 }
 0x4a0   : > { %v6848_v12 = vpop.eup %6847  ;;  %v4581_v17 = vrot.slane %v4580_v8, 1  ;;  %v4617_v40 = vadd.f32 %v4616_v14, %v4615_v31  ;;  %v4669_v39 = vadd.f32 %v4668_v2, %v4141_v3  ;;  %v3210_v52 = vadd.f32 1.0, %v6846_v55 }
 0x4a1   : > { %v6850_v6 = vpop.eup %6849  ;;  %6865 = vrcp.f32 %v3201_v22  ;;  %v3211_v45 = vadd.f32 1.0, %v6848_v12  ;;  %v5280_v9 = vmul.f32 -1.442695, %v10255_v4  ;;  %v10275_v54 = vadd.f32 %v10884_v57, %v9775_v48  ;;  %v10886_v22 = vld [vmem:[#allocation30_spill] sm:$0xff] }
 0x4a2   : > { %v6852_v27 = vpop.eup %6851  ;;  %v4582_v10 = vadd.f32 %v4581_v17, %v4580_v8  ;;  %v4618_v61 = vrot.slane %v4617_v40, 1  ;;  %6867 = vrcp.f32 %v3210_v52  ;;  %v3220_v51 = vadd.f32 1.0, %v6850_v6  ;;  %v10885_v8 = vld [vmem:[#allocation29_spill] sm:$0xff] }
 0x4a3   : > { %v6854_v5 = vpop.eup %6853  ;;  %6869 = vrcp.f32 %v3211_v45  ;;  %v3221_v28 = vadd.f32 1.0, %v6852_v27  ;;  %v5281_v42 = vmul.f32 -1.442695, %v10261_v56  ;;  %v5290_v16 = vmul.f32 -1.442695, %v10265_v37 }
 0x4a4   : > { %v6856_v44 = vpop.eup %6855  ;;  %v4619_v11 = vadd.f32 %v4618_v61, %v4617_v40  ;;  %6871 = vrcp.f32 %v3220_v51  ;;  %v3230_v31 = vadd.f32 1.0, %v6854_v5  ;;  %v5291_v26 = vmul.f32 -1.442695, %v10270_v25  ;;  %v10887_v40 = vld [vmem:[#allocation32_spill] sm:$0xff]  ;;  %v10890_v61 = vld [vmem:[#allocation31_spill] sm:$0xff] }
 0x4a5   : > { %v6858_v0 = vpop.eup %6857  ;;  %v4150_v33 = vmul.f32 %v6856_v44, %v10174_v38  ;;  %6873 = vrcp.f32 %v3221_v28  ;;  %v5300_v1 = vmul.f32 -1.442695, %v10275_v54  ;;  %v10284_v14 = vadd.f32 %v10885_v8, %v9787_v47  ;;  %v10891_v28 = vld [vmem:[#allocation57_spill] sm:$0xff] }
 0x4a6   : > { %v6860_v2 = vpop.eup %6859  ;;  %v4707_v3 = vcombine.low %v4582_v10, %v4619_v11  ;;  %6875 = vrcp.f32 %v3230_v31  ;;  %v3231_v55 = vadd.f32 1.0, %v6858_v0  ;;  %v10289_v15 = vadd.f32 %v10886_v22, %v9775_v48 }
 0x4a7   : > { %v6862_v12 = vpop.eup %6861  ;;  %v4633_v38 = vadd.f32 %v4632_v23, %v4150_v33  ;;  %v4151_v17 = vmul.f32 %v6860_v2, %v10180_v29  ;;  %6877 = vpow2.f32 %v10251_v53  ;;  %v10295_v52 = vadd.f32 %v10887_v40, %v9787_v47  ;;  %v10889_v29 = vld [vmem:[#allocation14_spill] sm:$0xff] }
 0x4a8   : > { %v10888_v6 = vcombine.low %v9931_v32, %v9949_v20  ;;  %v4735_v57 = vrot.slane %v4707_v3, %v10875_v62  ;;  %v4160_v27 = vmul.f32 %v6862_v12, %v10184_v7  ;;  %6879 = vrcp.f32 %v3231_v55 }
 0x4a9   : > { %v6864_v10 = vpop.eup %6863  ;;  %v4670_v23 = vadd.f32 %v4669_v39, %v4151_v17  ;;  %6881 = vpow2.f32 %v5280_v9  ;;  %v10305_v53 = vadd.f32 %v10889_v29, %v9775_v48  ;;  %v10309_v51 = vadd.f32 %v10890_v61, %v9787_v47 }
 0x4aa   : > { %v4728_v45 = vrot.slane %v10888_v6, %v10875_v62  ;;  %v4634_v20 = vadd.f32 %v4633_v38, %v4160_v27  ;;  %v3240_v5 = vadd.f32 1.0, %v6864_v10  ;;  %6883 = vpow2.f32 %v5281_v42 }
 0x4ab   : > { %v6866_v7 = vpop.eup %6865  ;;  %6885 = vpow2.f32 %v5290_v16  ;;  %v5301_v39 = vmul.f32 -1.442695, %v10284_v14  ;;  %v5310_v9 = vmul.f32 -1.442695, %v10289_v15  ;;  %v10320_v44 = vadd.f32 %v10891_v28, %v9775_v48 }
 0x4ac   : > { %v4737_v32 = vcombine.low %v4728_v45, %v4735_v57  ;;  %v6868_v11 = vpop.eup %6867  ;;  %v4161_v0 = vmul.f32 %v6866_v7, %v10189_v46  ;;  %6887 = vrcp.f32 %v3240_v5  ;;  %v5311_v33 = vmul.f32 -1.442695, %v10295_v52 }
 0x4ad   : > { %v6870_v42 = vpop.eup %6869  ;;  %v4170_v8 = vmul.f32 %v6868_v11, %v10202_v58  ;;  %6889 = vpow2.f32 %v5291_v26  ;;  %v5320_v16 = vmul.f32 -1.442695, %v10305_v53  ;;  %v5321_v2 = vmul.f32 -1.442695, %v10309_v51 }
 0x4ae   : > { %v4751_v31 = vrot.slane %v4737_v32, %v10875_v62  ;;  %v6872_v3 = vpop.eup %6871  ;;  %v4671_v22 = vadd.f32 %v4670_v23, %v4161_v0  ;;  %v4171_v12 = vmul.f32 %v6870_v42, %v10207_v30  ;;  %6891 = vpow2.f32 %v5300_v1  ;;  %v10892_v30 = vld [vmem:[#allocation45_spill] sm:$0xff] }
 0x4af   : > { %v6874_v46 = vpop.eup %6873  ;;  %v4635_v38 = vadd.f32 %v4634_v20, %v4170_v8  ;;  %v4180_v17 = vmul.f32 %v6872_v3, %v10213_v43  ;;  %6893 = vpow2.f32 %v5301_v39  ;;  %v5330_v58 = vmul.f32 -1.442695, %v10320_v44 }
 0x4b0   : > { %v4752_v55 = vcombine.low %v10195_v13, %v4751_v31  ;;  %v6876_v26 = vpop.eup %6875  ;;  %v4672_v40 = vadd.f32 %v4671_v22, %v4171_v12  ;;  %v4181_v6 = vmul.f32 %v6874_v46, %v10217_v21  ;;  %6895 = vpow2.f32 %v5310_v9  ;;  %v10894_v22 = vld [vmem:[#allocation33_spill] sm:$0xff] }
 0x4b1   : > { %v6878_v45 = vpop.eup %6877  ;;  %v4636_v57 = vadd.f32 %v4635_v38, %v4180_v17  ;;  %v4190_v13 = vmul.f32 %v6876_v26, %v10221_v24  ;;  %6897 = vpow2.f32 %v5311_v33  ;;  %v10337_v1 = vadd.f32 %v10892_v30, %v9787_v47  ;;  %v10895_v38 = vld [vmem:[#allocation17_spill] sm:$0xff] }
 0x4b2   : > { %v6880_v43 = vpop.eup %6879  ;;  %v4673_v27 = vadd.f32 %v4672_v40, %v4181_v6  ;;  %v3241_v10 = vadd.f32 1.0, %v6878_v45  ;;  %6899 = vpow2.f32 %v5320_v16  ;;  %v4783_v21 = vmul.f32 0.00390625, %v4752_v55  ;;  %v10893_v16 = vld [vmem:[#allocation22_spill] sm:$0xff] }
 0x4b3   : > { %v6882_v23 = vpop.eup %6881  ;;  %v4637_v29 = vadd.f32 %v4636_v57, %v4190_v13  ;;  %v4191_v24 = vmul.f32 %v6880_v43, %v10229_v49  ;;  %6901 = vpow2.f32 %v5321_v2  ;;  %v5331_v39 = vmul.f32 -1.442695, %v10337_v1  ;;  %v10896_v40 = vld [vmem:[#allocation46_spill] sm:$0xff] }
 0x4b4   : > { %v6884_v61 = vpop.eup %6883  ;;  %6903 = vrcp.f32 %v3241_v10  ;;  %v3250_v32 = vadd.f32 1.0, %v6882_v23  ;;  %4785 = vst [vmem:[%s10342_s22] sm:$0xff] %v4783_v21  ;;  %v10350_v2 = vadd.f32 %v10893_v16, %v9775_v48  ;;  %v10354_v12 = vadd.f32 %v10894_v22, %v9787_v47 }
 0x4b5   : > { %v6886_v20 = vpop.eup %6885  ;;  %v4674_v5 = vadd.f32 %v4673_v27, %v4191_v24  ;;  %v3251_v7 = vadd.f32 1.0, %v6884_v61  ;;  %6905 = vpow2.f32 %v5330_v58  ;;  %v10358_v17 = vadd.f32 %v10895_v38, %v9775_v48 }
 0x4b6   : > { %v6888_v9 = vpop.eup %6887  ;;  %6907 = vrcp.f32 %v3250_v32  ;;  %v3260_v28 = vadd.f32 1.0, %v6886_v20  ;;  %v10362_v6 = vadd.f32 %v10896_v40, %v9787_v47  ;;  %v10366_v45 = vadd.f32 %v9966_v35, %v9775_v48 }
 0x4b7   : > { %v6890_v11 = vpop.eup %6889  ;;  %v4200_v31 = vmul.f32 %v6888_v9, %v10235_v41  ;;  %6909 = vrcp.f32 %v3251_v7  ;;  %v5340_v30 = vmul.f32 -1.442695, %v10350_v2  ;;  %v10371_v43 = vadd.f32 %v9973_v19, %v9787_v47 }
 0x4b8   : > { %v6892_v0 = vpop.eup %6891  ;;  %6911 = vrcp.f32 %v3260_v28  ;;  %v3261_v49 = vadd.f32 1.0, %v6890_v11  ;;  %v5341_v21 = vmul.f32 -1.442695, %v10354_v12  ;;  %v5350_v35 = vmul.f32 -1.442695, %v10358_v17 }
 0x4b9   : > { %v6894_v33 = vpop.eup %6893  ;;  %v4638_v42 = vadd.f32 %v4637_v29, %v4200_v31  ;;  %v3270_v8 = vadd.f32 1.0, %v6892_v0  ;;  %6913 = vpow2.f32 %v5331_v39  ;;  %v10378_v24 = vadd.f32 %v9980_v34, %v9775_v48 }
 0x4ba   : > { %v6896_v3 = vpop.eup %6895  ;;  %6915 = vrcp.f32 %v3261_v49  ;;  %v3271_v55 = vadd.f32 1.0, %v6894_v33  ;;  %v5351_v19 = vmul.f32 -1.442695, %v10362_v6  ;;  %v5360_v20 = vmul.f32 -1.442695, %v10366_v45 }
 0x4bb   : > { %v6898_v41 = vpop.eup %6897  ;;  %6917 = vrcp.f32 %v3270_v8  ;;  %v3280_v46 = vadd.f32 1.0, %v6896_v3  ;;  %v10387_v34 = vadd.f32 %v9986_v60, %v9787_v47  ;;  %v10391_v31 = vadd.f32 %v9994_v50, %v9775_v48 }
 0x4bc   : > { %v6900_v58 = vpop.eup %6899  ;;  %6919 = vrcp.f32 %v3271_v55  ;;  %v3281_v26 = vadd.f32 1.0, %v6898_v41 }
 0x4bd   : > { %v6902_v57 = vpop.eup %6901  ;;  %6921 = vrcp.f32 %v3280_v46  ;;  %v3290_v13 = vadd.f32 1.0, %v6900_v58  ;;  %v5371_v22 = vmul.f32 -1.442695, %v10387_v34  ;;  %v5380_v41 = vmul.f32 -1.442695, %v10391_v31 }
 0x4be   : > { %v6904_v27 = vpop.eup %6903  ;;  %6923 = vrcp.f32 %v3281_v26  ;;  %v3291_v10 = vadd.f32 1.0, %v6902_v57 }
 0x4bf   : > { %v6906_v23 = vpop.eup %6905  ;;  %v4201_v29 = vmul.f32 %v6904_v27, %v10243_v59  ;;  %6925 = vrcp.f32 %v3290_v13  ;;  %v5361_v59 = vmul.f32 -1.442695, %v10371_v43 }
 0x4c0   : > { %v6908_v61 = vpop.eup %6907  ;;  %6927 = vrcp.f32 %v3291_v10  ;;  %v3300_v32 = vadd.f32 1.0, %v6906_v23 }
 0x4c1   : > { %v6910_v7 = vpop.eup %6909  ;;  %v4675_v39 = vadd.f32 %v4674_v5, %v4201_v29  ;;  %v4210_v9 = vmul.f32 %v6908_v61, %v10255_v4  ;;  %6929 = vpow2.f32 %v5340_v30  ;;  %v5370_v4 = vmul.f32 -1.442695, %v10378_v24 }
 0x4c2   : > { %v6912_v28 = vpop.eup %6911  ;;  %v4211_v11 = vmul.f32 %v6910_v7, %v10261_v56  ;;  %6931 = vrcp.f32 %v3300_v32  ;;  %v10397_v56 = vadd.f32 %v9997_v36, %v9787_v47 }
 0x4c3   : > { %v6914_v0 = vpop.eup %6913  ;;  %v4639_v49 = vadd.f32 %v4638_v42, %v4210_v9  ;;  %v4220_v5 = vmul.f32 %v6912_v28, %v10265_v37  ;;  %6933 = vpow2.f32 %v5341_v21  ;;  %v10402_v42 = vadd.f32 %v10003_v18, %v9775_v48 }
 0x4c4   : > { %v6916_v33 = vpop.eup %6915  ;;  %v4676_v8 = vadd.f32 %v4675_v39, %v4211_v11  ;;  %v3301_v16 = vadd.f32 1.0, %v6914_v0  ;;  %6935 = vpow2.f32 %v5350_v35 }
 0x4c5   : > { %v6918_v60 = vpop.eup %6917  ;;  %v4640_v3 = vadd.f32 %v4639_v49, %v4220_v5  ;;  %v4221_v50 = vmul.f32 %v6916_v33, %v10270_v25  ;;  %6937 = vpow2.f32 %v5351_v19  ;;  %v10897_v25 = vld [vmem:[#allocation49_spill] sm:$0xff]  ;;  %v5390_v30 = vmul.f32 -1.442695, %v10402_v42 }
 0x4c6   : > { %v6920_v37 = vpop.eup %6919  ;;  %v4230_v55 = vmul.f32 %v6918_v60, %v10275_v54  ;;  %6939 = vrcp.f32 %v3301_v16  ;;  %v10410_v58 = vadd.f32 %v10897_v25, %v9787_v47  ;;  %v5381_v54 = vmul.f32 -1.442695, %v10397_v56 }
 0x4c7   : > { %v6922_v46 = vpop.eup %6921  ;;  %v4677_v36 = vadd.f32 %v4676_v8, %v4221_v50  ;;  %v4231_v38 = vmul.f32 %v6920_v37, %v10284_v14  ;;  %6941 = vpow2.f32 %v5360_v20 }
 0x4c8   : > { %v6924_v26 = vpop.eup %6923  ;;  %v4641_v48 = vadd.f32 %v4640_v3, %v4230_v55  ;;  %v4240_v18 = vmul.f32 %v6922_v46, %v10289_v15  ;;  %6943 = vpow2.f32 %v5361_v59  ;;  %v5391_v15 = vmul.f32 -1.442695, %v10410_v58 }
 0x4c9   : > { %v6926_v40 = vpop.eup %6925  ;;  %v4678_v57 = vadd.f32 %v4677_v36, %v4231_v38  ;;  %v4241_v13 = vmul.f32 %v6924_v26, %v10295_v52  ;;  %6945 = vpow2.f32 %v5370_v4 }
 0x4ca   : > { %v6928_v14 = vpop.eup %6927  ;;  %v4642_v27 = vadd.f32 %v4641_v48, %v4240_v18  ;;  %v4250_v10 = vmul.f32 %v6926_v40, %v10305_v53  ;;  %6947 = vpow2.f32 %v5371_v22 }
 0x4cb   : > { %v6930_v47 = vpop.eup %6929  ;;  %v4679_v21 = vadd.f32 %v4678_v57, %v4241_v13  ;;  %v4251_v23 = vmul.f32 %v6928_v14, %v10309_v51  ;;  %6949 = vpow2.f32 %v5380_v41 }
 0x4cc   : > { %v6932_v29 = vpop.eup %6931  ;;  %v4643_v35 = vadd.f32 %v4642_v27, %v4250_v10  ;;  %v3310_v61 = vadd.f32 1.0, %v6930_v47  ;;  %6951 = vpow2.f32 %v5381_v54 }
 0x4cd   : > { %v6934_v52 = vpop.eup %6933  ;;  %v4680_v32 = vadd.f32 %v4679_v21, %v4251_v23  ;;  %v4260_v19 = vmul.f32 %v6932_v29, %v10320_v44  ;;  %6953 = vpow2.f32 %v5390_v30 }
 0x4ce   : > { %v6936_v20 = vpop.eup %6935  ;;  %6955 = vrcp.f32 %v3310_v61  ;;  %v3311_v53 = vadd.f32 1.0, %v6934_v52 }
 0x4cf   : > { %v6938_v7 = vpop.eup %6937  ;;  %v4644_v39 = vadd.f32 %v4643_v35, %v4260_v19  ;;  %v3320_v9 = vadd.f32 1.0, %v6936_v20  ;;  %6957 = vpow2.f32 %v5391_v15 }
 0x4d0   : > { %v6940_v51 = vpop.eup %6939  ;;  %6959 = vrcp.f32 %v3311_v53  ;;  %v3321_v59 = vadd.f32 1.0, %v6938_v7 }
 0x4d1   : > { %v6942_v28 = vpop.eup %6941  ;;  %v4261_v11 = vmul.f32 %v6940_v51, %v10337_v1  ;;  %6961 = vrcp.f32 %v3320_v9 }
 0x4d2   : > { %v6944_v0 = vpop.eup %6943  ;;  %6963 = vrcp.f32 %v3321_v59  ;;  %v3330_v49 = vadd.f32 1.0, %v6942_v28 }
 0x4d3   : > { %v6946_v5 = vpop.eup %6945  ;;  %v4681_v44 = vadd.f32 %v4680_v32, %v4261_v11  ;;  %v3331_v4 = vadd.f32 1.0, %v6944_v0 }
 0x4d4   : > { %v6948_v33 = vpop.eup %6947  ;;  %6965 = vrcp.f32 %v3330_v49  ;;  %v3340_v8 = vadd.f32 1.0, %v6946_v5 }
 0x4d5   : > { %v6950_v16 = vpop.eup %6949  ;;  %6967 = vrcp.f32 %v3331_v4  ;;  %v3341_v60 = vadd.f32 1.0, %v6948_v33  ;;  %v4323_v33 = vld [vmem:[#allocation2 + $0x8] sm:$0x3] }
 0x4d6   : > { %v6952_v3 = vpop.eup %6951  ;;  %6969 = vrcp.f32 %v3340_v8  ;;  %v3350_v50 = vadd.f32 1.0, %v6950_v16 }
 0x4d7   : > { %v6954_v37 = vpop.eup %6953  ;;  %6971 = vrcp.f32 %v3341_v60  ;;  %v3351_v55 = vadd.f32 1.0, %v6952_v3 }
 0x4d8   : > { %v6956_v1 = vpop.eup %6955  ;;  %6973 = vrcp.f32 %v3350_v50  ;;  %v3360_v22 = vadd.f32 1.0, %v6954_v37 }
 0x4d9   : > { %v6958_v41 = vpop.eup %6957  ;;  %v4270_v46 = vmul.f32 %v6956_v1, %v10350_v2  ;;  %6975 = vrcp.f32 %v3351_v55 }
 0x4da   : > { %v6960_v36 = vpop.eup %6959  ;;  %6977 = vrcp.f32 %v3360_v22  ;;  %v3361_v38 = vadd.f32 1.0, %v6958_v41 }
 0x4db   : > { %v6962_v25 = vpop.eup %6961  ;;  %v4645_v26 = vadd.f32 %v4644_v39, %v4270_v46  ;;  %v4271_v48 = vmul.f32 %v6960_v36, %v10354_v12 }
 0x4dc   : > { %v6964_v18 = vpop.eup %6963  ;;  %v4280_v54 = vmul.f32 %v6962_v25, %v10358_v17  ;;  %6979 = vrcp.f32 %v3361_v38 }
 0x4dd   : > { %v4682_v40 = vadd.f32 %v4681_v44, %v4271_v48  ;;  %v4281_v57 = vmul.f32 %v6964_v18, %v10362_v6 }
 0x4de   : > { %v6966_v13 = vpop.eup %6965  ;;  %v4646_v30 = vadd.f32 %v4645_v26, %v4280_v54 }
 0x4df   : > { %v6968_v14 = vpop.eup %6967  ;;  %v4683_v27 = vadd.f32 %v4682_v40, %v4281_v57  ;;  %v4290_v2 = vmul.f32 %v6966_v13, %v10366_v45 }
 0x4e0   : > { %v6970_v10 = vpop.eup %6969  ;;  %v4291_v47 = vmul.f32 %v6968_v14, %v10371_v43 }
 0x4e1   : > { %v6972_v21 = vpop.eup %6971  ;;  %v4647_v23 = vadd.f32 %v4646_v30, %v4290_v2  ;;  %v4300_v12 = vmul.f32 %v6970_v10, %v10378_v24 }
 0x4e2   : > { %v6974_v15 = vpop.eup %6973  ;;  %v4684_v29 = vadd.f32 %v4683_v27, %v4291_v47  ;;  %v4301_v17 = vmul.f32 %v6972_v21, %v10387_v34 }
 0x4e3   : > { %v6976_v35 = vpop.eup %6975  ;;  %v4648_v61 = vadd.f32 %v4647_v23, %v4300_v12  ;;  %v4310_v6 = vmul.f32 %v6974_v15, %v10391_v31 }
 0x4e4   : > { %v6978_v52 = vpop.eup %6977  ;;  %v4685_v32 = vadd.f32 %v4684_v29, %v4301_v17  ;;  %v4311_v19 = vmul.f32 %v6976_v35, %v10397_v56 }
 0x4e5   : > { %v4649_v45 = vadd.f32 %v4648_v61, %v4310_v6  ;;  %v4320_v20 = vmul.f32 %v6978_v52, %v10402_v42 }
 0x4e6   : > { %v6980_v43 = vpop.eup %6979  ;;  %v4686_v53 = vadd.f32 %v4685_v32, %v4311_v19 }
 0x4e7   : > { %v4650_v7 = vadd.f32 %v4649_v45, %v4320_v20  ;;  %v4321_v24 = vmul.f32 %v6980_v43, %v10410_v58 }
 0x4e9   : > { %v4651_v39 = vrot.slane %v4650_v7, 4  ;;  %v4687_v9 = vadd.f32 %v4686_v53, %v4321_v24 }
 0x4eb   : > { %v4652_v51 = vadd.f32 %v4651_v39, %v4650_v7  ;;  %v4688_v34 = vrot.slane %v4687_v9, 4 }
 0x4ed   : > { %v4653_v59 = vrot.slane %v4652_v51, 2  ;;  %v4689_v28 = vadd.f32 %v4688_v34, %v4687_v9 }
 0x4ef   : > { %v4654_v31 = vadd.f32 %v4653_v59, %v4652_v51  ;;  %v4690_v11 = vrot.slane %v4689_v28, 2 }
 0x4f1   : > { %v4655_v0 = vrot.slane %v4654_v31, 1  ;;  %v4691_v49 = vadd.f32 %v4690_v11, %v4689_v28 }
 0x4f3   : > { %v4656_v56 = vadd.f32 %v4655_v0, %v4654_v31  ;;  %v4692_v5 = vrot.slane %v4691_v49, 1 }
 0x4f5   : > { %v4693_v44 = vadd.f32 %v4692_v5, %v4691_v49 }
 0x4f7   : > { %v4753_v42 = vcombine.low %v4656_v56, %v4693_v44 }
 0x4f9   : > { %v4760_v4 = vrot.slane %v4753_v42, %v10875_v62 }
 0x4fb   : > { %v4767_v58 = vrot.slane %v4760_v4, %v10875_v62 }
 0x4fd   : > { %v4771_v8 = vadd.f32 %v4767_v58, %v4323_v33 }
 0x4ff   : > { %4777 = vst.msk [vmem:[#allocation2 + $0x8] sm:$0x3] %vm10113_vm1, %v4771_v8 }
 0x506   : > { %v4782_v16 = vld [vmem:[#allocation2 + $0x8] sm:$0x3] }
 0x507   : > { %v4784_v60 = vmul.f32 0.00390625, %v4782_v16 }
 0x509   : > { %4786 = vst.msk [vmem:[%s10342_s22 + $0x8] sm:$0x3] %vm10113_vm1, %v4784_v60 }
 0x50a PF: > { %s18_s20 = sadd.s32 1, %s7129_s20   ;;  %s10898_s18 = smov %s7125_s19 }
 0x50b   : > { %p15_p6 = scmp.ge.s32.totalorder %s18_s20, 4   ;;  %s10899_s19 = smov %s10901_s26 }
 0x50d   :  { %17 = sbr.rel (!%p15_p6) target bundleno = 4 (0x4), region = 95 }
 0x514   :  { %4806 = vsyncpa [#allocation4], 1 }
 0x515   :  { %4808 = vsyncpa [#allocation4 + $0x1], 1 }
 0x516   :  { %4809 = vsyncpa [#allocation6], 1 }
 0x517   :  { %4810 = vsyncpa [#allocation9], 1 }

</bundles_post_ra>
